<compile_context>
chip_gen: v5e
topology: v5e:2x2
jax: 0.10.0
libtpu: 0.0.40
codegen_flags: <defaults>
</compile_context>

<pallas_src>
import functools

import jax
import jax.numpy as jnp
import numpy as np
from jax.experimental import pallas as pl
from jax.experimental.pallas import tpu as pltpu

LANE = 128            # lane-dense output width (Cout padded to this)
NEG_SLOPE = 0.2       # LeakyReLU slope
MAX_TM = 512          # max rows (M) per grid step


def _round_up(x, m):
    return (x + m - 1) // m * m


# ----------------------------------------------------------------------------- Pallas kernels

def _mm_kernel(x_ref, w_ref, b_ref, o_ref, *, act):
    """out = [leakyrelu](x @ w + b).  x:(TM,K) bf16, w:(K,128) bf16, b:(1,128) f32."""
    acc = jnp.dot(x_ref[...], w_ref[...], preferred_element_type=jnp.float32)
    acc = acc + b_ref[...]
    if act:
        acc = jnp.where(acc >= 0.0, acc, NEG_SLOPE * acc)
    o_ref[...] = acc


def _mm_skip_kernel(x_ref, w_ref, b_ref, s_ref, o_ref, *, act):
    """out = [leakyrelu](x @ w + b) + skip  (fused `upsample2x(feat) + lat(feat)`)."""
    acc = jnp.dot(x_ref[...], w_ref[...], preferred_element_type=jnp.float32)
    acc = acc + b_ref[...]
    if act:
        acc = jnp.where(acc >= 0.0, acc, NEG_SLOPE * acc)
    o_ref[...] = acc + s_ref[...]


def _mm2_kernel(x_ref, w1_ref, b1_ref, w2_ref, b2_ref, o_ref):
    """Fused finalN + outputN: h = leakyrelu(x@w1+b1); out = h@w2+b2 (h stays in VMEM)."""
    h = jnp.dot(x_ref[...], w1_ref[...], preferred_element_type=jnp.float32)
    h = h + b1_ref[...]
    h = jnp.where(h >= 0.0, h, NEG_SLOPE * h)
    y = jnp.dot(h.astype(w2_ref.dtype), w2_ref[...], preferred_element_type=jnp.float32)
    o_ref[...] = y + b2_ref[...]


# ----------------------------------------------------------------------------- JAX glue

def _im2col(x, kh, kw, stride, padding):
    """x: (N,H,W,C) -> (N*Ho*Wo, kh*kw*C), Ho, Wo.  K order = (kh, kw, cin)."""
    N, H, W, C = x.shape
    if padding:
        x = jnp.pad(x, ((0, 0), (padding, padding), (padding, padding), (0, 0)))
    Ho = (H + 2 * padding - kh) // stride + 1
    Wo = (W + 2 * padding - kw) // stride + 1
    if kh == 1 and kw == 1 and stride == 1:
        return x.reshape(N * Ho * Wo, C), Ho, Wo
    patches = []
    for i in range(kh):
        for j in range(kw):
            patches.append(x[:, i:i + stride * (Ho - 1) + 1:stride,
                              j:j + stride * (Wo - 1) + 1:stride, :])
    cols = jnp.stack(patches, axis=3)                 # (N, Ho, Wo, T, C)
    return cols.reshape(N * Ho * Wo, kh * kw * C), Ho, Wo


def _prep_wb(w, b):
    """(KH,KW,Cin,Cout) -> (K, 128) bf16 weights, (1, 128) f32 bias (Cout zero-padded)."""
    KH, KW, Cin, Cout = w.shape
    assert Cout <= LANE
    K = KH * KW * Cin
    w_p = jnp.zeros((K, LANE), jnp.bfloat16).at[:, :Cout].set(
        w.reshape(K, Cout).astype(jnp.bfloat16))
    b_p = jnp.zeros((1, LANE), jnp.float32).at[0, :Cout].set(b.astype(jnp.float32))
    return w_p, b_p


def _tile_rows(M):
    TM = min(MAX_TM, _round_up(M, 8))
    Mp = _round_up(M, TM)
    return TM, Mp


def _matmul_call(cols_bf16, w_p, b_p, skip=None, *, act):
    """Single fused conv: grid over row tiles of M, one MXU matmul per tile."""
    M, K = cols_bf16.shape
    TM, Mp = _tile_rows(M)
    if Mp != M:
        cols_bf16 = jnp.pad(cols_bf16, ((0, Mp - M), (0, 0)))
        if skip is not None:
            skip = jnp.pad(skip, ((0, Mp - M), (0, 0)))

    in_specs = [
        pl.BlockSpec((TM, K), lambda i: (i, 0)),
        pl.BlockSpec((K, LANE), lambda i: (0, 0)),
        pl.BlockSpec((1, LANE), lambda i: (0, 0)),
    ]
    operands = [cols_bf16, w_p, b_p]
    if skip is None:
        kernel = functools.partial(_mm_kernel, act=act)
    else:
        kernel = functools.partial(_mm_skip_kernel, act=act)
        in_specs.append(pl.BlockSpec((TM, LANE), lambda i: (i, 0)))
        operands.append(skip)

    out = pl.pallas_call(
        kernel,
        out_shape=jax.ShapeDtypeStruct((Mp, LANE), jnp.float32),
        grid=(Mp // TM,),
        in_specs=in_specs,
        out_specs=pl.BlockSpec((TM, LANE), lambda i: (i, 0)),
        compiler_params=pltpu.CompilerParams(dimension_semantics=("parallel",)),
    )(*operands)
    return out[:M]


def conv_block(x, params, *, stride, padding, act, skip=None):
    """Conv2dBlock forward (NHWC). x:(N,H,W,Cin), params=(w[KH,KW,Cin,Cout], b[Cout]).
    If `skip` is given it is added AFTER the activation (== upsample2x(prev) + lat(x))."""
    w, b = params
    KH, KW, Cin, Cout = w.shape
    N = x.shape[0]
    cols, Ho, Wo = _im2col(x, KH, KW, stride, padding)
    w_p, b_p = _prep_wb(w, b)
    skip_p = None
    if skip is not None:
        s = skip.reshape(N * Ho * Wo, Cout).astype(jnp.float32)
        skip_p = jnp.pad(s, ((0, 0), (0, LANE - Cout)))
    y = _matmul_call(cols.astype(jnp.bfloat16), w_p, b_p, skip_p, act=act)
    return y[:, :Cout].reshape(N, Ho, Wo, Cout)


def final_output_block(x, final_params, out_params, *, padding):
    """Fused finalN (3x3, stride 1, LeakyReLU) + outputN (1x1, no act). Returns pred (NHWC)."""
    wf, bfin = final_params
    wo, bo = out_params
    KH, KW, Cin, Cmid = wf.shape
    _, _, Cmid2, Cout = wo.shape
    assert Cmid == Cmid2 and Cmid <= LANE and Cout <= LANE
    N = x.shape[0]

    cols, Ho, Wo = _im2col(x, KH, KW, 1, padding)
    M, K = cols.shape
    w1_p, b1_p = _prep_wb(wf, bfin)
    w2_p = jnp.zeros((LANE, LANE), jnp.bfloat16).at[:Cmid, :Cout].set(
        wo.reshape(Cmid, Cout).astype(jnp.bfloat16))
    b2_p = jnp.zeros((1, LANE), jnp.float32).at[0, :Cout].set(bo.astype(jnp.float32))

    TM, Mp = _tile_rows(M)
    cols = cols.astype(jnp.bfloat16)
    if Mp != M:
        cols = jnp.pad(cols, ((0, Mp - M), (0, 0)))

    out = pl.pallas_call(
        _mm2_kernel,
        out_shape=jax.ShapeDtypeStruct((Mp, LANE), jnp.float32),
        grid=(Mp // TM,),
        in_specs=[
            pl.BlockSpec((TM, K), lambda i: (i, 0)),
            pl.BlockSpec((K, LANE), lambda i: (0, 0)),
            pl.BlockSpec((1, LANE), lambda i: (0, 0)),
            pl.BlockSpec((LANE, LANE), lambda i: (0, 0)),
            pl.BlockSpec((1, LANE), lambda i: (0, 0)),
        ],
        out_specs=pl.BlockSpec((TM, LANE), lambda i: (i, 0)),
        compiler_params=pltpu.CompilerParams(dimension_semantics=("parallel",)),
    )(cols, w1_p, b1_p, w2_p, b2_p)
    return out[:M, :Cout].reshape(N, Ho, Wo, Cout)


def _up1d_bilinear2x(x, axis):
    """2x bilinear upsample (align_corners=False) along one axis."""
    n = x.shape[axis]
    o = jnp.arange(2 * n, dtype=jnp.float32)
    src = (o + 0.5) / 2.0 - 0.5
    lo = jnp.floor(src).astype(jnp.int32)
    frac = src - lo.astype(jnp.float32)
    lo_c = jnp.clip(lo, 0, n - 1)
    hi_c = jnp.clip(lo + 1, 0, n - 1)
    xl = jnp.take(x, lo_c, axis=axis)
    xh = jnp.take(x, hi_c, axis=axis)
    shape = [1] * x.ndim
    shape[axis] = 2 * n
    frac = frac.reshape(shape)
    return xl * (1.0 - frac) + xh * frac


def upsample2x_bilinear(x):
    """x: (N,H,W,C) -> (N,2H,2W,C); matches nn.Upsample(scale_factor=2, bilinear, align_corners=False)."""
    return _up1d_bilinear2x(_up1d_bilinear2x(x, 1), 2)


def nearest_resize_nchw(x, out_hw):
    """x: (N,C,H,W) nearest resize (PyTorch 'nearest' index rule)."""
    N, C, H, W = x.shape
    oh, ow = out_hw
    hi = (jnp.arange(oh) * H) // oh
    wi = (jnp.arange(ow) * W) // ow
    return x[:, :, hi, :][:, :, :, wi]


# ----------------------------------------------------------------------------- parameters

def _init_conv(key, kh, kw, cin, cout):
    k1, k2 = jax.random.split(key)
    fan_in = kh * kw * cin
    w = jax.random.normal(k1, (kh, kw, cin, cout), jnp.float32) / np.sqrt(fan_in)
    b = 0.01 * jax.random.normal(k2, (cout,), jnp.float32)
    return (w, b)


def init_fpse_params(key, num_input_channels, num_labels, num_filters,
                     kernel_size, do_multiscale, no_label_except_largest_scale):
    nf = num_filters
    ks = kernel_size
    names_shapes = [
        ("enc1", ks, ks, num_input_channels, nf),
        ("enc2", ks, ks, 1 * nf, 2 * nf),
        ("enc3", ks, ks, 2 * nf, 4 * nf),
        ("enc4", ks, ks, 4 * nf, 8 * nf),
        ("enc5", ks, ks, 8 * nf, 8 * nf),
        ("lat2", 1, 1, 2 * nf, 4 * nf),
        ("lat3", 1, 1, 4 * nf, 4 * nf),
        ("lat4", 1, 1, 8 * nf, 4 * nf),
        ("lat5", 1, 1, 8 * nf, 4 * nf),
        ("final2", ks, ks, 4 * nf, 2 * nf),
        ("output", 1, 1, 2 * nf, num_labels + 1),
    ]
    if do_multiscale:
        out_ch = 2 if no_label_except_largest_scale else num_labels + 1
        names_shapes += [
            ("final3", ks, ks, 4 * nf, 2 * nf),
            ("final4", ks, ks, 4 * nf, 2 * nf),
            ("output3", 1, 1, 2 * nf, out_ch),
            ("output4", 1, 1, 2 * nf, out_ch),
        ]
    keys = jax.random.split(key, len(names_shapes))
    return {name: _init_conv(k, kh, kw, cin, cout)
            for k, (name, kh, kw, cin, cout) in zip(keys, names_shapes)}


# ----------------------------------------------------------------------------- forward

def fpse_forward(params, images, segmaps, weights=None, *,
                 kernel_size=3, do_multiscale=True, no_label_except_largest_scale=True):
    """images, segmaps: NCHW. Returns (results, features) like the PyTorch module (NCHW outputs)."""
    pad = int(np.ceil((kernel_size - 1.0) / 2))
    x = jnp.transpose(images, (0, 2, 3, 1))       # NCHW -> NHWC for kernels

    feat11 = conv_block(x,      params["enc1"], stride=2, padding=pad, act=True)
    feat12 = conv_block(feat11, params["enc2"], stride=2, padding=pad, act=True)
    feat13 = conv_block(feat12, params["enc3"], stride=2, padding=pad, act=True)
    feat14 = conv_block(feat13, params["enc4"], stride=2, padding=pad, act=True)
    feat15 = conv_block(feat14, params["enc5"], stride=2, padding=pad, act=True)

    feat25 = conv_block(feat15, params["lat5"], stride=1, padding=0, act=True)
    feat24 = conv_block(feat14, params["lat4"], stride=1, padding=0, act=True,
                        skip=upsample2x_bilinear(feat25))
    feat23 = conv_block(feat13, params["lat3"], stride=1, padding=0, act=True,
                        skip=upsample2x_bilinear(feat24))
    feat22 = conv_block(feat12, params["lat2"], stride=1, padding=0, act=True,
                        skip=upsample2x_bilinear(feat23))

    # fused final2 + output (feat32 never leaves VMEM)
    pred2 = final_output_block(feat22, params["final2"], params["output"], padding=pad)

    label_map = nearest_resize_nchw(segmaps, (pred2.shape[1], pred2.shape[2]))
    if weights is not None:
        label_map = label_map * weights[..., None, None]

    nchw = lambda t: jnp.transpose(t, (0, 3, 1, 2))
    results = [{"pred": nchw(pred2), "label": label_map}]
    features = [nchw(f) for f in
                (feat11, feat12, feat13, feat14, feat15, feat25, feat24, feat23, feat22)]

    if do_multiscale:
        pred3 = final_output_block(feat23, params["final3"], params["output3"], padding=pad)
        pred4 = final_output_block(feat24, params["final4"], params["output4"], padding=pad)
        if no_label_except_largest_scale:
            label_map3 = jnp.ones((pred3.shape[0], 1, pred3.shape[1], pred3.shape[2]), jnp.float32)
            label_map4 = jnp.ones((pred4.shape[0], 1, pred4.shape[1], pred4.shape[2]), jnp.float32)
        else:
            label_map3 = nearest_resize_nchw(segmaps, (pred3.shape[1], pred3.shape[2]))
            label_map4 = nearest_resize_nchw(segmaps, (pred4.shape[1], pred4.shape[2]))
        if weights is not None:
            label_map3 = label_map3 * weights[..., None, None]
            label_map4 = label_map4 * weights[..., None, None]
        results.append({"pred": nchw(pred3), "label": label_map3})
        results.append({"pred": nchw(pred4), "label": label_map4})

    return results, features


# ----------------------------------------------------------------------------- main

if __name__ == "__main__":
    N, C_IMG, NUM_LABELS, NF, KS, H, W = 2, 3, 4, 8, 3, 64, 64

    key = jax.random.PRNGKey(0)
    k_params, k_img, k_seg = jax.random.split(key, 3)

    params = init_fpse_params(k_params, C_IMG, NUM_LABELS, NF, KS,
                              do_multiscale=True, no_label_except_largest_scale=True)

    images = jax.random.normal(k_img, (N, C_IMG, H, W), jnp.float32)
    seg_idx = jax.random.randint(k_seg, (N, H, W), 0, NUM_LABELS)
    segmaps = jax.nn.one_hot(seg_idx, NUM_LABELS, axis=1, dtype=jnp.float32)

    fwd = jax.jit(functools.partial(
        fpse_forward, kernel_size=KS, do_multiscale=True,
        no_label_except_largest_scale=True))

    results, features = fwd(params, images, segmaps)
    jax.block_until_ready((results, features))

    # light sanity checks on shapes
    assert results[0]["pred"].shape == (N, NUM_LABELS + 1, H // 4, W // 4)
    assert results[0]["label"].shape == (N, NUM_LABELS, H // 4, W // 4)
    assert results[1]["pred"].shape == (N, 2, H // 8, W // 8)
    assert results[2]["pred"].shape == (N, 2, H // 16, W // 16)
    assert features[0].shape == (N, NF, H // 2, W // 2)
    assert features[4].shape == (N, 8 * NF, H // 32, W // 32)
    assert features[8].shape == (N, 4 * NF, H // 4, W // 4)
    for r in results:
        assert bool(jnp.all(jnp.isfinite(r["pred"])))

    print("KERNEL_OK")
</pallas_src>

<mosaic_0001>
module attributes {stable_mosaic.version = 11 : i64} {
  func.func @_mm_kernel(%arg0: i32, %arg1: memref<512x27xbf16, #tpu.memory_space<vmem>>, %arg2: memref<27x128xbf16, #tpu.memory_space<vmem>>, %arg3: memref<1x128xf32, #tpu.memory_space<vmem>>, %arg4: memref<512x128xf32, #tpu.memory_space<vmem>>) attributes {dimension_semantics = [#tpu.dimension_semantics<parallel>], iteration_bounds = array<i64: 4>, scalar_prefetch = 0 : i64, scratch_operands = 0 : i64, tpu.core_type = #tpu.core_type<tc>, window_params = [{transform_indices = @transform_0, window_bounds = array<i64: 512, 27>}, {pipeline_mode = #tpu.pipeline_mode<synchronous>, transform_indices = @transform_1, window_bounds = array<i64: 27, 128>}, {pipeline_mode = #tpu.pipeline_mode<synchronous>, transform_indices = @transform_2, window_bounds = array<i64: 1, 128>}, {transform_indices = @transform_3, window_bounds = array<i64: 512, 128>}]} {
    %c0 = arith.constant 0 : index
    %c0_0 = arith.constant 0 : index
    %0 = vector.load %arg1[%c0, %c0_0] : memref<512x27xbf16, #tpu.memory_space<vmem>>, vector<512x27xbf16>
    %c0_1 = arith.constant 0 : index
    %c0_2 = arith.constant 0 : index
    %1 = vector.load %arg2[%c0_1, %c0_2] : memref<27x128xbf16, #tpu.memory_space<vmem>>, vector<27x128xbf16>
    %cst = arith.constant dense<0.000000e+00> : vector<512x128xf32>
    %2 = tpu.matmul %0, %1, %cst {dimension_numbers = #tpu.dot_dimension_numbers<[1], [0], [0], [1], [0, 0, 1, 1], [], []>} : vector<512x27xbf16>, vector<27x128xbf16>, vector<512x128xf32> -> vector<512x128xf32>
    %c0_3 = arith.constant 0 : index
    %c0_4 = arith.constant 0 : index
    %3 = vector.load %arg3[%c0_3, %c0_4] : memref<1x128xf32, #tpu.memory_space<vmem>>, vector<1x128xf32>
    %4 = vector.broadcast %3 : vector<1x128xf32> to vector<512x128xf32>
    %5 = arith.addf %2, %4 : vector<512x128xf32>
    %cst_5 = arith.constant 0.000000e+00 : f32
    %6 = vector.broadcast %cst_5 : f32 to vector<512x128xf32>
    %7 = arith.cmpf oge, %5, %6 : vector<512x128xf32>
    %cst_6 = arith.constant 2.000000e-01 : f32
    %8 = vector.broadcast %cst_6 : f32 to vector<512x128xf32>
    %9 = arith.mulf %8, %5 : vector<512x128xf32>
    %10 = arith.select %7, %5, %9 : vector<512x128xi1>, vector<512x128xf32>
    %c0_7 = arith.constant 0 : index
    %c0_8 = arith.constant 0 : index
    %11 = vector.load %arg4[%c0_7, %c0_8] : memref<512x128xf32, #tpu.memory_space<vmem>>, vector<512x128xf32>
    tpu.vector_store %arg4[%c0_7, %c0_8], %10 {strides = array<i32>} : memref<512x128xf32, #tpu.memory_space<vmem>>, vector<512x128xf32>,
    return
  }
  func.func @transform_0(%arg0: i32) -> (i32, i32) {
    %c0_i32 = arith.constant 0 : i32
    %c0_i32_0 = arith.constant 0 : i32
    return %arg0, %c0_i32 : i32, i32
  }
  func.func @transform_1(%arg0: i32) -> (i32, i32) {
    %c0_i32 = arith.constant 0 : i32
    %c0_i32_0 = arith.constant 0 : i32
    %c0_i32_1 = arith.constant 0 : i32
    return %c0_i32, %c0_i32_0 : i32, i32
  }
  func.func @transform_2(%arg0: i32) -> (i32, i32) {
    %c0_i32 = arith.constant 0 : i32
    %c0_i32_0 = arith.constant 0 : i32
    %c0_i32_1 = arith.constant 0 : i32
    return %c0_i32, %c0_i32_0 : i32, i32
  }
  func.func @transform_3(%arg0: i32) -> (i32, i32) {
    %c0_i32 = arith.constant 0 : i32
    %c0_i32_0 = arith.constant 0 : i32
    return %arg0, %c0_i32 : i32, i32
  }
}

module attributes {stable_mosaic.version = 11 : i64} {
  func.func @_mm_kernel(%arg0: i32, %arg1: memref<512x72xbf16, #tpu.memory_space<vmem>>, %arg2: memref<72x128xbf16, #tpu.memory_space<vmem>>, %arg3: memref<1x128xf32, #tpu.memory_space<vmem>>, %arg4: memref<512x128xf32, #tpu.memory_space<vmem>>) attributes {dimension_semantics = [#tpu.dimension_semantics<parallel>], iteration_bounds = array<i64: 1>, scalar_prefetch = 0 : i64, scratch_operands = 0 : i64, tpu.core_type = #tpu.core_type<tc>, window_params = [{transform_indices = @transform_0, window_bounds = array<i64: 512, 72>}, {pipeline_mode = #tpu.pipeline_mode<synchronous>, transform_indices = @transform_1, window_bounds = array<i64: 72, 128>}, {pipeline_mode = #tpu.pipeline_mode<synchronous>, transform_indices = @transform_2, window_bounds = array<i64: 1, 128>}, {transform_indices = @transform_3, window_bounds = array<i64: 512, 128>}]} {
    %c0 = arith.constant 0 : index
    %c0_0 = arith.constant 0 : index
    %0 = vector.load %arg1[%c0, %c0_0] : memref<512x72xbf16, #tpu.memory_space<vmem>>, vector<512x72xbf16>
    %c0_1 = arith.constant 0 : index
    %c0_2 = arith.constant 0 : index
    %1 = vector.load %arg2[%c0_1, %c0_2] : memref<72x128xbf16, #tpu.memory_space<vmem>>, vector<72x128xbf16>
    %cst = arith.constant dense<0.000000e+00> : vector<512x128xf32>
    %2 = tpu.matmul %0, %1, %cst {dimension_numbers = #tpu.dot_dimension_numbers<[1], [0], [0], [1], [0, 0, 1, 1], [], []>} : vector<512x72xbf16>, vector<72x128xbf16>, vector<512x128xf32> -> vector<512x128xf32>
    %c0_3 = arith.constant 0 : index
    %c0_4 = arith.constant 0 : index
    %3 = vector.load %arg3[%c0_3, %c0_4] : memref<1x128xf32, #tpu.memory_space<vmem>>, vector<1x128xf32>
    %4 = vector.broadcast %3 : vector<1x128xf32> to vector<512x128xf32>
    %5 = arith.addf %2, %4 : vector<512x128xf32>
    %cst_5 = arith.constant 0.000000e+00 : f32
    %6 = vector.broadcast %cst_5 : f32 to vector<512x128xf32>
    %7 = arith.cmpf oge, %5, %6 : vector<512x128xf32>
    %cst_6 = arith.constant 2.000000e-01 : f32
    %8 = vector.broadcast %cst_6 : f32 to vector<512x128xf32>
    %9 = arith.mulf %8, %5 : vector<512x128xf32>
    %10 = arith.select %7, %5, %9 : vector<512x128xi1>, vector<512x128xf32>
    %c0_7 = arith.constant 0 : index
    %c0_8 = arith.constant 0 : index
    %11 = vector.load %arg4[%c0_7, %c0_8] : memref<512x128xf32, #tpu.memory_space<vmem>>, vector<512x128xf32>
    tpu.vector_store %arg4[%c0_7, %c0_8], %10 {strides = array<i32>} : memref<512x128xf32, #tpu.memory_space<vmem>>, vector<512x128xf32>,
    return
  }
  func.func @transform_0(%arg0: i32) -> (i32, i32) {
    %c0_i32 = arith.constant 0 : i32
    %c0_i32_0 = arith.constant 0 : i32
    return %arg0, %c0_i32 : i32, i32
  }
  func.func @transform_1(%arg0: i32) -> (i32, i32) {
    %c0_i32 = arith.constant 0 : i32
    %c0_i32_0 = arith.constant 0 : i32
    %c0_i32_1 = arith.constant 0 : i32
    return %c0_i32, %c0_i32_0 : i32, i32
  }
  func.func @transform_2(%arg0: i32) -> (i32, i32) {
    %c0_i32 = arith.constant 0 : i32
    %c0_i32_0 = arith.constant 0 : i32
    %c0_i32_1 = arith.constant 0 : i32
    return %c0_i32, %c0_i32_0 : i32, i32
  }
  func.func @transform_3(%arg0: i32) -> (i32, i32) {
    %c0_i32 = arith.constant 0 : i32
    %c0_i32_0 = arith.constant 0 : i32
    return %arg0, %c0_i32 : i32, i32
  }
}

module attributes {stable_mosaic.version = 11 : i64} {
  func.func @_mm_kernel(%arg0: i32, %arg1: memref<128x144xbf16, #tpu.memory_space<vmem>>, %arg2: memref<144x128xbf16, #tpu.memory_space<vmem>>, %arg3: memref<1x128xf32, #tpu.memory_space<vmem>>, %arg4: memref<128x128xf32, #tpu.memory_space<vmem>>) attributes {dimension_semantics = [#tpu.dimension_semantics<parallel>], iteration_bounds = array<i64: 1>, scalar_prefetch = 0 : i64, scratch_operands = 0 : i64, tpu.core_type = #tpu.core_type<tc>, window_params = [{transform_indices = @transform_0, window_bounds = array<i64: 128, 144>}, {pipeline_mode = #tpu.pipeline_mode<synchronous>, transform_indices = @transform_1, window_bounds = array<i64: 144, 128>}, {pipeline_mode = #tpu.pipeline_mode<synchronous>, transform_indices = @transform_2, window_bounds = array<i64: 1, 128>}, {transform_indices = @transform_3, window_bounds = array<i64: 128, 128>}]} {
    %c0 = arith.constant 0 : index
    %c0_0 = arith.constant 0 : index
    %0 = vector.load %arg1[%c0, %c0_0] : memref<128x144xbf16, #tpu.memory_space<vmem>>, vector<128x144xbf16>
    %c0_1 = arith.constant 0 : index
    %c0_2 = arith.constant 0 : index
    %1 = vector.load %arg2[%c0_1, %c0_2] : memref<144x128xbf16, #tpu.memory_space<vmem>>, vector<144x128xbf16>
    %cst = arith.constant dense<0.000000e+00> : vector<128x128xf32>
    %2 = tpu.matmul %0, %1, %cst {dimension_numbers = #tpu.dot_dimension_numbers<[1], [0], [0], [1], [0, 0, 1, 1], [], []>} : vector<128x144xbf16>, vector<144x128xbf16>, vector<128x128xf32> -> vector<128x128xf32>
    %c0_3 = arith.constant 0 : index
    %c0_4 = arith.constant 0 : index
    %3 = vector.load %arg3[%c0_3, %c0_4] : memref<1x128xf32, #tpu.memory_space<vmem>>, vector<1x128xf32>
    %4 = vector.broadcast %3 : vector<1x128xf32> to vector<128x128xf32>
    %5 = arith.addf %2, %4 : vector<128x128xf32>
    %cst_5 = arith.constant 0.000000e+00 : f32
    %6 = vector.broadcast %cst_5 : f32 to vector<128x128xf32>
    %7 = arith.cmpf oge, %5, %6 : vector<128x128xf32>
    %cst_6 = arith.constant 2.000000e-01 : f32
    %8 = vector.broadcast %cst_6 : f32 to vector<128x128xf32>
    %9 = arith.mulf %8, %5 : vector<128x128xf32>
    %10 = arith.select %7, %5, %9 : vector<128x128xi1>, vector<128x128xf32>
    %c0_7 = arith.constant 0 : index
    %c0_8 = arith.constant 0 : index
    %11 = vector.load %arg4[%c0_7, %c0_8] : memref<128x128xf32, #tpu.memory_space<vmem>>, vector<128x128xf32>
    tpu.vector_store %arg4[%c0_7, %c0_8], %10 {strides = array<i32>} : memref<128x128xf32, #tpu.memory_space<vmem>>, vector<128x128xf32>,
    return
  }
  func.func @transform_0(%arg0: i32) -> (i32, i32) {
    %c0_i32 = arith.constant 0 : i32
    %c0_i32_0 = arith.constant 0 : i32
    return %arg0, %c0_i32 : i32, i32
  }
  func.func @transform_1(%arg0: i32) -> (i32, i32) {
    %c0_i32 = arith.constant 0 : i32
    %c0_i32_0 = arith.constant 0 : i32
    %c0_i32_1 = arith.constant 0 : i32
    return %c0_i32, %c0_i32_0 : i32, i32
  }
  func.func @transform_2(%arg0: i32) -> (i32, i32) {
    %c0_i32 = arith.constant 0 : i32
    %c0_i32_0 = arith.constant 0 : i32
    %c0_i32_1 = arith.constant 0 : i32
    return %c0_i32, %c0_i32_0 : i32, i32
  }
  func.func @transform_3(%arg0: i32) -> (i32, i32) {
    %c0_i32 = arith.constant 0 : i32
    %c0_i32_0 = arith.constant 0 : i32
    return %arg0, %c0_i32 : i32, i32
  }
}

module attributes {stable_mosaic.version = 11 : i64} {
  func.func @_mm_kernel(%arg0: i32, %arg1: memref<32x288xbf16, #tpu.memory_space<vmem>>, %arg2: memref<288x128xbf16, #tpu.memory_space<vmem>>, %arg3: memref<1x128xf32, #tpu.memory_space<vmem>>, %arg4: memref<32x128xf32, #tpu.memory_space<vmem>>) attributes {dimension_semantics = [#tpu.dimension_semantics<parallel>], iteration_bounds = array<i64: 1>, scalar_prefetch = 0 : i64, scratch_operands = 0 : i64, tpu.core_type = #tpu.core_type<tc>, window_params = [{transform_indices = @transform_0, window_bounds = array<i64: 32, 288>}, {pipeline_mode = #tpu.pipeline_mode<synchronous>, transform_indices = @transform_1, window_bounds = array<i64: 288, 128>}, {pipeline_mode = #tpu.pipeline_mode<synchronous>, transform_indices = @transform_2, window_bounds = array<i64: 1, 128>}, {transform_indices = @transform_3, window_bounds = array<i64: 32, 128>}]} {
    %c0 = arith.constant 0 : index
    %c0_0 = arith.constant 0 : index
    %0 = vector.load %arg1[%c0, %c0_0] : memref<32x288xbf16, #tpu.memory_space<vmem>>, vector<32x288xbf16>
    %c0_1 = arith.constant 0 : index
    %c0_2 = arith.constant 0 : index
    %1 = vector.load %arg2[%c0_1, %c0_2] : memref<288x128xbf16, #tpu.memory_space<vmem>>, vector<288x128xbf16>
    %cst = arith.constant dense<0.000000e+00> : vector<32x128xf32>
    %2 = tpu.matmul %0, %1, %cst {dimension_numbers = #tpu.dot_dimension_numbers<[1], [0], [0], [1], [0, 0, 1, 1], [], []>} : vector<32x288xbf16>, vector<288x128xbf16>, vector<32x128xf32> -> vector<32x128xf32>
    %c0_3 = arith.constant 0 : index
    %c0_4 = arith.constant 0 : index
    %3 = vector.load %arg3[%c0_3, %c0_4] : memref<1x128xf32, #tpu.memory_space<vmem>>, vector<1x128xf32>
    %4 = vector.broadcast %3 : vector<1x128xf32> to vector<32x128xf32>
    %5 = arith.addf %2, %4 : vector<32x128xf32>
    %cst_5 = arith.constant 0.000000e+00 : f32
    %6 = vector.broadcast %cst_5 : f32 to vector<32x128xf32>
    %7 = arith.cmpf oge, %5, %6 : vector<32x128xf32>
    %cst_6 = arith.constant 2.000000e-01 : f32
    %8 = vector.broadcast %cst_6 : f32 to vector<32x128xf32>
    %9 = arith.mulf %8, %5 : vector<32x128xf32>
    %10 = arith.select %7, %5, %9 : vector<32x128xi1>, vector<32x128xf32>
    %c0_7 = arith.constant 0 : index
    %c0_8 = arith.constant 0 : index
    %11 = vector.load %arg4[%c0_7, %c0_8] : memref<32x128xf32, #tpu.memory_space<vmem>>, vector<32x128xf32>
    tpu.vector_store %arg4[%c0_7, %c0_8], %10 {strides = array<i32>} : memref<32x128xf32, #tpu.memory_space<vmem>>, vector<32x128xf32>,
    return
  }
  func.func @transform_0(%arg0: i32) -> (i32, i32) {
    %c0_i32 = arith.constant 0 : i32
    %c0_i32_0 = arith.constant 0 : i32
    return %arg0, %c0_i32 : i32, i32
  }
  func.func @transform_1(%arg0: i32) -> (i32, i32) {
    %c0_i32 = arith.constant 0 : i32
    %c0_i32_0 = arith.constant 0 : i32
    %c0_i32_1 = arith.constant 0 : i32
    return %c0_i32, %c0_i32_0 : i32, i32
  }
  func.func @transform_2(%arg0: i32) -> (i32, i32) {
    %c0_i32 = arith.constant 0 : i32
    %c0_i32_0 = arith.constant 0 : i32
    %c0_i32_1 = arith.constant 0 : i32
    return %c0_i32, %c0_i32_0 : i32, i32
  }
  func.func @transform_3(%arg0: i32) -> (i32, i32) {
    %c0_i32 = arith.constant 0 : i32
    %c0_i32_0 = arith.constant 0 : i32
    return %arg0, %c0_i32 : i32, i32
  }
}

module attributes {stable_mosaic.version = 11 : i64} {
  func.func @_mm_kernel(%arg0: i32, %arg1: memref<8x576xbf16, #tpu.memory_space<vmem>>, %arg2: memref<576x128xbf16, #tpu.memory_space<vmem>>, %arg3: memref<1x128xf32, #tpu.memory_space<vmem>>, %arg4: memref<8x128xf32, #tpu.memory_space<vmem>>) attributes {dimension_semantics = [#tpu.dimension_semantics<parallel>], iteration_bounds = array<i64: 1>, scalar_prefetch = 0 : i64, scratch_operands = 0 : i64, tpu.core_type = #tpu.core_type<tc>, window_params = [{transform_indices = @transform_0, window_bounds = array<i64: 8, 576>}, {pipeline_mode = #tpu.pipeline_mode<synchronous>, transform_indices = @transform_1, window_bounds = array<i64: 576, 128>}, {pipeline_mode = #tpu.pipeline_mode<synchronous>, transform_indices = @transform_2, window_bounds = array<i64: 1, 128>}, {transform_indices = @transform_3, window_bounds = array<i64: 8, 128>}]} {
    %c0 = arith.constant 0 : index
    %c0_0 = arith.constant 0 : index
    %0 = vector.load %arg1[%c0, %c0_0] : memref<8x576xbf16, #tpu.memory_space<vmem>>, vector<8x576xbf16>
    %c0_1 = arith.constant 0 : index
    %c0_2 = arith.constant 0 : index
    %1 = vector.load %arg2[%c0_1, %c0_2] : memref<576x128xbf16, #tpu.memory_space<vmem>>, vector<576x128xbf16>
    %cst = arith.constant dense<0.000000e+00> : vector<8x128xf32>
    %2 = tpu.matmul %0, %1, %cst {dimension_numbers = #tpu.dot_dimension_numbers<[1], [0], [0], [1], [0, 0, 1, 1], [], []>} : vector<8x576xbf16>, vector<576x128xbf16>, vector<8x128xf32> -> vector<8x128xf32>
    %c0_3 = arith.constant 0 : index
    %c0_4 = arith.constant 0 : index
    %3 = vector.load %arg3[%c0_3, %c0_4] : memref<1x128xf32, #tpu.memory_space<vmem>>, vector<1x128xf32>
    %4 = vector.broadcast %3 : vector<1x128xf32> to vector<8x128xf32>
    %5 = arith.addf %2, %4 : vector<8x128xf32>
    %cst_5 = arith.constant 0.000000e+00 : f32
    %6 = vector.broadcast %cst_5 : f32 to vector<8x128xf32>
    %7 = arith.cmpf oge, %5, %6 : vector<8x128xf32>
    %cst_6 = arith.constant 2.000000e-01 : f32
    %8 = vector.broadcast %cst_6 : f32 to vector<8x128xf32>
    %9 = arith.mulf %8, %5 : vector<8x128xf32>
    %10 = arith.select %7, %5, %9 : vector<8x128xi1>, vector<8x128xf32>
    %c0_7 = arith.constant 0 : index
    %c0_8 = arith.constant 0 : index
    %11 = vector.load %arg4[%c0_7, %c0_8] : memref<8x128xf32, #tpu.memory_space<vmem>>, vector<8x128xf32>
    tpu.vector_store %arg4[%c0_7, %c0_8], %10 {strides = array<i32>} : memref<8x128xf32, #tpu.memory_space<vmem>>, vector<8x128xf32>,
    return
  }
  func.func @transform_0(%arg0: i32) -> (i32, i32) {
    %c0_i32 = arith.constant 0 : i32
    %c0_i32_0 = arith.constant 0 : i32
    return %arg0, %c0_i32 : i32, i32
  }
  func.func @transform_1(%arg0: i32) -> (i32, i32) {
    %c0_i32 = arith.constant 0 : i32
    %c0_i32_0 = arith.constant 0 : i32
    %c0_i32_1 = arith.constant 0 : i32
    return %c0_i32, %c0_i32_0 : i32, i32
  }
  func.func @transform_2(%arg0: i32) -> (i32, i32) {
    %c0_i32 = arith.constant 0 : i32
    %c0_i32_0 = arith.constant 0 : i32
    %c0_i32_1 = arith.constant 0 : i32
    return %c0_i32, %c0_i32_0 : i32, i32
  }
  func.func @transform_3(%arg0: i32) -> (i32, i32) {
    %c0_i32 = arith.constant 0 : i32
    %c0_i32_0 = arith.constant 0 : i32
    return %arg0, %c0_i32 : i32, i32
  }
}

module attributes {stable_mosaic.version = 11 : i64} {
  func.func @_mm_kernel(%arg0: i32, %arg1: memref<8x64xbf16, #tpu.memory_space<vmem>>, %arg2: memref<64x128xbf16, #tpu.memory_space<vmem>>, %arg3: memref<1x128xf32, #tpu.memory_space<vmem>>, %arg4: memref<8x128xf32, #tpu.memory_space<vmem>>) attributes {dimension_semantics = [#tpu.dimension_semantics<parallel>], iteration_bounds = array<i64: 1>, scalar_prefetch = 0 : i64, scratch_operands = 0 : i64, tpu.core_type = #tpu.core_type<tc>, window_params = [{transform_indices = @transform_0, window_bounds = array<i64: 8, 64>}, {pipeline_mode = #tpu.pipeline_mode<synchronous>, transform_indices = @transform_1, window_bounds = array<i64: 64, 128>}, {pipeline_mode = #tpu.pipeline_mode<synchronous>, transform_indices = @transform_2, window_bounds = array<i64: 1, 128>}, {transform_indices = @transform_3, window_bounds = array<i64: 8, 128>}]} {
    %c0 = arith.constant 0 : index
    %c0_0 = arith.constant 0 : index
    %0 = vector.load %arg1[%c0, %c0_0] : memref<8x64xbf16, #tpu.memory_space<vmem>>, vector<8x64xbf16>
    %c0_1 = arith.constant 0 : index
    %c0_2 = arith.constant 0 : index
    %1 = vector.load %arg2[%c0_1, %c0_2] : memref<64x128xbf16, #tpu.memory_space<vmem>>, vector<64x128xbf16>
    %cst = arith.constant dense<0.000000e+00> : vector<8x128xf32>
    %2 = tpu.matmul %0, %1, %cst {dimension_numbers = #tpu.dot_dimension_numbers<[1], [0], [0], [1], [0, 0, 1, 1], [], []>} : vector<8x64xbf16>, vector<64x128xbf16>, vector<8x128xf32> -> vector<8x128xf32>
    %c0_3 = arith.constant 0 : index
    %c0_4 = arith.constant 0 : index
    %3 = vector.load %arg3[%c0_3, %c0_4] : memref<1x128xf32, #tpu.memory_space<vmem>>, vector<1x128xf32>
    %4 = vector.broadcast %3 : vector<1x128xf32> to vector<8x128xf32>
    %5 = arith.addf %2, %4 : vector<8x128xf32>
    %cst_5 = arith.constant 0.000000e+00 : f32
    %6 = vector.broadcast %cst_5 : f32 to vector<8x128xf32>
    %7 = arith.cmpf oge, %5, %6 : vector<8x128xf32>
    %cst_6 = arith.constant 2.000000e-01 : f32
    %8 = vector.broadcast %cst_6 : f32 to vector<8x128xf32>
    %9 = arith.mulf %8, %5 : vector<8x128xf32>
    %10 = arith.select %7, %5, %9 : vector<8x128xi1>, vector<8x128xf32>
    %c0_7 = arith.constant 0 : index
    %c0_8 = arith.constant 0 : index
    %11 = vector.load %arg4[%c0_7, %c0_8] : memref<8x128xf32, #tpu.memory_space<vmem>>, vector<8x128xf32>
    tpu.vector_store %arg4[%c0_7, %c0_8], %10 {strides = array<i32>} : memref<8x128xf32, #tpu.memory_space<vmem>>, vector<8x128xf32>,
    return
  }
  func.func @transform_0(%arg0: i32) -> (i32, i32) {
    %c0_i32 = arith.constant 0 : i32
    %c0_i32_0 = arith.constant 0 : i32
    return %arg0, %c0_i32 : i32, i32
  }
  func.func @transform_1(%arg0: i32) -> (i32, i32) {
    %c0_i32 = arith.constant 0 : i32
    %c0_i32_0 = arith.constant 0 : i32
    %c0_i32_1 = arith.constant 0 : i32
    return %c0_i32, %c0_i32_0 : i32, i32
  }
  func.func @transform_2(%arg0: i32) -> (i32, i32) {
    %c0_i32 = arith.constant 0 : i32
    %c0_i32_0 = arith.constant 0 : i32
    %c0_i32_1 = arith.constant 0 : i32
    return %c0_i32, %c0_i32_0 : i32, i32
  }
  func.func @transform_3(%arg0: i32) -> (i32, i32) {
    %c0_i32 = arith.constant 0 : i32
    %c0_i32_0 = arith.constant 0 : i32
    return %arg0, %c0_i32 : i32, i32
  }
}

module attributes {stable_mosaic.version = 11 : i64} {
  func.func @_mm_skip_kernel(%arg0: i32, %arg1: memref<32x64xbf16, #tpu.memory_space<vmem>>, %arg2: memref<64x128xbf16, #tpu.memory_space<vmem>>, %arg3: memref<1x128xf32, #tpu.memory_space<vmem>>, %arg4: memref<32x128xf32, #tpu.memory_space<vmem>>, %arg5: memref<32x128xf32, #tpu.memory_space<vmem>>) attributes {dimension_semantics = [#tpu.dimension_semantics<parallel>], iteration_bounds = array<i64: 1>, scalar_prefetch = 0 : i64, scratch_operands = 0 : i64, tpu.core_type = #tpu.core_type<tc>, window_params = [{transform_indices = @transform_0, window_bounds = array<i64: 32, 64>}, {pipeline_mode = #tpu.pipeline_mode<synchronous>, transform_indices = @transform_1, window_bounds = array<i64: 64, 128>}, {pipeline_mode = #tpu.pipeline_mode<synchronous>, transform_indices = @transform_2, window_bounds = array<i64: 1, 128>}, {transform_indices = @transform_3, window_bounds = array<i64: 32, 128>}, {transform_indices = @transform_4, window_bounds = array<i64: 32, 128>}]} {
    %c0 = arith.constant 0 : index
    %c0_0 = arith.constant 0 : index
    %0 = vector.load %arg1[%c0, %c0_0] : memref<32x64xbf16, #tpu.memory_space<vmem>>, vector<32x64xbf16>
    %c0_1 = arith.constant 0 : index
    %c0_2 = arith.constant 0 : index
    %1 = vector.load %arg2[%c0_1, %c0_2] : memref<64x128xbf16, #tpu.memory_space<vmem>>, vector<64x128xbf16>
    %cst = arith.constant dense<0.000000e+00> : vector<32x128xf32>
    %2 = tpu.matmul %0, %1, %cst {dimension_numbers = #tpu.dot_dimension_numbers<[1], [0], [0], [1], [0, 0, 1, 1], [], []>} : vector<32x64xbf16>, vector<64x128xbf16>, vector<32x128xf32> -> vector<32x128xf32>
    %c0_3 = arith.constant 0 : index
    %c0_4 = arith.constant 0 : index
    %3 = vector.load %arg3[%c0_3, %c0_4] : memref<1x128xf32, #tpu.memory_space<vmem>>, vector<1x128xf32>
    %4 = vector.broadcast %3 : vector<1x128xf32> to vector<32x128xf32>
    %5 = arith.addf %2, %4 : vector<32x128xf32>
    %cst_5 = arith.constant 0.000000e+00 : f32
    %6 = vector.broadcast %cst_5 : f32 to vector<32x128xf32>
    %7 = arith.cmpf oge, %5, %6 : vector<32x128xf32>
    %cst_6 = arith.constant 2.000000e-01 : f32
    %8 = vector.broadcast %cst_6 : f32 to vector<32x128xf32>
    %9 = arith.mulf %8, %5 : vector<32x128xf32>
    %10 = arith.select %7, %5, %9 : vector<32x128xi1>, vector<32x128xf32>
    %c0_7 = arith.constant 0 : index
    %c0_8 = arith.constant 0 : index
    %11 = vector.load %arg4[%c0_7, %c0_8] : memref<32x128xf32, #tpu.memory_space<vmem>>, vector<32x128xf32>
    %12 = arith.addf %10, %11 : vector<32x128xf32>
    %c0_9 = arith.constant 0 : index
    %c0_10 = arith.constant 0 : index
    %13 = vector.load %arg5[%c0_9, %c0_10] : memref<32x128xf32, #tpu.memory_space<vmem>>, vector<32x128xf32>
    tpu.vector_store %arg5[%c0_9, %c0_10], %12 {strides = array<i32>} : memref<32x128xf32, #tpu.memory_space<vmem>>, vector<32x128xf32>,
    return
  }
  func.func @transform_0(%arg0: i32) -> (i32, i32) {
    %c0_i32 = arith.constant 0 : i32
    %c0_i32_0 = arith.constant 0 : i32
    return %arg0, %c0_i32 : i32, i32
  }
  func.func @transform_1(%arg0: i32) -> (i32, i32) {
    %c0_i32 = arith.constant 0 : i32
    %c0_i32_0 = arith.constant 0 : i32
    %c0_i32_1 = arith.constant 0 : i32
    return %c0_i32, %c0_i32_0 : i32, i32
  }
  func.func @transform_2(%arg0: i32) -> (i32, i32) {
    %c0_i32 = arith.constant 0 : i32
    %c0_i32_0 = arith.constant 0 : i32
    %c0_i32_1 = arith.constant 0 : i32
    return %c0_i32, %c0_i32_0 : i32, i32
  }
  func.func @transform_3(%arg0: i32) -> (i32, i32) {
    %c0_i32 = arith.constant 0 : i32
    %c0_i32_0 = arith.constant 0 : i32
    return %arg0, %c0_i32 : i32, i32
  }
  func.func @transform_4(%arg0: i32) -> (i32, i32) {
    %c0_i32 = arith.constant 0 : i32
    %c0_i32_0 = arith.constant 0 : i32
    return %arg0, %c0_i32 : i32, i32
  }
}

module attributes {stable_mosaic.version = 11 : i64} {
  func.func @_mm_skip_kernel(%arg0: i32, %arg1: memref<128x32xbf16, #tpu.memory_space<vmem>>, %arg2: memref<32x128xbf16, #tpu.memory_space<vmem>>, %arg3: memref<1x128xf32, #tpu.memory_space<vmem>>, %arg4: memref<128x128xf32, #tpu.memory_space<vmem>>, %arg5: memref<128x128xf32, #tpu.memory_space<vmem>>) attributes {dimension_semantics = [#tpu.dimension_semantics<parallel>], iteration_bounds = array<i64: 1>, scalar_prefetch = 0 : i64, scratch_operands = 0 : i64, tpu.core_type = #tpu.core_type<tc>, window_params = [{transform_indices = @transform_0, window_bounds = array<i64: 128, 32>}, {pipeline_mode = #tpu.pipeline_mode<synchronous>, transform_indices = @transform_1, window_bounds = array<i64: 32, 128>}, {pipeline_mode = #tpu.pipeline_mode<synchronous>, transform_indices = @transform_2, window_bounds = array<i64: 1, 128>}, {transform_indices = @transform_3, window_bounds = array<i64: 128, 128>}, {transform_indices = @transform_4, window_bounds = array<i64: 128, 128>}]} {
    %c0 = arith.constant 0 : index
    %c0_0 = arith.constant 0 : index
    %0 = vector.load %arg1[%c0, %c0_0] : memref<128x32xbf16, #tpu.memory_space<vmem>>, vector<128x32xbf16>
    %c0_1 = arith.constant 0 : index
    %c0_2 = arith.constant 0 : index
    %1 = vector.load %arg2[%c0_1, %c0_2] : memref<32x128xbf16, #tpu.memory_space<vmem>>, vector<32x128xbf16>
    %cst = arith.constant dense<0.000000e+00> : vector<128x128xf32>
    %2 = tpu.matmul %0, %1, %cst {dimension_numbers = #tpu.dot_dimension_numbers<[1], [0], [0], [1], [0, 0, 1, 1], [], []>} : vector<128x32xbf16>, vector<32x128xbf16>, vector<128x128xf32> -> vector<128x128xf32>
    %c0_3 = arith.constant 0 : index
    %c0_4 = arith.constant 0 : index
    %3 = vector.load %arg3[%c0_3, %c0_4] : memref<1x128xf32, #tpu.memory_space<vmem>>, vector<1x128xf32>
    %4 = vector.broadcast %3 : vector<1x128xf32> to vector<128x128xf32>
    %5 = arith.addf %2, %4 : vector<128x128xf32>
    %cst_5 = arith.constant 0.000000e+00 : f32
    %6 = vector.broadcast %cst_5 : f32 to vector<128x128xf32>
    %7 = arith.cmpf oge, %5, %6 : vector<128x128xf32>
    %cst_6 = arith.constant 2.000000e-01 : f32
    %8 = vector.broadcast %cst_6 : f32 to vector<128x128xf32>
    %9 = arith.mulf %8, %5 : vector<128x128xf32>
    %10 = arith.select %7, %5, %9 : vector<128x128xi1>, vector<128x128xf32>
    %c0_7 = arith.constant 0 : index
    %c0_8 = arith.constant 0 : index
    %11 = vector.load %arg4[%c0_7, %c0_8] : memref<128x128xf32, #tpu.memory_space<vmem>>, vector<128x128xf32>
    %12 = arith.addf %10, %11 : vector<128x128xf32>
    %c0_9 = arith.constant 0 : index
    %c0_10 = arith.constant 0 : index
    %13 = vector.load %arg5[%c0_9, %c0_10] : memref<128x128xf32, #tpu.memory_space<vmem>>, vector<128x128xf32>
    tpu.vector_store %arg5[%c0_9, %c0_10], %12 {strides = array<i32>} : memref<128x128xf32, #tpu.memory_space<vmem>>, vector<128x128xf32>,
    return
  }
  func.func @transform_0(%arg0: i32) -> (i32, i32) {
    %c0_i32 = arith.constant 0 : i32
    %c0_i32_0 = arith.constant 0 : i32
    return %arg0, %c0_i32 : i32, i32
  }
  func.func @transform_1(%arg0: i32) -> (i32, i32) {
    %c0_i32 = arith.constant 0 : i32
    %c0_i32_0 = arith.constant 0 : i32
    %c0_i32_1 = arith.constant 0 : i32
    return %c0_i32, %c0_i32_0 : i32, i32
  }
  func.func @transform_2(%arg0: i32) -> (i32, i32) {
    %c0_i32 = arith.constant 0 : i32
    %c0_i32_0 = arith.constant 0 : i32
    %c0_i32_1 = arith.constant 0 : i32
    return %c0_i32, %c0_i32_0 : i32, i32
  }
  func.func @transform_3(%arg0: i32) -> (i32, i32) {
    %c0_i32 = arith.constant 0 : i32
    %c0_i32_0 = arith.constant 0 : i32
    return %arg0, %c0_i32 : i32, i32
  }
  func.func @transform_4(%arg0: i32) -> (i32, i32) {
    %c0_i32 = arith.constant 0 : i32
    %c0_i32_0 = arith.constant 0 : i32
    return %arg0, %c0_i32 : i32, i32
  }
}

module attributes {stable_mosaic.version = 11 : i64} {
  func.func @_mm2_kernel(%arg0: i32, %arg1: memref<32x288xbf16, #tpu.memory_space<vmem>>, %arg2: memref<288x128xbf16, #tpu.memory_space<vmem>>, %arg3: memref<1x128xf32, #tpu.memory_space<vmem>>, %arg4: memref<128x128xbf16, #tpu.memory_space<vmem>>, %arg5: memref<1x128xf32, #tpu.memory_space<vmem>>, %arg6: memref<32x128xf32, #tpu.memory_space<vmem>>) attributes {dimension_semantics = [#tpu.dimension_semantics<parallel>], iteration_bounds = array<i64: 1>, scalar_prefetch = 0 : i64, scratch_operands = 0 : i64, tpu.core_type = #tpu.core_type<tc>, window_params = [{transform_indices = @transform_0, window_bounds = array<i64: 32, 288>}, {pipeline_mode = #tpu.pipeline_mode<synchronous>, transform_indices = @transform_1, window_bounds = array<i64: 288, 128>}, {pipeline_mode = #tpu.pipeline_mode<synchronous>, transform_indices = @transform_2, window_bounds = array<i64: 1, 128>}, {pipeline_mode = #tpu.pipeline_mode<synchronous>, transform_indices = @transform_3, window_bounds = array<i64: 128, 128>}, {pipeline_mode = #tpu.pipeline_mode<synchronous>, transform_indices = @transform_4, window_bounds = array<i64: 1, 128>}, {transform_indices = @transform_5, window_bounds = array<i64: 32, 128>}]} {
    %c0 = arith.constant 0 : index
    %c0_0 = arith.constant 0 : index
    %0 = vector.load %arg1[%c0, %c0_0] : memref<32x288xbf16, #tpu.memory_space<vmem>>, vector<32x288xbf16>
    %c0_1 = arith.constant 0 : index
    %c0_2 = arith.constant 0 : index
    %1 = vector.load %arg2[%c0_1, %c0_2] : memref<288x128xbf16, #tpu.memory_space<vmem>>, vector<288x128xbf16>
    %cst = arith.constant dense<0.000000e+00> : vector<32x128xf32>
    %2 = tpu.matmul %0, %1, %cst {dimension_numbers = #tpu.dot_dimension_numbers<[1], [0], [0], [1], [0, 0, 1, 1], [], []>} : vector<32x288xbf16>, vector<288x128xbf16>, vector<32x128xf32> -> vector<32x128xf32>
    %c0_3 = arith.constant 0 : index
    %c0_4 = arith.constant 0 : index
    %3 = vector.load %arg3[%c0_3, %c0_4] : memref<1x128xf32, #tpu.memory_space<vmem>>, vector<1x128xf32>
    %4 = vector.broadcast %3 : vector<1x128xf32> to vector<32x128xf32>
    %5 = arith.addf %2, %4 : vector<32x128xf32>
    %cst_5 = arith.constant 0.000000e+00 : f32
    %6 = vector.broadcast %cst_5 : f32 to vector<32x128xf32>
    %7 = arith.cmpf oge, %5, %6 : vector<32x128xf32>
    %cst_6 = arith.constant 2.000000e-01 : f32
    %8 = vector.broadcast %cst_6 : f32 to vector<32x128xf32>
    %9 = arith.mulf %8, %5 : vector<32x128xf32>
    %10 = arith.select %7, %5, %9 : vector<32x128xi1>, vector<32x128xf32>
    %11 = arith.truncf %10 : vector<32x128xf32> to vector<32x128xbf16>
    %c0_7 = arith.constant 0 : index
    %c0_8 = arith.constant 0 : index
    %12 = vector.load %arg4[%c0_7, %c0_8] : memref<128x128xbf16, #tpu.memory_space<vmem>>, vector<128x128xbf16>
    %cst_9 = arith.constant dense<0.000000e+00> : vector<32x128xf32>
    %13 = tpu.matmul %11, %12, %cst_9 {dimension_numbers = #tpu.dot_dimension_numbers<[1], [0], [0], [1], [0, 0, 1, 1], [], []>} : vector<32x128xbf16>, vector<128x128xbf16>, vector<32x128xf32> -> vector<32x128xf32>
    %c0_10 = arith.constant 0 : index
    %c0_11 = arith.constant 0 : index
    %14 = vector.load %arg5[%c0_10, %c0_11] : memref<1x128xf32, #tpu.memory_space<vmem>>, vector<1x128xf32>
    %15 = vector.broadcast %14 : vector<1x128xf32> to vector<32x128xf32>
    %16 = arith.addf %13, %15 : vector<32x128xf32>
    %c0_12 = arith.constant 0 : index
    %c0_13 = arith.constant 0 : index
    %17 = vector.load %arg6[%c0_12, %c0_13] : memref<32x128xf32, #tpu.memory_space<vmem>>, vector<32x128xf32>
    tpu.vector_store %arg6[%c0_12, %c0_13], %16 {strides = array<i32>} : memref<32x128xf32, #tpu.memory_space<vmem>>, vector<32x128xf32>,
    return
  }
  func.func @transform_0(%arg0: i32) -> (i32, i32) {
    %c0_i32 = arith.constant 0 : i32
    %c0_i32_0 = arith.constant 0 : i32
    return %arg0, %c0_i32 : i32, i32
  }
  func.func @transform_1(%arg0: i32) -> (i32, i32) {
    %c0_i32 = arith.constant 0 : i32
    %c0_i32_0 = arith.constant 0 : i32
    %c0_i32_1 = arith.constant 0 : i32
    return %c0_i32, %c0_i32_0 : i32, i32
  }
  func.func @transform_2(%arg0: i32) -> (i32, i32) {
    %c0_i32 = arith.constant 0 : i32
    %c0_i32_0 = arith.constant 0 : i32
    %c0_i32_1 = arith.constant 0 : i32
    return %c0_i32, %c0_i32_0 : i32, i32
  }
  func.func @transform_3(%arg0: i32) -> (i32, i32) {
    %c0_i32 = arith.constant 0 : i32
    %c0_i32_0 = arith.constant 0 : i32
    %c0_i32_1 = arith.constant 0 : i32
    return %c0_i32, %c0_i32_0 : i32, i32
  }
  func.func @transform_4(%arg0: i32) -> (i32, i32) {
    %c0_i32 = arith.constant 0 : i32
    %c0_i32_0 = arith.constant 0 : i32
    %c0_i32_1 = arith.constant 0 : i32
    return %c0_i32, %c0_i32_0 : i32, i32
  }
  func.func @transform_5(%arg0: i32) -> (i32, i32) {
    %c0_i32 = arith.constant 0 : i32
    %c0_i32_0 = arith.constant 0 : i32
    return %arg0, %c0_i32 : i32, i32
  }
}

module attributes {stable_mosaic.version = 11 : i64} {
  func.func @_mm_skip_kernel(%arg0: i32, %arg1: memref<512x16xbf16, #tpu.memory_space<vmem>>, %arg2: memref<16x128xbf16, #tpu.memory_space<vmem>>, %arg3: memref<1x128xf32, #tpu.memory_space<vmem>>, %arg4: memref<512x128xf32, #tpu.memory_space<vmem>>, %arg5: memref<512x128xf32, #tpu.memory_space<vmem>>) attributes {dimension_semantics = [#tpu.dimension_semantics<parallel>], iteration_bounds = array<i64: 1>, scalar_prefetch = 0 : i64, scratch_operands = 0 : i64, tpu.core_type = #tpu.core_type<tc>, window_params = [{transform_indices = @transform_0, window_bounds = array<i64: 512, 16>}, {pipeline_mode = #tpu.pipeline_mode<synchronous>, transform_indices = @transform_1, window_bounds = array<i64: 16, 128>}, {pipeline_mode = #tpu.pipeline_mode<synchronous>, transform_indices = @transform_2, window_bounds = array<i64: 1, 128>}, {transform_indices = @transform_3, window_bounds = array<i64: 512, 128>}, {transform_indices = @transform_4, window_bounds = array<i64: 512, 128>}]} {
    %c0 = arith.constant 0 : index
    %c0_0 = arith.constant 0 : index
    %0 = vector.load %arg1[%c0, %c0_0] : memref<512x16xbf16, #tpu.memory_space<vmem>>, vector<512x16xbf16>
    %c0_1 = arith.constant 0 : index
    %c0_2 = arith.constant 0 : index
    %1 = vector.load %arg2[%c0_1, %c0_2] : memref<16x128xbf16, #tpu.memory_space<vmem>>, vector<16x128xbf16>
    %cst = arith.constant dense<0.000000e+00> : vector<512x128xf32>
    %2 = tpu.matmul %0, %1, %cst {dimension_numbers = #tpu.dot_dimension_numbers<[1], [0], [0], [1], [0, 0, 1, 1], [], []>} : vector<512x16xbf16>, vector<16x128xbf16>, vector<512x128xf32> -> vector<512x128xf32>
    %c0_3 = arith.constant 0 : index
    %c0_4 = arith.constant 0 : index
    %3 = vector.load %arg3[%c0_3, %c0_4] : memref<1x128xf32, #tpu.memory_space<vmem>>, vector<1x128xf32>
    %4 = vector.broadcast %3 : vector<1x128xf32> to vector<512x128xf32>
    %5 = arith.addf %2, %4 : vector<512x128xf32>
    %cst_5 = arith.constant 0.000000e+00 : f32
    %6 = vector.broadcast %cst_5 : f32 to vector<512x128xf32>
    %7 = arith.cmpf oge, %5, %6 : vector<512x128xf32>
    %cst_6 = arith.constant 2.000000e-01 : f32
    %8 = vector.broadcast %cst_6 : f32 to vector<512x128xf32>
    %9 = arith.mulf %8, %5 : vector<512x128xf32>
    %10 = arith.select %7, %5, %9 : vector<512x128xi1>, vector<512x128xf32>
    %c0_7 = arith.constant 0 : index
    %c0_8 = arith.constant 0 : index
    %11 = vector.load %arg4[%c0_7, %c0_8] : memref<512x128xf32, #tpu.memory_space<vmem>>, vector<512x128xf32>
    %12 = arith.addf %10, %11 : vector<512x128xf32>
    %c0_9 = arith.constant 0 : index
    %c0_10 = arith.constant 0 : index
    %13 = vector.load %arg5[%c0_9, %c0_10] : memref<512x128xf32, #tpu.memory_space<vmem>>, vector<512x128xf32>
    tpu.vector_store %arg5[%c0_9, %c0_10], %12 {strides = array<i32>} : memref<512x128xf32, #tpu.memory_space<vmem>>, vector<512x128xf32>,
    return
  }
  func.func @transform_0(%arg0: i32) -> (i32, i32) {
    %c0_i32 = arith.constant 0 : i32
    %c0_i32_0 = arith.constant 0 : i32
    return %arg0, %c0_i32 : i32, i32
  }
  func.func @transform_1(%arg0: i32) -> (i32, i32) {
    %c0_i32 = arith.constant 0 : i32
    %c0_i32_0 = arith.constant 0 : i32
    %c0_i32_1 = arith.constant 0 : i32
    return %c0_i32, %c0_i32_0 : i32, i32
  }
  func.func @transform_2(%arg0: i32) -> (i32, i32) {
    %c0_i32 = arith.constant 0 : i32
    %c0_i32_0 = arith.constant 0 : i32
    %c0_i32_1 = arith.constant 0 : i32
    return %c0_i32, %c0_i32_0 : i32, i32
  }
  func.func @transform_3(%arg0: i32) -> (i32, i32) {
    %c0_i32 = arith.constant 0 : i32
    %c0_i32_0 = arith.constant 0 : i32
    return %arg0, %c0_i32 : i32, i32
  }
  func.func @transform_4(%arg0: i32) -> (i32, i32) {
    %c0_i32 = arith.constant 0 : i32
    %c0_i32_0 = arith.constant 0 : i32
    return %arg0, %c0_i32 : i32, i32
  }
}

module attributes {stable_mosaic.version = 11 : i64} {
  func.func @_mm2_kernel(%arg0: i32, %arg1: memref<128x288xbf16, #tpu.memory_space<vmem>>, %arg2: memref<288x128xbf16, #tpu.memory_space<vmem>>, %arg3: memref<1x128xf32, #tpu.memory_space<vmem>>, %arg4: memref<128x128xbf16, #tpu.memory_space<vmem>>, %arg5: memref<1x128xf32, #tpu.memory_space<vmem>>, %arg6: memref<128x128xf32, #tpu.memory_space<vmem>>) attributes {dimension_semantics = [#tpu.dimension_semantics<parallel>], iteration_bounds = array<i64: 1>, scalar_prefetch = 0 : i64, scratch_operands = 0 : i64, tpu.core_type = #tpu.core_type<tc>, window_params = [{transform_indices = @transform_0, window_bounds = array<i64: 128, 288>}, {pipeline_mode = #tpu.pipeline_mode<synchronous>, transform_indices = @transform_1, window_bounds = array<i64: 288, 128>}, {pipeline_mode = #tpu.pipeline_mode<synchronous>, transform_indices = @transform_2, window_bounds = array<i64: 1, 128>}, {pipeline_mode = #tpu.pipeline_mode<synchronous>, transform_indices = @transform_3, window_bounds = array<i64: 128, 128>}, {pipeline_mode = #tpu.pipeline_mode<synchronous>, transform_indices = @transform_4, window_bounds = array<i64: 1, 128>}, {transform_indices = @transform_5, window_bounds = array<i64: 128, 128>}]} {
    %c0 = arith.constant 0 : index
    %c0_0 = arith.constant 0 : index
    %0 = vector.load %arg1[%c0, %c0_0] : memref<128x288xbf16, #tpu.memory_space<vmem>>, vector<128x288xbf16>
    %c0_1 = arith.constant 0 : index
    %c0_2 = arith.constant 0 : index
    %1 = vector.load %arg2[%c0_1, %c0_2] : memref<288x128xbf16, #tpu.memory_space<vmem>>, vector<288x128xbf16>
    %cst = arith.constant dense<0.000000e+00> : vector<128x128xf32>
    %2 = tpu.matmul %0, %1, %cst {dimension_numbers = #tpu.dot_dimension_numbers<[1], [0], [0], [1], [0, 0, 1, 1], [], []>} : vector<128x288xbf16>, vector<288x128xbf16>, vector<128x128xf32> -> vector<128x128xf32>
    %c0_3 = arith.constant 0 : index
    %c0_4 = arith.constant 0 : index
    %3 = vector.load %arg3[%c0_3, %c0_4] : memref<1x128xf32, #tpu.memory_space<vmem>>, vector<1x128xf32>
    %4 = vector.broadcast %3 : vector<1x128xf32> to vector<128x128xf32>
    %5 = arith.addf %2, %4 : vector<128x128xf32>
    %cst_5 = arith.constant 0.000000e+00 : f32
    %6 = vector.broadcast %cst_5 : f32 to vector<128x128xf32>
    %7 = arith.cmpf oge, %5, %6 : vector<128x128xf32>
    %cst_6 = arith.constant 2.000000e-01 : f32
    %8 = vector.broadcast %cst_6 : f32 to vector<128x128xf32>
    %9 = arith.mulf %8, %5 : vector<128x128xf32>
    %10 = arith.select %7, %5, %9 : vector<128x128xi1>, vector<128x128xf32>
    %11 = arith.truncf %10 : vector<128x128xf32> to vector<128x128xbf16>
    %c0_7 = arith.constant 0 : index
    %c0_8 = arith.constant 0 : index
    %12 = vector.load %arg4[%c0_7, %c0_8] : memref<128x128xbf16, #tpu.memory_space<vmem>>, vector<128x128xbf16>
    %cst_9 = arith.constant dense<0.000000e+00> : vector<128x128xf32>
    %13 = tpu.matmul %11, %12, %cst_9 {dimension_numbers = #tpu.dot_dimension_numbers<[1], [0], [0], [1], [0, 0, 1, 1], [], []>} : vector<128x128xbf16>, vector<128x128xbf16>, vector<128x128xf32> -> vector<128x128xf32>
    %c0_10 = arith.constant 0 : index
    %c0_11 = arith.constant 0 : index
    %14 = vector.load %arg5[%c0_10, %c0_11] : memref<1x128xf32, #tpu.memory_space<vmem>>, vector<1x128xf32>
    %15 = vector.broadcast %14 : vector<1x128xf32> to vector<128x128xf32>
    %16 = arith.addf %13, %15 : vector<128x128xf32>
    %c0_12 = arith.constant 0 : index
    %c0_13 = arith.constant 0 : index
    %17 = vector.load %arg6[%c0_12, %c0_13] : memref<128x128xf32, #tpu.memory_space<vmem>>, vector<128x128xf32>
    tpu.vector_store %arg6[%c0_12, %c0_13], %16 {strides = array<i32>} : memref<128x128xf32, #tpu.memory_space<vmem>>, vector<128x128xf32>,
    return
  }
  func.func @transform_0(%arg0: i32) -> (i32, i32) {
    %c0_i32 = arith.constant 0 : i32
    %c0_i32_0 = arith.constant 0 : i32
    return %arg0, %c0_i32 : i32, i32
  }
  func.func @transform_1(%arg0: i32) -> (i32, i32) {
    %c0_i32 = arith.constant 0 : i32
    %c0_i32_0 = arith.constant 0 : i32
    %c0_i32_1 = arith.constant 0 : i32
    return %c0_i32, %c0_i32_0 : i32, i32
  }
  func.func @transform_2(%arg0: i32) -> (i32, i32) {
    %c0_i32 = arith.constant 0 : i32
    %c0_i32_0 = arith.constant 0 : i32
    %c0_i32_1 = arith.constant 0 : i32
    return %c0_i32, %c0_i32_0 : i32, i32
  }
  func.func @transform_3(%arg0: i32) -> (i32, i32) {
    %c0_i32 = arith.constant 0 : i32
    %c0_i32_0 = arith.constant 0 : i32
    %c0_i32_1 = arith.constant 0 : i32
    return %c0_i32, %c0_i32_0 : i32, i32
  }
  func.func @transform_4(%arg0: i32) -> (i32, i32) {
    %c0_i32 = arith.constant 0 : i32
    %c0_i32_0 = arith.constant 0 : i32
    %c0_i32_1 = arith.constant 0 : i32
    return %c0_i32, %c0_i32_0 : i32, i32
  }
  func.func @transform_5(%arg0: i32) -> (i32, i32) {
    %c0_i32 = arith.constant 0 : i32
    %c0_i32_0 = arith.constant 0 : i32
    return %arg0, %c0_i32 : i32, i32
  }
}

module attributes {stable_mosaic.version = 11 : i64} {
  func.func @_mm2_kernel(%arg0: i32, %arg1: memref<512x288xbf16, #tpu.memory_space<vmem>>, %arg2: memref<288x128xbf16, #tpu.memory_space<vmem>>, %arg3: memref<1x128xf32, #tpu.memory_space<vmem>>, %arg4: memref<128x128xbf16, #tpu.memory_space<vmem>>, %arg5: memref<1x128xf32, #tpu.memory_space<vmem>>, %arg6: memref<512x128xf32, #tpu.memory_space<vmem>>) attributes {dimension_semantics = [#tpu.dimension_semantics<parallel>], iteration_bounds = array<i64: 1>, scalar_prefetch = 0 : i64, scratch_operands = 0 : i64, tpu.core_type = #tpu.core_type<tc>, window_params = [{transform_indices = @transform_0, window_bounds = array<i64: 512, 288>}, {pipeline_mode = #tpu.pipeline_mode<synchronous>, transform_indices = @transform_1, window_bounds = array<i64: 288, 128>}, {pipeline_mode = #tpu.pipeline_mode<synchronous>, transform_indices = @transform_2, window_bounds = array<i64: 1, 128>}, {pipeline_mode = #tpu.pipeline_mode<synchronous>, transform_indices = @transform_3, window_bounds = array<i64: 128, 128>}, {pipeline_mode = #tpu.pipeline_mode<synchronous>, transform_indices = @transform_4, window_bounds = array<i64: 1, 128>}, {transform_indices = @transform_5, window_bounds = array<i64: 512, 128>}]} {
    %c0 = arith.constant 0 : index
    %c0_0 = arith.constant 0 : index
    %0 = vector.load %arg1[%c0, %c0_0] : memref<512x288xbf16, #tpu.memory_space<vmem>>, vector<512x288xbf16>
    %c0_1 = arith.constant 0 : index
    %c0_2 = arith.constant 0 : index
    %1 = vector.load %arg2[%c0_1, %c0_2] : memref<288x128xbf16, #tpu.memory_space<vmem>>, vector<288x128xbf16>
    %cst = arith.constant dense<0.000000e+00> : vector<512x128xf32>
    %2 = tpu.matmul %0, %1, %cst {dimension_numbers = #tpu.dot_dimension_numbers<[1], [0], [0], [1], [0, 0, 1, 1], [], []>} : vector<512x288xbf16>, vector<288x128xbf16>, vector<512x128xf32> -> vector<512x128xf32>
    %c0_3 = arith.constant 0 : index
    %c0_4 = arith.constant 0 : index
    %3 = vector.load %arg3[%c0_3, %c0_4] : memref<1x128xf32, #tpu.memory_space<vmem>>, vector<1x128xf32>
    %4 = vector.broadcast %3 : vector<1x128xf32> to vector<512x128xf32>
    %5 = arith.addf %2, %4 : vector<512x128xf32>
    %cst_5 = arith.constant 0.000000e+00 : f32
    %6 = vector.broadcast %cst_5 : f32 to vector<512x128xf32>
    %7 = arith.cmpf oge, %5, %6 : vector<512x128xf32>
    %cst_6 = arith.constant 2.000000e-01 : f32
    %8 = vector.broadcast %cst_6 : f32 to vector<512x128xf32>
    %9 = arith.mulf %8, %5 : vector<512x128xf32>
    %10 = arith.select %7, %5, %9 : vector<512x128xi1>, vector<512x128xf32>
    %11 = arith.truncf %10 : vector<512x128xf32> to vector<512x128xbf16>
    %c0_7 = arith.constant 0 : index
    %c0_8 = arith.constant 0 : index
    %12 = vector.load %arg4[%c0_7, %c0_8] : memref<128x128xbf16, #tpu.memory_space<vmem>>, vector<128x128xbf16>
    %cst_9 = arith.constant dense<0.000000e+00> : vector<512x128xf32>
    %13 = tpu.matmul %11, %12, %cst_9 {dimension_numbers = #tpu.dot_dimension_numbers<[1], [0], [0], [1], [0, 0, 1, 1], [], []>} : vector<512x128xbf16>, vector<128x128xbf16>, vector<512x128xf32> -> vector<512x128xf32>
    %c0_10 = arith.constant 0 : index
    %c0_11 = arith.constant 0 : index
    %14 = vector.load %arg5[%c0_10, %c0_11] : memref<1x128xf32, #tpu.memory_space<vmem>>, vector<1x128xf32>
    %15 = vector.broadcast %14 : vector<1x128xf32> to vector<512x128xf32>
    %16 = arith.addf %13, %15 : vector<512x128xf32>
    %c0_12 = arith.constant 0 : index
    %c0_13 = arith.constant 0 : index
    %17 = vector.load %arg6[%c0_12, %c0_13] : memref<512x128xf32, #tpu.memory_space<vmem>>, vector<512x128xf32>
    tpu.vector_store %arg6[%c0_12, %c0_13], %16 {strides = array<i32>} : memref<512x128xf32, #tpu.memory_space<vmem>>, vector<512x128xf32>,
    return
  }
  func.func @transform_0(%arg0: i32) -> (i32, i32) {
    %c0_i32 = arith.constant 0 : i32
    %c0_i32_0 = arith.constant 0 : i32
    return %arg0, %c0_i32 : i32, i32
  }
  func.func @transform_1(%arg0: i32) -> (i32, i32) {
    %c0_i32 = arith.constant 0 : i32
    %c0_i32_0 = arith.constant 0 : i32
    %c0_i32_1 = arith.constant 0 : i32
    return %c0_i32, %c0_i32_0 : i32, i32
  }
  func.func @transform_2(%arg0: i32) -> (i32, i32) {
    %c0_i32 = arith.constant 0 : i32
    %c0_i32_0 = arith.constant 0 : i32
    %c0_i32_1 = arith.constant 0 : i32
    return %c0_i32, %c0_i32_0 : i32, i32
  }
  func.func @transform_3(%arg0: i32) -> (i32, i32) {
    %c0_i32 = arith.constant 0 : i32
    %c0_i32_0 = arith.constant 0 : i32
    %c0_i32_1 = arith.constant 0 : i32
    return %c0_i32, %c0_i32_0 : i32, i32
  }
  func.func @transform_4(%arg0: i32) -> (i32, i32) {
    %c0_i32 = arith.constant 0 : i32
    %c0_i32_0 = arith.constant 0 : i32
    %c0_i32_1 = arith.constant 0 : i32
    return %c0_i32, %c0_i32_0 : i32, i32
  }
  func.func @transform_5(%arg0: i32) -> (i32, i32) {
    %c0_i32 = arith.constant 0 : i32
    %c0_i32_0 = arith.constant 0 : i32
    return %arg0, %c0_i32 : i32, i32
  }
}

</mosaic_0001>

<bundles_post_ra>
// kernel: fpse_forward.12
= control target key start
LH: loop header
LB: loop body
LE: loop exit
PB: predicated region body
PF: predicated region fallthrough
CT: control target
= control target key end

     0   :  { %s1261_s12 = smov 0   ;;  %s1492_s0 = inlined_call_operand.vmem [shape: bf16[2048,27], index: 0, kind: input, shape index: {}]   ;;  %s1493_s1 = inlined_call_operand.vmem [shape: bf16[27,128], index: 1, kind: input, shape index: {}]   ;;  %s1494_s2 = inlined_call_operand.vmem [shape: f32[1,128], index: 2, kind: input, shape index: {}]   ;;  %s1495_s3 = inlined_call_operand.vmem [shape: f32[2048,128], index: 3, kind: output, shape index: {}]  }
   0x1 LB: > { %s1003_s13 = sadd.s32 4294967295, %s1238_s12   ;;  %p1007_p0 = scmp.ge.s32.totalorder %s1238_s12, 1  ;;  %s1238_s12 = sphi %s1261_s12, %s13_s12  }
   0x2   : > { %p138_p1 = scmp.lt.s32.totalorder %s1238_s12, 5 }
   0x4   : > { %p139_p2 = pnand %p1007_p0, %p138_p1 }
   0x5   : > { %s1008_s18 = sshll.u32 (!%p139_p2), %s1003_s13, 6 }
   0x6   : > { %142 = sbr.rel (%p139_p2) target bundleno = 284 (0x11c), region = 32  ;;  %p163_p3 = scmp.lt.s32.totalorder (!%p139_p2), %s1008_s18, 255 }
   0xb   : > { %v1146_v0 = vld [vmem:[%s1493_s1 + $0x8] sm:$0xf]  ;;  %v1215_v1 = vld [vmem:[%s1493_s1 + $0x8] sm:$0x30]  ;;  %vm515_vm0 = vcmask 1044480   ;;  %vm516_vm1 = vcmask 1045504  }
   0xc   : > { %v1147_v2 = vor.u32 %v1215_v1, %v1146_v0  ;;  %v1240_v3 = vmov 65535   ;;  %s1497_s18 = smov (!%p163_p3, %s1008_s18), 255  ;;  %v1214_v7 = vld [vmem:[%s1493_s1] sm:$0xff]  ;;  %vm418_vm2 = vcmask 220160  }
   0xd   : > { %v517_v4 = vsel %vm515_vm0, 4294967295, %v1240_v3  ;;  %s1009_s21 = sshll.u32 %s1497_s18, 2  ;;  %v1353_v40 = vld [vmem:[%s1494_s2] ss:$0 sm:$0xff]  ;;  %s1011_s27 = sshll.u32 %s1497_s18, 3 }
   0xe   : > { %v518_v5 = vsel %vm516_vm1, %v517_v4, 0  ;;  %s1284_s24 = scalar_lea.vmem %s1492_s0, %s1009_s21  ;;  %s1361_s30 = scalar_lea.vmem %s1495_s3, %s1011_s27 }
   0xf   : > { %v520_v6 = vand.u32 %v1147_v2, %v518_v5  ;;  %v1182_v8 = vld [vmem:[%s1284_s24] sm:$0xff]  ;;  %v1183_v12 = vld [vmem:[%s1284_s24 + $0x8] sm:$0xff]  ;;  %v1184_v16 = vld [vmem:[%s1284_s24 + $0x10] sm:$0xff] }
  0x10   : > { %v1190_v9 = vld [vmem:[%s1284_s24 + $0x40] sm:$0xff]  ;;  %v1191_v13 = vld [vmem:[%s1284_s24 + $0x48] sm:$0xff]  ;;  %v1192_v17 = vld [vmem:[%s1284_s24 + $0x50] sm:$0xff] }
  0x11   : > { %528 = vmatpush.bf16.msra.mxu0 %v520_v6  ;;  %1216 = vmatpush.bf16.msra.mxu1 %v520_v6  ;;  %v1198_v10 = vld [vmem:[%s1284_s24 + $0x80] sm:$0xff]  ;;  %v1199_v14 = vld [vmem:[%s1284_s24 + $0x88] sm:$0xff]  ;;  %v1200_v18 = vld [vmem:[%s1284_s24 + $0x90] sm:$0xff] }
  0x12   : > { %1217 = vmatpush.bf16.msra.mxu2 %v520_v6  ;;  %1218 = vmatpush.bf16.msra.mxu3 %v520_v6  ;;  %v1206_v11 = vld [vmem:[%s1284_s24 + $0xc0] sm:$0xff]  ;;  %v1207_v15 = vld [vmem:[%s1284_s24 + $0xc8] sm:$0xff]  ;;  %v1208_v19 = vld [vmem:[%s1284_s24 + $0xd0] sm:$0xff] }
  0x13   : > { %v1185_v20 = vld [vmem:[%s1284_s24 + $0x18] sm:$0xff]  ;;  %v1186_v24 = vld [vmem:[%s1284_s24 + $0x20] sm:$0xff]  ;;  %v1187_v28 = vld [vmem:[%s1284_s24 + $0x28] sm:$0xff] }
  0x14   : > { %v1193_v21 = vld [vmem:[%s1284_s24 + $0x58] sm:$0xff]  ;;  %v1194_v25 = vld [vmem:[%s1284_s24 + $0x60] sm:$0xff]  ;;  %v1195_v29 = vld [vmem:[%s1284_s24 + $0x68] sm:$0xff] }
  0x15   : > { %529 = vmatpush.bf16.msra.mxu0 %v1214_v7  ;;  %1219 = vmatpush.bf16.msra.mxu1 %v1214_v7  ;;  %v1201_v22 = vld [vmem:[%s1284_s24 + $0x98] sm:$0xff]  ;;  %v1202_v26 = vld [vmem:[%s1284_s24 + $0xa0] sm:$0xff]  ;;  %v1203_v30 = vld [vmem:[%s1284_s24 + $0xa8] sm:$0xff] }
  0x16   : > { %1220 = vmatpush.bf16.msra.mxu2 %v1214_v7  ;;  %1221 = vmatpush.bf16.msra.mxu3 %v1214_v7  ;;  %v1209_v23 = vld [vmem:[%s1284_s24 + $0xd8] sm:$0xff]  ;;  %v1210_v27 = vld [vmem:[%s1284_s24 + $0xe0] sm:$0xff]  ;;  %v1211_v31 = vld [vmem:[%s1284_s24 + $0xe8] sm:$0xff] }
  0x17   : > { %v1188_v32 = vld [vmem:[%s1284_s24 + $0x30] sm:$0xff]  ;;  %v1189_v36 = vld [vmem:[%s1284_s24 + $0x38] sm:$0xff] }
  0x18   : > { %1148 = vmatmul.msk.bf16.vlgmr.msra.gmra.mxu0 %vm418_vm2, %v1182_v8  ;;  %1156 = vmatmul.msk.bf16.vlgmr.msra.gmra.mxu1 %vm418_vm2, %v1190_v9  ;;  %v1196_v33 = vld [vmem:[%s1284_s24 + $0x70] sm:$0xff]  ;;  %v1197_v37 = vld [vmem:[%s1284_s24 + $0x78] sm:$0xff] }
  0x19   : > { %1164 = vmatmul.msk.bf16.vlgmr.msra.gmra.mxu2 %vm418_vm2, %v1198_v10  ;;  %1172 = vmatmul.msk.bf16.vlgmr.msra.gmra.mxu3 %vm418_vm2, %v1206_v11  ;;  %v1204_v34 = vld [vmem:[%s1284_s24 + $0xb0] sm:$0xff]  ;;  %v1205_v38 = vld [vmem:[%s1284_s24 + $0xb8] sm:$0xff] }
  0x1a   : > { %v1212_v35 = vld [vmem:[%s1284_s24 + $0xf0] sm:$0xff]  ;;  %v1213_v39 = vld [vmem:[%s1284_s24 + $0xf8] sm:$0xff] }
  0x28   : > { %1149 = vmatmul.msk.bf16.gmra.mxu0 %vm418_vm2, %v1183_v12  ;;  %1157 = vmatmul.msk.bf16.gmra.mxu1 %vm418_vm2, %v1191_v13 }
  0x29   : > { %1165 = vmatmul.msk.bf16.gmra.mxu2 %vm418_vm2, %v1199_v14  ;;  %1173 = vmatmul.msk.bf16.gmra.mxu3 %vm418_vm2, %v1207_v15 }
  0x38   : > { %1150 = vmatmul.msk.bf16.gmra.mxu0 %vm418_vm2, %v1184_v16  ;;  %1158 = vmatmul.msk.bf16.gmra.mxu1 %vm418_vm2, %v1192_v17 }
  0x39   : > { %1166 = vmatmul.msk.bf16.gmra.mxu2 %vm418_vm2, %v1200_v18  ;;  %1174 = vmatmul.msk.bf16.gmra.mxu3 %vm418_vm2, %v1208_v19 }
  0x48   : > { %1151 = vmatmul.msk.bf16.gmra.mxu0 %vm418_vm2, %v1185_v20  ;;  %1159 = vmatmul.msk.bf16.gmra.mxu1 %vm418_vm2, %v1193_v21 }
  0x49   : > { %1167 = vmatmul.msk.bf16.gmra.mxu2 %vm418_vm2, %v1201_v22  ;;  %1175 = vmatmul.msk.bf16.gmra.mxu3 %vm418_vm2, %v1209_v23 }
  0x58   : > { %1152 = vmatmul.msk.bf16.gmra.mxu0 %vm418_vm2, %v1186_v24  ;;  %1160 = vmatmul.msk.bf16.gmra.mxu1 %vm418_vm2, %v1194_v25 }
  0x59   : > { %1168 = vmatmul.msk.bf16.gmra.mxu2 %vm418_vm2, %v1202_v26  ;;  %1176 = vmatmul.msk.bf16.gmra.mxu3 %vm418_vm2, %v1210_v27 }
  0x68   : > { %1153 = vmatmul.msk.bf16.gmra.mxu0 %vm418_vm2, %v1187_v28  ;;  %1161 = vmatmul.msk.bf16.gmra.mxu1 %vm418_vm2, %v1195_v29 }
  0x69   : > { %1169 = vmatmul.msk.bf16.gmra.mxu2 %vm418_vm2, %v1203_v30  ;;  %1177 = vmatmul.msk.bf16.gmra.mxu3 %vm418_vm2, %v1211_v31 }
  0x78   : > { %1154 = vmatmul.msk.bf16.gmra.mxu0 %vm418_vm2, %v1188_v32  ;;  %1162 = vmatmul.msk.bf16.gmra.mxu1 %vm418_vm2, %v1196_v33 }
  0x79   : > { %1170 = vmatmul.msk.bf16.gmra.mxu2 %vm418_vm2, %v1204_v34  ;;  %1178 = vmatmul.msk.bf16.gmra.mxu3 %vm418_vm2, %v1212_v35 }
  0x88   : > { %1155 = vmatmul.msk.bf16.gmra.mxu0 %vm418_vm2, %v1189_v36  ;;  %1163 = vmatmul.msk.bf16.gmra.mxu1 %vm418_vm2, %v1197_v37 }
  0x89   : > { %1171 = vmatmul.msk.bf16.gmra.mxu2 %vm418_vm2, %v1205_v38  ;;  %1179 = vmatmul.msk.bf16.gmra.mxu3 %vm418_vm2, %v1213_v39 }
  0x95   : > { %v531_v41 = vpop.f32.mrf.mxu0  ;;  %v571_v42 = vpop.f32.mrf.mxu1 }
  0x96   : > { %v532_v43 = vadd.f32 %v1353_v40, %v531_v41  ;;  %v572_v44 = vadd.f32 %v1353_v40, %v571_v42 }
  0x98   : > { %vm691_vm3 = vcmp.ge.f32.partialorder %v532_v43, 0.0  ;;  %v755_v45 = vmul.f32 0.2, %v532_v43  ;;  %vm707_vm4 = vcmp.ge.f32.partialorder %v572_v44, 0.0  ;;  %v771_v46 = vmul.f32 0.2, %v572_v44 }
  0x9a   : > { %v819_v47 = vsel %vm691_vm3, %v532_v43, %v755_v45  ;;  %v835_v48 = vsel %vm707_vm4, %v572_v44, %v771_v46 }
  0x9b   : > { %883 = vst [vmem:[%s1361_s30] sm:$0xff] %v819_v47 }
  0x9c   : > { %899 = vst [vmem:[%s1361_s30 + $0x80] sm:$0xff] %v835_v48  ;;  %v611_v49 = vpop.f32.mrf.mxu2  ;;  %v651_v50 = vpop.f32.mrf.mxu3 }
  0x9d   : > { %v612_v51 = vadd.f32 %v1353_v40, %v611_v49  ;;  %v652_v52 = vadd.f32 %v1353_v40, %v651_v50  ;;  %v533_v53 = vpop.f32.mrf.mxu0  ;;  %v573_v54 = vpop.f32.mrf.mxu1 }
  0x9e   : > { %v534_v55 = vadd.f32 %v1353_v40, %v533_v53  ;;  %v574_v56 = vadd.f32 %v1353_v40, %v573_v54 }
  0x9f   : > { %vm723_vm5 = vcmp.ge.f32.partialorder %v612_v51, 0.0  ;;  %v787_v57 = vmul.f32 0.2, %v612_v51  ;;  %vm739_vm6 = vcmp.ge.f32.partialorder %v652_v52, 0.0  ;;  %v803_v58 = vmul.f32 0.2, %v652_v52 }
  0xa0   : > { %vm692_vm7 = vcmp.ge.f32.partialorder %v534_v55, 0.0  ;;  %v756_v59 = vmul.f32 0.2, %v534_v55  ;;  %vm708_vm8 = vcmp.ge.f32.partialorder %v574_v56, 0.0  ;;  %v772_v60 = vmul.f32 0.2, %v574_v56 }
  0xa1   : > { %v851_v61 = vsel %vm723_vm5, %v612_v51, %v787_v57  ;;  %v867_v62 = vsel %vm739_vm6, %v652_v52, %v803_v58 }
  0xa2   : > { %915 = vst [vmem:[%s1361_s30 + $0x100] sm:$0xff] %v851_v61  ;;  %v820_v63 = vsel %vm692_vm7, %v534_v55, %v756_v59  ;;  %v836_v0 = vsel %vm708_vm8, %v574_v56, %v772_v60 }
  0xa3   : > { %931 = vst [vmem:[%s1361_s30 + $0x180] sm:$0xff] %v867_v62 }
  0xa4   : > { %884 = vst [vmem:[%s1361_s30 + $0x8] sm:$0xff] %v820_v63  ;;  %v613_v1 = vpop.f32.mrf.mxu2  ;;  %v653_v2 = vpop.f32.mrf.mxu3 }
  0xa5   : > { %900 = vst [vmem:[%s1361_s30 + $0x88] sm:$0xff] %v836_v0  ;;  %v614_v3 = vadd.f32 %v1353_v40, %v613_v1  ;;  %v654_v4 = vadd.f32 %v1353_v40, %v653_v2  ;;  %v536_v5 = vpop.f32.mrf.mxu0  ;;  %v576_v6 = vpop.f32.mrf.mxu1 }
  0xa6   : > { %v537_v7 = vadd.f32 %v1353_v40, %v536_v5  ;;  %v577_v8 = vadd.f32 %v1353_v40, %v576_v6 }
  0xa7   : > { %vm724_vm9 = vcmp.ge.f32.partialorder %v614_v3, 0.0  ;;  %v788_v9 = vmul.f32 0.2, %v614_v3  ;;  %vm740_vm10 = vcmp.ge.f32.partialorder %v654_v4, 0.0  ;;  %v804_v10 = vmul.f32 0.2, %v654_v4 }
  0xa8   : > { %vm693_vm11 = vcmp.ge.f32.partialorder %v537_v7, 0.0  ;;  %v757_v11 = vmul.f32 0.2, %v537_v7  ;;  %vm709_vm12 = vcmp.ge.f32.partialorder %v577_v8, 0.0  ;;  %v773_v12 = vmul.f32 0.2, %v577_v8 }
  0xa9   : > { %v852_v13 = vsel %vm724_vm9, %v614_v3, %v788_v9  ;;  %v868_v14 = vsel %vm740_vm10, %v654_v4, %v804_v10 }
  0xaa   : > { %916 = vst [vmem:[%s1361_s30 + $0x108] sm:$0xff] %v852_v13  ;;  %v821_v15 = vsel %vm693_vm11, %v537_v7, %v757_v11  ;;  %v837_v16 = vsel %vm709_vm12, %v577_v8, %v773_v12 }
  0xab   : > { %932 = vst [vmem:[%s1361_s30 + $0x188] sm:$0xff] %v868_v14 }
  0xac   : > { %885 = vst [vmem:[%s1361_s30 + $0x10] sm:$0xff] %v821_v15  ;;  %v616_v17 = vpop.f32.mrf.mxu2  ;;  %v656_v18 = vpop.f32.mrf.mxu3 }
  0xad   : > { %901 = vst [vmem:[%s1361_s30 + $0x90] sm:$0xff] %v837_v16  ;;  %v617_v19 = vadd.f32 %v1353_v40, %v616_v17  ;;  %v657_v20 = vadd.f32 %v1353_v40, %v656_v18  ;;  %v538_v21 = vpop.f32.mrf.mxu0  ;;  %v578_v22 = vpop.f32.mrf.mxu1 }
  0xae   : > { %v539_v23 = vadd.f32 %v1353_v40, %v538_v21  ;;  %v579_v24 = vadd.f32 %v1353_v40, %v578_v22 }
  0xaf   : > { %vm725_vm13 = vcmp.ge.f32.partialorder %v617_v19, 0.0  ;;  %v789_v25 = vmul.f32 0.2, %v617_v19  ;;  %vm741_vm14 = vcmp.ge.f32.partialorder %v657_v20, 0.0  ;;  %v805_v26 = vmul.f32 0.2, %v657_v20 }
  0xb0   : > { %vm694_vm15 = vcmp.ge.f32.partialorder %v539_v23, 0.0  ;;  %v758_v27 = vmul.f32 0.2, %v539_v23  ;;  %vm710_vm0 = vcmp.ge.f32.partialorder %v579_v24, 0.0  ;;  %v774_v28 = vmul.f32 0.2, %v579_v24 }
  0xb1   : > { %v853_v29 = vsel %vm725_vm13, %v617_v19, %v789_v25  ;;  %v869_v30 = vsel %vm741_vm14, %v657_v20, %v805_v26 }
  0xb2   : > { %917 = vst [vmem:[%s1361_s30 + $0x110] sm:$0xff] %v853_v29  ;;  %v822_v31 = vsel %vm694_vm15, %v539_v23, %v758_v27  ;;  %v838_v32 = vsel %vm710_vm0, %v579_v24, %v774_v28 }
  0xb3   : > { %933 = vst [vmem:[%s1361_s30 + $0x190] sm:$0xff] %v869_v30 }
  0xb4   : > { %886 = vst [vmem:[%s1361_s30 + $0x18] sm:$0xff] %v822_v31  ;;  %v618_v33 = vpop.f32.mrf.mxu2  ;;  %v658_v34 = vpop.f32.mrf.mxu3 }
  0xb5   : > { %902 = vst [vmem:[%s1361_s30 + $0x98] sm:$0xff] %v838_v32  ;;  %v619_v35 = vadd.f32 %v1353_v40, %v618_v33  ;;  %v659_v36 = vadd.f32 %v1353_v40, %v658_v34  ;;  %v541_v37 = vpop.f32.mrf.mxu0  ;;  %v581_v38 = vpop.f32.mrf.mxu1 }
  0xb6   : > { %v542_v39 = vadd.f32 %v1353_v40, %v541_v37  ;;  %v582_v41 = vadd.f32 %v1353_v40, %v581_v38 }
  0xb7   : > { %vm726_vm1 = vcmp.ge.f32.partialorder %v619_v35, 0.0  ;;  %v790_v42 = vmul.f32 0.2, %v619_v35  ;;  %vm742_vm2 = vcmp.ge.f32.partialorder %v659_v36, 0.0  ;;  %v806_v43 = vmul.f32 0.2, %v659_v36 }
  0xb8   : > { %vm695_vm3 = vcmp.ge.f32.partialorder %v542_v39, 0.0  ;;  %v759_v44 = vmul.f32 0.2, %v542_v39  ;;  %vm711_vm4 = vcmp.ge.f32.partialorder %v582_v41, 0.0  ;;  %v775_v45 = vmul.f32 0.2, %v582_v41 }
  0xb9   : > { %v854_v46 = vsel %vm726_vm1, %v619_v35, %v790_v42  ;;  %v870_v47 = vsel %vm742_vm2, %v659_v36, %v806_v43 }
  0xba   : > { %918 = vst [vmem:[%s1361_s30 + $0x118] sm:$0xff] %v854_v46  ;;  %v823_v48 = vsel %vm695_vm3, %v542_v39, %v759_v44  ;;  %v839_v49 = vsel %vm711_vm4, %v582_v41, %v775_v45 }
  0xbb   : > { %934 = vst [vmem:[%s1361_s30 + $0x198] sm:$0xff] %v870_v47 }
  0xbc   : > { %887 = vst [vmem:[%s1361_s30 + $0x20] sm:$0xff] %v823_v48  ;;  %v621_v50 = vpop.f32.mrf.mxu2  ;;  %v661_v51 = vpop.f32.mrf.mxu3 }
  0xbd   : > { %903 = vst [vmem:[%s1361_s30 + $0xa0] sm:$0xff] %v839_v49  ;;  %v622_v52 = vadd.f32 %v1353_v40, %v621_v50  ;;  %v662_v53 = vadd.f32 %v1353_v40, %v661_v51  ;;  %v543_v54 = vpop.f32.mrf.mxu0  ;;  %v583_v55 = vpop.f32.mrf.mxu1 }
  0xbe   : > { %v544_v56 = vadd.f32 %v1353_v40, %v543_v54  ;;  %v584_v57 = vadd.f32 %v1353_v40, %v583_v55 }
  0xbf   : > { %vm727_vm5 = vcmp.ge.f32.partialorder %v622_v52, 0.0  ;;  %v791_v58 = vmul.f32 0.2, %v622_v52  ;;  %vm743_vm6 = vcmp.ge.f32.partialorder %v662_v53, 0.0  ;;  %v807_v59 = vmul.f32 0.2, %v662_v53 }
  0xc0   : > { %vm696_vm7 = vcmp.ge.f32.partialorder %v544_v56, 0.0  ;;  %v760_v60 = vmul.f32 0.2, %v544_v56  ;;  %vm712_vm8 = vcmp.ge.f32.partialorder %v584_v57, 0.0  ;;  %v776_v61 = vmul.f32 0.2, %v584_v57 }
  0xc1   : > { %v855_v62 = vsel %vm727_vm5, %v622_v52, %v791_v58  ;;  %v871_v63 = vsel %vm743_vm6, %v662_v53, %v807_v59 }
  0xc2   : > { %919 = vst [vmem:[%s1361_s30 + $0x120] sm:$0xff] %v855_v62  ;;  %v824_v0 = vsel %vm696_vm7, %v544_v56, %v760_v60  ;;  %v840_v1 = vsel %vm712_vm8, %v584_v57, %v776_v61 }
  0xc3   : > { %935 = vst [vmem:[%s1361_s30 + $0x1a0] sm:$0xff] %v871_v63 }
  0xc4   : > { %888 = vst [vmem:[%s1361_s30 + $0x28] sm:$0xff] %v824_v0  ;;  %v623_v2 = vpop.f32.mrf.mxu2  ;;  %v663_v3 = vpop.f32.mrf.mxu3 }
  0xc5   : > { %904 = vst [vmem:[%s1361_s30 + $0xa8] sm:$0xff] %v840_v1  ;;  %v624_v4 = vadd.f32 %v1353_v40, %v623_v2  ;;  %v664_v5 = vadd.f32 %v1353_v40, %v663_v3  ;;  %v546_v6 = vpop.f32.mrf.mxu0  ;;  %v586_v7 = vpop.f32.mrf.mxu1 }
  0xc6   : > { %v547_v8 = vadd.f32 %v1353_v40, %v546_v6  ;;  %v587_v9 = vadd.f32 %v1353_v40, %v586_v7 }
  0xc7   : > { %vm728_vm9 = vcmp.ge.f32.partialorder %v624_v4, 0.0  ;;  %v792_v10 = vmul.f32 0.2, %v624_v4  ;;  %vm744_vm10 = vcmp.ge.f32.partialorder %v664_v5, 0.0  ;;  %v808_v11 = vmul.f32 0.2, %v664_v5 }
  0xc8   : > { %vm697_vm11 = vcmp.ge.f32.partialorder %v547_v8, 0.0  ;;  %v761_v12 = vmul.f32 0.2, %v547_v8  ;;  %vm713_vm12 = vcmp.ge.f32.partialorder %v587_v9, 0.0  ;;  %v777_v13 = vmul.f32 0.2, %v587_v9 }
  0xc9   : > { %v856_v14 = vsel %vm728_vm9, %v624_v4, %v792_v10  ;;  %v872_v15 = vsel %vm744_vm10, %v664_v5, %v808_v11 }
  0xca   : > { %920 = vst [vmem:[%s1361_s30 + $0x128] sm:$0xff] %v856_v14  ;;  %v825_v16 = vsel %vm697_vm11, %v547_v8, %v761_v12  ;;  %v841_v17 = vsel %vm713_vm12, %v587_v9, %v777_v13 }
  0xcb   : > { %936 = vst [vmem:[%s1361_s30 + $0x1a8] sm:$0xff] %v872_v15 }
  0xcc   : > { %889 = vst [vmem:[%s1361_s30 + $0x30] sm:$0xff] %v825_v16  ;;  %v626_v18 = vpop.f32.mrf.mxu2  ;;  %v666_v19 = vpop.f32.mrf.mxu3 }
  0xcd   : > { %905 = vst [vmem:[%s1361_s30 + $0xb0] sm:$0xff] %v841_v17  ;;  %v627_v20 = vadd.f32 %v1353_v40, %v626_v18  ;;  %v667_v21 = vadd.f32 %v1353_v40, %v666_v19  ;;  %v548_v22 = vpop.f32.mrf.mxu0  ;;  %v588_v23 = vpop.f32.mrf.mxu1 }
  0xce   : > { %v549_v24 = vadd.f32 %v1353_v40, %v548_v22  ;;  %v589_v25 = vadd.f32 %v1353_v40, %v588_v23 }
  0xcf   : > { %vm729_vm13 = vcmp.ge.f32.partialorder %v627_v20, 0.0  ;;  %v793_v26 = vmul.f32 0.2, %v627_v20  ;;  %vm745_vm14 = vcmp.ge.f32.partialorder %v667_v21, 0.0  ;;  %v809_v27 = vmul.f32 0.2, %v667_v21 }
  0xd0   : > { %vm698_vm15 = vcmp.ge.f32.partialorder %v549_v24, 0.0  ;;  %v762_v28 = vmul.f32 0.2, %v549_v24  ;;  %vm714_vm0 = vcmp.ge.f32.partialorder %v589_v25, 0.0  ;;  %v778_v29 = vmul.f32 0.2, %v589_v25 }
  0xd1   : > { %v857_v30 = vsel %vm729_vm13, %v627_v20, %v793_v26  ;;  %v873_v31 = vsel %vm745_vm14, %v667_v21, %v809_v27 }
  0xd2   : > { %921 = vst [vmem:[%s1361_s30 + $0x130] sm:$0xff] %v857_v30  ;;  %v826_v32 = vsel %vm698_vm15, %v549_v24, %v762_v28  ;;  %v842_v33 = vsel %vm714_vm0, %v589_v25, %v778_v29 }
  0xd3   : > { %937 = vst [vmem:[%s1361_s30 + $0x1b0] sm:$0xff] %v873_v31 }
  0xd4   : > { %890 = vst [vmem:[%s1361_s30 + $0x38] sm:$0xff] %v826_v32  ;;  %v628_v34 = vpop.f32.mrf.mxu2  ;;  %v668_v35 = vpop.f32.mrf.mxu3 }
  0xd5   : > { %906 = vst [vmem:[%s1361_s30 + $0xb8] sm:$0xff] %v842_v33  ;;  %v629_v36 = vadd.f32 %v1353_v40, %v628_v34  ;;  %v669_v37 = vadd.f32 %v1353_v40, %v668_v35  ;;  %v551_v38 = vpop.f32.mrf.mxu0  ;;  %v591_v39 = vpop.f32.mrf.mxu1 }
  0xd6   : > { %v552_v41 = vadd.f32 %v1353_v40, %v551_v38  ;;  %v592_v42 = vadd.f32 %v1353_v40, %v591_v39 }
  0xd7   : > { %vm730_vm1 = vcmp.ge.f32.partialorder %v629_v36, 0.0  ;;  %v794_v43 = vmul.f32 0.2, %v629_v36  ;;  %vm746_vm2 = vcmp.ge.f32.partialorder %v669_v37, 0.0  ;;  %v810_v44 = vmul.f32 0.2, %v669_v37 }
  0xd8   : > { %vm699_vm3 = vcmp.ge.f32.partialorder %v552_v41, 0.0  ;;  %v763_v45 = vmul.f32 0.2, %v552_v41  ;;  %vm715_vm4 = vcmp.ge.f32.partialorder %v592_v42, 0.0  ;;  %v779_v46 = vmul.f32 0.2, %v592_v42 }
  0xd9   : > { %v858_v47 = vsel %vm730_vm1, %v629_v36, %v794_v43  ;;  %v874_v48 = vsel %vm746_vm2, %v669_v37, %v810_v44 }
  0xda   : > { %922 = vst [vmem:[%s1361_s30 + $0x138] sm:$0xff] %v858_v47  ;;  %v827_v49 = vsel %vm699_vm3, %v552_v41, %v763_v45  ;;  %v843_v50 = vsel %vm715_vm4, %v592_v42, %v779_v46 }
  0xdb   : > { %938 = vst [vmem:[%s1361_s30 + $0x1b8] sm:$0xff] %v874_v48 }
  0xdc   : > { %891 = vst [vmem:[%s1361_s30 + $0x40] sm:$0xff] %v827_v49  ;;  %v631_v51 = vpop.f32.mrf.mxu2  ;;  %v671_v52 = vpop.f32.mrf.mxu3 }
  0xdd   : > { %907 = vst [vmem:[%s1361_s30 + $0xc0] sm:$0xff] %v843_v50  ;;  %v632_v53 = vadd.f32 %v1353_v40, %v631_v51  ;;  %v672_v54 = vadd.f32 %v1353_v40, %v671_v52  ;;  %v553_v55 = vpop.f32.mrf.mxu0  ;;  %v593_v56 = vpop.f32.mrf.mxu1 }
  0xde   : > { %v554_v57 = vadd.f32 %v1353_v40, %v553_v55  ;;  %v594_v58 = vadd.f32 %v1353_v40, %v593_v56 }
  0xdf   : > { %vm731_vm5 = vcmp.ge.f32.partialorder %v632_v53, 0.0  ;;  %v795_v59 = vmul.f32 0.2, %v632_v53  ;;  %vm747_vm6 = vcmp.ge.f32.partialorder %v672_v54, 0.0  ;;  %v811_v60 = vmul.f32 0.2, %v672_v54 }
  0xe0   : > { %vm700_vm7 = vcmp.ge.f32.partialorder %v554_v57, 0.0  ;;  %v764_v61 = vmul.f32 0.2, %v554_v57  ;;  %vm716_vm8 = vcmp.ge.f32.partialorder %v594_v58, 0.0  ;;  %v780_v62 = vmul.f32 0.2, %v594_v58 }
  0xe1   : > { %v859_v63 = vsel %vm731_vm5, %v632_v53, %v795_v59  ;;  %v875_v0 = vsel %vm747_vm6, %v672_v54, %v811_v60 }
  0xe2   : > { %923 = vst [vmem:[%s1361_s30 + $0x140] sm:$0xff] %v859_v63  ;;  %v828_v1 = vsel %vm700_vm7, %v554_v57, %v764_v61  ;;  %v844_v2 = vsel %vm716_vm8, %v594_v58, %v780_v62 }
  0xe3   : > { %939 = vst [vmem:[%s1361_s30 + $0x1c0] sm:$0xff] %v875_v0 }
  0xe4   : > { %892 = vst [vmem:[%s1361_s30 + $0x48] sm:$0xff] %v828_v1  ;;  %v633_v3 = vpop.f32.mrf.mxu2  ;;  %v673_v4 = vpop.f32.mrf.mxu3 }
  0xe5   : > { %908 = vst [vmem:[%s1361_s30 + $0xc8] sm:$0xff] %v844_v2  ;;  %v634_v5 = vadd.f32 %v1353_v40, %v633_v3  ;;  %v674_v6 = vadd.f32 %v1353_v40, %v673_v4  ;;  %v556_v7 = vpop.f32.mrf.mxu0  ;;  %v596_v8 = vpop.f32.mrf.mxu1 }
  0xe6   : > { %v557_v9 = vadd.f32 %v1353_v40, %v556_v7  ;;  %v597_v10 = vadd.f32 %v1353_v40, %v596_v8 }
  0xe7   : > { %vm732_vm9 = vcmp.ge.f32.partialorder %v634_v5, 0.0  ;;  %v796_v11 = vmul.f32 0.2, %v634_v5  ;;  %vm748_vm10 = vcmp.ge.f32.partialorder %v674_v6, 0.0  ;;  %v812_v12 = vmul.f32 0.2, %v674_v6 }
  0xe8   : > { %vm701_vm11 = vcmp.ge.f32.partialorder %v557_v9, 0.0  ;;  %v765_v13 = vmul.f32 0.2, %v557_v9  ;;  %vm717_vm12 = vcmp.ge.f32.partialorder %v597_v10, 0.0  ;;  %v781_v14 = vmul.f32 0.2, %v597_v10 }
  0xe9   : > { %v860_v15 = vsel %vm732_vm9, %v634_v5, %v796_v11  ;;  %v876_v16 = vsel %vm748_vm10, %v674_v6, %v812_v12 }
  0xea   : > { %924 = vst [vmem:[%s1361_s30 + $0x148] sm:$0xff] %v860_v15  ;;  %v829_v17 = vsel %vm701_vm11, %v557_v9, %v765_v13  ;;  %v845_v18 = vsel %vm717_vm12, %v597_v10, %v781_v14 }
  0xeb   : > { %940 = vst [vmem:[%s1361_s30 + $0x1c8] sm:$0xff] %v876_v16 }
  0xec   : > { %893 = vst [vmem:[%s1361_s30 + $0x50] sm:$0xff] %v829_v17  ;;  %v636_v19 = vpop.f32.mrf.mxu2  ;;  %v676_v20 = vpop.f32.mrf.mxu3 }
  0xed   : > { %909 = vst [vmem:[%s1361_s30 + $0xd0] sm:$0xff] %v845_v18  ;;  %v637_v21 = vadd.f32 %v1353_v40, %v636_v19  ;;  %v677_v22 = vadd.f32 %v1353_v40, %v676_v20  ;;  %v558_v23 = vpop.f32.mrf.mxu0  ;;  %v598_v24 = vpop.f32.mrf.mxu1 }
  0xee   : > { %v559_v25 = vadd.f32 %v1353_v40, %v558_v23  ;;  %v599_v26 = vadd.f32 %v1353_v40, %v598_v24 }
  0xef   : > { %vm733_vm13 = vcmp.ge.f32.partialorder %v637_v21, 0.0  ;;  %v797_v27 = vmul.f32 0.2, %v637_v21  ;;  %vm749_vm14 = vcmp.ge.f32.partialorder %v677_v22, 0.0  ;;  %v813_v28 = vmul.f32 0.2, %v677_v22 }
  0xf0   : > { %vm702_vm15 = vcmp.ge.f32.partialorder %v559_v25, 0.0  ;;  %v766_v29 = vmul.f32 0.2, %v559_v25  ;;  %vm718_vm0 = vcmp.ge.f32.partialorder %v599_v26, 0.0  ;;  %v782_v30 = vmul.f32 0.2, %v599_v26 }
  0xf1   : > { %v861_v31 = vsel %vm733_vm13, %v637_v21, %v797_v27  ;;  %v877_v32 = vsel %vm749_vm14, %v677_v22, %v813_v28 }
  0xf2   : > { %925 = vst [vmem:[%s1361_s30 + $0x150] sm:$0xff] %v861_v31  ;;  %v830_v33 = vsel %vm702_vm15, %v559_v25, %v766_v29  ;;  %v846_v34 = vsel %vm718_vm0, %v599_v26, %v782_v30 }
  0xf3   : > { %941 = vst [vmem:[%s1361_s30 + $0x1d0] sm:$0xff] %v877_v32 }
  0xf4   : > { %894 = vst [vmem:[%s1361_s30 + $0x58] sm:$0xff] %v830_v33  ;;  %v638_v35 = vpop.f32.mrf.mxu2  ;;  %v678_v36 = vpop.f32.mrf.mxu3 }
  0xf5   : > { %910 = vst [vmem:[%s1361_s30 + $0xd8] sm:$0xff] %v846_v34  ;;  %v639_v37 = vadd.f32 %v1353_v40, %v638_v35  ;;  %v679_v38 = vadd.f32 %v1353_v40, %v678_v36  ;;  %v561_v39 = vpop.f32.mrf.mxu0  ;;  %v601_v41 = vpop.f32.mrf.mxu1 }
  0xf6   : > { %v562_v42 = vadd.f32 %v1353_v40, %v561_v39  ;;  %v602_v43 = vadd.f32 %v1353_v40, %v601_v41 }
  0xf7   : > { %vm734_vm1 = vcmp.ge.f32.partialorder %v639_v37, 0.0  ;;  %v798_v44 = vmul.f32 0.2, %v639_v37  ;;  %vm750_vm2 = vcmp.ge.f32.partialorder %v679_v38, 0.0  ;;  %v814_v45 = vmul.f32 0.2, %v679_v38 }
  0xf8   : > { %vm703_vm3 = vcmp.ge.f32.partialorder %v562_v42, 0.0  ;;  %v767_v46 = vmul.f32 0.2, %v562_v42  ;;  %vm719_vm4 = vcmp.ge.f32.partialorder %v602_v43, 0.0  ;;  %v783_v47 = vmul.f32 0.2, %v602_v43 }
  0xf9   : > { %v862_v48 = vsel %vm734_vm1, %v639_v37, %v798_v44  ;;  %v878_v49 = vsel %vm750_vm2, %v679_v38, %v814_v45 }
  0xfa   : > { %926 = vst [vmem:[%s1361_s30 + $0x158] sm:$0xff] %v862_v48  ;;  %v831_v50 = vsel %vm703_vm3, %v562_v42, %v767_v46  ;;  %v847_v51 = vsel %vm719_vm4, %v602_v43, %v783_v47 }
  0xfb   : > { %942 = vst [vmem:[%s1361_s30 + $0x1d8] sm:$0xff] %v878_v49 }
  0xfc   : > { %895 = vst [vmem:[%s1361_s30 + $0x60] sm:$0xff] %v831_v50  ;;  %v641_v52 = vpop.f32.mrf.mxu2  ;;  %v681_v53 = vpop.f32.mrf.mxu3 }
  0xfd   : > { %911 = vst [vmem:[%s1361_s30 + $0xe0] sm:$0xff] %v847_v51  ;;  %v642_v54 = vadd.f32 %v1353_v40, %v641_v52  ;;  %v682_v55 = vadd.f32 %v1353_v40, %v681_v53  ;;  %v563_v56 = vpop.f32.mrf.mxu0  ;;  %v603_v57 = vpop.f32.mrf.mxu1 }
  0xfe   : > { %v564_v58 = vadd.f32 %v1353_v40, %v563_v56  ;;  %v604_v59 = vadd.f32 %v1353_v40, %v603_v57 }
  0xff   : > { %vm735_vm5 = vcmp.ge.f32.partialorder %v642_v54, 0.0  ;;  %v799_v60 = vmul.f32 0.2, %v642_v54  ;;  %vm751_vm6 = vcmp.ge.f32.partialorder %v682_v55, 0.0  ;;  %v815_v61 = vmul.f32 0.2, %v682_v55 }
 0x100   : > { %vm704_vm7 = vcmp.ge.f32.partialorder %v564_v58, 0.0  ;;  %v768_v62 = vmul.f32 0.2, %v564_v58  ;;  %vm720_vm8 = vcmp.ge.f32.partialorder %v604_v59, 0.0  ;;  %v784_v63 = vmul.f32 0.2, %v604_v59 }
 0x101   : > { %v863_v0 = vsel %vm735_vm5, %v642_v54, %v799_v60  ;;  %v879_v1 = vsel %vm751_vm6, %v682_v55, %v815_v61 }
 0x102   : > { %927 = vst [vmem:[%s1361_s30 + $0x160] sm:$0xff] %v863_v0  ;;  %v832_v2 = vsel %vm704_vm7, %v564_v58, %v768_v62  ;;  %v848_v3 = vsel %vm720_vm8, %v604_v59, %v784_v63 }
 0x103   : > { %943 = vst [vmem:[%s1361_s30 + $0x1e0] sm:$0xff] %v879_v1 }
 0x104   : > { %896 = vst [vmem:[%s1361_s30 + $0x68] sm:$0xff] %v832_v2  ;;  %v643_v4 = vpop.f32.mrf.mxu2  ;;  %v683_v5 = vpop.f32.mrf.mxu3 }
 0x105   : > { %912 = vst [vmem:[%s1361_s30 + $0xe8] sm:$0xff] %v848_v3  ;;  %v644_v6 = vadd.f32 %v1353_v40, %v643_v4  ;;  %v684_v7 = vadd.f32 %v1353_v40, %v683_v5  ;;  %v566_v8 = vpop.f32.mrf.mxu0  ;;  %v606_v9 = vpop.f32.mrf.mxu1 }
 0x106   : > { %v567_v10 = vadd.f32 %v1353_v40, %v566_v8  ;;  %v607_v11 = vadd.f32 %v1353_v40, %v606_v9 }
 0x107   : > { %vm736_vm9 = vcmp.ge.f32.partialorder %v644_v6, 0.0  ;;  %v800_v12 = vmul.f32 0.2, %v644_v6  ;;  %vm752_vm10 = vcmp.ge.f32.partialorder %v684_v7, 0.0  ;;  %v816_v13 = vmul.f32 0.2, %v684_v7 }
 0x108   : > { %vm705_vm11 = vcmp.ge.f32.partialorder %v567_v10, 0.0  ;;  %v769_v14 = vmul.f32 0.2, %v567_v10  ;;  %vm721_vm12 = vcmp.ge.f32.partialorder %v607_v11, 0.0  ;;  %v785_v15 = vmul.f32 0.2, %v607_v11 }
 0x109   : > { %v864_v16 = vsel %vm736_vm9, %v644_v6, %v800_v12  ;;  %v880_v17 = vsel %vm752_vm10, %v684_v7, %v816_v13 }
 0x10a   : > { %928 = vst [vmem:[%s1361_s30 + $0x168] sm:$0xff] %v864_v16  ;;  %v833_v18 = vsel %vm705_vm11, %v567_v10, %v769_v14  ;;  %v849_v19 = vsel %vm721_vm12, %v607_v11, %v785_v15 }
 0x10b   : > { %944 = vst [vmem:[%s1361_s30 + $0x1e8] sm:$0xff] %v880_v17 }
 0x10c   : > { %897 = vst [vmem:[%s1361_s30 + $0x70] sm:$0xff] %v833_v18  ;;  %v646_v20 = vpop.f32.mrf.mxu2  ;;  %v686_v21 = vpop.f32.mrf.mxu3 }
 0x10d   : > { %913 = vst [vmem:[%s1361_s30 + $0xf0] sm:$0xff] %v849_v19  ;;  %v647_v22 = vadd.f32 %v1353_v40, %v646_v20  ;;  %v687_v23 = vadd.f32 %v1353_v40, %v686_v21  ;;  %v568_v24 = vpop.f32.mrf.mxu0  ;;  %v608_v25 = vpop.f32.mrf.mxu1 }
 0x10e   : > { %v569_v26 = vadd.f32 %v1353_v40, %v568_v24  ;;  %v609_v27 = vadd.f32 %v1353_v40, %v608_v25 }
 0x10f   : > { %vm737_vm13 = vcmp.ge.f32.partialorder %v647_v22, 0.0  ;;  %v801_v28 = vmul.f32 0.2, %v647_v22  ;;  %vm753_vm14 = vcmp.ge.f32.partialorder %v687_v23, 0.0  ;;  %v817_v29 = vmul.f32 0.2, %v687_v23 }
 0x110   : > { %vm706_vm15 = vcmp.ge.f32.partialorder %v569_v26, 0.0  ;;  %v770_v30 = vmul.f32 0.2, %v569_v26  ;;  %vm722_vm0 = vcmp.ge.f32.partialorder %v609_v27, 0.0  ;;  %v786_v31 = vmul.f32 0.2, %v609_v27 }
 0x111   : > { %v865_v32 = vsel %vm737_vm13, %v647_v22, %v801_v28  ;;  %v881_v33 = vsel %vm753_vm14, %v687_v23, %v817_v29 }
 0x112   : > { %929 = vst [vmem:[%s1361_s30 + $0x170] sm:$0xff] %v865_v32  ;;  %v834_v34 = vsel %vm706_vm15, %v569_v26, %v770_v30  ;;  %v850_v35 = vsel %vm722_vm0, %v609_v27, %v786_v31 }
 0x113   : > { %945 = vst [vmem:[%s1361_s30 + $0x1f0] sm:$0xff] %v881_v33 }
 0x114   : > { %898 = vst [vmem:[%s1361_s30 + $0x78] sm:$0xff] %v834_v34  ;;  %v648_v36 = vpop.f32.mrf.mxu2  ;;  %v688_v37 = vpop.f32.mrf.mxu3 }
 0x115   : > { %914 = vst [vmem:[%s1361_s30 + $0xf8] sm:$0xff] %v850_v35  ;;  %v649_v38 = vadd.f32 %v1353_v40, %v648_v36  ;;  %v689_v39 = vadd.f32 %v1353_v40, %v688_v37 }
 0x117   : > { %vm738_vm1 = vcmp.ge.f32.partialorder %v649_v38, 0.0  ;;  %v802_v41 = vmul.f32 0.2, %v649_v38  ;;  %vm754_vm2 = vcmp.ge.f32.partialorder %v689_v39, 0.0  ;;  %v818_v42 = vmul.f32 0.2, %v689_v39 }
 0x119   : > { %v866_v43 = vsel %vm738_vm1, %v649_v38, %v802_v41  ;;  %v882_v44 = vsel %vm754_vm2, %v689_v39, %v818_v42 }
 0x11a   : > { %930 = vst [vmem:[%s1361_s30 + $0x178] sm:$0xff] %v866_v43 }
 0x11b   : > { %946 = vst [vmem:[%s1361_s30 + $0x1f8] sm:$0xff] %v882_v44 }
 0x11c PF: > { %s13_s12 = sadd.s32 1, %s1238_s12  }
 0x11d   : > { %p10_p4 = scmp.ge.s32.totalorder %s13_s12, 6  }
 0x11f   :  { %12 = sbr.rel (!%p10_p4) target bundleno = 1 (0x1), region = 62 }

// kernel: fpse_forward.13
= control target key start
LH: loop header
LB: loop body
LE: loop exit
PB: predicated region body
PF: predicated region fallthrough
CT: control target
= control target key end

     0   :  { %vm376_vm0 = vcmask 1043456   ;;  %vm279_vm1 = vcmask 588800   ;;  %s1461_s1 = inlined_call_operand.vmem [shape: bf16[72,128], index: 1, kind: input, shape index: {}]   ;;  %s1462_s2 = inlined_call_operand.vmem [shape: f32[1,128], index: 2, kind: input, shape index: {}]   ;;  %s1463_s0 = inlined_call_operand.vmem [shape: bf16[512,72], index: 0, kind: input, shape index: {}]   ;;  %s1464_s3 = inlined_call_operand.vmem [shape: f32[512,128], index: 3, kind: output, shape index: {}]  }
   0x1   :  { %v87_v0 = vld [vmem:[%s1461_s1 + $0x20] sm:$0xf]  ;;  %v1020_v4 = vld [vmem:[%s1461_s1 + $0x18] sm:$0xff]  ;;  %v1019_v5 = vld [vmem:[%s1461_s1 + $0x10] sm:$0xff] }
   0x2   :  { %v269_v1 = vunpack.c.l.b16 %v87_v0  ;;  %v1018_v6 = vld [vmem:[%s1461_s1 + $0x8] sm:$0xff]  ;;  %v1017_v7 = vld [vmem:[%s1461_s1] sm:$0xff]  ;;  %v987_v16 = vld [vmem:[%s1463_s0 + $0x10] sm:$0xff] }
   0x3   :  { %v985_v8 = vld [vmem:[%s1463_s0] sm:$0xff]  ;;  %v986_v12 = vld [vmem:[%s1463_s0 + $0x8] sm:$0xff]  ;;  %v995_v17 = vld [vmem:[%s1463_s0 + $0x50] sm:$0xff] }
   0x4   :  { %v274_v2 = vpack.c.b16 %v269_v1, %v269_v1  ;;  %v993_v9 = vld [vmem:[%s1463_s0 + $0x40] sm:$0xff]  ;;  %v994_v13 = vld [vmem:[%s1463_s0 + $0x48] sm:$0xff]  ;;  %v1003_v18 = vld [vmem:[%s1463_s0 + $0x90] sm:$0xff] }
   0x5   :  { %v1001_v10 = vld [vmem:[%s1463_s0 + $0x80] sm:$0xff]  ;;  %v1002_v14 = vld [vmem:[%s1463_s0 + $0x88] sm:$0xff]  ;;  %v1011_v19 = vld [vmem:[%s1463_s0 + $0xd0] sm:$0xff] }
   0x6   :  { %v378_v3 = vsel %vm376_vm0, %v274_v2, 0  ;;  %v1009_v11 = vld [vmem:[%s1463_s0 + $0xc0] sm:$0xff]  ;;  %v1010_v15 = vld [vmem:[%s1463_s0 + $0xc8] sm:$0xff]  ;;  %v988_v20 = vld [vmem:[%s1463_s0 + $0x18] sm:$0xff] }
   0x7   :  { %383 = vmatpush.bf16.msra.mxu0 %v378_v3  ;;  %1021 = vmatpush.bf16.msra.mxu1 %v378_v3  ;;  %v996_v21 = vld [vmem:[%s1463_s0 + $0x58] sm:$0xff]  ;;  %v989_v24 = vld [vmem:[%s1463_s0 + $0x20] sm:$0xff]  ;;  %v990_v28 = vld [vmem:[%s1463_s0 + $0x28] sm:$0xff] }
   0x8   :  { %1022 = vmatpush.bf16.msra.mxu2 %v378_v3  ;;  %1023 = vmatpush.bf16.msra.mxu3 %v378_v3  ;;  %v1004_v22 = vld [vmem:[%s1463_s0 + $0x98] sm:$0xff]  ;;  %v997_v25 = vld [vmem:[%s1463_s0 + $0x60] sm:$0xff]  ;;  %v998_v29 = vld [vmem:[%s1463_s0 + $0x68] sm:$0xff] }
   0x9   :  { %v1012_v23 = vld [vmem:[%s1463_s0 + $0xd8] sm:$0xff]  ;;  %v1005_v26 = vld [vmem:[%s1463_s0 + $0xa0] sm:$0xff]  ;;  %v1006_v30 = vld [vmem:[%s1463_s0 + $0xa8] sm:$0xff] }
   0xa   :  { %v1013_v27 = vld [vmem:[%s1463_s0 + $0xe0] sm:$0xff]  ;;  %v1014_v31 = vld [vmem:[%s1463_s0 + $0xe8] sm:$0xff]  ;;  %v991_v32 = vld [vmem:[%s1463_s0 + $0x30] sm:$0xff] }
   0xb   :  { %384 = vmatpush.bf16.msra.mxu0 %v1020_v4  ;;  %1024 = vmatpush.bf16.msra.mxu1 %v1020_v4  ;;  %v999_v33 = vld [vmem:[%s1463_s0 + $0x70] sm:$0xff]  ;;  %v992_v36 = vld [vmem:[%s1463_s0 + $0x38] sm:$0xff]  ;;  %v1203_v40 = vld [vmem:[%s1462_s2] ss:$0 sm:$0xff] }
   0xc   :  { %1025 = vmatpush.bf16.msra.mxu2 %v1020_v4  ;;  %1026 = vmatpush.bf16.msra.mxu3 %v1020_v4  ;;  %v1007_v34 = vld [vmem:[%s1463_s0 + $0xb0] sm:$0xff]  ;;  %v1000_v37 = vld [vmem:[%s1463_s0 + $0x78] sm:$0xff] }
   0xd   :  { %v1015_v35 = vld [vmem:[%s1463_s0 + $0xf0] sm:$0xff]  ;;  %v1008_v38 = vld [vmem:[%s1463_s0 + $0xb8] sm:$0xff] }
   0xe   :  { %v1016_v39 = vld [vmem:[%s1463_s0 + $0xf8] sm:$0xff] }
   0xf   :  { %385 = vmatpush.bf16.msra.mxu0 %v1019_v5  ;;  %1027 = vmatpush.bf16.msra.mxu1 %v1019_v5 }
  0x10   :  { %1028 = vmatpush.bf16.msra.mxu2 %v1019_v5  ;;  %1029 = vmatpush.bf16.msra.mxu3 %v1019_v5 }
  0x13   :  { %386 = vmatpush.bf16.msra.mxu0 %v1018_v6  ;;  %1030 = vmatpush.bf16.msra.mxu1 %v1018_v6 }
  0x14   :  { %1031 = vmatpush.bf16.msra.mxu2 %v1018_v6  ;;  %1032 = vmatpush.bf16.msra.mxu3 %v1018_v6 }
  0x17   :  { %387 = vmatpush.bf16.msra.mxu0 %v1017_v7  ;;  %1033 = vmatpush.bf16.msra.mxu1 %v1017_v7 }
  0x18   :  { %1034 = vmatpush.bf16.msra.mxu2 %v1017_v7  ;;  %1035 = vmatpush.bf16.msra.mxu3 %v1017_v7 }
  0x1a   :  { %953 = vmatmul.msk.bf16.vlgmr.msra.gmra.mxu0 %vm279_vm1, %v985_v8  ;;  %961 = vmatmul.msk.bf16.vlgmr.msra.gmra.mxu1 %vm279_vm1, %v993_v9 }
  0x1b   :  { %969 = vmatmul.msk.bf16.vlgmr.msra.gmra.mxu2 %vm279_vm1, %v1001_v10  ;;  %977 = vmatmul.msk.bf16.vlgmr.msra.gmra.mxu3 %vm279_vm1, %v1009_v11 }
  0x2a   :  { %954 = vmatmul.msk.bf16.gmra.mxu0 %vm279_vm1, %v986_v12  ;;  %962 = vmatmul.msk.bf16.gmra.mxu1 %vm279_vm1, %v994_v13 }
  0x2b   :  { %970 = vmatmul.msk.bf16.gmra.mxu2 %vm279_vm1, %v1002_v14  ;;  %978 = vmatmul.msk.bf16.gmra.mxu3 %vm279_vm1, %v1010_v15 }
  0x3a   :  { %955 = vmatmul.msk.bf16.gmra.mxu0 %vm279_vm1, %v987_v16  ;;  %963 = vmatmul.msk.bf16.gmra.mxu1 %vm279_vm1, %v995_v17 }
  0x3b   :  { %971 = vmatmul.msk.bf16.gmra.mxu2 %vm279_vm1, %v1003_v18  ;;  %979 = vmatmul.msk.bf16.gmra.mxu3 %vm279_vm1, %v1011_v19 }
  0x4a   :  { %956 = vmatmul.msk.bf16.gmra.mxu0 %vm279_vm1, %v988_v20  ;;  %964 = vmatmul.msk.bf16.gmra.mxu1 %vm279_vm1, %v996_v21 }
  0x4b   :  { %972 = vmatmul.msk.bf16.gmra.mxu2 %vm279_vm1, %v1004_v22  ;;  %980 = vmatmul.msk.bf16.gmra.mxu3 %vm279_vm1, %v1012_v23 }
  0x5a   :  { %957 = vmatmul.msk.bf16.gmra.mxu0 %vm279_vm1, %v989_v24  ;;  %965 = vmatmul.msk.bf16.gmra.mxu1 %vm279_vm1, %v997_v25 }
  0x5b   :  { %973 = vmatmul.msk.bf16.gmra.mxu2 %vm279_vm1, %v1005_v26  ;;  %981 = vmatmul.msk.bf16.gmra.mxu3 %vm279_vm1, %v1013_v27 }
  0x6a   :  { %958 = vmatmul.msk.bf16.gmra.mxu0 %vm279_vm1, %v990_v28  ;;  %966 = vmatmul.msk.bf16.gmra.mxu1 %vm279_vm1, %v998_v29 }
  0x6b   :  { %974 = vmatmul.msk.bf16.gmra.mxu2 %vm279_vm1, %v1006_v30  ;;  %982 = vmatmul.msk.bf16.gmra.mxu3 %vm279_vm1, %v1014_v31 }
  0x7a   :  { %959 = vmatmul.msk.bf16.gmra.mxu0 %vm279_vm1, %v991_v32  ;;  %967 = vmatmul.msk.bf16.gmra.mxu1 %vm279_vm1, %v999_v33 }
  0x7b   :  { %975 = vmatmul.msk.bf16.gmra.mxu2 %vm279_vm1, %v1007_v34  ;;  %983 = vmatmul.msk.bf16.gmra.mxu3 %vm279_vm1, %v1015_v35 }
  0x8a   :  { %960 = vmatmul.msk.bf16.gmra.mxu0 %vm279_vm1, %v992_v36  ;;  %968 = vmatmul.msk.bf16.gmra.mxu1 %vm279_vm1, %v1000_v37 }
  0x8b   :  { %976 = vmatmul.msk.bf16.gmra.mxu2 %vm279_vm1, %v1008_v38  ;;  %984 = vmatmul.msk.bf16.gmra.mxu3 %vm279_vm1, %v1016_v39 }
  0x97   :  { %v389_v41 = vpop.f32.mrf.mxu0  ;;  %v429_v42 = vpop.f32.mrf.mxu1 }
  0x98   :  { %v390_v43 = vadd.f32 %v1203_v40, %v389_v41  ;;  %v430_v44 = vadd.f32 %v1203_v40, %v429_v42 }
  0x9a   :  { %vm549_vm2 = vcmp.ge.f32.partialorder %v390_v43, 0.0  ;;  %v613_v45 = vmul.f32 0.2, %v390_v43  ;;  %vm565_vm3 = vcmp.ge.f32.partialorder %v430_v44, 0.0  ;;  %v629_v46 = vmul.f32 0.2, %v430_v44 }
  0x9c   :  { %v677_v47 = vsel %vm549_vm2, %v390_v43, %v613_v45  ;;  %v693_v48 = vsel %vm565_vm3, %v430_v44, %v629_v46 }
  0x9d   :  { %741 = vst [vmem:[%s1464_s3] sm:$0xff] %v677_v47 }
  0x9e   :  { %757 = vst [vmem:[%s1464_s3 + $0x80] sm:$0xff] %v693_v48  ;;  %v469_v49 = vpop.f32.mrf.mxu2  ;;  %v509_v50 = vpop.f32.mrf.mxu3 }
  0x9f   :  { %v470_v51 = vadd.f32 %v1203_v40, %v469_v49  ;;  %v510_v52 = vadd.f32 %v1203_v40, %v509_v50  ;;  %v391_v53 = vpop.f32.mrf.mxu0  ;;  %v431_v54 = vpop.f32.mrf.mxu1 }
  0xa0   :  { %v392_v55 = vadd.f32 %v1203_v40, %v391_v53  ;;  %v432_v56 = vadd.f32 %v1203_v40, %v431_v54 }
  0xa1   :  { %vm581_vm4 = vcmp.ge.f32.partialorder %v470_v51, 0.0  ;;  %v645_v57 = vmul.f32 0.2, %v470_v51  ;;  %vm597_vm5 = vcmp.ge.f32.partialorder %v510_v52, 0.0  ;;  %v661_v58 = vmul.f32 0.2, %v510_v52 }
  0xa2   :  { %vm550_vm6 = vcmp.ge.f32.partialorder %v392_v55, 0.0  ;;  %v614_v59 = vmul.f32 0.2, %v392_v55  ;;  %vm566_vm7 = vcmp.ge.f32.partialorder %v432_v56, 0.0  ;;  %v630_v60 = vmul.f32 0.2, %v432_v56 }
  0xa3   :  { %v709_v61 = vsel %vm581_vm4, %v470_v51, %v645_v57  ;;  %v725_v62 = vsel %vm597_vm5, %v510_v52, %v661_v58 }
  0xa4   :  { %773 = vst [vmem:[%s1464_s3 + $0x100] sm:$0xff] %v709_v61  ;;  %v678_v63 = vsel %vm550_vm6, %v392_v55, %v614_v59  ;;  %v694_v0 = vsel %vm566_vm7, %v432_v56, %v630_v60 }
  0xa5   :  { %789 = vst [vmem:[%s1464_s3 + $0x180] sm:$0xff] %v725_v62 }
  0xa6   :  { %742 = vst [vmem:[%s1464_s3 + $0x8] sm:$0xff] %v678_v63  ;;  %v471_v1 = vpop.f32.mrf.mxu2  ;;  %v511_v2 = vpop.f32.mrf.mxu3 }
  0xa7   :  { %758 = vst [vmem:[%s1464_s3 + $0x88] sm:$0xff] %v694_v0  ;;  %v472_v3 = vadd.f32 %v1203_v40, %v471_v1  ;;  %v512_v4 = vadd.f32 %v1203_v40, %v511_v2  ;;  %v394_v5 = vpop.f32.mrf.mxu0  ;;  %v434_v6 = vpop.f32.mrf.mxu1 }
  0xa8   :  { %v395_v7 = vadd.f32 %v1203_v40, %v394_v5  ;;  %v435_v8 = vadd.f32 %v1203_v40, %v434_v6 }
  0xa9   :  { %vm582_vm8 = vcmp.ge.f32.partialorder %v472_v3, 0.0  ;;  %v646_v9 = vmul.f32 0.2, %v472_v3  ;;  %vm598_vm9 = vcmp.ge.f32.partialorder %v512_v4, 0.0  ;;  %v662_v10 = vmul.f32 0.2, %v512_v4 }
  0xaa   :  { %vm551_vm10 = vcmp.ge.f32.partialorder %v395_v7, 0.0  ;;  %v615_v11 = vmul.f32 0.2, %v395_v7  ;;  %vm567_vm11 = vcmp.ge.f32.partialorder %v435_v8, 0.0  ;;  %v631_v12 = vmul.f32 0.2, %v435_v8 }
  0xab   :  { %v710_v13 = vsel %vm582_vm8, %v472_v3, %v646_v9  ;;  %v726_v14 = vsel %vm598_vm9, %v512_v4, %v662_v10 }
  0xac   :  { %774 = vst [vmem:[%s1464_s3 + $0x108] sm:$0xff] %v710_v13  ;;  %v679_v15 = vsel %vm551_vm10, %v395_v7, %v615_v11  ;;  %v695_v16 = vsel %vm567_vm11, %v435_v8, %v631_v12 }
  0xad   :  { %790 = vst [vmem:[%s1464_s3 + $0x188] sm:$0xff] %v726_v14 }
  0xae   :  { %743 = vst [vmem:[%s1464_s3 + $0x10] sm:$0xff] %v679_v15  ;;  %v474_v17 = vpop.f32.mrf.mxu2  ;;  %v514_v18 = vpop.f32.mrf.mxu3 }
  0xaf   :  { %759 = vst [vmem:[%s1464_s3 + $0x90] sm:$0xff] %v695_v16  ;;  %v475_v19 = vadd.f32 %v1203_v40, %v474_v17  ;;  %v515_v20 = vadd.f32 %v1203_v40, %v514_v18  ;;  %v396_v21 = vpop.f32.mrf.mxu0  ;;  %v436_v22 = vpop.f32.mrf.mxu1 }
  0xb0   :  { %v397_v23 = vadd.f32 %v1203_v40, %v396_v21  ;;  %v437_v24 = vadd.f32 %v1203_v40, %v436_v22 }
  0xb1   :  { %vm583_vm12 = vcmp.ge.f32.partialorder %v475_v19, 0.0  ;;  %v647_v25 = vmul.f32 0.2, %v475_v19  ;;  %vm599_vm13 = vcmp.ge.f32.partialorder %v515_v20, 0.0  ;;  %v663_v26 = vmul.f32 0.2, %v515_v20 }
  0xb2   :  { %vm552_vm14 = vcmp.ge.f32.partialorder %v397_v23, 0.0  ;;  %v616_v27 = vmul.f32 0.2, %v397_v23  ;;  %vm568_vm15 = vcmp.ge.f32.partialorder %v437_v24, 0.0  ;;  %v632_v28 = vmul.f32 0.2, %v437_v24 }
  0xb3   :  { %v711_v29 = vsel %vm583_vm12, %v475_v19, %v647_v25  ;;  %v727_v30 = vsel %vm599_vm13, %v515_v20, %v663_v26 }
  0xb4   :  { %775 = vst [vmem:[%s1464_s3 + $0x110] sm:$0xff] %v711_v29  ;;  %v680_v31 = vsel %vm552_vm14, %v397_v23, %v616_v27  ;;  %v696_v32 = vsel %vm568_vm15, %v437_v24, %v632_v28 }
  0xb5   :  { %791 = vst [vmem:[%s1464_s3 + $0x190] sm:$0xff] %v727_v30 }
  0xb6   :  { %744 = vst [vmem:[%s1464_s3 + $0x18] sm:$0xff] %v680_v31  ;;  %v476_v33 = vpop.f32.mrf.mxu2  ;;  %v516_v34 = vpop.f32.mrf.mxu3 }
  0xb7   :  { %760 = vst [vmem:[%s1464_s3 + $0x98] sm:$0xff] %v696_v32  ;;  %v477_v35 = vadd.f32 %v1203_v40, %v476_v33  ;;  %v517_v36 = vadd.f32 %v1203_v40, %v516_v34  ;;  %v399_v37 = vpop.f32.mrf.mxu0  ;;  %v439_v38 = vpop.f32.mrf.mxu1 }
  0xb8   :  { %v400_v39 = vadd.f32 %v1203_v40, %v399_v37  ;;  %v440_v41 = vadd.f32 %v1203_v40, %v439_v38 }
  0xb9   :  { %vm584_vm0 = vcmp.ge.f32.partialorder %v477_v35, 0.0  ;;  %v648_v42 = vmul.f32 0.2, %v477_v35  ;;  %vm600_vm1 = vcmp.ge.f32.partialorder %v517_v36, 0.0  ;;  %v664_v43 = vmul.f32 0.2, %v517_v36 }
  0xba   :  { %vm553_vm2 = vcmp.ge.f32.partialorder %v400_v39, 0.0  ;;  %v617_v44 = vmul.f32 0.2, %v400_v39  ;;  %vm569_vm3 = vcmp.ge.f32.partialorder %v440_v41, 0.0  ;;  %v633_v45 = vmul.f32 0.2, %v440_v41 }
  0xbb   :  { %v712_v46 = vsel %vm584_vm0, %v477_v35, %v648_v42  ;;  %v728_v47 = vsel %vm600_vm1, %v517_v36, %v664_v43 }
  0xbc   :  { %776 = vst [vmem:[%s1464_s3 + $0x118] sm:$0xff] %v712_v46  ;;  %v681_v48 = vsel %vm553_vm2, %v400_v39, %v617_v44  ;;  %v697_v49 = vsel %vm569_vm3, %v440_v41, %v633_v45 }
  0xbd   :  { %792 = vst [vmem:[%s1464_s3 + $0x198] sm:$0xff] %v728_v47 }
  0xbe   :  { %745 = vst [vmem:[%s1464_s3 + $0x20] sm:$0xff] %v681_v48  ;;  %v479_v50 = vpop.f32.mrf.mxu2  ;;  %v519_v51 = vpop.f32.mrf.mxu3 }
  0xbf   :  { %761 = vst [vmem:[%s1464_s3 + $0xa0] sm:$0xff] %v697_v49  ;;  %v480_v52 = vadd.f32 %v1203_v40, %v479_v50  ;;  %v520_v53 = vadd.f32 %v1203_v40, %v519_v51  ;;  %v401_v54 = vpop.f32.mrf.mxu0  ;;  %v441_v55 = vpop.f32.mrf.mxu1 }
  0xc0   :  { %v402_v56 = vadd.f32 %v1203_v40, %v401_v54  ;;  %v442_v57 = vadd.f32 %v1203_v40, %v441_v55 }
  0xc1   :  { %vm585_vm4 = vcmp.ge.f32.partialorder %v480_v52, 0.0  ;;  %v649_v58 = vmul.f32 0.2, %v480_v52  ;;  %vm601_vm5 = vcmp.ge.f32.partialorder %v520_v53, 0.0  ;;  %v665_v59 = vmul.f32 0.2, %v520_v53 }
  0xc2   :  { %vm554_vm6 = vcmp.ge.f32.partialorder %v402_v56, 0.0  ;;  %v618_v60 = vmul.f32 0.2, %v402_v56  ;;  %vm570_vm7 = vcmp.ge.f32.partialorder %v442_v57, 0.0  ;;  %v634_v61 = vmul.f32 0.2, %v442_v57 }
  0xc3   :  { %v713_v62 = vsel %vm585_vm4, %v480_v52, %v649_v58  ;;  %v729_v63 = vsel %vm601_vm5, %v520_v53, %v665_v59 }
  0xc4   :  { %777 = vst [vmem:[%s1464_s3 + $0x120] sm:$0xff] %v713_v62  ;;  %v682_v0 = vsel %vm554_vm6, %v402_v56, %v618_v60  ;;  %v698_v1 = vsel %vm570_vm7, %v442_v57, %v634_v61 }
  0xc5   :  { %793 = vst [vmem:[%s1464_s3 + $0x1a0] sm:$0xff] %v729_v63 }
  0xc6   :  { %746 = vst [vmem:[%s1464_s3 + $0x28] sm:$0xff] %v682_v0  ;;  %v481_v2 = vpop.f32.mrf.mxu2  ;;  %v521_v3 = vpop.f32.mrf.mxu3 }
  0xc7   :  { %762 = vst [vmem:[%s1464_s3 + $0xa8] sm:$0xff] %v698_v1  ;;  %v482_v4 = vadd.f32 %v1203_v40, %v481_v2  ;;  %v522_v5 = vadd.f32 %v1203_v40, %v521_v3  ;;  %v404_v6 = vpop.f32.mrf.mxu0  ;;  %v444_v7 = vpop.f32.mrf.mxu1 }
  0xc8   :  { %v405_v8 = vadd.f32 %v1203_v40, %v404_v6  ;;  %v445_v9 = vadd.f32 %v1203_v40, %v444_v7 }
  0xc9   :  { %vm586_vm8 = vcmp.ge.f32.partialorder %v482_v4, 0.0  ;;  %v650_v10 = vmul.f32 0.2, %v482_v4  ;;  %vm602_vm9 = vcmp.ge.f32.partialorder %v522_v5, 0.0  ;;  %v666_v11 = vmul.f32 0.2, %v522_v5 }
  0xca   :  { %vm555_vm10 = vcmp.ge.f32.partialorder %v405_v8, 0.0  ;;  %v619_v12 = vmul.f32 0.2, %v405_v8  ;;  %vm571_vm11 = vcmp.ge.f32.partialorder %v445_v9, 0.0  ;;  %v635_v13 = vmul.f32 0.2, %v445_v9 }
  0xcb   :  { %v714_v14 = vsel %vm586_vm8, %v482_v4, %v650_v10  ;;  %v730_v15 = vsel %vm602_vm9, %v522_v5, %v666_v11 }
  0xcc   :  { %778 = vst [vmem:[%s1464_s3 + $0x128] sm:$0xff] %v714_v14  ;;  %v683_v16 = vsel %vm555_vm10, %v405_v8, %v619_v12  ;;  %v699_v17 = vsel %vm571_vm11, %v445_v9, %v635_v13 }
  0xcd   :  { %794 = vst [vmem:[%s1464_s3 + $0x1a8] sm:$0xff] %v730_v15 }
  0xce   :  { %747 = vst [vmem:[%s1464_s3 + $0x30] sm:$0xff] %v683_v16  ;;  %v484_v18 = vpop.f32.mrf.mxu2  ;;  %v524_v19 = vpop.f32.mrf.mxu3 }
  0xcf   :  { %763 = vst [vmem:[%s1464_s3 + $0xb0] sm:$0xff] %v699_v17  ;;  %v485_v20 = vadd.f32 %v1203_v40, %v484_v18  ;;  %v525_v21 = vadd.f32 %v1203_v40, %v524_v19  ;;  %v406_v22 = vpop.f32.mrf.mxu0  ;;  %v446_v23 = vpop.f32.mrf.mxu1 }
  0xd0   :  { %v407_v24 = vadd.f32 %v1203_v40, %v406_v22  ;;  %v447_v25 = vadd.f32 %v1203_v40, %v446_v23 }
  0xd1   :  { %vm587_vm12 = vcmp.ge.f32.partialorder %v485_v20, 0.0  ;;  %v651_v26 = vmul.f32 0.2, %v485_v20  ;;  %vm603_vm13 = vcmp.ge.f32.partialorder %v525_v21, 0.0  ;;  %v667_v27 = vmul.f32 0.2, %v525_v21 }
  0xd2   :  { %vm556_vm14 = vcmp.ge.f32.partialorder %v407_v24, 0.0  ;;  %v620_v28 = vmul.f32 0.2, %v407_v24  ;;  %vm572_vm15 = vcmp.ge.f32.partialorder %v447_v25, 0.0  ;;  %v636_v29 = vmul.f32 0.2, %v447_v25 }
  0xd3   :  { %v715_v30 = vsel %vm587_vm12, %v485_v20, %v651_v26  ;;  %v731_v31 = vsel %vm603_vm13, %v525_v21, %v667_v27 }
  0xd4   :  { %779 = vst [vmem:[%s1464_s3 + $0x130] sm:$0xff] %v715_v30  ;;  %v684_v32 = vsel %vm556_vm14, %v407_v24, %v620_v28  ;;  %v700_v33 = vsel %vm572_vm15, %v447_v25, %v636_v29 }
  0xd5   :  { %795 = vst [vmem:[%s1464_s3 + $0x1b0] sm:$0xff] %v731_v31 }
  0xd6   :  { %748 = vst [vmem:[%s1464_s3 + $0x38] sm:$0xff] %v684_v32  ;;  %v486_v34 = vpop.f32.mrf.mxu2  ;;  %v526_v35 = vpop.f32.mrf.mxu3 }
  0xd7   :  { %764 = vst [vmem:[%s1464_s3 + $0xb8] sm:$0xff] %v700_v33  ;;  %v487_v36 = vadd.f32 %v1203_v40, %v486_v34  ;;  %v527_v37 = vadd.f32 %v1203_v40, %v526_v35  ;;  %v409_v38 = vpop.f32.mrf.mxu0  ;;  %v449_v39 = vpop.f32.mrf.mxu1 }
  0xd8   :  { %v410_v41 = vadd.f32 %v1203_v40, %v409_v38  ;;  %v450_v42 = vadd.f32 %v1203_v40, %v449_v39 }
  0xd9   :  { %vm588_vm0 = vcmp.ge.f32.partialorder %v487_v36, 0.0  ;;  %v652_v43 = vmul.f32 0.2, %v487_v36  ;;  %vm604_vm1 = vcmp.ge.f32.partialorder %v527_v37, 0.0  ;;  %v668_v44 = vmul.f32 0.2, %v527_v37 }
  0xda   :  { %vm557_vm2 = vcmp.ge.f32.partialorder %v410_v41, 0.0  ;;  %v621_v45 = vmul.f32 0.2, %v410_v41  ;;  %vm573_vm3 = vcmp.ge.f32.partialorder %v450_v42, 0.0  ;;  %v637_v46 = vmul.f32 0.2, %v450_v42 }
  0xdb   :  { %v716_v47 = vsel %vm588_vm0, %v487_v36, %v652_v43  ;;  %v732_v48 = vsel %vm604_vm1, %v527_v37, %v668_v44 }
  0xdc   :  { %780 = vst [vmem:[%s1464_s3 + $0x138] sm:$0xff] %v716_v47  ;;  %v685_v49 = vsel %vm557_vm2, %v410_v41, %v621_v45  ;;  %v701_v50 = vsel %vm573_vm3, %v450_v42, %v637_v46 }
  0xdd   :  { %796 = vst [vmem:[%s1464_s3 + $0x1b8] sm:$0xff] %v732_v48 }
  0xde   :  { %749 = vst [vmem:[%s1464_s3 + $0x40] sm:$0xff] %v685_v49  ;;  %v489_v51 = vpop.f32.mrf.mxu2  ;;  %v529_v52 = vpop.f32.mrf.mxu3 }
  0xdf   :  { %765 = vst [vmem:[%s1464_s3 + $0xc0] sm:$0xff] %v701_v50  ;;  %v490_v53 = vadd.f32 %v1203_v40, %v489_v51  ;;  %v530_v54 = vadd.f32 %v1203_v40, %v529_v52  ;;  %v411_v55 = vpop.f32.mrf.mxu0  ;;  %v451_v56 = vpop.f32.mrf.mxu1 }
  0xe0   :  { %v412_v57 = vadd.f32 %v1203_v40, %v411_v55  ;;  %v452_v58 = vadd.f32 %v1203_v40, %v451_v56 }
  0xe1   :  { %vm589_vm4 = vcmp.ge.f32.partialorder %v490_v53, 0.0  ;;  %v653_v59 = vmul.f32 0.2, %v490_v53  ;;  %vm605_vm5 = vcmp.ge.f32.partialorder %v530_v54, 0.0  ;;  %v669_v60 = vmul.f32 0.2, %v530_v54 }
  0xe2   :  { %vm558_vm6 = vcmp.ge.f32.partialorder %v412_v57, 0.0  ;;  %v622_v61 = vmul.f32 0.2, %v412_v57  ;;  %vm574_vm7 = vcmp.ge.f32.partialorder %v452_v58, 0.0  ;;  %v638_v62 = vmul.f32 0.2, %v452_v58 }
  0xe3   :  { %v717_v63 = vsel %vm589_vm4, %v490_v53, %v653_v59  ;;  %v733_v0 = vsel %vm605_vm5, %v530_v54, %v669_v60 }
  0xe4   :  { %781 = vst [vmem:[%s1464_s3 + $0x140] sm:$0xff] %v717_v63  ;;  %v686_v1 = vsel %vm558_vm6, %v412_v57, %v622_v61  ;;  %v702_v2 = vsel %vm574_vm7, %v452_v58, %v638_v62 }
  0xe5   :  { %797 = vst [vmem:[%s1464_s3 + $0x1c0] sm:$0xff] %v733_v0 }
  0xe6   :  { %750 = vst [vmem:[%s1464_s3 + $0x48] sm:$0xff] %v686_v1  ;;  %v491_v3 = vpop.f32.mrf.mxu2  ;;  %v531_v4 = vpop.f32.mrf.mxu3 }
  0xe7   :  { %766 = vst [vmem:[%s1464_s3 + $0xc8] sm:$0xff] %v702_v2  ;;  %v492_v5 = vadd.f32 %v1203_v40, %v491_v3  ;;  %v532_v6 = vadd.f32 %v1203_v40, %v531_v4  ;;  %v414_v7 = vpop.f32.mrf.mxu0  ;;  %v454_v8 = vpop.f32.mrf.mxu1 }
  0xe8   :  { %v415_v9 = vadd.f32 %v1203_v40, %v414_v7  ;;  %v455_v10 = vadd.f32 %v1203_v40, %v454_v8 }
  0xe9   :  { %vm590_vm8 = vcmp.ge.f32.partialorder %v492_v5, 0.0  ;;  %v654_v11 = vmul.f32 0.2, %v492_v5  ;;  %vm606_vm9 = vcmp.ge.f32.partialorder %v532_v6, 0.0  ;;  %v670_v12 = vmul.f32 0.2, %v532_v6 }
  0xea   :  { %vm559_vm10 = vcmp.ge.f32.partialorder %v415_v9, 0.0  ;;  %v623_v13 = vmul.f32 0.2, %v415_v9  ;;  %vm575_vm11 = vcmp.ge.f32.partialorder %v455_v10, 0.0  ;;  %v639_v14 = vmul.f32 0.2, %v455_v10 }
  0xeb   :  { %v718_v15 = vsel %vm590_vm8, %v492_v5, %v654_v11  ;;  %v734_v16 = vsel %vm606_vm9, %v532_v6, %v670_v12 }
  0xec   :  { %782 = vst [vmem:[%s1464_s3 + $0x148] sm:$0xff] %v718_v15  ;;  %v687_v17 = vsel %vm559_vm10, %v415_v9, %v623_v13  ;;  %v703_v18 = vsel %vm575_vm11, %v455_v10, %v639_v14 }
  0xed   :  { %798 = vst [vmem:[%s1464_s3 + $0x1c8] sm:$0xff] %v734_v16 }
  0xee   :  { %751 = vst [vmem:[%s1464_s3 + $0x50] sm:$0xff] %v687_v17  ;;  %v494_v19 = vpop.f32.mrf.mxu2  ;;  %v534_v20 = vpop.f32.mrf.mxu3 }
  0xef   :  { %767 = vst [vmem:[%s1464_s3 + $0xd0] sm:$0xff] %v703_v18  ;;  %v495_v21 = vadd.f32 %v1203_v40, %v494_v19  ;;  %v535_v22 = vadd.f32 %v1203_v40, %v534_v20  ;;  %v416_v23 = vpop.f32.mrf.mxu0  ;;  %v456_v24 = vpop.f32.mrf.mxu1 }
  0xf0   :  { %v417_v25 = vadd.f32 %v1203_v40, %v416_v23  ;;  %v457_v26 = vadd.f32 %v1203_v40, %v456_v24 }
  0xf1   :  { %vm591_vm12 = vcmp.ge.f32.partialorder %v495_v21, 0.0  ;;  %v655_v27 = vmul.f32 0.2, %v495_v21  ;;  %vm607_vm13 = vcmp.ge.f32.partialorder %v535_v22, 0.0  ;;  %v671_v28 = vmul.f32 0.2, %v535_v22 }
  0xf2   :  { %vm560_vm14 = vcmp.ge.f32.partialorder %v417_v25, 0.0  ;;  %v624_v29 = vmul.f32 0.2, %v417_v25  ;;  %vm576_vm15 = vcmp.ge.f32.partialorder %v457_v26, 0.0  ;;  %v640_v30 = vmul.f32 0.2, %v457_v26 }
  0xf3   :  { %v719_v31 = vsel %vm591_vm12, %v495_v21, %v655_v27  ;;  %v735_v32 = vsel %vm607_vm13, %v535_v22, %v671_v28 }
  0xf4   :  { %783 = vst [vmem:[%s1464_s3 + $0x150] sm:$0xff] %v719_v31  ;;  %v688_v33 = vsel %vm560_vm14, %v417_v25, %v624_v29  ;;  %v704_v34 = vsel %vm576_vm15, %v457_v26, %v640_v30 }
  0xf5   :  { %799 = vst [vmem:[%s1464_s3 + $0x1d0] sm:$0xff] %v735_v32 }
  0xf6   :  { %752 = vst [vmem:[%s1464_s3 + $0x58] sm:$0xff] %v688_v33  ;;  %v496_v35 = vpop.f32.mrf.mxu2  ;;  %v536_v36 = vpop.f32.mrf.mxu3 }
  0xf7   :  { %768 = vst [vmem:[%s1464_s3 + $0xd8] sm:$0xff] %v704_v34  ;;  %v497_v37 = vadd.f32 %v1203_v40, %v496_v35  ;;  %v537_v38 = vadd.f32 %v1203_v40, %v536_v36  ;;  %v419_v39 = vpop.f32.mrf.mxu0  ;;  %v459_v41 = vpop.f32.mrf.mxu1 }
  0xf8   :  { %v420_v42 = vadd.f32 %v1203_v40, %v419_v39  ;;  %v460_v43 = vadd.f32 %v1203_v40, %v459_v41 }
  0xf9   :  { %vm592_vm0 = vcmp.ge.f32.partialorder %v497_v37, 0.0  ;;  %v656_v44 = vmul.f32 0.2, %v497_v37  ;;  %vm608_vm1 = vcmp.ge.f32.partialorder %v537_v38, 0.0  ;;  %v672_v45 = vmul.f32 0.2, %v537_v38 }
  0xfa   :  { %vm561_vm2 = vcmp.ge.f32.partialorder %v420_v42, 0.0  ;;  %v625_v46 = vmul.f32 0.2, %v420_v42  ;;  %vm577_vm3 = vcmp.ge.f32.partialorder %v460_v43, 0.0  ;;  %v641_v47 = vmul.f32 0.2, %v460_v43 }
  0xfb   :  { %v720_v48 = vsel %vm592_vm0, %v497_v37, %v656_v44  ;;  %v736_v49 = vsel %vm608_vm1, %v537_v38, %v672_v45 }
  0xfc   :  { %784 = vst [vmem:[%s1464_s3 + $0x158] sm:$0xff] %v720_v48  ;;  %v689_v50 = vsel %vm561_vm2, %v420_v42, %v625_v46  ;;  %v705_v51 = vsel %vm577_vm3, %v460_v43, %v641_v47 }
  0xfd   :  { %800 = vst [vmem:[%s1464_s3 + $0x1d8] sm:$0xff] %v736_v49 }
  0xfe   :  { %753 = vst [vmem:[%s1464_s3 + $0x60] sm:$0xff] %v689_v50  ;;  %v499_v52 = vpop.f32.mrf.mxu2  ;;  %v539_v53 = vpop.f32.mrf.mxu3 }
  0xff   :  { %769 = vst [vmem:[%s1464_s3 + $0xe0] sm:$0xff] %v705_v51  ;;  %v500_v54 = vadd.f32 %v1203_v40, %v499_v52  ;;  %v540_v55 = vadd.f32 %v1203_v40, %v539_v53  ;;  %v421_v56 = vpop.f32.mrf.mxu0  ;;  %v461_v57 = vpop.f32.mrf.mxu1 }
 0x100   :  { %v422_v58 = vadd.f32 %v1203_v40, %v421_v56  ;;  %v462_v59 = vadd.f32 %v1203_v40, %v461_v57 }
 0x101   :  { %vm593_vm4 = vcmp.ge.f32.partialorder %v500_v54, 0.0  ;;  %v657_v60 = vmul.f32 0.2, %v500_v54  ;;  %vm609_vm5 = vcmp.ge.f32.partialorder %v540_v55, 0.0  ;;  %v673_v61 = vmul.f32 0.2, %v540_v55 }
 0x102   :  { %vm562_vm6 = vcmp.ge.f32.partialorder %v422_v58, 0.0  ;;  %v626_v62 = vmul.f32 0.2, %v422_v58  ;;  %vm578_vm7 = vcmp.ge.f32.partialorder %v462_v59, 0.0  ;;  %v642_v63 = vmul.f32 0.2, %v462_v59 }
 0x103   :  { %v721_v0 = vsel %vm593_vm4, %v500_v54, %v657_v60  ;;  %v737_v1 = vsel %vm609_vm5, %v540_v55, %v673_v61 }
 0x104   :  { %785 = vst [vmem:[%s1464_s3 + $0x160] sm:$0xff] %v721_v0  ;;  %v690_v2 = vsel %vm562_vm6, %v422_v58, %v626_v62  ;;  %v706_v3 = vsel %vm578_vm7, %v462_v59, %v642_v63 }
 0x105   :  { %801 = vst [vmem:[%s1464_s3 + $0x1e0] sm:$0xff] %v737_v1 }
 0x106   :  { %754 = vst [vmem:[%s1464_s3 + $0x68] sm:$0xff] %v690_v2  ;;  %v501_v4 = vpop.f32.mrf.mxu2  ;;  %v541_v5 = vpop.f32.mrf.mxu3 }
 0x107   :  { %770 = vst [vmem:[%s1464_s3 + $0xe8] sm:$0xff] %v706_v3  ;;  %v502_v6 = vadd.f32 %v1203_v40, %v501_v4  ;;  %v542_v7 = vadd.f32 %v1203_v40, %v541_v5  ;;  %v424_v8 = vpop.f32.mrf.mxu0  ;;  %v464_v9 = vpop.f32.mrf.mxu1 }
 0x108   :  { %v425_v10 = vadd.f32 %v1203_v40, %v424_v8  ;;  %v465_v11 = vadd.f32 %v1203_v40, %v464_v9 }
 0x109   :  { %vm594_vm8 = vcmp.ge.f32.partialorder %v502_v6, 0.0  ;;  %v658_v12 = vmul.f32 0.2, %v502_v6  ;;  %vm610_vm9 = vcmp.ge.f32.partialorder %v542_v7, 0.0  ;;  %v674_v13 = vmul.f32 0.2, %v542_v7 }
 0x10a   :  { %vm563_vm10 = vcmp.ge.f32.partialorder %v425_v10, 0.0  ;;  %v627_v14 = vmul.f32 0.2, %v425_v10  ;;  %vm579_vm11 = vcmp.ge.f32.partialorder %v465_v11, 0.0  ;;  %v643_v15 = vmul.f32 0.2, %v465_v11 }
 0x10b   :  { %v722_v16 = vsel %vm594_vm8, %v502_v6, %v658_v12  ;;  %v738_v17 = vsel %vm610_vm9, %v542_v7, %v674_v13 }
 0x10c   :  { %786 = vst [vmem:[%s1464_s3 + $0x168] sm:$0xff] %v722_v16  ;;  %v691_v18 = vsel %vm563_vm10, %v425_v10, %v627_v14  ;;  %v707_v19 = vsel %vm579_vm11, %v465_v11, %v643_v15 }
 0x10d   :  { %802 = vst [vmem:[%s1464_s3 + $0x1e8] sm:$0xff] %v738_v17 }
 0x10e   :  { %755 = vst [vmem:[%s1464_s3 + $0x70] sm:$0xff] %v691_v18  ;;  %v504_v20 = vpop.f32.mrf.mxu2  ;;  %v544_v21 = vpop.f32.mrf.mxu3 }
 0x10f   :  { %771 = vst [vmem:[%s1464_s3 + $0xf0] sm:$0xff] %v707_v19  ;;  %v505_v22 = vadd.f32 %v1203_v40, %v504_v20  ;;  %v545_v23 = vadd.f32 %v1203_v40, %v544_v21  ;;  %v426_v24 = vpop.f32.mrf.mxu0  ;;  %v466_v25 = vpop.f32.mrf.mxu1 }
 0x110   :  { %v427_v26 = vadd.f32 %v1203_v40, %v426_v24  ;;  %v467_v27 = vadd.f32 %v1203_v40, %v466_v25 }
 0x111   :  { %vm595_vm12 = vcmp.ge.f32.partialorder %v505_v22, 0.0  ;;  %v659_v28 = vmul.f32 0.2, %v505_v22  ;;  %vm611_vm13 = vcmp.ge.f32.partialorder %v545_v23, 0.0  ;;  %v675_v29 = vmul.f32 0.2, %v545_v23 }
 0x112   :  { %vm564_vm14 = vcmp.ge.f32.partialorder %v427_v26, 0.0  ;;  %v628_v30 = vmul.f32 0.2, %v427_v26  ;;  %vm580_vm15 = vcmp.ge.f32.partialorder %v467_v27, 0.0  ;;  %v644_v31 = vmul.f32 0.2, %v467_v27 }
 0x113   :  { %v723_v32 = vsel %vm595_vm12, %v505_v22, %v659_v28  ;;  %v739_v33 = vsel %vm611_vm13, %v545_v23, %v675_v29 }
 0x114   :  { %787 = vst [vmem:[%s1464_s3 + $0x170] sm:$0xff] %v723_v32  ;;  %v692_v34 = vsel %vm564_vm14, %v427_v26, %v628_v30  ;;  %v708_v35 = vsel %vm580_vm15, %v467_v27, %v644_v31 }
 0x115   :  { %803 = vst [vmem:[%s1464_s3 + $0x1f0] sm:$0xff] %v739_v33 }
 0x116   :  { %756 = vst [vmem:[%s1464_s3 + $0x78] sm:$0xff] %v692_v34  ;;  %v506_v36 = vpop.f32.mrf.mxu2  ;;  %v546_v37 = vpop.f32.mrf.mxu3 }
 0x117   :  { %772 = vst [vmem:[%s1464_s3 + $0xf8] sm:$0xff] %v708_v35  ;;  %v507_v38 = vadd.f32 %v1203_v40, %v506_v36  ;;  %v547_v39 = vadd.f32 %v1203_v40, %v546_v37 }
 0x119   :  { %vm596_vm0 = vcmp.ge.f32.partialorder %v507_v38, 0.0  ;;  %v660_v41 = vmul.f32 0.2, %v507_v38  ;;  %vm612_vm1 = vcmp.ge.f32.partialorder %v547_v39, 0.0  ;;  %v676_v42 = vmul.f32 0.2, %v547_v39 }
 0x11b   :  { %v724_v43 = vsel %vm596_vm0, %v507_v38, %v660_v41  ;;  %v740_v44 = vsel %vm612_vm1, %v547_v39, %v676_v42 }
 0x11c   :  { %788 = vst [vmem:[%s1464_s3 + $0x178] sm:$0xff] %v724_v43 }
 0x11d   :  { %804 = vst [vmem:[%s1464_s3 + $0x1f8] sm:$0xff] %v740_v44 }

// kernel: fpse_forward.14
= control target key start
LH: loop header
LB: loop body
LE: loop exit
PB: predicated region body
PF: predicated region fallthrough
CT: control target
= control target key end

     0   :  { %vm179_vm0 = vcmask 130048   ;;  %s739_s1 = inlined_call_operand.vmem [shape: bf16[144,128], index: 1, kind: input, shape index: {}]   ;;  %s740_s0 = inlined_call_operand.vmem [shape: bf16[128,144], index: 0, kind: input, shape index: {}]   ;;  %s741_s2 = inlined_call_operand.vmem [shape: f32[1,128], index: 2, kind: input, shape index: {}]   ;;  %s742_s3 = inlined_call_operand.vmem [shape: f32[128,128], index: 3, kind: output, shape index: {}]  }
   0x1   :  { %v501_v0 = vld [vmem:[%s739_s1 + $0x38] sm:$0xff]  ;;  %v502_v1 = vld [vmem:[%s739_s1 + $0x40] sm:$0xff]  ;;  %v374_v3 = vld [vmem:[%s740_s0 + $0x8] sm:$0xf0] }
   0x2   :  { %v478_v2 = vld [vmem:[%s740_s0 + $0x4] sm:$0xf]  ;;  %204 = vmatpush.bf16.msra.mxu0 %v501_v0  ;;  %503 = vmatpush.bf16.msra.mxu2 %v501_v0  ;;  %v500_v5 = vld [vmem:[%s739_s1 + $0x30] sm:$0xff]  ;;  %v499_v6 = vld [vmem:[%s739_s1 + $0x28] sm:$0xff] }
   0x3   :  { %v377_v4 = vor.u32 %v478_v2, %v374_v3  ;;  %260 = vmatpush.bf16.msra.mxu1 %v502_v1  ;;  %511 = vmatpush.bf16.msra.mxu3 %v502_v1  ;;  %v488_v7 = vld [vmem:[%s740_s0 + $0x54] sm:$0xf]  ;;  %v414_v8 = vld [vmem:[%s740_s0 + $0x58] sm:$0xf0]  ;;  %v498_v10 = vld [vmem:[%s739_s1 + $0x20] sm:$0xff] }
   0x4   :  { %v417_v9 = vor.u32 %v488_v7, %v414_v8  ;;  %v497_v11 = vld [vmem:[%s739_s1 + $0x18] sm:$0xff]  ;;  %v480_v12 = vld [vmem:[%s740_s0 + $0x14] sm:$0xf]  ;;  %v495_v16 = vld [vmem:[%s739_s1 + $0x8] sm:$0xff] }
   0x5   :  { %v382_v13 = vld [vmem:[%s740_s0 + $0x18] sm:$0xf0]  ;;  %v496_v15 = vld [vmem:[%s739_s1 + $0x10] sm:$0xff]  ;;  %v490_v17 = vld [vmem:[%s740_s0 + $0x64] sm:$0xf] }
   0x6   :  { %470 = vmatmul.msk.bf16.vlgmr.msra.gmra.mxu1 %vm179_vm0, %v377_v4  ;;  %205 = vmatpush.bf16.msra.mxu0 %v500_v5  ;;  %v385_v14 = vor.u32 %v480_v12, %v382_v13  ;;  %v422_v18 = vld [vmem:[%s740_s0 + $0x68] sm:$0xf0]  ;;  %v494_v20 = vld [vmem:[%s739_s1] sm:$0xff]  ;;  %v479_v22 = vld [vmem:[%s740_s0 + $0x4] sm:$0xf0] }
   0x7   :  { %504 = vmatpush.bf16.msra.mxu2 %v500_v5  ;;  %475 = vmatmul.msk.bf16.vlgmr.msra.gmra.mxu3 %vm179_vm0, %v417_v9  ;;  %v425_v19 = vor.u32 %v490_v17, %v422_v18  ;;  %v372_v21 = vld [vmem:[%s740_s0] sm:$0xf]  ;;  %v487_v24 = vld [vmem:[%s740_s0 + $0x44] sm:$0xf0]  ;;  %v482_v27 = vld [vmem:[%s740_s0 + $0x24] sm:$0xf] }
   0x8   :  { %v404_v23 = vld [vmem:[%s740_s0 + $0x40] sm:$0xf]  ;;  %v373_v25 = vor.u32 %v479_v22, %v372_v21  ;;  %v390_v28 = vld [vmem:[%s740_s0 + $0x28] sm:$0xf0]  ;;  %v492_v30 = vld [vmem:[%s740_s0 + $0x74] sm:$0xf] }
   0x9   :  { %v405_v26 = vor.u32 %v487_v24, %v404_v23  ;;  %v393_v29 = vor.u32 %v482_v27, %v390_v28  ;;  %v430_v31 = vld [vmem:[%s740_s0 + $0x78] sm:$0xf0]  ;;  %v380_v33 = vld [vmem:[%s740_s0 + $0x10] sm:$0xf]  ;;  %v481_v34 = vld [vmem:[%s740_s0 + $0x14] sm:$0xf0] }
   0xa   :  { %206 = vmatpush.bf16.msra.mxu0 %v499_v6  ;;  %v433_v32 = vor.u32 %v492_v30, %v430_v31  ;;  %v412_v35 = vld [vmem:[%s740_s0 + $0x50] sm:$0xf]  ;;  %v489_v36 = vld [vmem:[%s740_s0 + $0x54] sm:$0xf0]  ;;  %v381_v37 = vor.u32 %v481_v34, %v380_v33  ;;  %v484_v39 = vld [vmem:[%s740_s0 + $0x34] sm:$0xf] }
   0xb   :  { %505 = vmatpush.bf16.msra.mxu2 %v499_v6  ;;  %v413_v38 = vor.u32 %v489_v36, %v412_v35  ;;  %v398_v40 = vld [vmem:[%s740_s0 + $0x38] sm:$0xf0]  ;;  %v388_v42 = vld [vmem:[%s740_s0 + $0x20] sm:$0xf]  ;;  %v483_v43 = vld [vmem:[%s740_s0 + $0x24] sm:$0xf0] }
   0xc   :  { %v401_v41 = vor.u32 %v484_v39, %v398_v40  ;;  %v420_v44 = vld [vmem:[%s740_s0 + $0x60] sm:$0xf]  ;;  %v491_v45 = vld [vmem:[%s740_s0 + $0x64] sm:$0xf0]  ;;  %v389_v46 = vor.u32 %v483_v43, %v388_v42  ;;  %v486_v48 = vld [vmem:[%s740_s0 + $0x44] sm:$0xf] }
   0xd   :  { %v421_v47 = vor.u32 %v491_v45, %v420_v44  ;;  %v406_v49 = vld [vmem:[%s740_s0 + $0x48] sm:$0xf0]  ;;  %v396_v51 = vld [vmem:[%s740_s0 + $0x30] sm:$0xf]  ;;  %v485_v52 = vld [vmem:[%s740_s0 + $0x34] sm:$0xf0] }
   0xe   :  { %207 = vmatpush.bf16.msra.mxu0 %v498_v10  ;;  %v409_v50 = vor.u32 %v486_v48, %v406_v49  ;;  %v428_v53 = vld [vmem:[%s740_s0 + $0x70] sm:$0xf]  ;;  %v493_v54 = vld [vmem:[%s740_s0 + $0x74] sm:$0xf0]  ;;  %v397_v55 = vor.u32 %v485_v52, %v396_v51  ;;  %v667_v61 = vld [vmem:[%s741_s2] ss:$0 sm:$0xff] }
   0xf   :  { %506 = vmatpush.bf16.msra.mxu2 %v498_v10  ;;  %v429_v56 = vor.u32 %v493_v54, %v428_v53 }
  0x12   :  { %208 = vmatpush.bf16.msra.mxu0 %v497_v11 }
  0x13   :  { %507 = vmatpush.bf16.msra.mxu2 %v497_v11 }
  0x16   :  { %471 = vmatmul.msk.bf16.gmra.mxu1 %vm179_vm0, %v385_v14  ;;  %209 = vmatpush.bf16.msra.mxu0 %v496_v15 }
  0x17   :  { %508 = vmatpush.bf16.msra.mxu2 %v496_v15  ;;  %476 = vmatmul.msk.bf16.gmra.mxu3 %vm179_vm0, %v425_v19 }
  0x1a   :  { %210 = vmatpush.bf16.msra.mxu0 %v495_v16 }
  0x1b   :  { %509 = vmatpush.bf16.msra.mxu2 %v495_v16 }
  0x1e   :  { %211 = vmatpush.bf16.msra.mxu0 %v494_v20 }
  0x1f   :  { %510 = vmatpush.bf16.msra.mxu2 %v494_v20 }
  0x21   :  { %212 = vmatmul.bf16.vlgmr.msra.gmra.mxu0 %v373_v25 }
  0x22   :  { %232 = vmatmul.bf16.vlgmr.msra.gmra.mxu2 %v405_v26 }
  0x26   :  { %472 = vmatmul.msk.bf16.gmra.mxu1 %vm179_vm0, %v393_v29 }
  0x27   :  { %477 = vmatmul.msk.bf16.gmra.mxu3 %vm179_vm0, %v433_v32 }
  0x31   :  { %217 = vmatmul.bf16.gmra.mxu0 %v381_v37 }
  0x32   :  { %237 = vmatmul.bf16.gmra.mxu2 %v413_v38 }
  0x36   :  { %473 = vmatmul.msk.bf16.gmra.mxu1 %vm179_vm0, %v401_v41 }
  0x41   :  { %222 = vmatmul.bf16.gmra.mxu0 %v389_v46 }
  0x42   :  { %242 = vmatmul.bf16.gmra.mxu2 %v421_v47 }
  0x46   :  { %474 = vmatmul.msk.bf16.gmra.mxu1 %vm179_vm0, %v409_v50 }
  0x51   :  { %227 = vmatmul.bf16.gmra.mxu0 %v397_v55 }
  0x52   :  { %247 = vmatmul.bf16.gmra.mxu2 %v429_v56 }
  0x83   :  { %v262_v57 = vpop.f32.mrf.mxu1 }
  0x8a   :  { %v287_v12 = vpop.f32.mrf.mxu3 }
  0x8b   :  { %v264_v58 = vpop.f32.mrf.mxu1 }
  0x92   :  { %v289_v23 = vpop.f32.mrf.mxu3 }
  0x93   :  { %v267_v59 = vpop.f32.mrf.mxu1 }
  0x9a   :  { %v292_v37 = vpop.f32.mrf.mxu3 }
  0x9b   :  { %v269_v60 = vpop.f32.mrf.mxu1 }
  0x9e   :  { %v213_v62 = vpop.f32.mrf.mxu0 }
  0x9f   :  { %v214_v63 = vadd.f32 %v667_v61, %v213_v62 }
  0xa1   :  { %v263_v0 = vadd.f32 %v262_v57, %v214_v63 }
  0xa2   :  { %v294_v56 = vpop.f32.mrf.mxu3 }
  0xa3   :  { %vm302_vm1 = vcmp.ge.f32.partialorder %v263_v0, 0.0  ;;  %v318_v1 = vmul.f32 0.2, %v263_v0  ;;  %v272_v2 = vpop.f32.mrf.mxu1 }
  0xa5   :  { %v334_v3 = vsel %vm302_vm1, %v263_v0, %v318_v1  ;;  %v233_v4 = vpop.f32.mrf.mxu2 }
  0xa6   :  { %350 = vst [vmem:[%s742_s3] sm:$0xff] %v334_v3  ;;  %v215_v5 = vpop.f32.mrf.mxu0  ;;  %v234_v38 = vadd.f32 %v667_v61, %v233_v4 }
  0xa7   :  { %v216_v6 = vadd.f32 %v667_v61, %v215_v5 }
  0xa9   :  { %v265_v7 = vadd.f32 %v264_v58, %v216_v6 }
  0xab   :  { %vm303_vm2 = vcmp.ge.f32.partialorder %v265_v7, 0.0  ;;  %v319_v8 = vmul.f32 0.2, %v265_v7  ;;  %v274_v9 = vpop.f32.mrf.mxu1 }
  0xad   :  { %v335_v10 = vsel %vm303_vm2, %v265_v7, %v319_v8  ;;  %v235_v11 = vpop.f32.mrf.mxu2 }
  0xae   :  { %351 = vst [vmem:[%s742_s3 + $0x8] sm:$0xff] %v335_v10  ;;  %v218_v13 = vpop.f32.mrf.mxu0  ;;  %v236_v53 = vadd.f32 %v667_v61, %v235_v11  ;;  %v297_v10 = vpop.f32.mrf.mxu3 }
  0xaf   :  { %v219_v14 = vadd.f32 %v667_v61, %v218_v13 }
  0xb1   :  { %v268_v15 = vadd.f32 %v267_v59, %v219_v14 }
  0xb3   :  { %vm304_vm3 = vcmp.ge.f32.partialorder %v268_v15, 0.0  ;;  %v320_v16 = vmul.f32 0.2, %v268_v15  ;;  %v678_v17 = vpop.f32.mrf.mxu1 }
  0xb5   :  { %v336_v18 = vsel %vm304_vm3, %v268_v15, %v320_v16  ;;  %v238_v19 = vpop.f32.mrf.mxu2 }
  0xb6   :  { %352 = vst [vmem:[%s742_s3 + $0x10] sm:$0xff] %v336_v18  ;;  %v239_v20 = vadd.f32 %v667_v61, %v238_v19  ;;  %v220_v21 = vpop.f32.mrf.mxu0 }
  0xb7   :  { %v221_v22 = vadd.f32 %v667_v61, %v220_v21 }
  0xb8   :  { %v288_v24 = vadd.f32 %v287_v12, %v239_v20 }
  0xb9   :  { %v270_v25 = vadd.f32 %v269_v60, %v221_v22 }
  0xba   :  { %vm312_vm4 = vcmp.ge.f32.partialorder %v288_v24, 0.0  ;;  %v328_v26 = vmul.f32 0.2, %v288_v24 }
  0xbb   :  { %vm305_vm5 = vcmp.ge.f32.partialorder %v270_v25, 0.0  ;;  %v321_v27 = vmul.f32 0.2, %v270_v25  ;;  %v685_v28 = vpop.f32.mrf.mxu1 }
  0xbc   :  { %v344_v29 = vsel %vm312_vm4, %v288_v24, %v328_v26 }
  0xbd   :  { %360 = vst [vmem:[%s742_s3 + $0x50] sm:$0xff] %v344_v29  ;;  %v337_v30 = vsel %vm305_vm5, %v270_v25, %v321_v27  ;;  %v240_v31 = vpop.f32.mrf.mxu2 }
  0xbe   :  { %353 = vst [vmem:[%s742_s3 + $0x18] sm:$0xff] %v337_v30  ;;  %v241_v32 = vadd.f32 %v667_v61, %v240_v31  ;;  %v223_v33 = vpop.f32.mrf.mxu0 }
  0xbf   :  { %v224_v34 = vadd.f32 %v667_v61, %v223_v33 }
  0xc0   :  { %v290_v35 = vadd.f32 %v289_v23, %v241_v32  ;;  %v299_v23 = vpop.f32.mrf.mxu3 }
  0xc1   :  { %v273_v36 = vadd.f32 %v272_v2, %v224_v34 }
  0xc2   :  { %vm313_vm6 = vcmp.ge.f32.partialorder %v290_v35, 0.0  ;;  %v329_v39 = vmul.f32 0.2, %v290_v35 }
  0xc3   :  { %vm306_vm7 = vcmp.ge.f32.partialorder %v273_v36, 0.0  ;;  %v322_v40 = vmul.f32 0.2, %v273_v36  ;;  %v282_v41 = vpop.f32.mrf.mxu1 }
  0xc4   :  { %v345_v42 = vsel %vm313_vm6, %v290_v35, %v329_v39  ;;  %v283_v43 = vadd.f32 %v282_v41, %v234_v38 }
  0xc5   :  { %361 = vst [vmem:[%s742_s3 + $0x58] sm:$0xff] %v345_v42  ;;  %v338_v44 = vsel %vm306_vm7, %v273_v36, %v322_v40  ;;  %v243_v45 = vpop.f32.mrf.mxu2 }
  0xc6   :  { %354 = vst [vmem:[%s742_s3 + $0x20] sm:$0xff] %v338_v44  ;;  %vm310_vm8 = vcmp.ge.f32.partialorder %v283_v43, 0.0  ;;  %v326_v46 = vmul.f32 0.2, %v283_v43  ;;  %v244_v47 = vadd.f32 %v667_v61, %v243_v45  ;;  %v225_v48 = vpop.f32.mrf.mxu0 }
  0xc7   :  { %v226_v49 = vadd.f32 %v667_v61, %v225_v48 }
  0xc8   :  { %v342_v50 = vsel %vm310_vm8, %v283_v43, %v326_v46  ;;  %v293_v51 = vadd.f32 %v292_v37, %v244_v47 }
  0xc9   :  { %358 = vst [vmem:[%s742_s3 + $0x40] sm:$0xff] %v342_v50  ;;  %v275_v52 = vadd.f32 %v274_v9, %v226_v49 }
  0xca   :  { %vm314_vm9 = vcmp.ge.f32.partialorder %v293_v51, 0.0  ;;  %v330_v54 = vmul.f32 0.2, %v293_v51 }
  0xcb   :  { %vm307_vm10 = vcmp.ge.f32.partialorder %v275_v52, 0.0  ;;  %v323_v55 = vmul.f32 0.2, %v275_v52  ;;  %v284_v57 = vpop.f32.mrf.mxu1 }
  0xcc   :  { %v346_v58 = vsel %vm314_vm9, %v293_v51, %v330_v54  ;;  %v285_v59 = vadd.f32 %v284_v57, %v236_v53 }
  0xcd   :  { %362 = vst [vmem:[%s742_s3 + $0x60] sm:$0xff] %v346_v58  ;;  %v339_v60 = vsel %vm307_vm10, %v275_v52, %v323_v55  ;;  %v245_v62 = vpop.f32.mrf.mxu2 }
  0xce   :  { %355 = vst [vmem:[%s742_s3 + $0x28] sm:$0xff] %v339_v60  ;;  %vm311_vm11 = vcmp.ge.f32.partialorder %v285_v59, 0.0  ;;  %v327_v63 = vmul.f32 0.2, %v285_v59  ;;  %v246_v0 = vadd.f32 %v667_v61, %v245_v62  ;;  %v228_v1 = vpop.f32.mrf.mxu0 }
  0xcf   :  { %v229_v2 = vadd.f32 %v667_v61, %v228_v1 }
  0xd0   :  { %v343_v3 = vsel %vm311_vm11, %v285_v59, %v327_v63  ;;  %v295_v4 = vadd.f32 %v294_v56, %v246_v0 }
  0xd1   :  { %359 = vst [vmem:[%s742_s3 + $0x48] sm:$0xff] %v343_v3  ;;  %v278_v5 = vadd.f32 %v678_v17, %v229_v2 }
  0xd2   :  { %vm315_vm12 = vcmp.ge.f32.partialorder %v295_v4, 0.0  ;;  %v331_v6 = vmul.f32 0.2, %v295_v4 }
  0xd3   :  { %vm308_vm13 = vcmp.ge.f32.partialorder %v278_v5, 0.0  ;;  %v324_v7 = vmul.f32 0.2, %v278_v5 }
  0xd4   :  { %v347_v8 = vsel %vm315_vm12, %v295_v4, %v331_v6 }
  0xd5   :  { %363 = vst [vmem:[%s742_s3 + $0x68] sm:$0xff] %v347_v8  ;;  %v340_v9 = vsel %vm308_vm13, %v278_v5, %v324_v7  ;;  %v248_v11 = vpop.f32.mrf.mxu2 }
  0xd6   :  { %356 = vst [vmem:[%s742_s3 + $0x30] sm:$0xff] %v340_v9  ;;  %v249_v12 = vadd.f32 %v667_v61, %v248_v11  ;;  %v230_v13 = vpop.f32.mrf.mxu0 }
  0xd7   :  { %v231_v14 = vadd.f32 %v667_v61, %v230_v13 }
  0xd8   :  { %v298_v15 = vadd.f32 %v297_v10, %v249_v12 }
  0xd9   :  { %v280_v16 = vadd.f32 %v685_v28, %v231_v14 }
  0xda   :  { %vm316_vm14 = vcmp.ge.f32.partialorder %v298_v15, 0.0  ;;  %v332_v17 = vmul.f32 0.2, %v298_v15 }
  0xdb   :  { %vm309_vm15 = vcmp.ge.f32.partialorder %v280_v16, 0.0  ;;  %v325_v18 = vmul.f32 0.2, %v280_v16 }
  0xdc   :  { %v348_v19 = vsel %vm316_vm14, %v298_v15, %v332_v17 }
  0xdd   :  { %364 = vst [vmem:[%s742_s3 + $0x70] sm:$0xff] %v348_v19  ;;  %v341_v20 = vsel %vm309_vm15, %v280_v16, %v325_v18  ;;  %v250_v21 = vpop.f32.mrf.mxu2 }
  0xde   :  { %357 = vst [vmem:[%s742_s3 + $0x38] sm:$0xff] %v341_v20  ;;  %v251_v22 = vadd.f32 %v667_v61, %v250_v21 }
  0xe0   :  { %v300_v24 = vadd.f32 %v299_v23, %v251_v22 }
  0xe2   :  { %vm317_vm0 = vcmp.ge.f32.partialorder %v300_v24, 0.0  ;;  %v333_v25 = vmul.f32 0.2, %v300_v24 }
  0xe4   :  { %v349_v26 = vsel %vm317_vm0, %v300_v24, %v333_v25 }
  0xe5   :  { %365 = vst [vmem:[%s742_s3 + $0x78] sm:$0xff] %v349_v26 }

// kernel: fpse_forward.15
= control target key start
LH: loop header
LB: loop body
LE: loop exit
PB: predicated region body
PF: predicated region fallthrough
CT: control target
= control target key end

     0   :  { %vm201_vm0 = vcmask 261120   ;;  %s543_s1 = inlined_call_operand.vmem [shape: bf16[288,128], index: 1, kind: input, shape index: {}]   ;;  %s544_s0 = inlined_call_operand.vmem [shape: bf16[32,288], index: 0, kind: input, shape index: {}]   ;;  %s545_s2 = inlined_call_operand.vmem [shape: f32[1,128], index: 2, kind: input, shape index: {}]   ;;  %s546_s3 = inlined_call_operand.vmem [shape: f32[32,128], index: 3, kind: output, shape index: {}]  }
   0x1   :  { %v396_v0 = vld [vmem:[%s543_s1 + $0x38] sm:$0xff]  ;;  %v395_v2 = vld [vmem:[%s543_s1 + $0x30] sm:$0xff]  ;;  %v406_v3 = vld [vmem:[%s543_s1 + $0x88] sm:$0xff] }
   0x2   :  { %v404_v1 = vld [vmem:[%s543_s1 + $0x78] sm:$0xff]  ;;  %208 = vmatpush.bf16.msra.mxu0 %v396_v0  ;;  %407 = vmatpush.bf16.msra.mxu3 %v396_v0  ;;  %v403_v4 = vld [vmem:[%s543_s1 + $0x70] sm:$0xff]  ;;  %v405_v5 = vld [vmem:[%s543_s1 + $0x80] sm:$0xff] }
   0x3   :  { %227 = vmatpush.bf16.msra.mxu1 %v404_v1  ;;  %252 = vmatpush.bf16.msra.mxu2 %v406_v3  ;;  %v295_v6 = vld [vmem:[%s544_s0 + $0x8] sm:$0xf]  ;;  %v385_v7 = vld [vmem:[%s544_s0 + $0x10] sm:$0xf0]  ;;  %v393_v11 = vld [vmem:[%s543_s1 + $0x20] sm:$0xff] }
   0x4   :  { %v394_v8 = vld [vmem:[%s543_s1 + $0x28] sm:$0xff]  ;;  %v296_v10 = vor.u32 %v385_v7, %v295_v6  ;;  %v401_v12 = vld [vmem:[%s543_s1 + $0x60] sm:$0xff]  ;;  %v392_v13 = vld [vmem:[%s543_s1 + $0x18] sm:$0xff] }
   0x5   :  { %v402_v9 = vld [vmem:[%s543_s1 + $0x68] sm:$0xff]  ;;  %v400_v14 = vld [vmem:[%s543_s1 + $0x58] sm:$0xff]  ;;  %v391_v15 = vld [vmem:[%s543_s1 + $0x10] sm:$0xff] }
   0x6   :  { %209 = vmatpush.bf16.msra.mxu0 %v395_v2  ;;  %408 = vmatpush.bf16.msra.mxu3 %v395_v2  ;;  %v399_v16 = vld [vmem:[%s543_s1 + $0x50] sm:$0xff]  ;;  %v307_v17 = vld [vmem:[%s544_s0 + $0x20] sm:$0xf]  ;;  %v388_v18 = vld [vmem:[%s544_s0 + $0x28] sm:$0xf0] }
   0x7   :  { %228 = vmatpush.bf16.msra.mxu1 %v403_v4  ;;  %253 = vmatpush.bf16.msra.mxu2 %v405_v5  ;;  %v390_v19 = vld [vmem:[%s543_s1 + $0x8] sm:$0xff]  ;;  %v308_v21 = vor.u32 %v388_v18, %v307_v17  ;;  %v389_v22 = vld [vmem:[%s543_s1] sm:$0xff]  ;;  %v299_v25 = vld [vmem:[%s544_s0 + $0x18] sm:$0xf] }
   0x8   :  { %v398_v20 = vld [vmem:[%s543_s1 + $0x48] sm:$0xff]  ;;  %v287_v23 = vld [vmem:[%s544_s0] sm:$0xf]  ;;  %v387_v26 = vld [vmem:[%s544_s0 + $0x20] sm:$0xf0] }
   0x9   :  { %v384_v24 = vld [vmem:[%s544_s0 + $0x8] sm:$0xf0]  ;;  %v397_v27 = vld [vmem:[%s543_s1 + $0x40] sm:$0xff]  ;;  %v289_v29 = vld [vmem:[%s544_s0 + $0xc] sm:$0xf0]  ;;  %v300_v31 = vor.u32 %v387_v26, %v299_v25 }
   0xa   :  { %210 = vmatpush.bf16.msra.mxu0 %v394_v8  ;;  %409 = vmatpush.bf16.msra.mxu3 %v394_v8  ;;  %v383_v28 = vld [vmem:[%s544_s0 + $0x4] sm:$0xf]  ;;  %v288_v30 = vor.u32 %v384_v24, %v287_v23  ;;  %v386_v33 = vld [vmem:[%s544_s0 + $0x1c] sm:$0xf]  ;;  %v301_v34 = vld [vmem:[%s544_s0 + $0x24] sm:$0xf0] }
   0xb   :  { %229 = vmatpush.bf16.msra.mxu1 %v402_v9  ;;  %381 = vmatmul.msk.bf16.vlgmr.msra.gmra.mxu2 %vm201_vm0, %v296_v10  ;;  %v292_v32 = vor.u32 %v383_v28, %v289_v29  ;;  %v304_v35 = vor.u32 %v386_v33, %v301_v34  ;;  %v415_v37 = vld [vmem:[%s545_s2] ss:$0 sm:$0xff] }
   0xe   :  { %211 = vmatpush.bf16.msra.mxu0 %v393_v11  ;;  %410 = vmatpush.bf16.msra.mxu3 %v393_v11 }
   0xf   :  { %230 = vmatpush.bf16.msra.mxu1 %v401_v12 }
  0x12   :  { %212 = vmatpush.bf16.msra.mxu0 %v392_v13  ;;  %411 = vmatpush.bf16.msra.mxu3 %v392_v13 }
  0x13   :  { %231 = vmatpush.bf16.msra.mxu1 %v400_v14 }
  0x16   :  { %213 = vmatpush.bf16.msra.mxu0 %v391_v15  ;;  %412 = vmatpush.bf16.msra.mxu3 %v391_v15 }
  0x17   :  { %232 = vmatpush.bf16.msra.mxu1 %v399_v16 }
  0x1a   :  { %214 = vmatpush.bf16.msra.mxu0 %v390_v19  ;;  %413 = vmatpush.bf16.msra.mxu3 %v390_v19 }
  0x1b   :  { %233 = vmatpush.bf16.msra.mxu1 %v398_v20  ;;  %382 = vmatmul.msk.bf16.gmra.mxu2 %vm201_vm0, %v308_v21 }
  0x1e   :  { %215 = vmatpush.bf16.msra.mxu0 %v389_v22  ;;  %414 = vmatpush.bf16.msra.mxu3 %v389_v22 }
  0x1f   :  { %234 = vmatpush.bf16.msra.mxu1 %v397_v27 }
  0x21   :  { %216 = vmatmul.bf16.vlgmr.msra.gmra.mxu0 %v288_v30  ;;  %221 = vmatmul.bf16.vlgmr.msra.gmra.mxu3 %v300_v31 }
  0x22   :  { %235 = vmatmul.bf16.vlgmr.msra.gmra.mxu1 %v292_v32 }
  0x32   :  { %240 = vmatmul.bf16.gmra.mxu1 %v304_v35 }
  0x8e   :  { %v255_v36 = vpop.f32.mrf.mxu2 }
  0x96   :  { %v257_v44 = vpop.f32.mrf.mxu2 }
  0x9e   :  { %v217_v38 = vpop.f32.mrf.mxu0  ;;  %v260_v55 = vpop.f32.mrf.mxu2 }
  0x9f   :  { %v218_v39 = vadd.f32 %v415_v37, %v217_v38  ;;  %v236_v40 = vpop.f32.mrf.mxu1 }
  0xa1   :  { %v237_v41 = vadd.f32 %v236_v40, %v218_v39 }
  0xa3   :  { %v256_v42 = vadd.f32 %v255_v36, %v237_v41 }
  0xa4   :  { %v222_v49 = vpop.f32.mrf.mxu3 }
  0xa5   :  { %vm265_vm1 = vcmp.ge.f32.partialorder %v256_v42, 0.0  ;;  %v269_v43 = vmul.f32 0.2, %v256_v42  ;;  %v223_v52 = vadd.f32 %v415_v37, %v222_v49 }
  0xa6   :  { %v219_v45 = vpop.f32.mrf.mxu0  ;;  %v262_v1 = vpop.f32.mrf.mxu2 }
  0xa7   :  { %v273_v46 = vsel %vm265_vm1, %v256_v42, %v269_v43  ;;  %v220_v47 = vadd.f32 %v415_v37, %v219_v45  ;;  %v238_v48 = vpop.f32.mrf.mxu1 }
  0xa8   :  { %277 = vst [vmem:[%s546_s3] sm:$0xff] %v273_v46 }
  0xa9   :  { %v239_v50 = vadd.f32 %v238_v48, %v220_v47 }
  0xab   :  { %v258_v51 = vadd.f32 %v257_v44, %v239_v50 }
  0xac   :  { %v224_v59 = vpop.f32.mrf.mxu3 }
  0xad   :  { %vm266_vm2 = vcmp.ge.f32.partialorder %v258_v51, 0.0  ;;  %v270_v53 = vmul.f32 0.2, %v258_v51  ;;  %v225_v61 = vadd.f32 %v415_v37, %v224_v59 }
  0xaf   :  { %v274_v54 = vsel %vm266_vm2, %v258_v51, %v270_v53  ;;  %v241_v56 = vpop.f32.mrf.mxu1 }
  0xb0   :  { %278 = vst [vmem:[%s546_s3 + $0x8] sm:$0xff] %v274_v54  ;;  %v242_v57 = vadd.f32 %v241_v56, %v223_v52 }
  0xb2   :  { %v261_v58 = vadd.f32 %v260_v55, %v242_v57 }
  0xb4   :  { %vm267_vm3 = vcmp.ge.f32.partialorder %v261_v58, 0.0  ;;  %v271_v60 = vmul.f32 0.2, %v261_v58 }
  0xb6   :  { %v275_v62 = vsel %vm267_vm3, %v261_v58, %v271_v60 }
  0xb7   :  { %279 = vst [vmem:[%s546_s3 + $0x10] sm:$0xff] %v275_v62  ;;  %v243_v63 = vpop.f32.mrf.mxu1 }
  0xb8   :  { %v244_v0 = vadd.f32 %v243_v63, %v225_v61 }
  0xba   :  { %v263_v2 = vadd.f32 %v262_v1, %v244_v0 }
  0xbc   :  { %vm268_vm4 = vcmp.ge.f32.partialorder %v263_v2, 0.0  ;;  %v272_v3 = vmul.f32 0.2, %v263_v2 }
  0xbe   :  { %v276_v4 = vsel %vm268_vm4, %v263_v2, %v272_v3 }
  0xbf   :  { %280 = vst [vmem:[%s546_s3 + $0x18] sm:$0xff] %v276_v4 }

// kernel: fpse_forward.17
= control target key start
LH: loop header
LB: loop body
LE: loop exit
PB: predicated region body
PF: predicated region fallthrough
CT: control target
= control target key end

     0   :  { %vm52_vm0 = vcmask 523264   ;;  %s140_s1 = inlined_call_operand.vmem [shape: bf16[64,128], index: 1, kind: input, shape index: {}]   ;;  %s141_s2 = inlined_call_operand.vmem [shape: f32[1,128], index: 2, kind: input, shape index: {}]   ;;  %s142_s0 = inlined_call_operand.vmem [shape: bf16[8,64], index: 0, kind: input, shape index: {}]   ;;  %s143_s3 = inlined_call_operand.vmem [shape: f32[8,128], index: 3, kind: output, shape index: {}]  }
   0x1   :  { %v97_v0 = vld [vmem:[%s140_s1 + $0x18] sm:$0xff]  ;;  %v96_v1 = vld [vmem:[%s140_s1 + $0x10] sm:$0xff]  ;;  %v95_v2 = vld [vmem:[%s140_s1 + $0x8] sm:$0xff] }
   0x2   :  { %60 = vmatpush.bf16.msra.mxu0 %v97_v0  ;;  %v94_v3 = vld [vmem:[%s140_s1] sm:$0xff] }
   0x3   :  { %v15_v4 = vld [vmem:[%s142_s0] sm:$0xf] }
   0x4   :  { %v98_v5 = vld [vmem:[%s141_s2] ss:$0 sm:$0xff] }
   0x6   :  { %61 = vmatpush.bf16.msra.mxu0 %v96_v1 }
   0xa   :  { %62 = vmatpush.bf16.msra.mxu0 %v95_v2 }
   0xe   :  { %63 = vmatpush.bf16.msra.mxu0 %v94_v3 }
  0x11   :  { %93 = vmatmul.msk.bf16.vlgmr.msra.gmra.mxu0 %vm52_vm0, %v15_v4 }
  0x8e   :  { %v65_v6 = vpop.f32.mrf.mxu0 }
  0x8f   :  { %v66_v7 = vadd.f32 %v98_v5, %v65_v6 }
  0x91   :  { %vm69_vm1 = vcmp.ge.f32.partialorder %v66_v7, 0.0  ;;  %v70_v8 = vmul.f32 0.2, %v66_v7 }
  0x93   :  { %v71_v9 = vsel %vm69_vm1, %v66_v7, %v70_v8 }
  0x94   :  { %72 = vst [vmem:[%s143_s3] sm:$0xff] %v71_v9 }
  0x96   :  { %v67_v10 = vpop.f32.mrf.mxu0 }

// kernel: fpse_forward.16
= control target key start
LH: loop header
LB: loop body
LE: loop exit
PB: predicated region body
PF: predicated region fallthrough
CT: control target
= control target key end

     0   :  { %vm327_vm0 = vcmask 523264   ;;  %s729_s1 = inlined_call_operand.vmem [shape: bf16[576,128], index: 1, kind: input, shape index: {}]   ;;  %s730_s2 = inlined_call_operand.vmem [shape: f32[1,128], index: 2, kind: input, shape index: {}]   ;;  %s731_s0 = inlined_call_operand.vmem [shape: bf16[8,576], index: 0, kind: input, shape index: {}]   ;;  %s732_s3 = inlined_call_operand.vmem [shape: f32[8,128], index: 3, kind: output, shape index: {}]  }
   0x1   :  { %v556_v0 = vld [vmem:[%s729_s1 + $0x38] sm:$0xff]  ;;  %v555_v4 = vld [vmem:[%s729_s1 + $0x30] sm:$0xff]  ;;  %v554_v8 = vld [vmem:[%s729_s1 + $0x28] sm:$0xff] }
   0x2   :  { %v572_v1 = vld [vmem:[%s729_s1 + $0xb8] sm:$0xff]  ;;  %331 = vmatpush.bf16.msra.mxu0 %v556_v0  ;;  %v571_v5 = vld [vmem:[%s729_s1 + $0xb0] sm:$0xff]  ;;  %v570_v9 = vld [vmem:[%s729_s1 + $0xa8] sm:$0xff] }
   0x3   :  { %v564_v2 = vld [vmem:[%s729_s1 + $0x78] sm:$0xff]  ;;  %357 = vmatpush.bf16.msra.mxu2 %v572_v1  ;;  %v563_v6 = vld [vmem:[%s729_s1 + $0x70] sm:$0xff]  ;;  %v562_v10 = vld [vmem:[%s729_s1 + $0x68] sm:$0xff] }
   0x4   :  { %v580_v3 = vld [vmem:[%s729_s1 + $0xf8] sm:$0xff]  ;;  %344 = vmatpush.bf16.msra.mxu1 %v564_v2  ;;  %v579_v7 = vld [vmem:[%s729_s1 + $0xf0] sm:$0xff]  ;;  %v578_v11 = vld [vmem:[%s729_s1 + $0xe8] sm:$0xff] }
   0x5   :  { %370 = vmatpush.bf16.msra.mxu3 %v580_v3  ;;  %v553_v12 = vld [vmem:[%s729_s1 + $0x20] sm:$0xff]  ;;  %v552_v16 = vld [vmem:[%s729_s1 + $0x18] sm:$0xff]  ;;  %v551_v20 = vld [vmem:[%s729_s1 + $0x10] sm:$0xff] }
   0x6   :  { %332 = vmatpush.bf16.msra.mxu0 %v555_v4  ;;  %v569_v13 = vld [vmem:[%s729_s1 + $0xa0] sm:$0xff]  ;;  %v568_v17 = vld [vmem:[%s729_s1 + $0x98] sm:$0xff]  ;;  %v567_v21 = vld [vmem:[%s729_s1 + $0x90] sm:$0xff] }
   0x7   :  { %358 = vmatpush.bf16.msra.mxu2 %v571_v5  ;;  %v561_v14 = vld [vmem:[%s729_s1 + $0x60] sm:$0xff]  ;;  %v560_v18 = vld [vmem:[%s729_s1 + $0x58] sm:$0xff]  ;;  %v559_v22 = vld [vmem:[%s729_s1 + $0x50] sm:$0xff] }
   0x8   :  { %345 = vmatpush.bf16.msra.mxu1 %v563_v6  ;;  %v577_v15 = vld [vmem:[%s729_s1 + $0xe0] sm:$0xff]  ;;  %v576_v19 = vld [vmem:[%s729_s1 + $0xd8] sm:$0xff]  ;;  %v575_v23 = vld [vmem:[%s729_s1 + $0xd0] sm:$0xff] }
   0x9   :  { %371 = vmatpush.bf16.msra.mxu3 %v579_v7  ;;  %v550_v24 = vld [vmem:[%s729_s1 + $0x8] sm:$0xff]  ;;  %v15_v26 = vld [vmem:[%s731_s0] sm:$0xff]  ;;  %v584_v38 = vld [vmem:[%s729_s1 + $0x118] sm:$0xff] }
   0xa   :  { %333 = vmatpush.bf16.msra.mxu0 %v554_v8  ;;  %v566_v25 = vld [vmem:[%s729_s1 + $0x88] sm:$0xff]  ;;  %v97_v30 = vunpack.c.l.b16 %v15_v26  ;;  %v549_v32 = vld [vmem:[%s729_s1] sm:$0xff]  ;;  %v98_v34 = vunpack.c.h.b16 %v15_v26  ;;  %v583_v43 = vld [vmem:[%s729_s1 + $0x110] sm:$0xff] }
   0xb   :  { %359 = vmatpush.bf16.msra.mxu2 %v570_v9  ;;  %v16_v27 = vld [vmem:[%s731_s0 + $0x8] sm:$0xff]  ;;  %v565_v33 = vld [vmem:[%s729_s1 + $0x80] sm:$0xff]  ;;  %v17_v45 = vld [vmem:[%s731_s0 + $0x10] sm:$0xf] }
   0xc   :  { %346 = vmatpush.bf16.msra.mxu1 %v562_v10  ;;  %v558_v28 = vld [vmem:[%s729_s1 + $0x48] sm:$0xff]  ;;  %v99_v31 = vunpack.c.l.b16 %v16_v27  ;;  %v100_v35 = vunpack.c.h.b16 %v16_v27  ;;  %v557_v36 = vld [vmem:[%s729_s1 + $0x40] sm:$0xff]  ;;  %v102_v39 = vpack.c.b16 %v97_v30, %v97_v30  ;;  %v103_v41 = vpack.c.b16 %v98_v34, %v98_v34 }
   0xd   :  { %372 = vmatpush.bf16.msra.mxu3 %v578_v11  ;;  %v574_v29 = vld [vmem:[%s729_s1 + $0xc8] sm:$0xff]  ;;  %v573_v37 = vld [vmem:[%s729_s1 + $0xc0] sm:$0xff]  ;;  %v101_v47 = vunpack.c.l.b16 %v17_v45 }
   0xe   :  { %334 = vmatpush.bf16.msra.mxu0 %v553_v12  ;;  %v104_v40 = vpack.c.b16 %v99_v31, %v99_v31  ;;  %v105_v42 = vpack.c.b16 %v100_v35, %v100_v35  ;;  %v582_v44 = vld [vmem:[%s729_s1 + $0x108] sm:$0xff]  ;;  %v581_v46 = vld [vmem:[%s729_s1 + $0x100] sm:$0xff] }
   0xf   :  { %360 = vmatpush.bf16.msra.mxu2 %v569_v13  ;;  %v106_v48 = vpack.c.b16 %v101_v47, %v101_v47  ;;  %v585_v50 = vld [vmem:[%s730_s2] ss:$0 sm:$0xff] }
  0x10   :  { %347 = vmatpush.bf16.msra.mxu1 %v561_v14 }
  0x11   :  { %373 = vmatpush.bf16.msra.mxu3 %v577_v15 }
  0x12   :  { %335 = vmatpush.bf16.msra.mxu0 %v552_v16 }
  0x13   :  { %361 = vmatpush.bf16.msra.mxu2 %v568_v17 }
  0x14   :  { %348 = vmatpush.bf16.msra.mxu1 %v560_v18 }
  0x15   :  { %374 = vmatpush.bf16.msra.mxu3 %v576_v19 }
  0x16   :  { %336 = vmatpush.bf16.msra.mxu0 %v551_v20 }
  0x17   :  { %362 = vmatpush.bf16.msra.mxu2 %v567_v21 }
  0x18   :  { %349 = vmatpush.bf16.msra.mxu1 %v559_v22 }
  0x19   :  { %375 = vmatpush.bf16.msra.mxu3 %v575_v23 }
  0x1a   :  { %337 = vmatpush.bf16.msra.mxu0 %v550_v24 }
  0x1b   :  { %363 = vmatpush.bf16.msra.mxu2 %v566_v25 }
  0x1c   :  { %350 = vmatpush.bf16.msra.mxu1 %v558_v28 }
  0x1d   :  { %376 = vmatpush.bf16.msra.mxu3 %v574_v29 }
  0x1e   :  { %338 = vmatpush.bf16.msra.mxu0 %v549_v32 }
  0x1f   :  { %364 = vmatpush.bf16.msra.mxu2 %v565_v33 }
  0x20   :  { %351 = vmatpush.bf16.msra.mxu1 %v557_v36 }
  0x21   :  { %377 = vmatpush.bf16.msra.mxu3 %v573_v37  ;;  %339 = vmatmul.bf16.vlgmr.msra.gmra.mxu0 %v102_v39 }
  0x22   :  { %387 = vmatpush.bf16.msrb.mxu0 %v584_v38  ;;  %365 = vmatmul.bf16.vlgmr.msra.gmra.mxu2 %v104_v40 }
  0x23   :  { %352 = vmatmul.bf16.vlgmr.msra.gmra.mxu1 %v103_v41 }
  0x24   :  { %378 = vmatmul.bf16.vlgmr.msra.gmra.mxu3 %v105_v42 }
  0x26   :  { %388 = vmatpush.bf16.msrb.mxu0 %v583_v43 }
  0x2a   :  { %389 = vmatpush.bf16.msrb.mxu0 %v582_v44 }
  0x2e   :  { %390 = vmatpush.bf16.msrb.mxu0 %v581_v46 }
  0x31   :  { %548 = vmatmul.msk.bf16.vlgmr.msrb.gmra.mxu0 %vm327_vm0, %v106_v48 }
  0x9e   :  { %v340_v49 = vpop.f32.mrf.mxu0 }
  0x9f   :  { %v341_v52 = vadd.f32 %v585_v50, %v340_v49 }
  0xa0   :  { %v353_v51 = vpop.f32.mrf.mxu1 }
  0xa1   :  { %v354_v56 = vadd.f32 %v353_v51, %v341_v52 }
  0xa5   :  { %v366_v53 = vpop.f32.mrf.mxu2 }
  0xa6   :  { %v342_v55 = vpop.f32.mrf.mxu0  ;;  %v367_v58 = vadd.f32 %v366_v53, %v354_v56 }
  0xa7   :  { %v379_v54 = vpop.f32.mrf.mxu3 }
  0xa8   :  { %v355_v57 = vpop.f32.mrf.mxu1  ;;  %v380_v60 = vadd.f32 %v379_v54, %v367_v58 }
  0xad   :  { %v368_v59 = vpop.f32.mrf.mxu2 }
  0xae   :  { %v392_v62 = vpop.f32.mrf.mxu0 }
  0xaf   :  { %v381_v61 = vpop.f32.mrf.mxu3  ;;  %v393_v63 = vadd.f32 %v392_v62, %v380_v60 }
  0xb1   :  { %vm396_vm1 = vcmp.ge.f32.partialorder %v393_v63, 0.0  ;;  %v397_v0 = vmul.f32 0.2, %v393_v63 }
  0xb3   :  { %v398_v1 = vsel %vm396_vm1, %v393_v63, %v397_v0 }
  0xb4   :  { %399 = vst [vmem:[%s732_s3] sm:$0xff] %v398_v1 }
  0xb6   :  { %v394_v2 = vpop.f32.mrf.mxu0 }

// kernel: fpse_forward.18
= control target key start
LH: loop header
LB: loop body
LE: loop exit
PB: predicated region body
PF: predicated region fallthrough
CT: control target
= control target key end

     0   :  { %vm68_vm0 = vcmask 523264   ;;  %s229_s1 = inlined_call_operand.vmem [shape: bf16[64,128], index: 1, kind: input, shape index: {}]   ;;  %s230_s2 = inlined_call_operand.vmem [shape: f32[1,128], index: 2, kind: input, shape index: {}]   ;;  %s231_s0 = inlined_call_operand.vmem [shape: bf16[32,64], index: 0, kind: input, shape index: {}]   ;;  %s232_s3 = inlined_call_operand.vmem [shape: f32[32,128], index: 3, kind: input, shape index: {}]   ;;  %s233_s4 = inlined_call_operand.vmem [shape: f32[32,128], index: 4, kind: output, shape index: {}]  }
   0x1   :  { %v153_v0 = vld [vmem:[%s229_s1 + $0x18] sm:$0xff]  ;;  %v152_v1 = vld [vmem:[%s229_s1 + $0x10] sm:$0xff]  ;;  %v151_v2 = vld [vmem:[%s229_s1 + $0x8] sm:$0xff] }
   0x2   :  { %79 = vmatpush.bf16.msra.mxu0 %v153_v0  ;;  %154 = vmatpush.bf16.msra.mxu1 %v153_v0  ;;  %v150_v3 = vld [vmem:[%s229_s1] sm:$0xff]  ;;  %v149_v5 = vld [vmem:[%s231_s0 + $0x8] sm:$0xff]  ;;  %v108_v12 = vld [vmem:[%s232_s3 + $0x10] sm:$0xff] }
   0x3   :  { %v148_v4 = vld [vmem:[%s231_s0] sm:$0xff]  ;;  %v107_v23 = vld [vmem:[%s232_s3 + $0x8] sm:$0xff]  ;;  %v109_v24 = vld [vmem:[%s232_s3 + $0x18] sm:$0xff] }
   0x4   :  { %v158_v6 = vld [vmem:[%s230_s2] ss:$0 sm:$0xff] }
   0x5   :  { %v106_v11 = vld [vmem:[%s232_s3] sm:$0xff] }
   0x6   :  { %80 = vmatpush.bf16.msra.mxu0 %v152_v1  ;;  %155 = vmatpush.bf16.msra.mxu1 %v152_v1 }
   0xa   :  { %81 = vmatpush.bf16.msra.mxu0 %v151_v2  ;;  %156 = vmatpush.bf16.msra.mxu1 %v151_v2 }
   0xe   :  { %82 = vmatpush.bf16.msra.mxu0 %v150_v3  ;;  %157 = vmatpush.bf16.msra.mxu1 %v150_v3 }
  0x11   :  { %146 = vmatmul.msk.bf16.vlgmr.msra.gmra.mxu0 %vm68_vm0, %v148_v4  ;;  %147 = vmatmul.msk.bf16.vlgmr.msra.gmra.mxu1 %vm68_vm0, %v149_v5 }
  0x8e   :  { %v84_v7 = vpop.f32.mrf.mxu0  ;;  %v89_v8 = vpop.f32.mrf.mxu1 }
  0x8f   :  { %v85_v9 = vadd.f32 %v158_v6, %v84_v7  ;;  %v90_v10 = vadd.f32 %v158_v6, %v89_v8 }
  0x91   :  { %vm94_vm1 = vcmp.ge.f32.partialorder %v85_v9, 0.0  ;;  %v98_v13 = vmul.f32 0.2, %v85_v9  ;;  %vm96_vm2 = vcmp.ge.f32.partialorder %v90_v10, 0.0  ;;  %v100_v14 = vmul.f32 0.2, %v90_v10 }
  0x93   :  { %v102_v15 = vsel %vm94_vm1, %v85_v9, %v98_v13  ;;  %v104_v16 = vsel %vm96_vm2, %v90_v10, %v100_v14 }
  0x94   :  { %v110_v17 = vadd.f32 %v106_v11, %v102_v15  ;;  %v112_v18 = vadd.f32 %v108_v12, %v104_v16 }
  0x96   :  { %114 = vst [vmem:[%s233_s4] sm:$0xff] %v110_v17  ;;  %v86_v19 = vpop.f32.mrf.mxu0  ;;  %v91_v20 = vpop.f32.mrf.mxu1 }
  0x97   :  { %116 = vst [vmem:[%s233_s4 + $0x10] sm:$0xff] %v112_v18  ;;  %v87_v21 = vadd.f32 %v158_v6, %v86_v19  ;;  %v92_v22 = vadd.f32 %v158_v6, %v91_v20 }
  0x99   :  { %vm95_vm3 = vcmp.ge.f32.partialorder %v87_v21, 0.0  ;;  %v99_v25 = vmul.f32 0.2, %v87_v21  ;;  %vm97_vm4 = vcmp.ge.f32.partialorder %v92_v22, 0.0  ;;  %v101_v26 = vmul.f32 0.2, %v92_v22 }
  0x9b   :  { %v103_v27 = vsel %vm95_vm3, %v87_v21, %v99_v25  ;;  %v105_v28 = vsel %vm97_vm4, %v92_v22, %v101_v26 }
  0x9c   :  { %v111_v29 = vadd.f32 %v107_v23, %v103_v27  ;;  %v113_v30 = vadd.f32 %v109_v24, %v105_v28 }
  0x9e   :  { %115 = vst [vmem:[%s233_s4 + $0x8] sm:$0xff] %v111_v29 }
  0x9f   :  { %117 = vst [vmem:[%s233_s4 + $0x18] sm:$0xff] %v113_v30 }

// kernel: fpse_forward.19
= control target key start
LH: loop header
LB: loop body
LE: loop exit
PB: predicated region body
PF: predicated region fallthrough
CT: control target
= control target key end

     0   :  { %vm94_vm0 = vcmask 261120   ;;  %s513_s1 = inlined_call_operand.vmem [shape: bf16[32,128], index: 1, kind: input, shape index: {}]   ;;  %s514_s0 = inlined_call_operand.vmem [shape: bf16[128,32], index: 0, kind: input, shape index: {}]   ;;  %s515_s2 = inlined_call_operand.vmem [shape: f32[1,128], index: 2, kind: input, shape index: {}]   ;;  %s516_s3 = inlined_call_operand.vmem [shape: f32[128,128], index: 3, kind: input, shape index: {}]   ;;  %s517_s4 = inlined_call_operand.vmem [shape: f32[128,128], index: 4, kind: output, shape index: {}]  }
   0x1   :  { %v325_v0 = vld [vmem:[%s513_s1 + $0x8] sm:$0xff]  ;;  %v324_v1 = vld [vmem:[%s513_s1] sm:$0xff]  ;;  %v318_v3 = vld [vmem:[%s514_s0 + $0x10] sm:$0xff] }
   0x2   :  { %125 = vmatpush.bf16.msra.mxu0 %v325_v0  ;;  %326 = vmatpush.bf16.msra.mxu1 %v325_v0  ;;  %v316_v2 = vld [vmem:[%s514_s0] sm:$0xff]  ;;  %v322_v5 = vld [vmem:[%s514_s0 + $0x30] sm:$0xff]  ;;  %v317_v6 = vld [vmem:[%s514_s0 + $0x8] sm:$0xff] }
   0x3   :  { %327 = vmatpush.bf16.msra.mxu2 %v325_v0  ;;  %328 = vmatpush.bf16.msra.mxu3 %v325_v0  ;;  %v320_v4 = vld [vmem:[%s514_s0 + $0x20] sm:$0xff]  ;;  %v319_v7 = vld [vmem:[%s514_s0 + $0x18] sm:$0xff]  ;;  %v321_v8 = vld [vmem:[%s514_s0 + $0x28] sm:$0xff] }
   0x4   :  { %v323_v9 = vld [vmem:[%s514_s0 + $0x38] sm:$0xff]  ;;  %v399_v10 = vld [vmem:[%s515_s2] ss:$0 sm:$0xff]  ;;  %v217_v32 = vld [vmem:[%s516_s3 + $0x8] sm:$0xff] }
   0x5   :  { %v216_v15 = vld [vmem:[%s516_s3] sm:$0xff]  ;;  %v221_v34 = vld [vmem:[%s516_s3 + $0x28] sm:$0xff]  ;;  %v218_v58 = vld [vmem:[%s516_s3 + $0x10] sm:$0xff] }
   0x6   :  { %126 = vmatpush.bf16.msra.mxu0 %v324_v1  ;;  %329 = vmatpush.bf16.msra.mxu1 %v324_v1  ;;  %v220_v16 = vld [vmem:[%s516_s3 + $0x20] sm:$0xff]  ;;  %v225_v53 = vld [vmem:[%s516_s3 + $0x48] sm:$0xff]  ;;  %v222_v63 = vld [vmem:[%s516_s3 + $0x30] sm:$0xff] }
   0x7   :  { %330 = vmatpush.bf16.msra.mxu2 %v324_v1  ;;  %331 = vmatpush.bf16.msra.mxu3 %v324_v1  ;;  %v224_v26 = vld [vmem:[%s516_s3 + $0x40] sm:$0xff]  ;;  %v229_v54 = vld [vmem:[%s516_s3 + $0x68] sm:$0xff] }
   0x8   :  { %v228_v30 = vld [vmem:[%s516_s3 + $0x60] sm:$0xff] }
   0x9   :  { %308 = vmatmul.msk.bf16.vlgmr.msra.gmra.mxu0 %vm94_vm0, %v316_v2  ;;  %310 = vmatmul.msk.bf16.vlgmr.msra.gmra.mxu1 %vm94_vm0, %v318_v3 }
   0xa   :  { %312 = vmatmul.msk.bf16.vlgmr.msra.gmra.mxu2 %vm94_vm0, %v320_v4  ;;  %314 = vmatmul.msk.bf16.vlgmr.msra.gmra.mxu3 %vm94_vm0, %v322_v5 }
  0x19   :  { %309 = vmatmul.msk.bf16.gmra.mxu0 %vm94_vm0, %v317_v6  ;;  %311 = vmatmul.msk.bf16.gmra.mxu1 %vm94_vm0, %v319_v7 }
  0x1a   :  { %313 = vmatmul.msk.bf16.gmra.mxu2 %vm94_vm0, %v321_v8  ;;  %315 = vmatmul.msk.bf16.gmra.mxu3 %vm94_vm0, %v323_v9 }
  0x86   :  { %v128_v11 = vpop.f32.mrf.mxu0  ;;  %v138_v12 = vpop.f32.mrf.mxu1 }
  0x87   :  { %v129_v13 = vadd.f32 %v399_v10, %v128_v11  ;;  %v139_v14 = vadd.f32 %v399_v10, %v138_v12 }
  0x89   :  { %vm168_vm1 = vcmp.ge.f32.partialorder %v129_v13, 0.0  ;;  %v184_v17 = vmul.f32 0.2, %v129_v13  ;;  %vm172_vm2 = vcmp.ge.f32.partialorder %v139_v14, 0.0  ;;  %v188_v18 = vmul.f32 0.2, %v139_v14 }
  0x8b   :  { %v200_v19 = vsel %vm168_vm1, %v129_v13, %v184_v17  ;;  %v204_v20 = vsel %vm172_vm2, %v139_v14, %v188_v18  ;;  %v226_v14 = vld [vmem:[%s516_s3 + $0x50] sm:$0xff] }
  0x8c   :  { %v232_v21 = vadd.f32 %v216_v15, %v200_v19  ;;  %v236_v22 = vadd.f32 %v220_v16, %v204_v20  ;;  %v230_v15 = vld [vmem:[%s516_s3 + $0x70] sm:$0xff]  ;;  %v219_v19 = vld [vmem:[%s516_s3 + $0x18] sm:$0xff] }
  0x8d   :  { %v148_v23 = vpop.f32.mrf.mxu2  ;;  %v158_v24 = vpop.f32.mrf.mxu3 }
  0x8e   :  { %248 = vst [vmem:[%s517_s4] sm:$0xff] %v232_v21  ;;  %v149_v25 = vadd.f32 %v399_v10, %v148_v23  ;;  %v159_v27 = vadd.f32 %v399_v10, %v158_v24  ;;  %v130_v28 = vpop.f32.mrf.mxu0  ;;  %v140_v29 = vpop.f32.mrf.mxu1  ;;  %v223_v24 = vld [vmem:[%s516_s3 + $0x38] sm:$0xff] }
  0x8f   :  { %252 = vst [vmem:[%s517_s4 + $0x20] sm:$0xff] %v236_v22  ;;  %v131_v31 = vadd.f32 %v399_v10, %v130_v28  ;;  %v141_v33 = vadd.f32 %v399_v10, %v140_v29 }
  0x90   :  { %vm176_vm3 = vcmp.ge.f32.partialorder %v149_v25, 0.0  ;;  %v192_v35 = vmul.f32 0.2, %v149_v25  ;;  %vm180_vm4 = vcmp.ge.f32.partialorder %v159_v27, 0.0  ;;  %v196_v36 = vmul.f32 0.2, %v159_v27 }
  0x91   :  { %vm169_vm5 = vcmp.ge.f32.partialorder %v131_v31, 0.0  ;;  %v185_v37 = vmul.f32 0.2, %v131_v31  ;;  %vm173_vm6 = vcmp.ge.f32.partialorder %v141_v33, 0.0  ;;  %v189_v38 = vmul.f32 0.2, %v141_v33 }
  0x92   :  { %v208_v39 = vsel %vm176_vm3, %v149_v25, %v192_v35  ;;  %v212_v40 = vsel %vm180_vm4, %v159_v27, %v196_v36 }
  0x93   :  { %v240_v41 = vadd.f32 %v224_v26, %v208_v39  ;;  %v244_v42 = vadd.f32 %v228_v30, %v212_v40  ;;  %v201_v43 = vsel %vm169_vm5, %v131_v31, %v185_v37  ;;  %v205_v44 = vsel %vm173_vm6, %v141_v33, %v189_v38  ;;  %v227_v37 = vld [vmem:[%s516_s3 + $0x58] sm:$0xff] }
  0x94   :  { %v233_v45 = vadd.f32 %v217_v32, %v201_v43  ;;  %v237_v46 = vadd.f32 %v221_v34, %v205_v44 }
  0x95   :  { %256 = vst [vmem:[%s517_s4 + $0x40] sm:$0xff] %v240_v41  ;;  %v150_v47 = vpop.f32.mrf.mxu2  ;;  %v160_v48 = vpop.f32.mrf.mxu3 }
  0x96   :  { %260 = vst [vmem:[%s517_s4 + $0x60] sm:$0xff] %v244_v42  ;;  %v151_v49 = vadd.f32 %v399_v10, %v150_v47  ;;  %v161_v50 = vadd.f32 %v399_v10, %v160_v48  ;;  %v133_v51 = vpop.f32.mrf.mxu0  ;;  %v143_v52 = vpop.f32.mrf.mxu1 }
  0x97   :  { %249 = vst [vmem:[%s517_s4 + $0x8] sm:$0xff] %v233_v45  ;;  %v134_v55 = vadd.f32 %v399_v10, %v133_v51  ;;  %v144_v56 = vadd.f32 %v399_v10, %v143_v52 }
  0x98   :  { %253 = vst [vmem:[%s517_s4 + $0x28] sm:$0xff] %v237_v46  ;;  %vm177_vm7 = vcmp.ge.f32.partialorder %v151_v49, 0.0  ;;  %v193_v57 = vmul.f32 0.2, %v151_v49  ;;  %vm181_vm8 = vcmp.ge.f32.partialorder %v161_v50, 0.0 }
  0x99   :  { %v197_v59 = vmul.f32 0.2, %v161_v50  ;;  %vm170_vm9 = vcmp.ge.f32.partialorder %v134_v55, 0.0  ;;  %v186_v60 = vmul.f32 0.2, %v134_v55  ;;  %vm174_vm10 = vcmp.ge.f32.partialorder %v144_v56, 0.0 }
  0x9a   :  { %v209_v61 = vsel %vm177_vm7, %v151_v49, %v193_v57  ;;  %v190_v62 = vmul.f32 0.2, %v144_v56 }
  0x9b   :  { %v241_v0 = vadd.f32 %v225_v53, %v209_v61  ;;  %v213_v1 = vsel %vm181_vm8, %v161_v50, %v197_v59  ;;  %v202_v2 = vsel %vm170_vm9, %v134_v55, %v186_v60 }
  0x9c   :  { %v245_v3 = vadd.f32 %v229_v54, %v213_v1  ;;  %v234_v4 = vadd.f32 %v218_v58, %v202_v2  ;;  %v206_v5 = vsel %vm174_vm10, %v144_v56, %v190_v62 }
  0x9d   :  { %257 = vst [vmem:[%s517_s4 + $0x48] sm:$0xff] %v241_v0  ;;  %v238_v6 = vadd.f32 %v222_v63, %v206_v5  ;;  %v153_v7 = vpop.f32.mrf.mxu2  ;;  %v163_v8 = vpop.f32.mrf.mxu3 }
  0x9e   :  { %261 = vst [vmem:[%s517_s4 + $0x68] sm:$0xff] %v245_v3  ;;  %v154_v9 = vadd.f32 %v399_v10, %v153_v7  ;;  %v164_v11 = vadd.f32 %v399_v10, %v163_v8  ;;  %v135_v12 = vpop.f32.mrf.mxu0  ;;  %v145_v13 = vpop.f32.mrf.mxu1 }
  0x9f   :  { %250 = vst [vmem:[%s517_s4 + $0x10] sm:$0xff] %v234_v4  ;;  %v136_v16 = vadd.f32 %v399_v10, %v135_v12  ;;  %v146_v17 = vadd.f32 %v399_v10, %v145_v13 }
  0xa0   :  { %254 = vst [vmem:[%s517_s4 + $0x30] sm:$0xff] %v238_v6  ;;  %vm178_vm11 = vcmp.ge.f32.partialorder %v154_v9, 0.0  ;;  %v194_v18 = vmul.f32 0.2, %v154_v9  ;;  %vm182_vm12 = vcmp.ge.f32.partialorder %v164_v11, 0.0 }
  0xa1   :  { %v198_v20 = vmul.f32 0.2, %v164_v11  ;;  %vm171_vm13 = vcmp.ge.f32.partialorder %v136_v16, 0.0  ;;  %v187_v21 = vmul.f32 0.2, %v136_v16  ;;  %vm175_vm14 = vcmp.ge.f32.partialorder %v146_v17, 0.0 }
  0xa2   :  { %v210_v22 = vsel %vm178_vm11, %v154_v9, %v194_v18  ;;  %v191_v23 = vmul.f32 0.2, %v146_v17 }
  0xa3   :  { %v242_v25 = vadd.f32 %v226_v14, %v210_v22  ;;  %v214_v26 = vsel %vm182_vm12, %v164_v11, %v198_v20  ;;  %v203_v27 = vsel %vm171_vm13, %v136_v16, %v187_v21 }
  0xa4   :  { %v246_v28 = vadd.f32 %v230_v15, %v214_v26  ;;  %v235_v29 = vadd.f32 %v219_v19, %v203_v27  ;;  %v207_v30 = vsel %vm175_vm14, %v146_v17, %v191_v23 }
  0xa5   :  { %258 = vst [vmem:[%s517_s4 + $0x50] sm:$0xff] %v242_v25  ;;  %v239_v31 = vadd.f32 %v223_v24, %v207_v30  ;;  %v155_v32 = vpop.f32.mrf.mxu2  ;;  %v165_v33 = vpop.f32.mrf.mxu3 }
  0xa6   :  { %262 = vst [vmem:[%s517_s4 + $0x70] sm:$0xff] %v246_v28  ;;  %v156_v34 = vadd.f32 %v399_v10, %v155_v32  ;;  %v166_v35 = vadd.f32 %v399_v10, %v165_v33  ;;  %v231_v10 = vld [vmem:[%s516_s3 + $0x78] sm:$0xff] }
  0xa7   :  { %251 = vst [vmem:[%s517_s4 + $0x18] sm:$0xff] %v235_v29 }
  0xa8   :  { %255 = vst [vmem:[%s517_s4 + $0x38] sm:$0xff] %v239_v31  ;;  %vm179_vm15 = vcmp.ge.f32.partialorder %v156_v34, 0.0  ;;  %v195_v36 = vmul.f32 0.2, %v156_v34  ;;  %vm183_vm0 = vcmp.ge.f32.partialorder %v166_v35, 0.0 }
  0xa9   :  { %v199_v38 = vmul.f32 0.2, %v166_v35 }
  0xaa   :  { %v211_v39 = vsel %vm179_vm15, %v156_v34, %v195_v36 }
  0xab   :  { %v243_v40 = vadd.f32 %v227_v37, %v211_v39  ;;  %v215_v41 = vsel %vm183_vm0, %v166_v35, %v199_v38 }
  0xac   :  { %v247_v42 = vadd.f32 %v231_v10, %v215_v41 }
  0xad   :  { %259 = vst [vmem:[%s517_s4 + $0x58] sm:$0xff] %v243_v40 }
  0xae   :  { %263 = vst [vmem:[%s517_s4 + $0x78] sm:$0xff] %v247_v42 }

// kernel: fpse_forward.23
= control target key start
LH: loop header
LB: loop body
LE: loop exit
PB: predicated region body
PF: predicated region fallthrough
CT: control target
= control target key end

     0   :  { %vm207_vm0 = vcmask 261120   ;;  %s708_s1 = inlined_call_operand.vmem [shape: bf16[288,128], index: 1, kind: input, shape index: {}]   ;;  %s709_s0 = inlined_call_operand.vmem [shape: bf16[32,288], index: 0, kind: input, shape index: {}]   ;;  %s710_s3 = inlined_call_operand.vmem [shape: bf16[128,128], index: 3, kind: input, shape index: {}]   ;;  %s711_s2 = inlined_call_operand.vmem [shape: f32[1,128], index: 2, kind: input, shape index: {}]   ;;  %s712_s4 = inlined_call_operand.vmem [shape: f32[1,128], index: 4, kind: input, shape index: {}]   ;;  %s713_s5 = inlined_call_operand.vmem [shape: f32[32,128], index: 5, kind: output, shape index: {}]  }
   0x1   :  { %v523_v0 = vld [vmem:[%s708_s1 + $0x38] sm:$0xff]  ;;  %v522_v2 = vld [vmem:[%s708_s1 + $0x30] sm:$0xff]  ;;  %v533_v4 = vld [vmem:[%s708_s1 + $0x88] sm:$0xff] }
   0x2   :  { %v531_v1 = vld [vmem:[%s708_s1 + $0x78] sm:$0xff]  ;;  %214 = vmatpush.bf16.msra.mxu0 %v523_v0  ;;  %v530_v3 = vld [vmem:[%s708_s1 + $0x70] sm:$0xff]  ;;  %258 = vmatpush.bf16.msra.mxu2 %v533_v4  ;;  %v532_v5 = vld [vmem:[%s708_s1 + $0x80] sm:$0xff] }
   0x3   :  { %233 = vmatpush.bf16.msra.mxu1 %v531_v1  ;;  %v390_v6 = vld [vmem:[%s709_s0 + $0x8] sm:$0xf]  ;;  %v512_v7 = vld [vmem:[%s709_s0 + $0x10] sm:$0xf0]  ;;  %v520_v11 = vld [vmem:[%s708_s1 + $0x20] sm:$0xff] }
   0x4   :  { %v521_v8 = vld [vmem:[%s708_s1 + $0x28] sm:$0xff]  ;;  %v391_v10 = vor.u32 %v512_v7, %v390_v6  ;;  %v528_v12 = vld [vmem:[%s708_s1 + $0x60] sm:$0xff]  ;;  %v519_v13 = vld [vmem:[%s708_s1 + $0x18] sm:$0xff] }
   0x5   :  { %v529_v9 = vld [vmem:[%s708_s1 + $0x68] sm:$0xff]  ;;  %v527_v14 = vld [vmem:[%s708_s1 + $0x58] sm:$0xff]  ;;  %v518_v16 = vld [vmem:[%s708_s1 + $0x10] sm:$0xff] }
   0x6   :  { %215 = vmatpush.bf16.msra.mxu0 %v522_v2  ;;  %259 = vmatpush.bf16.msra.mxu2 %v532_v5  ;;  %v541_v15 = vld [vmem:[%s710_s3 + $0x38] sm:$0xff]  ;;  %v526_v17 = vld [vmem:[%s708_s1 + $0x50] sm:$0xff]  ;;  %v402_v19 = vld [vmem:[%s709_s0 + $0x20] sm:$0xf] }
   0x7   :  { %234 = vmatpush.bf16.msra.mxu1 %v530_v3  ;;  %353 = vmatpush.bf16.msra.mxu3 %v541_v15  ;;  %v540_v18 = vld [vmem:[%s710_s3 + $0x30] sm:$0xff]  ;;  %v515_v20 = vld [vmem:[%s709_s0 + $0x28] sm:$0xf0]  ;;  %v516_v24 = vld [vmem:[%s708_s1] sm:$0xff] }
   0x8   :  { %v517_v21 = vld [vmem:[%s708_s1 + $0x8] sm:$0xff]  ;;  %v403_v23 = vor.u32 %v515_v20, %v402_v19  ;;  %v524_v25 = vld [vmem:[%s708_s1 + $0x40] sm:$0xff]  ;;  %v384_v29 = vld [vmem:[%s709_s0 + $0xc] sm:$0xf0] }
   0x9   :  { %476 = vmatmul.msk.bf16.vlgmr.msra.gmra.mxu2 %vm207_vm0, %v391_v10  ;;  %v525_v22 = vld [vmem:[%s708_s1 + $0x48] sm:$0xff]  ;;  %v382_v26 = vld [vmem:[%s709_s0] sm:$0xf]  ;;  %v510_v28 = vld [vmem:[%s709_s0 + $0x4] sm:$0xf] }
   0xa   :  { %216 = vmatpush.bf16.msra.mxu0 %v521_v8  ;;  %v511_v27 = vld [vmem:[%s709_s0 + $0x8] sm:$0xf0]  ;;  %v387_v31 = vor.u32 %v510_v28, %v384_v29  ;;  %v394_v32 = vld [vmem:[%s709_s0 + $0x18] sm:$0xf]  ;;  %v514_v33 = vld [vmem:[%s709_s0 + $0x20] sm:$0xf0] }
   0xb   :  { %235 = vmatpush.bf16.msra.mxu1 %v529_v9  ;;  %354 = vmatpush.bf16.msra.mxu3 %v540_v18  ;;  %v383_v30 = vor.u32 %v511_v27, %v382_v26  ;;  %v513_v34 = vld [vmem:[%s709_s0 + $0x1c] sm:$0xf]  ;;  %v396_v35 = vld [vmem:[%s709_s0 + $0x24] sm:$0xf0]  ;;  %v395_v36 = vor.u32 %v514_v33, %v394_v32  ;;  %v538_v39 = vld [vmem:[%s710_s3 + $0x20] sm:$0xff] }
   0xc   :  { %v399_v37 = vor.u32 %v513_v34, %v396_v35  ;;  %v539_v38 = vld [vmem:[%s710_s3 + $0x28] sm:$0xff]  ;;  %v537_v40 = vld [vmem:[%s710_s3 + $0x18] sm:$0xff]  ;;  %v536_v41 = vld [vmem:[%s710_s3 + $0x10] sm:$0xff] }
   0xd   :  { %v535_v42 = vld [vmem:[%s710_s3 + $0x8] sm:$0xff]  ;;  %v534_v43 = vld [vmem:[%s710_s3] sm:$0xff] }
   0xe   :  { %217 = vmatpush.bf16.msra.mxu0 %v520_v11  ;;  %v542_v45 = vld [vmem:[%s711_s2] ss:$0 sm:$0xff] }
   0xf   :  { %236 = vmatpush.bf16.msra.mxu1 %v528_v12  ;;  %355 = vmatpush.bf16.msra.mxu3 %v539_v38  ;;  %v543_v15 = vld [vmem:[%s712_s4] ss:$0 sm:$0xff] }
  0x12   :  { %218 = vmatpush.bf16.msra.mxu0 %v519_v13 }
  0x13   :  { %237 = vmatpush.bf16.msra.mxu1 %v527_v14  ;;  %356 = vmatpush.bf16.msra.mxu3 %v538_v39 }
  0x16   :  { %219 = vmatpush.bf16.msra.mxu0 %v518_v16 }
  0x17   :  { %238 = vmatpush.bf16.msra.mxu1 %v526_v17  ;;  %357 = vmatpush.bf16.msra.mxu3 %v537_v40 }
  0x19   :  { %477 = vmatmul.msk.bf16.gmra.mxu2 %vm207_vm0, %v403_v23 }
  0x1a   :  { %220 = vmatpush.bf16.msra.mxu0 %v517_v21 }
  0x1b   :  { %239 = vmatpush.bf16.msra.mxu1 %v525_v22  ;;  %358 = vmatpush.bf16.msra.mxu3 %v536_v41 }
  0x1e   :  { %221 = vmatpush.bf16.msra.mxu0 %v516_v24 }
  0x1f   :  { %240 = vmatpush.bf16.msra.mxu1 %v524_v25  ;;  %359 = vmatpush.bf16.msra.mxu3 %v535_v42 }
  0x21   :  { %222 = vmatmul.bf16.vlgmr.msra.gmra.mxu0 %v383_v30 }
  0x22   :  { %241 = vmatmul.bf16.vlgmr.msra.gmra.mxu1 %v387_v31 }
  0x23   :  { %360 = vmatpush.bf16.msra.mxu3 %v534_v43 }
  0x31   :  { %227 = vmatmul.bf16.gmra.mxu0 %v395_v36 }
  0x32   :  { %246 = vmatmul.bf16.gmra.mxu1 %v399_v37 }
  0x8c   :  { %v261_v44 = vpop.f32.mrf.mxu2 }
  0x94   :  { %v263_v50 = vpop.f32.mrf.mxu2 }
  0x9c   :  { %v266_v0 = vpop.f32.mrf.mxu2 }
  0x9e   :  { %v223_v46 = vpop.f32.mrf.mxu0 }
  0x9f   :  { %v242_v47 = vpop.f32.mrf.mxu1  ;;  %v224_v48 = vadd.f32 %v542_v45, %v223_v46 }
  0xa1   :  { %v243_v49 = vadd.f32 %v242_v47, %v224_v48 }
  0xa3   :  { %v262_v53 = vadd.f32 %v261_v44, %v243_v49 }
  0xa4   :  { %v268_v8 = vpop.f32.mrf.mxu2 }
  0xa5   :  { %v275_v57 = vmul.f32 0.2, %v262_v53  ;;  %vm271_vm1 = vcmp.ge.f32.partialorder %v262_v53, 0.0 }
  0xa6   :  { %v225_v51 = vpop.f32.mrf.mxu0 }
  0xa7   :  { %v244_v52 = vpop.f32.mrf.mxu1  ;;  %v226_v54 = vadd.f32 %v542_v45, %v225_v51  ;;  %v279_v62 = vsel %vm271_vm1, %v262_v53, %v275_v57 }
  0xa9   :  { %v245_v55 = vadd.f32 %v244_v52, %v226_v54 }
  0xab   :  { %v264_v56 = vadd.f32 %v263_v50, %v245_v55 }
  0xad   :  { %vm272_vm2 = vcmp.ge.f32.partialorder %v264_v56, 0.0  ;;  %v276_v58 = vmul.f32 0.2, %v264_v56 }
  0xae   :  { %v228_v59 = vpop.f32.mrf.mxu0 }
  0xaf   :  { %v247_v60 = vpop.f32.mrf.mxu1  ;;  %v229_v61 = vadd.f32 %v542_v45, %v228_v59  ;;  %v280_v63 = vsel %vm272_vm2, %v264_v56, %v276_v58 }
  0xb0   :  { %v283_v1 = vpack.c.bf16 %v280_v63, %v279_v62 }
  0xb1   :  { %v248_v2 = vadd.f32 %v247_v60, %v229_v61 }
  0xb2   :  { %361 = vmatmul.bf16.vlgmr.msra.gmra.mxu3 %v283_v1 }
  0xb3   :  { %v267_v4 = vadd.f32 %v266_v0, %v248_v2 }
  0xb5   :  { %v277_v10 = vmul.f32 0.2, %v267_v4  ;;  %vm273_vm3 = vcmp.ge.f32.partialorder %v267_v4, 0.0 }
  0xb6   :  { %v230_v3 = vpop.f32.mrf.mxu0 }
  0xb7   :  { %v231_v5 = vadd.f32 %v542_v45, %v230_v3  ;;  %v249_v6 = vpop.f32.mrf.mxu1  ;;  %v281_v12 = vsel %vm273_vm3, %v267_v4, %v277_v10 }
  0xb9   :  { %v250_v7 = vadd.f32 %v249_v6, %v231_v5 }
  0xbb   :  { %v269_v9 = vadd.f32 %v268_v8, %v250_v7 }
  0xbd   :  { %vm274_vm4 = vcmp.ge.f32.partialorder %v269_v9, 0.0  ;;  %v278_v11 = vmul.f32 0.2, %v269_v9 }
  0xbf   :  { %v282_v13 = vsel %vm274_vm4, %v269_v9, %v278_v11 }
  0xc0   :  { %v284_v14 = vpack.c.bf16 %v282_v13, %v281_v12 }
  0xc2   :  { %366 = vmatmul.bf16.gmra.mxu3 %v284_v14 }
 0x135   :  { %v362_v16 = vpop.f32.mrf.mxu3 }
 0x136   :  { %v363_v17 = vadd.f32 %v543_v15, %v362_v16 }
 0x138   :  { %372 = vst [vmem:[%s713_s5] sm:$0xff] %v363_v17 }
 0x13d   :  { %v364_v18 = vpop.f32.mrf.mxu3 }
 0x13e   :  { %v365_v19 = vadd.f32 %v543_v15, %v364_v18 }
 0x140   :  { %373 = vst [vmem:[%s713_s5 + $0x8] sm:$0xff] %v365_v19 }
 0x145   :  { %v367_v20 = vpop.f32.mrf.mxu3 }
 0x146   :  { %v368_v21 = vadd.f32 %v543_v15, %v367_v20 }
 0x148   :  { %374 = vst [vmem:[%s713_s5 + $0x10] sm:$0xff] %v368_v21 }
 0x14d   :  { %v369_v22 = vpop.f32.mrf.mxu3 }
 0x14e   :  { %v370_v23 = vadd.f32 %v543_v15, %v369_v22 }
 0x150   :  { %375 = vst [vmem:[%s713_s5 + $0x18] sm:$0xff] %v370_v23 }

// kernel: fpse_forward.20
= control target key start
LH: loop header
LB: loop body
LE: loop exit
PB: predicated region body
PF: predicated region fallthrough
CT: control target
= control target key end

     0   :  { %vm254_vm0 = vcmask 130048   ;;  %s1718_s1 = inlined_call_operand.vmem [shape: bf16[16,128], index: 1, kind: input, shape index: {}]   ;;  %s1719_s0 = inlined_call_operand.vmem [shape: bf16[512,16], index: 0, kind: input, shape index: {}]   ;;  %s1720_s2 = inlined_call_operand.vmem [shape: f32[1,128], index: 2, kind: input, shape index: {}]   ;;  %s1721_s3 = inlined_call_operand.vmem [shape: f32[512,128], index: 3, kind: input, shape index: {}]   ;;  %s1722_s4 = inlined_call_operand.vmem [shape: f32[512,128], index: 4, kind: output, shape index: {}]  }
   0x1   :  { %v1104_v0 = vld [vmem:[%s1718_s1] sm:$0xff]  ;;  %v1073_v5 = vld [vmem:[%s1719_s0 + $0x8] sm:$0xff]  ;;  %v1074_v9 = vld [vmem:[%s1719_s0 + $0x10] sm:$0xff] }
   0x2   :  { %v1072_v1 = vld [vmem:[%s1719_s0] sm:$0xff]  ;;  %358 = vmatpush.bf16.msra.mxu0 %v1104_v0  ;;  %1105 = vmatpush.bf16.msra.mxu1 %v1104_v0  ;;  %v1081_v6 = vld [vmem:[%s1719_s0 + $0x48] sm:$0xff]  ;;  %v1082_v10 = vld [vmem:[%s1719_s0 + $0x50] sm:$0xff] }
   0x3   :  { %v1080_v2 = vld [vmem:[%s1719_s0 + $0x40] sm:$0xff]  ;;  %1106 = vmatpush.bf16.msra.mxu2 %v1104_v0  ;;  %1107 = vmatpush.bf16.msra.mxu3 %v1104_v0  ;;  %v1089_v7 = vld [vmem:[%s1719_s0 + $0x88] sm:$0xff]  ;;  %v1090_v11 = vld [vmem:[%s1719_s0 + $0x90] sm:$0xff] }
   0x4   :  { %v1088_v3 = vld [vmem:[%s1719_s0 + $0x80] sm:$0xff]  ;;  %v1097_v8 = vld [vmem:[%s1719_s0 + $0xc8] sm:$0xff]  ;;  %v1098_v12 = vld [vmem:[%s1719_s0 + $0xd0] sm:$0xff] }
   0x5   :  { %v1096_v4 = vld [vmem:[%s1719_s0 + $0xc0] sm:$0xff]  ;;  %1040 = vmatmul.msk.bf16.vlgmr.msra.gmra.mxu0 %vm254_vm0, %v1072_v1  ;;  %1048 = vmatmul.msk.bf16.vlgmr.msra.gmra.mxu1 %vm254_vm0, %v1080_v2  ;;  %v1075_v13 = vld [vmem:[%s1719_s0 + $0x18] sm:$0xff]  ;;  %v1077_v21 = vld [vmem:[%s1719_s0 + $0x28] sm:$0xff] }
   0x6   :  { %1056 = vmatmul.msk.bf16.vlgmr.msra.gmra.mxu2 %vm254_vm0, %v1088_v3  ;;  %1064 = vmatmul.msk.bf16.vlgmr.msra.gmra.mxu3 %vm254_vm0, %v1096_v4  ;;  %v1083_v14 = vld [vmem:[%s1719_s0 + $0x58] sm:$0xff]  ;;  %v1076_v17 = vld [vmem:[%s1719_s0 + $0x20] sm:$0xff]  ;;  %v1085_v22 = vld [vmem:[%s1719_s0 + $0x68] sm:$0xff] }
   0x7   :  { %v1091_v15 = vld [vmem:[%s1719_s0 + $0x98] sm:$0xff]  ;;  %v1084_v18 = vld [vmem:[%s1719_s0 + $0x60] sm:$0xff]  ;;  %v1093_v23 = vld [vmem:[%s1719_s0 + $0xa8] sm:$0xff] }
   0x8   :  { %v1099_v16 = vld [vmem:[%s1719_s0 + $0xd8] sm:$0xff]  ;;  %v1092_v19 = vld [vmem:[%s1719_s0 + $0xa0] sm:$0xff]  ;;  %v1101_v24 = vld [vmem:[%s1719_s0 + $0xe8] sm:$0xff] }
   0x9   :  { %v1100_v20 = vld [vmem:[%s1719_s0 + $0xe0] sm:$0xff]  ;;  %v1078_v25 = vld [vmem:[%s1719_s0 + $0x30] sm:$0xff]  ;;  %v1079_v29 = vld [vmem:[%s1719_s0 + $0x38] sm:$0xff] }
   0xa   :  { %v1086_v26 = vld [vmem:[%s1719_s0 + $0x70] sm:$0xff]  ;;  %v1087_v30 = vld [vmem:[%s1719_s0 + $0x78] sm:$0xff]  ;;  %v1268_v33 = vld [vmem:[%s1720_s2] ss:$0 sm:$0xff] }
   0xb   :  { %v1094_v27 = vld [vmem:[%s1719_s0 + $0xb0] sm:$0xff]  ;;  %v1095_v31 = vld [vmem:[%s1719_s0 + $0xb8] sm:$0xff]  ;;  %v712_v38 = vld [vmem:[%s1721_s3] sm:$0xff] }
   0xc   :  { %v1102_v28 = vld [vmem:[%s1719_s0 + $0xf0] sm:$0xff]  ;;  %v1103_v32 = vld [vmem:[%s1719_s0 + $0xf8] sm:$0xff]  ;;  %v728_v39 = vld [vmem:[%s1721_s3 + $0x80] sm:$0xff] }
   0xd   :  { %v744_v49 = vld [vmem:[%s1721_s3 + $0x100] sm:$0xff]  ;;  %v713_v55 = vld [vmem:[%s1721_s3 + $0x8] sm:$0xff] }
   0xe   :  { %v760_v53 = vld [vmem:[%s1721_s3 + $0x180] sm:$0xff]  ;;  %v729_v57 = vld [vmem:[%s1721_s3 + $0x88] sm:$0xff] }
  0x15   :  { %1041 = vmatmul.msk.bf16.gmra.mxu0 %vm254_vm0, %v1073_v5  ;;  %1049 = vmatmul.msk.bf16.gmra.mxu1 %vm254_vm0, %v1081_v6 }
  0x16   :  { %1057 = vmatmul.msk.bf16.gmra.mxu2 %vm254_vm0, %v1089_v7  ;;  %1065 = vmatmul.msk.bf16.gmra.mxu3 %vm254_vm0, %v1097_v8 }
  0x25   :  { %1042 = vmatmul.msk.bf16.gmra.mxu0 %vm254_vm0, %v1074_v9  ;;  %1050 = vmatmul.msk.bf16.gmra.mxu1 %vm254_vm0, %v1082_v10 }
  0x26   :  { %1058 = vmatmul.msk.bf16.gmra.mxu2 %vm254_vm0, %v1090_v11  ;;  %1066 = vmatmul.msk.bf16.gmra.mxu3 %vm254_vm0, %v1098_v12  ;;  %v745_v12 = vld [vmem:[%s1721_s3 + $0x108] sm:$0xff] }
  0x35   :  { %1043 = vmatmul.msk.bf16.gmra.mxu0 %vm254_vm0, %v1075_v13  ;;  %1051 = vmatmul.msk.bf16.gmra.mxu1 %vm254_vm0, %v1083_v14  ;;  %v761_v13 = vld [vmem:[%s1721_s3 + $0x188] sm:$0xff] }
  0x36   :  { %1059 = vmatmul.msk.bf16.gmra.mxu2 %vm254_vm0, %v1091_v15  ;;  %1067 = vmatmul.msk.bf16.gmra.mxu3 %vm254_vm0, %v1099_v16 }
  0x45   :  { %1044 = vmatmul.msk.bf16.gmra.mxu0 %vm254_vm0, %v1076_v17  ;;  %1052 = vmatmul.msk.bf16.gmra.mxu1 %vm254_vm0, %v1084_v18  ;;  %v714_v17 = vld [vmem:[%s1721_s3 + $0x10] sm:$0xff] }
  0x46   :  { %1060 = vmatmul.msk.bf16.gmra.mxu2 %vm254_vm0, %v1092_v19  ;;  %1068 = vmatmul.msk.bf16.gmra.mxu3 %vm254_vm0, %v1100_v20 }
  0x55   :  { %1045 = vmatmul.msk.bf16.gmra.mxu0 %vm254_vm0, %v1077_v21  ;;  %1053 = vmatmul.msk.bf16.gmra.mxu1 %vm254_vm0, %v1085_v22  ;;  %v730_v22 = vld [vmem:[%s1721_s3 + $0x90] sm:$0xff] }
  0x56   :  { %1061 = vmatmul.msk.bf16.gmra.mxu2 %vm254_vm0, %v1093_v23  ;;  %1069 = vmatmul.msk.bf16.gmra.mxu3 %vm254_vm0, %v1101_v24 }
  0x65   :  { %1046 = vmatmul.msk.bf16.gmra.mxu0 %vm254_vm0, %v1078_v25  ;;  %1054 = vmatmul.msk.bf16.gmra.mxu1 %vm254_vm0, %v1086_v26 }
  0x66   :  { %1062 = vmatmul.msk.bf16.gmra.mxu2 %vm254_vm0, %v1094_v27  ;;  %1070 = vmatmul.msk.bf16.gmra.mxu3 %vm254_vm0, %v1102_v28 }
  0x75   :  { %1047 = vmatmul.msk.bf16.gmra.mxu0 %vm254_vm0, %v1079_v29  ;;  %1055 = vmatmul.msk.bf16.gmra.mxu1 %vm254_vm0, %v1087_v30 }
  0x76   :  { %1063 = vmatmul.msk.bf16.gmra.mxu2 %vm254_vm0, %v1095_v31  ;;  %1071 = vmatmul.msk.bf16.gmra.mxu3 %vm254_vm0, %v1103_v32 }
  0x82   :  { %v360_v34 = vpop.f32.mrf.mxu0  ;;  %v400_v35 = vpop.f32.mrf.mxu1 }
  0x83   :  { %v361_v36 = vadd.f32 %v1268_v33, %v360_v34  ;;  %v401_v37 = vadd.f32 %v1268_v33, %v400_v35 }
  0x85   :  { %vm520_vm1 = vcmp.ge.f32.partialorder %v361_v36, 0.0  ;;  %v584_v40 = vmul.f32 0.2, %v361_v36  ;;  %vm536_vm2 = vcmp.ge.f32.partialorder %v401_v37, 0.0  ;;  %v600_v41 = vmul.f32 0.2, %v401_v37 }
  0x87   :  { %v648_v42 = vsel %vm520_vm1, %v361_v36, %v584_v40  ;;  %v664_v43 = vsel %vm536_vm2, %v401_v37, %v600_v41  ;;  %v746_v37 = vld [vmem:[%s1721_s3 + $0x110] sm:$0xff] }
  0x88   :  { %v776_v44 = vadd.f32 %v712_v38, %v648_v42  ;;  %v792_v45 = vadd.f32 %v728_v39, %v664_v43  ;;  %v762_v38 = vld [vmem:[%s1721_s3 + $0x190] sm:$0xff]  ;;  %v715_v42 = vld [vmem:[%s1721_s3 + $0x18] sm:$0xff] }
  0x89   :  { %v440_v46 = vpop.f32.mrf.mxu2  ;;  %v480_v47 = vpop.f32.mrf.mxu3 }
  0x8a   :  { %840 = vst [vmem:[%s1722_s4] sm:$0xff] %v776_v44  ;;  %v441_v48 = vadd.f32 %v1268_v33, %v440_v46  ;;  %v481_v50 = vadd.f32 %v1268_v33, %v480_v47  ;;  %v362_v51 = vpop.f32.mrf.mxu0  ;;  %v402_v52 = vpop.f32.mrf.mxu1  ;;  %v731_v47 = vld [vmem:[%s1721_s3 + $0x98] sm:$0xff] }
  0x8b   :  { %856 = vst [vmem:[%s1722_s4 + $0x80] sm:$0xff] %v792_v45  ;;  %v363_v54 = vadd.f32 %v1268_v33, %v362_v51  ;;  %v403_v56 = vadd.f32 %v1268_v33, %v402_v52 }
  0x8c   :  { %vm552_vm3 = vcmp.ge.f32.partialorder %v441_v48, 0.0  ;;  %v616_v58 = vmul.f32 0.2, %v441_v48  ;;  %vm568_vm4 = vcmp.ge.f32.partialorder %v481_v50, 0.0  ;;  %v632_v59 = vmul.f32 0.2, %v481_v50 }
  0x8d   :  { %vm521_vm5 = vcmp.ge.f32.partialorder %v363_v54, 0.0  ;;  %v585_v60 = vmul.f32 0.2, %v363_v54  ;;  %vm537_vm6 = vcmp.ge.f32.partialorder %v403_v56, 0.0  ;;  %v601_v61 = vmul.f32 0.2, %v403_v56 }
  0x8e   :  { %v680_v62 = vsel %vm552_vm3, %v441_v48, %v616_v58  ;;  %v696_v63 = vsel %vm568_vm4, %v481_v50, %v632_v59 }
  0x8f   :  { %v808_v0 = vadd.f32 %v744_v49, %v680_v62  ;;  %v824_v1 = vadd.f32 %v760_v53, %v696_v63  ;;  %v649_v2 = vsel %vm521_vm5, %v363_v54, %v585_v60  ;;  %v665_v3 = vsel %vm537_vm6, %v403_v56, %v601_v61  ;;  %v747_v61 = vld [vmem:[%s1721_s3 + $0x118] sm:$0xff] }
  0x90   :  { %v777_v4 = vadd.f32 %v713_v55, %v649_v2  ;;  %v793_v5 = vadd.f32 %v729_v57, %v665_v3  ;;  %v763_v62 = vld [vmem:[%s1721_s3 + $0x198] sm:$0xff]  ;;  %v716_v2 = vld [vmem:[%s1721_s3 + $0x20] sm:$0xff] }
  0x91   :  { %872 = vst [vmem:[%s1722_s4 + $0x100] sm:$0xff] %v808_v0  ;;  %v442_v6 = vpop.f32.mrf.mxu2  ;;  %v482_v7 = vpop.f32.mrf.mxu3 }
  0x92   :  { %888 = vst [vmem:[%s1722_s4 + $0x180] sm:$0xff] %v824_v1  ;;  %v443_v8 = vadd.f32 %v1268_v33, %v442_v6  ;;  %v483_v9 = vadd.f32 %v1268_v33, %v482_v7  ;;  %v365_v10 = vpop.f32.mrf.mxu0  ;;  %v405_v11 = vpop.f32.mrf.mxu1  ;;  %v732_v7 = vld [vmem:[%s1721_s3 + $0xa0] sm:$0xff] }
  0x93   :  { %841 = vst [vmem:[%s1722_s4 + $0x8] sm:$0xff] %v777_v4  ;;  %v366_v14 = vadd.f32 %v1268_v33, %v365_v10  ;;  %v406_v15 = vadd.f32 %v1268_v33, %v405_v11 }
  0x94   :  { %857 = vst [vmem:[%s1722_s4 + $0x88] sm:$0xff] %v793_v5  ;;  %vm553_vm7 = vcmp.ge.f32.partialorder %v443_v8, 0.0  ;;  %v617_v16 = vmul.f32 0.2, %v443_v8  ;;  %vm569_vm8 = vcmp.ge.f32.partialorder %v483_v9, 0.0 }
  0x95   :  { %v633_v18 = vmul.f32 0.2, %v483_v9  ;;  %vm522_vm9 = vcmp.ge.f32.partialorder %v366_v14, 0.0  ;;  %v586_v19 = vmul.f32 0.2, %v366_v14  ;;  %vm538_vm10 = vcmp.ge.f32.partialorder %v406_v15, 0.0 }
  0x96   :  { %v681_v20 = vsel %vm553_vm7, %v443_v8, %v617_v16  ;;  %v602_v21 = vmul.f32 0.2, %v406_v15 }
  0x97   :  { %v809_v23 = vadd.f32 %v745_v12, %v681_v20  ;;  %v697_v24 = vsel %vm569_vm8, %v483_v9, %v633_v18  ;;  %v650_v25 = vsel %vm522_vm9, %v366_v14, %v586_v19 }
  0x98   :  { %v825_v26 = vadd.f32 %v761_v13, %v697_v24  ;;  %v778_v27 = vadd.f32 %v714_v17, %v650_v25  ;;  %v666_v28 = vsel %vm538_vm10, %v406_v15, %v602_v21  ;;  %v748_v21 = vld [vmem:[%s1721_s3 + $0x120] sm:$0xff] }
  0x99   :  { %873 = vst [vmem:[%s1722_s4 + $0x108] sm:$0xff] %v809_v23  ;;  %v794_v29 = vadd.f32 %v730_v22, %v666_v28  ;;  %v445_v30 = vpop.f32.mrf.mxu2  ;;  %v485_v31 = vpop.f32.mrf.mxu3  ;;  %v764_v22 = vld [vmem:[%s1721_s3 + $0x1a0] sm:$0xff] }
  0x9a   :  { %889 = vst [vmem:[%s1722_s4 + $0x188] sm:$0xff] %v825_v26  ;;  %v446_v32 = vadd.f32 %v1268_v33, %v445_v30  ;;  %v486_v34 = vadd.f32 %v1268_v33, %v485_v31  ;;  %v367_v35 = vpop.f32.mrf.mxu0  ;;  %v407_v36 = vpop.f32.mrf.mxu1  ;;  %v717_v26 = vld [vmem:[%s1721_s3 + $0x28] sm:$0xff] }
  0x9b   :  { %842 = vst [vmem:[%s1722_s4 + $0x10] sm:$0xff] %v778_v27  ;;  %v368_v39 = vadd.f32 %v1268_v33, %v367_v35  ;;  %v408_v40 = vadd.f32 %v1268_v33, %v407_v36  ;;  %v733_v31 = vld [vmem:[%s1721_s3 + $0xa8] sm:$0xff] }
  0x9c   :  { %858 = vst [vmem:[%s1722_s4 + $0x90] sm:$0xff] %v794_v29  ;;  %vm554_vm11 = vcmp.ge.f32.partialorder %v446_v32, 0.0  ;;  %v618_v41 = vmul.f32 0.2, %v446_v32  ;;  %vm570_vm12 = vcmp.ge.f32.partialorder %v486_v34, 0.0 }
  0x9d   :  { %v634_v43 = vmul.f32 0.2, %v486_v34  ;;  %vm523_vm13 = vcmp.ge.f32.partialorder %v368_v39, 0.0  ;;  %v587_v44 = vmul.f32 0.2, %v368_v39  ;;  %vm539_vm14 = vcmp.ge.f32.partialorder %v408_v40, 0.0 }
  0x9e   :  { %v682_v45 = vsel %vm554_vm11, %v446_v32, %v618_v41  ;;  %v603_v46 = vmul.f32 0.2, %v408_v40 }
  0x9f   :  { %v810_v48 = vadd.f32 %v746_v37, %v682_v45  ;;  %v698_v49 = vsel %vm570_vm12, %v486_v34, %v634_v43  ;;  %v651_v50 = vsel %vm523_vm13, %v368_v39, %v587_v44 }
  0xa0   :  { %v826_v51 = vadd.f32 %v762_v38, %v698_v49  ;;  %v779_v52 = vadd.f32 %v715_v42, %v651_v50  ;;  %v667_v53 = vsel %vm539_vm14, %v408_v40, %v603_v46  ;;  %v749_v46 = vld [vmem:[%s1721_s3 + $0x128] sm:$0xff] }
  0xa1   :  { %874 = vst [vmem:[%s1722_s4 + $0x110] sm:$0xff] %v810_v48  ;;  %v795_v54 = vadd.f32 %v731_v47, %v667_v53  ;;  %v447_v55 = vpop.f32.mrf.mxu2  ;;  %v487_v56 = vpop.f32.mrf.mxu3  ;;  %v765_v47 = vld [vmem:[%s1721_s3 + $0x1a8] sm:$0xff] }
  0xa2   :  { %890 = vst [vmem:[%s1722_s4 + $0x190] sm:$0xff] %v826_v51  ;;  %v448_v57 = vadd.f32 %v1268_v33, %v447_v55  ;;  %v488_v58 = vadd.f32 %v1268_v33, %v487_v56  ;;  %v370_v59 = vpop.f32.mrf.mxu0  ;;  %v410_v60 = vpop.f32.mrf.mxu1  ;;  %v718_v51 = vld [vmem:[%s1721_s3 + $0x30] sm:$0xff] }
  0xa3   :  { %843 = vst [vmem:[%s1722_s4 + $0x18] sm:$0xff] %v779_v52  ;;  %v371_v63 = vadd.f32 %v1268_v33, %v370_v59  ;;  %v411_v0 = vadd.f32 %v1268_v33, %v410_v60  ;;  %v734_v56 = vld [vmem:[%s1721_s3 + $0xb0] sm:$0xff] }
  0xa4   :  { %859 = vst [vmem:[%s1722_s4 + $0x98] sm:$0xff] %v795_v54  ;;  %vm555_vm15 = vcmp.ge.f32.partialorder %v448_v57, 0.0  ;;  %v619_v1 = vmul.f32 0.2, %v448_v57  ;;  %vm571_vm0 = vcmp.ge.f32.partialorder %v488_v58, 0.0 }
  0xa5   :  { %v635_v3 = vmul.f32 0.2, %v488_v58  ;;  %vm524_vm1 = vcmp.ge.f32.partialorder %v371_v63, 0.0  ;;  %v588_v4 = vmul.f32 0.2, %v371_v63  ;;  %vm540_vm2 = vcmp.ge.f32.partialorder %v411_v0, 0.0 }
  0xa6   :  { %v683_v5 = vsel %vm555_vm15, %v448_v57, %v619_v1  ;;  %v604_v6 = vmul.f32 0.2, %v411_v0 }
  0xa7   :  { %v811_v8 = vadd.f32 %v747_v61, %v683_v5  ;;  %v699_v9 = vsel %vm571_vm0, %v488_v58, %v635_v3  ;;  %v652_v10 = vsel %vm524_vm1, %v371_v63, %v588_v4 }
  0xa8   :  { %v827_v11 = vadd.f32 %v763_v62, %v699_v9  ;;  %v780_v12 = vadd.f32 %v716_v2, %v652_v10  ;;  %v668_v13 = vsel %vm540_vm2, %v411_v0, %v604_v6  ;;  %v750_v6 = vld [vmem:[%s1721_s3 + $0x130] sm:$0xff] }
  0xa9   :  { %875 = vst [vmem:[%s1722_s4 + $0x118] sm:$0xff] %v811_v8  ;;  %v796_v14 = vadd.f32 %v732_v7, %v668_v13  ;;  %v450_v15 = vpop.f32.mrf.mxu2  ;;  %v490_v16 = vpop.f32.mrf.mxu3  ;;  %v766_v7 = vld [vmem:[%s1721_s3 + $0x1b0] sm:$0xff] }
  0xaa   :  { %891 = vst [vmem:[%s1722_s4 + $0x198] sm:$0xff] %v827_v11  ;;  %v451_v17 = vadd.f32 %v1268_v33, %v450_v15  ;;  %v491_v18 = vadd.f32 %v1268_v33, %v490_v16  ;;  %v372_v19 = vpop.f32.mrf.mxu0  ;;  %v412_v20 = vpop.f32.mrf.mxu1  ;;  %v719_v11 = vld [vmem:[%s1721_s3 + $0x38] sm:$0xff] }
  0xab   :  { %844 = vst [vmem:[%s1722_s4 + $0x20] sm:$0xff] %v780_v12  ;;  %v373_v23 = vadd.f32 %v1268_v33, %v372_v19  ;;  %v413_v24 = vadd.f32 %v1268_v33, %v412_v20  ;;  %v735_v16 = vld [vmem:[%s1721_s3 + $0xb8] sm:$0xff] }
  0xac   :  { %860 = vst [vmem:[%s1722_s4 + $0xa0] sm:$0xff] %v796_v14  ;;  %vm556_vm3 = vcmp.ge.f32.partialorder %v451_v17, 0.0  ;;  %v620_v25 = vmul.f32 0.2, %v451_v17  ;;  %vm572_vm4 = vcmp.ge.f32.partialorder %v491_v18, 0.0 }
  0xad   :  { %v636_v27 = vmul.f32 0.2, %v491_v18  ;;  %vm525_vm5 = vcmp.ge.f32.partialorder %v373_v23, 0.0  ;;  %v589_v28 = vmul.f32 0.2, %v373_v23  ;;  %vm541_vm6 = vcmp.ge.f32.partialorder %v413_v24, 0.0 }
  0xae   :  { %v684_v29 = vsel %vm556_vm3, %v451_v17, %v620_v25  ;;  %v605_v30 = vmul.f32 0.2, %v413_v24 }
  0xaf   :  { %v812_v32 = vadd.f32 %v748_v21, %v684_v29  ;;  %v700_v34 = vsel %vm572_vm4, %v491_v18, %v636_v27  ;;  %v653_v35 = vsel %vm525_vm5, %v373_v23, %v589_v28 }
  0xb0   :  { %v828_v36 = vadd.f32 %v764_v22, %v700_v34  ;;  %v781_v37 = vadd.f32 %v717_v26, %v653_v35  ;;  %v669_v38 = vsel %vm541_vm6, %v413_v24, %v605_v30  ;;  %v751_v30 = vld [vmem:[%s1721_s3 + $0x138] sm:$0xff] }
  0xb1   :  { %876 = vst [vmem:[%s1722_s4 + $0x120] sm:$0xff] %v812_v32  ;;  %v797_v39 = vadd.f32 %v733_v31, %v669_v38  ;;  %v452_v40 = vpop.f32.mrf.mxu2  ;;  %v492_v41 = vpop.f32.mrf.mxu3  ;;  %v767_v31 = vld [vmem:[%s1721_s3 + $0x1b8] sm:$0xff] }
  0xb2   :  { %892 = vst [vmem:[%s1722_s4 + $0x1a0] sm:$0xff] %v828_v36  ;;  %v453_v42 = vadd.f32 %v1268_v33, %v452_v40  ;;  %v493_v43 = vadd.f32 %v1268_v33, %v492_v41  ;;  %v375_v44 = vpop.f32.mrf.mxu0  ;;  %v415_v45 = vpop.f32.mrf.mxu1  ;;  %v720_v36 = vld [vmem:[%s1721_s3 + $0x40] sm:$0xff] }
  0xb3   :  { %845 = vst [vmem:[%s1722_s4 + $0x28] sm:$0xff] %v781_v37  ;;  %v376_v48 = vadd.f32 %v1268_v33, %v375_v44  ;;  %v416_v49 = vadd.f32 %v1268_v33, %v415_v45  ;;  %v736_v41 = vld [vmem:[%s1721_s3 + $0xc0] sm:$0xff] }
  0xb4   :  { %861 = vst [vmem:[%s1722_s4 + $0xa8] sm:$0xff] %v797_v39  ;;  %vm557_vm7 = vcmp.ge.f32.partialorder %v453_v42, 0.0  ;;  %v621_v50 = vmul.f32 0.2, %v453_v42  ;;  %vm573_vm8 = vcmp.ge.f32.partialorder %v493_v43, 0.0 }
  0xb5   :  { %v637_v52 = vmul.f32 0.2, %v493_v43  ;;  %vm526_vm9 = vcmp.ge.f32.partialorder %v376_v48, 0.0  ;;  %v590_v53 = vmul.f32 0.2, %v376_v48  ;;  %vm542_vm10 = vcmp.ge.f32.partialorder %v416_v49, 0.0 }
  0xb6   :  { %v685_v54 = vsel %vm557_vm7, %v453_v42, %v621_v50  ;;  %v606_v55 = vmul.f32 0.2, %v416_v49 }
  0xb7   :  { %v813_v57 = vadd.f32 %v749_v46, %v685_v54  ;;  %v701_v58 = vsel %vm573_vm8, %v493_v43, %v637_v52  ;;  %v654_v59 = vsel %vm526_vm9, %v376_v48, %v590_v53 }
  0xb8   :  { %v829_v60 = vadd.f32 %v765_v47, %v701_v58  ;;  %v782_v61 = vadd.f32 %v718_v51, %v654_v59  ;;  %v670_v62 = vsel %vm542_vm10, %v416_v49, %v606_v55  ;;  %v752_v55 = vld [vmem:[%s1721_s3 + $0x140] sm:$0xff] }
  0xb9   :  { %877 = vst [vmem:[%s1722_s4 + $0x128] sm:$0xff] %v813_v57  ;;  %v798_v63 = vadd.f32 %v734_v56, %v670_v62  ;;  %v455_v0 = vpop.f32.mrf.mxu2  ;;  %v495_v1 = vpop.f32.mrf.mxu3  ;;  %v768_v56 = vld [vmem:[%s1721_s3 + $0x1c0] sm:$0xff] }
  0xba   :  { %893 = vst [vmem:[%s1722_s4 + $0x1a8] sm:$0xff] %v829_v60  ;;  %v456_v2 = vadd.f32 %v1268_v33, %v455_v0  ;;  %v496_v3 = vadd.f32 %v1268_v33, %v495_v1  ;;  %v377_v4 = vpop.f32.mrf.mxu0  ;;  %v417_v5 = vpop.f32.mrf.mxu1  ;;  %v721_v60 = vld [vmem:[%s1721_s3 + $0x48] sm:$0xff] }
  0xbb   :  { %846 = vst [vmem:[%s1722_s4 + $0x30] sm:$0xff] %v782_v61  ;;  %v378_v8 = vadd.f32 %v1268_v33, %v377_v4  ;;  %v418_v9 = vadd.f32 %v1268_v33, %v417_v5  ;;  %v737_v1 = vld [vmem:[%s1721_s3 + $0xc8] sm:$0xff] }
  0xbc   :  { %862 = vst [vmem:[%s1722_s4 + $0xb0] sm:$0xff] %v798_v63  ;;  %vm558_vm11 = vcmp.ge.f32.partialorder %v456_v2, 0.0  ;;  %v622_v10 = vmul.f32 0.2, %v456_v2  ;;  %vm574_vm12 = vcmp.ge.f32.partialorder %v496_v3, 0.0 }
  0xbd   :  { %v638_v12 = vmul.f32 0.2, %v496_v3  ;;  %vm527_vm13 = vcmp.ge.f32.partialorder %v378_v8, 0.0  ;;  %v591_v13 = vmul.f32 0.2, %v378_v8  ;;  %vm543_vm14 = vcmp.ge.f32.partialorder %v418_v9, 0.0 }
  0xbe   :  { %v686_v14 = vsel %vm558_vm11, %v456_v2, %v622_v10  ;;  %v607_v15 = vmul.f32 0.2, %v418_v9 }
  0xbf   :  { %v814_v17 = vadd.f32 %v750_v6, %v686_v14  ;;  %v702_v18 = vsel %vm574_vm12, %v496_v3, %v638_v12  ;;  %v655_v19 = vsel %vm527_vm13, %v378_v8, %v591_v13 }
  0xc0   :  { %v830_v20 = vadd.f32 %v766_v7, %v702_v18  ;;  %v783_v21 = vadd.f32 %v719_v11, %v655_v19  ;;  %v671_v22 = vsel %vm543_vm14, %v418_v9, %v607_v15  ;;  %v753_v15 = vld [vmem:[%s1721_s3 + $0x148] sm:$0xff] }
  0xc1   :  { %878 = vst [vmem:[%s1722_s4 + $0x130] sm:$0xff] %v814_v17  ;;  %v799_v23 = vadd.f32 %v735_v16, %v671_v22  ;;  %v457_v24 = vpop.f32.mrf.mxu2  ;;  %v497_v25 = vpop.f32.mrf.mxu3  ;;  %v769_v16 = vld [vmem:[%s1721_s3 + $0x1c8] sm:$0xff] }
  0xc2   :  { %894 = vst [vmem:[%s1722_s4 + $0x1b0] sm:$0xff] %v830_v20  ;;  %v458_v26 = vadd.f32 %v1268_v33, %v457_v24  ;;  %v498_v27 = vadd.f32 %v1268_v33, %v497_v25  ;;  %v380_v28 = vpop.f32.mrf.mxu0  ;;  %v420_v29 = vpop.f32.mrf.mxu1  ;;  %v722_v20 = vld [vmem:[%s1721_s3 + $0x50] sm:$0xff] }
  0xc3   :  { %847 = vst [vmem:[%s1722_s4 + $0x38] sm:$0xff] %v783_v21  ;;  %v381_v32 = vadd.f32 %v1268_v33, %v380_v28  ;;  %v421_v34 = vadd.f32 %v1268_v33, %v420_v29  ;;  %v738_v25 = vld [vmem:[%s1721_s3 + $0xd0] sm:$0xff] }
  0xc4   :  { %863 = vst [vmem:[%s1722_s4 + $0xb8] sm:$0xff] %v799_v23  ;;  %vm559_vm15 = vcmp.ge.f32.partialorder %v458_v26, 0.0  ;;  %v623_v35 = vmul.f32 0.2, %v458_v26  ;;  %vm575_vm0 = vcmp.ge.f32.partialorder %v498_v27, 0.0 }
  0xc5   :  { %v639_v37 = vmul.f32 0.2, %v498_v27  ;;  %vm528_vm1 = vcmp.ge.f32.partialorder %v381_v32, 0.0  ;;  %v592_v38 = vmul.f32 0.2, %v381_v32  ;;  %vm544_vm2 = vcmp.ge.f32.partialorder %v421_v34, 0.0 }
  0xc6   :  { %v687_v39 = vsel %vm559_vm15, %v458_v26, %v623_v35  ;;  %v608_v40 = vmul.f32 0.2, %v421_v34 }
  0xc7   :  { %v815_v42 = vadd.f32 %v751_v30, %v687_v39  ;;  %v703_v43 = vsel %vm575_vm0, %v498_v27, %v639_v37  ;;  %v656_v44 = vsel %vm528_vm1, %v381_v32, %v592_v38 }
  0xc8   :  { %v831_v45 = vadd.f32 %v767_v31, %v703_v43  ;;  %v784_v46 = vadd.f32 %v720_v36, %v656_v44  ;;  %v672_v47 = vsel %vm544_vm2, %v421_v34, %v608_v40  ;;  %v754_v40 = vld [vmem:[%s1721_s3 + $0x150] sm:$0xff] }
  0xc9   :  { %879 = vst [vmem:[%s1722_s4 + $0x138] sm:$0xff] %v815_v42  ;;  %v800_v48 = vadd.f32 %v736_v41, %v672_v47  ;;  %v460_v49 = vpop.f32.mrf.mxu2  ;;  %v500_v50 = vpop.f32.mrf.mxu3  ;;  %v770_v41 = vld [vmem:[%s1721_s3 + $0x1d0] sm:$0xff] }
  0xca   :  { %895 = vst [vmem:[%s1722_s4 + $0x1b8] sm:$0xff] %v831_v45  ;;  %v461_v51 = vadd.f32 %v1268_v33, %v460_v49  ;;  %v501_v52 = vadd.f32 %v1268_v33, %v500_v50  ;;  %v382_v53 = vpop.f32.mrf.mxu0  ;;  %v422_v54 = vpop.f32.mrf.mxu1  ;;  %v723_v45 = vld [vmem:[%s1721_s3 + $0x58] sm:$0xff] }
  0xcb   :  { %848 = vst [vmem:[%s1722_s4 + $0x40] sm:$0xff] %v784_v46  ;;  %v383_v57 = vadd.f32 %v1268_v33, %v382_v53  ;;  %v423_v58 = vadd.f32 %v1268_v33, %v422_v54  ;;  %v739_v50 = vld [vmem:[%s1721_s3 + $0xd8] sm:$0xff] }
  0xcc   :  { %864 = vst [vmem:[%s1722_s4 + $0xc0] sm:$0xff] %v800_v48  ;;  %vm560_vm3 = vcmp.ge.f32.partialorder %v461_v51, 0.0  ;;  %v624_v59 = vmul.f32 0.2, %v461_v51  ;;  %vm576_vm4 = vcmp.ge.f32.partialorder %v501_v52, 0.0 }
  0xcd   :  { %v640_v61 = vmul.f32 0.2, %v501_v52  ;;  %vm529_vm5 = vcmp.ge.f32.partialorder %v383_v57, 0.0  ;;  %v593_v62 = vmul.f32 0.2, %v383_v57  ;;  %vm545_vm6 = vcmp.ge.f32.partialorder %v423_v58, 0.0 }
  0xce   :  { %v688_v63 = vsel %vm560_vm3, %v461_v51, %v624_v59  ;;  %v609_v0 = vmul.f32 0.2, %v423_v58 }
  0xcf   :  { %v816_v2 = vadd.f32 %v752_v55, %v688_v63  ;;  %v704_v3 = vsel %vm576_vm4, %v501_v52, %v640_v61  ;;  %v657_v4 = vsel %vm529_vm5, %v383_v57, %v593_v62 }
  0xd0   :  { %v832_v5 = vadd.f32 %v768_v56, %v704_v3  ;;  %v785_v6 = vadd.f32 %v721_v60, %v657_v4  ;;  %v673_v7 = vsel %vm545_vm6, %v423_v58, %v609_v0  ;;  %v755_v0 = vld [vmem:[%s1721_s3 + $0x158] sm:$0xff] }
  0xd1   :  { %880 = vst [vmem:[%s1722_s4 + $0x140] sm:$0xff] %v816_v2  ;;  %v801_v8 = vadd.f32 %v737_v1, %v673_v7  ;;  %v462_v9 = vpop.f32.mrf.mxu2  ;;  %v502_v10 = vpop.f32.mrf.mxu3  ;;  %v771_v1 = vld [vmem:[%s1721_s3 + $0x1d8] sm:$0xff] }
  0xd2   :  { %896 = vst [vmem:[%s1722_s4 + $0x1c0] sm:$0xff] %v832_v5  ;;  %v463_v11 = vadd.f32 %v1268_v33, %v462_v9  ;;  %v503_v12 = vadd.f32 %v1268_v33, %v502_v10  ;;  %v385_v13 = vpop.f32.mrf.mxu0  ;;  %v425_v14 = vpop.f32.mrf.mxu1  ;;  %v724_v5 = vld [vmem:[%s1721_s3 + $0x60] sm:$0xff] }
  0xd3   :  { %849 = vst [vmem:[%s1722_s4 + $0x48] sm:$0xff] %v785_v6  ;;  %v386_v17 = vadd.f32 %v1268_v33, %v385_v13  ;;  %v426_v18 = vadd.f32 %v1268_v33, %v425_v14  ;;  %v740_v10 = vld [vmem:[%s1721_s3 + $0xe0] sm:$0xff] }
  0xd4   :  { %865 = vst [vmem:[%s1722_s4 + $0xc8] sm:$0xff] %v801_v8  ;;  %vm561_vm7 = vcmp.ge.f32.partialorder %v463_v11, 0.0  ;;  %v625_v19 = vmul.f32 0.2, %v463_v11  ;;  %vm577_vm8 = vcmp.ge.f32.partialorder %v503_v12, 0.0 }
  0xd5   :  { %v641_v21 = vmul.f32 0.2, %v503_v12  ;;  %vm530_vm9 = vcmp.ge.f32.partialorder %v386_v17, 0.0  ;;  %v594_v22 = vmul.f32 0.2, %v386_v17  ;;  %vm546_vm10 = vcmp.ge.f32.partialorder %v426_v18, 0.0 }
  0xd6   :  { %v689_v23 = vsel %vm561_vm7, %v463_v11, %v625_v19  ;;  %v610_v24 = vmul.f32 0.2, %v426_v18 }
  0xd7   :  { %v817_v26 = vadd.f32 %v753_v15, %v689_v23  ;;  %v705_v27 = vsel %vm577_vm8, %v503_v12, %v641_v21  ;;  %v658_v28 = vsel %vm530_vm9, %v386_v17, %v594_v22 }
  0xd8   :  { %v833_v29 = vadd.f32 %v769_v16, %v705_v27  ;;  %v786_v30 = vadd.f32 %v722_v20, %v658_v28  ;;  %v674_v31 = vsel %vm546_vm10, %v426_v18, %v610_v24  ;;  %v756_v24 = vld [vmem:[%s1721_s3 + $0x160] sm:$0xff] }
  0xd9   :  { %881 = vst [vmem:[%s1722_s4 + $0x148] sm:$0xff] %v817_v26  ;;  %v802_v32 = vadd.f32 %v738_v25, %v674_v31  ;;  %v465_v34 = vpop.f32.mrf.mxu2  ;;  %v505_v35 = vpop.f32.mrf.mxu3  ;;  %v772_v25 = vld [vmem:[%s1721_s3 + $0x1e0] sm:$0xff] }
  0xda   :  { %897 = vst [vmem:[%s1722_s4 + $0x1c8] sm:$0xff] %v833_v29  ;;  %v466_v36 = vadd.f32 %v1268_v33, %v465_v34  ;;  %v506_v37 = vadd.f32 %v1268_v33, %v505_v35  ;;  %v387_v38 = vpop.f32.mrf.mxu0  ;;  %v427_v39 = vpop.f32.mrf.mxu1  ;;  %v725_v29 = vld [vmem:[%s1721_s3 + $0x68] sm:$0xff] }
  0xdb   :  { %850 = vst [vmem:[%s1722_s4 + $0x50] sm:$0xff] %v786_v30  ;;  %v388_v42 = vadd.f32 %v1268_v33, %v387_v38  ;;  %v428_v43 = vadd.f32 %v1268_v33, %v427_v39  ;;  %v741_v35 = vld [vmem:[%s1721_s3 + $0xe8] sm:$0xff] }
  0xdc   :  { %866 = vst [vmem:[%s1722_s4 + $0xd0] sm:$0xff] %v802_v32  ;;  %vm562_vm11 = vcmp.ge.f32.partialorder %v466_v36, 0.0  ;;  %v626_v44 = vmul.f32 0.2, %v466_v36  ;;  %vm578_vm12 = vcmp.ge.f32.partialorder %v506_v37, 0.0 }
  0xdd   :  { %v642_v46 = vmul.f32 0.2, %v506_v37  ;;  %vm531_vm13 = vcmp.ge.f32.partialorder %v388_v42, 0.0  ;;  %v595_v47 = vmul.f32 0.2, %v388_v42  ;;  %vm547_vm14 = vcmp.ge.f32.partialorder %v428_v43, 0.0 }
  0xde   :  { %v690_v48 = vsel %vm562_vm11, %v466_v36, %v626_v44  ;;  %v611_v49 = vmul.f32 0.2, %v428_v43 }
  0xdf   :  { %v818_v51 = vadd.f32 %v754_v40, %v690_v48  ;;  %v706_v52 = vsel %vm578_vm12, %v506_v37, %v642_v46  ;;  %v659_v53 = vsel %vm531_vm13, %v388_v42, %v595_v47 }
  0xe0   :  { %v834_v54 = vadd.f32 %v770_v41, %v706_v52  ;;  %v787_v55 = vadd.f32 %v723_v45, %v659_v53  ;;  %v675_v56 = vsel %vm547_vm14, %v428_v43, %v611_v49  ;;  %v757_v49 = vld [vmem:[%s1721_s3 + $0x168] sm:$0xff] }
  0xe1   :  { %882 = vst [vmem:[%s1722_s4 + $0x150] sm:$0xff] %v818_v51  ;;  %v803_v57 = vadd.f32 %v739_v50, %v675_v56  ;;  %v467_v58 = vpop.f32.mrf.mxu2  ;;  %v507_v59 = vpop.f32.mrf.mxu3  ;;  %v773_v50 = vld [vmem:[%s1721_s3 + $0x1e8] sm:$0xff] }
  0xe2   :  { %898 = vst [vmem:[%s1722_s4 + $0x1d0] sm:$0xff] %v834_v54  ;;  %v468_v60 = vadd.f32 %v1268_v33, %v467_v58  ;;  %v508_v61 = vadd.f32 %v1268_v33, %v507_v59  ;;  %v390_v62 = vpop.f32.mrf.mxu0  ;;  %v430_v63 = vpop.f32.mrf.mxu1  ;;  %v726_v54 = vld [vmem:[%s1721_s3 + $0x70] sm:$0xff] }
  0xe3   :  { %851 = vst [vmem:[%s1722_s4 + $0x58] sm:$0xff] %v787_v55  ;;  %v391_v2 = vadd.f32 %v1268_v33, %v390_v62  ;;  %v431_v3 = vadd.f32 %v1268_v33, %v430_v63  ;;  %v742_v59 = vld [vmem:[%s1721_s3 + $0xf0] sm:$0xff] }
  0xe4   :  { %867 = vst [vmem:[%s1722_s4 + $0xd8] sm:$0xff] %v803_v57  ;;  %vm563_vm15 = vcmp.ge.f32.partialorder %v468_v60, 0.0  ;;  %v627_v4 = vmul.f32 0.2, %v468_v60  ;;  %vm579_vm0 = vcmp.ge.f32.partialorder %v508_v61, 0.0 }
  0xe5   :  { %v643_v6 = vmul.f32 0.2, %v508_v61  ;;  %vm532_vm1 = vcmp.ge.f32.partialorder %v391_v2, 0.0  ;;  %v596_v7 = vmul.f32 0.2, %v391_v2  ;;  %vm548_vm2 = vcmp.ge.f32.partialorder %v431_v3, 0.0 }
  0xe6   :  { %v691_v8 = vsel %vm563_vm15, %v468_v60, %v627_v4  ;;  %v612_v9 = vmul.f32 0.2, %v431_v3 }
  0xe7   :  { %v819_v11 = vadd.f32 %v755_v0, %v691_v8  ;;  %v707_v12 = vsel %vm579_vm0, %v508_v61, %v643_v6  ;;  %v660_v13 = vsel %vm532_vm1, %v391_v2, %v596_v7 }
  0xe8   :  { %v835_v14 = vadd.f32 %v771_v1, %v707_v12  ;;  %v788_v15 = vadd.f32 %v724_v5, %v660_v13  ;;  %v676_v16 = vsel %vm548_vm2, %v431_v3, %v612_v9  ;;  %v758_v9 = vld [vmem:[%s1721_s3 + $0x170] sm:$0xff] }
  0xe9   :  { %883 = vst [vmem:[%s1722_s4 + $0x158] sm:$0xff] %v819_v11  ;;  %v804_v17 = vadd.f32 %v740_v10, %v676_v16  ;;  %v470_v18 = vpop.f32.mrf.mxu2  ;;  %v510_v19 = vpop.f32.mrf.mxu3  ;;  %v774_v10 = vld [vmem:[%s1721_s3 + $0x1f0] sm:$0xff] }
  0xea   :  { %899 = vst [vmem:[%s1722_s4 + $0x1d8] sm:$0xff] %v835_v14  ;;  %v471_v20 = vadd.f32 %v1268_v33, %v470_v18  ;;  %v511_v21 = vadd.f32 %v1268_v33, %v510_v19  ;;  %v392_v22 = vpop.f32.mrf.mxu0  ;;  %v432_v23 = vpop.f32.mrf.mxu1  ;;  %v727_v14 = vld [vmem:[%s1721_s3 + $0x78] sm:$0xff] }
  0xeb   :  { %852 = vst [vmem:[%s1722_s4 + $0x60] sm:$0xff] %v788_v15  ;;  %v393_v26 = vadd.f32 %v1268_v33, %v392_v22  ;;  %v433_v27 = vadd.f32 %v1268_v33, %v432_v23  ;;  %v743_v19 = vld [vmem:[%s1721_s3 + $0xf8] sm:$0xff] }
  0xec   :  { %868 = vst [vmem:[%s1722_s4 + $0xe0] sm:$0xff] %v804_v17  ;;  %vm564_vm3 = vcmp.ge.f32.partialorder %v471_v20, 0.0  ;;  %v628_v28 = vmul.f32 0.2, %v471_v20  ;;  %vm580_vm4 = vcmp.ge.f32.partialorder %v511_v21, 0.0 }
  0xed   :  { %v644_v30 = vmul.f32 0.2, %v511_v21  ;;  %vm533_vm5 = vcmp.ge.f32.partialorder %v393_v26, 0.0  ;;  %v597_v31 = vmul.f32 0.2, %v393_v26  ;;  %vm549_vm6 = vcmp.ge.f32.partialorder %v433_v27, 0.0 }
  0xee   :  { %v692_v32 = vsel %vm564_vm3, %v471_v20, %v628_v28  ;;  %v613_v34 = vmul.f32 0.2, %v433_v27 }
  0xef   :  { %v820_v36 = vadd.f32 %v756_v24, %v692_v32  ;;  %v708_v37 = vsel %vm580_vm4, %v511_v21, %v644_v30  ;;  %v661_v38 = vsel %vm533_vm5, %v393_v26, %v597_v31  ;;  %v759_v32 = vld [vmem:[%s1721_s3 + $0x178] sm:$0xff] }
  0xf0   :  { %v836_v39 = vadd.f32 %v772_v25, %v708_v37  ;;  %v789_v40 = vadd.f32 %v725_v29, %v661_v38  ;;  %v677_v41 = vsel %vm549_vm6, %v433_v27, %v613_v34 }
  0xf1   :  { %884 = vst [vmem:[%s1722_s4 + $0x160] sm:$0xff] %v820_v36  ;;  %v805_v42 = vadd.f32 %v741_v35, %v677_v41  ;;  %v472_v43 = vpop.f32.mrf.mxu2  ;;  %v512_v44 = vpop.f32.mrf.mxu3 }
  0xf2   :  { %900 = vst [vmem:[%s1722_s4 + $0x1e0] sm:$0xff] %v836_v39  ;;  %v473_v45 = vadd.f32 %v1268_v33, %v472_v43  ;;  %v513_v46 = vadd.f32 %v1268_v33, %v512_v44  ;;  %v395_v47 = vpop.f32.mrf.mxu0  ;;  %v435_v48 = vpop.f32.mrf.mxu1 }
  0xf3   :  { %853 = vst [vmem:[%s1722_s4 + $0x68] sm:$0xff] %v789_v40  ;;  %v396_v51 = vadd.f32 %v1268_v33, %v395_v47  ;;  %v436_v52 = vadd.f32 %v1268_v33, %v435_v48 }
  0xf4   :  { %869 = vst [vmem:[%s1722_s4 + $0xe8] sm:$0xff] %v805_v42  ;;  %vm565_vm7 = vcmp.ge.f32.partialorder %v473_v45, 0.0  ;;  %v629_v53 = vmul.f32 0.2, %v473_v45  ;;  %vm581_vm8 = vcmp.ge.f32.partialorder %v513_v46, 0.0 }
  0xf5   :  { %v645_v55 = vmul.f32 0.2, %v513_v46  ;;  %vm534_vm9 = vcmp.ge.f32.partialorder %v396_v51, 0.0  ;;  %v598_v56 = vmul.f32 0.2, %v396_v51  ;;  %vm550_vm10 = vcmp.ge.f32.partialorder %v436_v52, 0.0 }
  0xf6   :  { %v693_v57 = vsel %vm565_vm7, %v473_v45, %v629_v53  ;;  %v614_v58 = vmul.f32 0.2, %v436_v52 }
  0xf7   :  { %v821_v60 = vadd.f32 %v757_v49, %v693_v57  ;;  %v709_v61 = vsel %vm581_vm8, %v513_v46, %v645_v55  ;;  %v662_v62 = vsel %vm534_vm9, %v396_v51, %v598_v56 }
  0xf8   :  { %v837_v63 = vadd.f32 %v773_v50, %v709_v61  ;;  %v790_v0 = vadd.f32 %v726_v54, %v662_v62  ;;  %v678_v1 = vsel %vm550_vm10, %v436_v52, %v614_v58 }
  0xf9   :  { %885 = vst [vmem:[%s1722_s4 + $0x168] sm:$0xff] %v821_v60  ;;  %v806_v2 = vadd.f32 %v742_v59, %v678_v1  ;;  %v475_v3 = vpop.f32.mrf.mxu2  ;;  %v515_v4 = vpop.f32.mrf.mxu3 }
  0xfa   :  { %901 = vst [vmem:[%s1722_s4 + $0x1e8] sm:$0xff] %v837_v63  ;;  %v476_v5 = vadd.f32 %v1268_v33, %v475_v3  ;;  %v516_v6 = vadd.f32 %v1268_v33, %v515_v4  ;;  %v397_v7 = vpop.f32.mrf.mxu0  ;;  %v437_v8 = vpop.f32.mrf.mxu1 }
  0xfb   :  { %854 = vst [vmem:[%s1722_s4 + $0x70] sm:$0xff] %v790_v0  ;;  %v398_v11 = vadd.f32 %v1268_v33, %v397_v7  ;;  %v438_v12 = vadd.f32 %v1268_v33, %v437_v8 }
  0xfc   :  { %870 = vst [vmem:[%s1722_s4 + $0xf0] sm:$0xff] %v806_v2  ;;  %vm566_vm11 = vcmp.ge.f32.partialorder %v476_v5, 0.0  ;;  %v630_v13 = vmul.f32 0.2, %v476_v5  ;;  %vm582_vm12 = vcmp.ge.f32.partialorder %v516_v6, 0.0 }
  0xfd   :  { %v646_v15 = vmul.f32 0.2, %v516_v6  ;;  %vm535_vm13 = vcmp.ge.f32.partialorder %v398_v11, 0.0  ;;  %v599_v16 = vmul.f32 0.2, %v398_v11  ;;  %vm551_vm14 = vcmp.ge.f32.partialorder %v438_v12, 0.0 }
  0xfe   :  { %v694_v17 = vsel %vm566_vm11, %v476_v5, %v630_v13  ;;  %v615_v18 = vmul.f32 0.2, %v438_v12 }
  0xff   :  { %v822_v20 = vadd.f32 %v758_v9, %v694_v17  ;;  %v710_v21 = vsel %vm582_vm12, %v516_v6, %v646_v15  ;;  %v663_v22 = vsel %vm535_vm13, %v398_v11, %v599_v16 }
 0x100   :  { %v838_v23 = vadd.f32 %v774_v10, %v710_v21  ;;  %v791_v24 = vadd.f32 %v727_v14, %v663_v22  ;;  %v679_v25 = vsel %vm551_vm14, %v438_v12, %v615_v18 }
 0x101   :  { %886 = vst [vmem:[%s1722_s4 + $0x170] sm:$0xff] %v822_v20  ;;  %v807_v26 = vadd.f32 %v743_v19, %v679_v25  ;;  %v477_v27 = vpop.f32.mrf.mxu2  ;;  %v517_v28 = vpop.f32.mrf.mxu3 }
 0x102   :  { %902 = vst [vmem:[%s1722_s4 + $0x1f0] sm:$0xff] %v838_v23  ;;  %v478_v29 = vadd.f32 %v1268_v33, %v477_v27  ;;  %v518_v30 = vadd.f32 %v1268_v33, %v517_v28  ;;  %v775_v33 = vld [vmem:[%s1721_s3 + $0x1f8] sm:$0xff] }
 0x103   :  { %855 = vst [vmem:[%s1722_s4 + $0x78] sm:$0xff] %v791_v24 }
 0x104   :  { %871 = vst [vmem:[%s1722_s4 + $0xf8] sm:$0xff] %v807_v26  ;;  %vm567_vm15 = vcmp.ge.f32.partialorder %v478_v29, 0.0  ;;  %v631_v31 = vmul.f32 0.2, %v478_v29  ;;  %vm583_vm0 = vcmp.ge.f32.partialorder %v518_v30, 0.0 }
 0x105   :  { %v647_v34 = vmul.f32 0.2, %v518_v30 }
 0x106   :  { %v695_v35 = vsel %vm567_vm15, %v478_v29, %v631_v31 }
 0x107   :  { %v823_v36 = vadd.f32 %v759_v32, %v695_v35  ;;  %v711_v37 = vsel %vm583_vm0, %v518_v30, %v647_v34 }
 0x108   :  { %v839_v38 = vadd.f32 %v775_v33, %v711_v37 }
 0x109   :  { %887 = vst [vmem:[%s1722_s4 + $0x178] sm:$0xff] %v823_v36 }
 0x10a   :  { %903 = vst [vmem:[%s1722_s4 + $0x1f8] sm:$0xff] %v839_v38 }

// kernel: fpse_forward.22
= control target key start
LH: loop header
LB: loop body
LE: loop exit
PB: predicated region body
PF: predicated region fallthrough
CT: control target
= control target key end

     0   :  { %vm321_vm0 = vcmask 261120   ;;  %s1278_s1 = inlined_call_operand.vmem [shape: bf16[288,128], index: 1, kind: input, shape index: {}]   ;;  %s1279_s0 = inlined_call_operand.vmem [shape: bf16[128,288], index: 0, kind: input, shape index: {}]   ;;  %s1280_s2 = inlined_call_operand.vmem [shape: f32[1,128], index: 2, kind: input, shape index: {}]   ;;  %s1281_s3 = inlined_call_operand.vmem [shape: bf16[128,128], index: 3, kind: input, shape index: {}]   ;;  %s1282_s4 = inlined_call_operand.vmem [shape: f32[1,128], index: 4, kind: input, shape index: {}]   ;;  %s1283_s5 = inlined_call_operand.vmem [shape: f32[128,128], index: 5, kind: output, shape index: {}]  }
   0x1   :  { %v925_v0 = vld [vmem:[%s1278_s1 + $0x38] sm:$0xff]  ;;  %v924_v2 = vld [vmem:[%s1278_s1 + $0x30] sm:$0xff]  ;;  %v935_v4 = vld [vmem:[%s1278_s1 + $0x88] sm:$0xff] }
   0x2   :  { %v933_v1 = vld [vmem:[%s1278_s1 + $0x78] sm:$0xff]  ;;  %346 = vmatpush.bf16.msra.mxu0 %v925_v0  ;;  %v932_v3 = vld [vmem:[%s1278_s1 + $0x70] sm:$0xff]  ;;  %450 = vmatpush.bf16.msra.mxu2 %v935_v4  ;;  %v934_v5 = vld [vmem:[%s1278_s1 + $0x80] sm:$0xff] }
   0x3   :  { %395 = vmatpush.bf16.msra.mxu1 %v933_v1  ;;  %v696_v6 = vld [vmem:[%s1279_s0 + $0x8] sm:$0xf]  ;;  %v896_v7 = vld [vmem:[%s1279_s0 + $0x10] sm:$0xf0]  ;;  %v922_v11 = vld [vmem:[%s1278_s1 + $0x20] sm:$0xff] }
   0x4   :  { %v923_v8 = vld [vmem:[%s1278_s1 + $0x28] sm:$0xff]  ;;  %v697_v10 = vor.u32 %v896_v7, %v696_v6  ;;  %v930_v12 = vld [vmem:[%s1278_s1 + $0x60] sm:$0xff]  ;;  %v921_v13 = vld [vmem:[%s1278_s1 + $0x18] sm:$0xff] }
   0x5   :  { %v931_v9 = vld [vmem:[%s1278_s1 + $0x68] sm:$0xff]  ;;  %v929_v14 = vld [vmem:[%s1278_s1 + $0x58] sm:$0xff]  ;;  %v920_v15 = vld [vmem:[%s1278_s1 + $0x10] sm:$0xff] }
   0x6   :  { %347 = vmatpush.bf16.msra.mxu0 %v924_v2  ;;  %451 = vmatpush.bf16.msra.mxu2 %v934_v5  ;;  %v928_v16 = vld [vmem:[%s1278_s1 + $0x50] sm:$0xff]  ;;  %v708_v17 = vld [vmem:[%s1279_s0 + $0x20] sm:$0xf]  ;;  %v899_v18 = vld [vmem:[%s1279_s0 + $0x28] sm:$0xf0] }
   0x7   :  { %396 = vmatpush.bf16.msra.mxu1 %v932_v3  ;;  %v919_v19 = vld [vmem:[%s1278_s1 + $0x8] sm:$0xff]  ;;  %v709_v21 = vor.u32 %v899_v18, %v708_v17  ;;  %v918_v22 = vld [vmem:[%s1278_s1] sm:$0xff]  ;;  %v690_v27 = vld [vmem:[%s1279_s0 + $0xc] sm:$0xf0] }
   0x8   :  { %v927_v20 = vld [vmem:[%s1278_s1 + $0x48] sm:$0xff]  ;;  %v926_v23 = vld [vmem:[%s1278_s1 + $0x40] sm:$0xff]  ;;  %v720_v30 = vld [vmem:[%s1279_s0 + $0x38] sm:$0xf] }
   0x9   :  { %854 = vmatmul.msk.bf16.vlgmr.msra.gmra.mxu2 %vm321_vm0, %v697_v10  ;;  %v688_v24 = vld [vmem:[%s1279_s0] sm:$0xf]  ;;  %v895_v25 = vld [vmem:[%s1279_s0 + $0x8] sm:$0xf0]  ;;  %v894_v26 = vld [vmem:[%s1279_s0 + $0x4] sm:$0xf] }
   0xa   :  { %348 = vmatpush.bf16.msra.mxu0 %v923_v8  ;;  %v689_v28 = vor.u32 %v895_v25, %v688_v24  ;;  %v693_v29 = vor.u32 %v894_v26, %v690_v27  ;;  %v902_v31 = vld [vmem:[%s1279_s0 + $0x40] sm:$0xf0]  ;;  %v700_v33 = vld [vmem:[%s1279_s0 + $0x18] sm:$0xf]  ;;  %v897_v35 = vld [vmem:[%s1279_s0 + $0x1c] sm:$0xf] }
   0xb   :  { %397 = vmatpush.bf16.msra.mxu1 %v931_v9  ;;  %v721_v32 = vor.u32 %v902_v31, %v720_v30  ;;  %v898_v34 = vld [vmem:[%s1279_s0 + $0x20] sm:$0xf0]  ;;  %v702_v36 = vld [vmem:[%s1279_s0 + $0x24] sm:$0xf0]  ;;  %v732_v39 = vld [vmem:[%s1279_s0 + $0x50] sm:$0xf] }
   0xc   :  { %v701_v37 = vor.u32 %v898_v34, %v700_v33  ;;  %v705_v38 = vor.u32 %v897_v35, %v702_v36  ;;  %v905_v40 = vld [vmem:[%s1279_s0 + $0x58] sm:$0xf0]  ;;  %v712_v42 = vld [vmem:[%s1279_s0 + $0x30] sm:$0xf]  ;;  %v900_v44 = vld [vmem:[%s1279_s0 + $0x34] sm:$0xf] }
   0xd   :  { %v733_v41 = vor.u32 %v905_v40, %v732_v39  ;;  %v901_v43 = vld [vmem:[%s1279_s0 + $0x38] sm:$0xf0]  ;;  %v714_v45 = vld [vmem:[%s1279_s0 + $0x3c] sm:$0xf0]  ;;  %v744_v48 = vld [vmem:[%s1279_s0 + $0x68] sm:$0xf] }
   0xe   :  { %349 = vmatpush.bf16.msra.mxu0 %v922_v11  ;;  %v713_v46 = vor.u32 %v901_v43, %v712_v42  ;;  %v717_v47 = vor.u32 %v900_v44, %v714_v45  ;;  %v908_v49 = vld [vmem:[%s1279_s0 + $0x70] sm:$0xf0]  ;;  %v724_v51 = vld [vmem:[%s1279_s0 + $0x48] sm:$0xf]  ;;  %v903_v53 = vld [vmem:[%s1279_s0 + $0x4c] sm:$0xf] }
   0xf   :  { %398 = vmatpush.bf16.msra.mxu1 %v930_v12  ;;  %v745_v50 = vor.u32 %v908_v49, %v744_v48  ;;  %v904_v52 = vld [vmem:[%s1279_s0 + $0x50] sm:$0xf0]  ;;  %v726_v54 = vld [vmem:[%s1279_s0 + $0x54] sm:$0xf0]  ;;  %v756_v57 = vld [vmem:[%s1279_s0 + $0x80] sm:$0xf] }
  0x10   :  { %v725_v55 = vor.u32 %v904_v52, %v724_v51  ;;  %v729_v56 = vor.u32 %v903_v53, %v726_v54  ;;  %v911_v58 = vld [vmem:[%s1279_s0 + $0x88] sm:$0xf0]  ;;  %v736_v60 = vld [vmem:[%s1279_s0 + $0x60] sm:$0xf]  ;;  %v906_v62 = vld [vmem:[%s1279_s0 + $0x64] sm:$0xf] }
  0x11   :  { %v757_v59 = vor.u32 %v911_v58, %v756_v57  ;;  %v907_v61 = vld [vmem:[%s1279_s0 + $0x68] sm:$0xf0]  ;;  %v738_v63 = vld [vmem:[%s1279_s0 + $0x6c] sm:$0xf0]  ;;  %v768_v2 = vld [vmem:[%s1279_s0 + $0x98] sm:$0xf] }
  0x12   :  { %350 = vmatpush.bf16.msra.mxu0 %v921_v13  ;;  %v737_v0 = vor.u32 %v907_v61, %v736_v60  ;;  %v741_v1 = vor.u32 %v906_v62, %v738_v63  ;;  %v914_v3 = vld [vmem:[%s1279_s0 + $0xa0] sm:$0xf0]  ;;  %v748_v5 = vld [vmem:[%s1279_s0 + $0x78] sm:$0xf]  ;;  %v909_v7 = vld [vmem:[%s1279_s0 + $0x7c] sm:$0xf] }
  0x13   :  { %399 = vmatpush.bf16.msra.mxu1 %v929_v14  ;;  %v769_v4 = vor.u32 %v914_v3, %v768_v2  ;;  %v910_v6 = vld [vmem:[%s1279_s0 + $0x80] sm:$0xf0]  ;;  %v750_v8 = vld [vmem:[%s1279_s0 + $0x84] sm:$0xf0]  ;;  %v943_v11 = vld [vmem:[%s1281_s3 + $0x38] sm:$0xff] }
  0x14   :  { %v749_v9 = vor.u32 %v910_v6, %v748_v5  ;;  %v753_v10 = vor.u32 %v909_v7, %v750_v8  ;;  %617 = vmatpush.bf16.msra.mxu3 %v943_v11  ;;  %v942_v12 = vld [vmem:[%s1281_s3 + $0x30] sm:$0xff]  ;;  %v917_v14 = vld [vmem:[%s1279_s0 + $0xb8] sm:$0xf0]  ;;  %v772_v26 = vld [vmem:[%s1279_s0 + $0xa8] sm:$0xf] }
  0x15   :  { %v780_v13 = vld [vmem:[%s1279_s0 + $0xb0] sm:$0xf]  ;;  %v913_v18 = vld [vmem:[%s1279_s0 + $0x98] sm:$0xf0]  ;;  %v937_v27 = vld [vmem:[%s1281_s3 + $0x8] sm:$0xff] }
  0x16   :  { %351 = vmatpush.bf16.msra.mxu0 %v920_v15  ;;  %v781_v15 = vor.u32 %v917_v14, %v780_v13  ;;  %v760_v17 = vld [vmem:[%s1279_s0 + $0x90] sm:$0xf]  ;;  %v939_v24 = vld [vmem:[%s1281_s3 + $0x18] sm:$0xff]  ;;  %v936_v33 = vld [vmem:[%s1281_s3] sm:$0xff] }
  0x17   :  { %400 = vmatpush.bf16.msra.mxu1 %v928_v16  ;;  %v941_v16 = vld [vmem:[%s1281_s3 + $0x28] sm:$0xff]  ;;  %v938_v25 = vld [vmem:[%s1281_s3 + $0x10] sm:$0xff]  ;;  %v774_v30 = vld [vmem:[%s1279_s0 + $0xb4] sm:$0xf0] }
  0x18   :  { %618 = vmatpush.bf16.msra.mxu3 %v942_v12  ;;  %v1209_v36 = vld [vmem:[%s1280_s2] ss:$0 sm:$0xff] }
  0x19   :  { %855 = vmatmul.msk.bf16.gmra.mxu2 %vm321_vm0, %v709_v21  ;;  %v761_v21 = vor.u32 %v913_v18, %v760_v17 }
  0x1a   :  { %352 = vmatpush.bf16.msra.mxu0 %v919_v19  ;;  %v912_v19 = vld [vmem:[%s1279_s0 + $0x94] sm:$0xf] }
  0x1b   :  { %401 = vmatpush.bf16.msra.mxu1 %v927_v20  ;;  %v762_v20 = vld [vmem:[%s1279_s0 + $0x9c] sm:$0xf0] }
  0x1c   :  { %619 = vmatpush.bf16.msra.mxu3 %v941_v16 }
  0x1e   :  { %353 = vmatpush.bf16.msra.mxu0 %v918_v22  ;;  %v765_v22 = vor.u32 %v912_v19, %v762_v20 }
  0x1f   :  { %402 = vmatpush.bf16.msra.mxu1 %v926_v23  ;;  %v940_v23 = vld [vmem:[%s1281_s3 + $0x20] sm:$0xff] }
  0x20   :  { %620 = vmatpush.bf16.msra.mxu3 %v940_v23 }
  0x21   :  { %354 = vmatmul.bf16.vlgmr.msra.gmra.mxu0 %v689_v28  ;;  %v916_v28 = vld [vmem:[%s1279_s0 + $0xb0] sm:$0xf0] }
  0x22   :  { %403 = vmatmul.bf16.vlgmr.msra.gmra.mxu1 %v693_v29  ;;  %v915_v29 = vld [vmem:[%s1279_s0 + $0xac] sm:$0xf]  ;;  %v773_v31 = vor.u32 %v916_v28, %v772_v26 }
  0x24   :  { %621 = vmatpush.bf16.msra.mxu3 %v939_v24 }
  0x28   :  { %622 = vmatpush.bf16.msra.mxu3 %v938_v25 }
  0x29   :  { %856 = vmatmul.msk.bf16.gmra.mxu2 %vm321_vm0, %v721_v32  ;;  %v777_v32 = vor.u32 %v915_v29, %v774_v30 }
  0x2c   :  { %623 = vmatpush.bf16.msra.mxu3 %v937_v27 }
  0x30   :  { %624 = vmatpush.bf16.msra.mxu3 %v936_v33 }
  0x31   :  { %359 = vmatmul.bf16.gmra.mxu0 %v701_v37 }
  0x32   :  { %408 = vmatmul.bf16.gmra.mxu1 %v705_v38 }
  0x39   :  { %857 = vmatmul.msk.bf16.gmra.mxu2 %vm321_vm0, %v733_v41 }
  0x41   :  { %364 = vmatmul.bf16.gmra.mxu0 %v713_v46 }
  0x42   :  { %413 = vmatmul.bf16.gmra.mxu1 %v717_v47 }
  0x49   :  { %858 = vmatmul.msk.bf16.gmra.mxu2 %vm321_vm0, %v745_v50 }
  0x51   :  { %369 = vmatmul.bf16.gmra.mxu0 %v725_v55 }
  0x52   :  { %418 = vmatmul.bf16.gmra.mxu1 %v729_v56 }
  0x59   :  { %859 = vmatmul.msk.bf16.gmra.mxu2 %vm321_vm0, %v757_v59 }
  0x61   :  { %374 = vmatmul.bf16.gmra.mxu0 %v737_v0 }
  0x62   :  { %423 = vmatmul.bf16.gmra.mxu1 %v741_v1 }
  0x69   :  { %860 = vmatmul.msk.bf16.gmra.mxu2 %vm321_vm0, %v769_v4 }
  0x71   :  { %379 = vmatmul.bf16.gmra.mxu0 %v749_v9 }
  0x72   :  { %428 = vmatmul.bf16.gmra.mxu1 %v753_v10 }
  0x79   :  { %861 = vmatmul.msk.bf16.gmra.mxu2 %vm321_vm0, %v781_v15 }
  0x81   :  { %384 = vmatmul.bf16.gmra.mxu0 %v761_v21 }
  0x82   :  { %433 = vmatmul.bf16.gmra.mxu1 %v765_v22 }
  0x8c   :  { %v453_v34 = vpop.f32.mrf.mxu2 }
  0x91   :  { %389 = vmatmul.bf16.gmra.mxu0 %v773_v31 }
  0x92   :  { %438 = vmatmul.bf16.gmra.mxu1 %v777_v32 }
  0x94   :  { %v455_v35 = vpop.f32.mrf.mxu2 }
  0x9c   :  { %v458_v40 = vpop.f32.mrf.mxu2 }
  0x9e   :  { %v355_v37 = vpop.f32.mrf.mxu0 }
  0x9f   :  { %v404_v38 = vpop.f32.mrf.mxu1  ;;  %v356_v39 = vadd.f32 %v1209_v36, %v355_v37 }
  0xa1   :  { %v405_v41 = vadd.f32 %v404_v38, %v356_v39 }
  0xa3   :  { %v454_v44 = vadd.f32 %v453_v34, %v405_v41 }
  0xa4   :  { %v460_v46 = vpop.f32.mrf.mxu2 }
  0xa5   :  { %v509_v49 = vmul.f32 0.2, %v454_v44  ;;  %vm493_vm1 = vcmp.ge.f32.partialorder %v454_v44, 0.0 }
  0xa6   :  { %v357_v42 = vpop.f32.mrf.mxu0 }
  0xa7   :  { %v406_v43 = vpop.f32.mrf.mxu1  ;;  %v358_v45 = vadd.f32 %v1209_v36, %v357_v42  ;;  %v525_v54 = vsel %vm493_vm1, %v454_v44, %v509_v49 }
  0xa9   :  { %v407_v47 = vadd.f32 %v406_v43, %v358_v45 }
  0xab   :  { %v456_v48 = vadd.f32 %v455_v35, %v407_v47 }
  0xac   :  { %v463_v56 = vpop.f32.mrf.mxu2 }
  0xad   :  { %vm494_vm2 = vcmp.ge.f32.partialorder %v456_v48, 0.0  ;;  %v510_v50 = vmul.f32 0.2, %v456_v48 }
  0xae   :  { %v360_v51 = vpop.f32.mrf.mxu0 }
  0xaf   :  { %v409_v52 = vpop.f32.mrf.mxu1  ;;  %v361_v53 = vadd.f32 %v1209_v36, %v360_v51  ;;  %v526_v55 = vsel %vm494_vm2, %v456_v48, %v510_v50 }
  0xb0   :  { %v541_v57 = vpack.c.bf16 %v526_v55, %v525_v54 }
  0xb1   :  { %v410_v58 = vadd.f32 %v409_v52, %v361_v53 }
  0xb2   :  { %625 = vmatmul.bf16.vlgmr.msra.gmra.mxu3 %v541_v57 }
  0xb3   :  { %v459_v61 = vadd.f32 %v458_v40, %v410_v58 }
  0xb4   :  { %v465_v63 = vpop.f32.mrf.mxu2 }
  0xb5   :  { %v511_v2 = vmul.f32 0.2, %v459_v61  ;;  %vm495_vm3 = vcmp.ge.f32.partialorder %v459_v61, 0.0 }
  0xb6   :  { %v362_v59 = vpop.f32.mrf.mxu0 }
  0xb7   :  { %v411_v60 = vpop.f32.mrf.mxu1  ;;  %v363_v62 = vadd.f32 %v1209_v36, %v362_v59  ;;  %v527_v7 = vsel %vm495_vm3, %v459_v61, %v511_v2 }
  0xb9   :  { %v412_v0 = vadd.f32 %v411_v60, %v363_v62 }
  0xbb   :  { %v461_v1 = vadd.f32 %v460_v46, %v412_v0 }
  0xbc   :  { %v468_v9 = vpop.f32.mrf.mxu2 }
  0xbd   :  { %vm496_vm4 = vcmp.ge.f32.partialorder %v461_v1, 0.0  ;;  %v512_v3 = vmul.f32 0.2, %v461_v1 }
  0xbe   :  { %v365_v4 = vpop.f32.mrf.mxu0 }
  0xbf   :  { %v414_v5 = vpop.f32.mrf.mxu1  ;;  %v366_v6 = vadd.f32 %v1209_v36, %v365_v4  ;;  %v528_v8 = vsel %vm496_vm4, %v461_v1, %v512_v3 }
  0xc0   :  { %v542_v10 = vpack.c.bf16 %v528_v8, %v527_v7 }
  0xc1   :  { %v415_v11 = vadd.f32 %v414_v5, %v366_v6 }
  0xc2   :  { %630 = vmatmul.bf16.gmra.mxu3 %v542_v10 }
  0xc3   :  { %v464_v14 = vadd.f32 %v463_v56, %v415_v11 }
  0xc4   :  { %v470_v17 = vpop.f32.mrf.mxu2 }
  0xc5   :  { %v513_v19 = vmul.f32 0.2, %v464_v14  ;;  %vm497_vm5 = vcmp.ge.f32.partialorder %v464_v14, 0.0 }
  0xc6   :  { %v367_v12 = vpop.f32.mrf.mxu0 }
  0xc7   :  { %v416_v13 = vpop.f32.mrf.mxu1  ;;  %v368_v15 = vadd.f32 %v1209_v36, %v367_v12  ;;  %v529_v24 = vsel %vm497_vm5, %v464_v14, %v513_v19 }
  0xc9   :  { %v417_v16 = vadd.f32 %v416_v13, %v368_v15 }
  0xcb   :  { %v466_v18 = vadd.f32 %v465_v63, %v417_v16 }
  0xcc   :  { %v473_v28 = vpop.f32.mrf.mxu2 }
  0xcd   :  { %vm498_vm6 = vcmp.ge.f32.partialorder %v466_v18, 0.0  ;;  %v514_v20 = vmul.f32 0.2, %v466_v18 }
  0xce   :  { %v370_v21 = vpop.f32.mrf.mxu0 }
  0xcf   :  { %v419_v22 = vpop.f32.mrf.mxu1  ;;  %v371_v23 = vadd.f32 %v1209_v36, %v370_v21  ;;  %v530_v25 = vsel %vm498_vm6, %v466_v18, %v514_v20 }
  0xd0   :  { %v543_v26 = vpack.c.bf16 %v530_v25, %v529_v24 }
  0xd1   :  { %v420_v27 = vadd.f32 %v419_v22, %v371_v23 }
  0xd2   :  { %635 = vmatmul.bf16.gmra.mxu3 %v543_v26 }
  0xd3   :  { %v469_v31 = vadd.f32 %v468_v9, %v420_v27 }
  0xd4   :  { %v475_v37 = vpop.f32.mrf.mxu2 }
  0xd5   :  { %v515_v35 = vmul.f32 0.2, %v469_v31  ;;  %vm499_vm7 = vcmp.ge.f32.partialorder %v469_v31, 0.0 }
  0xd6   :  { %v372_v29 = vpop.f32.mrf.mxu0 }
  0xd7   :  { %v421_v30 = vpop.f32.mrf.mxu1  ;;  %v373_v32 = vadd.f32 %v1209_v36, %v372_v29  ;;  %v531_v42 = vsel %vm499_vm7, %v469_v31, %v515_v35 }
  0xd9   :  { %v422_v33 = vadd.f32 %v421_v30, %v373_v32 }
  0xdb   :  { %v471_v34 = vadd.f32 %v470_v17, %v422_v33 }
  0xdc   :  { %v478_v50 = vpop.f32.mrf.mxu2 }
  0xdd   :  { %vm500_vm8 = vcmp.ge.f32.partialorder %v471_v34, 0.0  ;;  %v516_v38 = vmul.f32 0.2, %v471_v34 }
  0xde   :  { %v375_v39 = vpop.f32.mrf.mxu0 }
  0xdf   :  { %v424_v40 = vpop.f32.mrf.mxu1  ;;  %v376_v41 = vadd.f32 %v1209_v36, %v375_v39  ;;  %v532_v43 = vsel %vm500_vm8, %v471_v34, %v516_v38 }
  0xe0   :  { %v544_v44 = vpack.c.bf16 %v532_v43, %v531_v42 }
  0xe1   :  { %v425_v45 = vadd.f32 %v424_v40, %v376_v41 }
  0xe2   :  { %640 = vmatmul.bf16.gmra.mxu3 %v544_v44 }
  0xe3   :  { %v474_v48 = vadd.f32 %v473_v28, %v425_v45  ;;  %v945_v45 = vld [vmem:[%s1282_s4] ss:$0 sm:$0xff] }
  0xe4   :  { %v480_v61 = vpop.f32.mrf.mxu2 }
  0xe5   :  { %v517_v53 = vmul.f32 0.2, %v474_v48  ;;  %vm501_vm9 = vcmp.ge.f32.partialorder %v474_v48, 0.0 }
  0xe6   :  { %v377_v46 = vpop.f32.mrf.mxu0 }
  0xe7   :  { %v426_v47 = vpop.f32.mrf.mxu1  ;;  %v378_v49 = vadd.f32 %v1209_v36, %v377_v46  ;;  %v533_v58 = vsel %vm501_vm9, %v474_v48, %v517_v53 }
  0xe9   :  { %v427_v51 = vadd.f32 %v426_v47, %v378_v49 }
  0xeb   :  { %v476_v52 = vadd.f32 %v475_v37, %v427_v51 }
  0xec   :  { %v483_v5 = vpop.f32.mrf.mxu2 }
  0xed   :  { %vm502_vm10 = vcmp.ge.f32.partialorder %v476_v52, 0.0  ;;  %v518_v54 = vmul.f32 0.2, %v476_v52 }
  0xee   :  { %v380_v55 = vpop.f32.mrf.mxu0 }
  0xef   :  { %v429_v56 = vpop.f32.mrf.mxu1  ;;  %v381_v57 = vadd.f32 %v1209_v36, %v380_v55  ;;  %v534_v59 = vsel %vm502_vm10, %v476_v52, %v518_v54 }
  0xf0   :  { %v545_v60 = vpack.c.bf16 %v534_v59, %v533_v58 }
  0xf1   :  { %v430_v62 = vadd.f32 %v429_v56, %v381_v57 }
  0xf2   :  { %645 = vmatmul.bf16.gmra.mxu3 %v545_v60 }
  0xf3   :  { %v479_v1 = vadd.f32 %v478_v50, %v430_v62 }
  0xf4   :  { %v485_v15 = vpop.f32.mrf.mxu2 }
  0xf5   :  { %v519_v6 = vmul.f32 0.2, %v479_v1  ;;  %vm503_vm11 = vcmp.ge.f32.partialorder %v479_v1, 0.0 }
  0xf6   :  { %v382_v63 = vpop.f32.mrf.mxu0 }
  0xf7   :  { %v431_v0 = vpop.f32.mrf.mxu1  ;;  %v383_v2 = vadd.f32 %v1209_v36, %v382_v63  ;;  %v535_v11 = vsel %vm503_vm11, %v479_v1, %v519_v6 }
  0xf9   :  { %v432_v3 = vadd.f32 %v431_v0, %v383_v2 }
  0xfb   :  { %v481_v4 = vadd.f32 %v480_v61, %v432_v3 }
  0xfc   :  { %v488_v29 = vpop.f32.mrf.mxu2 }
  0xfd   :  { %vm504_vm12 = vcmp.ge.f32.partialorder %v481_v4, 0.0  ;;  %v520_v7 = vmul.f32 0.2, %v481_v4 }
  0xfe   :  { %v385_v8 = vpop.f32.mrf.mxu0 }
  0xff   :  { %v434_v9 = vpop.f32.mrf.mxu1  ;;  %v386_v10 = vadd.f32 %v1209_v36, %v385_v8  ;;  %v536_v12 = vsel %vm504_vm12, %v481_v4, %v520_v7 }
 0x100   :  { %v546_v13 = vpack.c.bf16 %v536_v12, %v535_v11 }
 0x101   :  { %v435_v14 = vadd.f32 %v434_v9, %v386_v10 }
 0x102   :  { %650 = vmatmul.bf16.gmra.mxu3 %v546_v13 }
 0x103   :  { %v484_v18 = vadd.f32 %v483_v5, %v435_v14 }
 0x104   :  { %v490_v38 = vpop.f32.mrf.mxu2 }
 0x105   :  { %v521_v22 = vmul.f32 0.2, %v484_v18  ;;  %vm505_vm13 = vcmp.ge.f32.partialorder %v484_v18, 0.0 }
 0x106   :  { %v387_v16 = vpop.f32.mrf.mxu0 }
 0x107   :  { %v436_v17 = vpop.f32.mrf.mxu1  ;;  %v388_v19 = vadd.f32 %v1209_v36, %v387_v16  ;;  %v537_v27 = vsel %vm505_vm13, %v484_v18, %v521_v22 }
 0x109   :  { %v437_v20 = vadd.f32 %v436_v17, %v388_v19 }
 0x10b   :  { %v486_v21 = vadd.f32 %v485_v15, %v437_v20 }
 0x10d   :  { %vm506_vm14 = vcmp.ge.f32.partialorder %v486_v21, 0.0  ;;  %v522_v23 = vmul.f32 0.2, %v486_v21 }
 0x10e   :  { %v390_v24 = vpop.f32.mrf.mxu0 }
 0x10f   :  { %v439_v25 = vpop.f32.mrf.mxu1  ;;  %v391_v26 = vadd.f32 %v1209_v36, %v390_v24  ;;  %v538_v28 = vsel %vm506_vm14, %v486_v21, %v522_v23 }
 0x110   :  { %v547_v30 = vpack.c.bf16 %v538_v28, %v537_v27 }
 0x111   :  { %v440_v31 = vadd.f32 %v439_v25, %v391_v26 }
 0x112   :  { %655 = vmatmul.bf16.gmra.mxu3 %v547_v30 }
 0x113   :  { %v489_v33 = vadd.f32 %v488_v29, %v440_v31 }
 0x115   :  { %v523_v40 = vmul.f32 0.2, %v489_v33  ;;  %vm507_vm15 = vcmp.ge.f32.partialorder %v489_v33, 0.0 }
 0x116   :  { %v392_v32 = vpop.f32.mrf.mxu0 }
 0x117   :  { %v393_v34 = vadd.f32 %v1209_v36, %v392_v32  ;;  %v441_v35 = vpop.f32.mrf.mxu1  ;;  %v539_v42 = vsel %vm507_vm15, %v489_v33, %v523_v40 }
 0x119   :  { %v442_v37 = vadd.f32 %v441_v35, %v393_v34 }
 0x11b   :  { %v491_v39 = vadd.f32 %v490_v38, %v442_v37 }
 0x11d   :  { %vm508_vm0 = vcmp.ge.f32.partialorder %v491_v39, 0.0  ;;  %v524_v41 = vmul.f32 0.2, %v491_v39 }
 0x11f   :  { %v540_v43 = vsel %vm508_vm0, %v491_v39, %v524_v41 }
 0x120   :  { %v548_v44 = vpack.c.bf16 %v540_v43, %v539_v42 }
 0x122   :  { %660 = vmatmul.bf16.gmra.mxu3 %v548_v44 }
 0x135   :  { %v626_v46 = vpop.f32.mrf.mxu3 }
 0x136   :  { %v627_v47 = vadd.f32 %v945_v45, %v626_v46 }
 0x138   :  { %666 = vst [vmem:[%s1283_s5] sm:$0xff] %v627_v47 }
 0x13d   :  { %v628_v36 = vpop.f32.mrf.mxu3 }
 0x13e   :  { %v629_v48 = vadd.f32 %v945_v45, %v628_v36 }
 0x140   :  { %667 = vst [vmem:[%s1283_s5 + $0x8] sm:$0xff] %v629_v48 }
 0x145   :  { %v631_v49 = vpop.f32.mrf.mxu3 }
 0x146   :  { %v632_v50 = vadd.f32 %v945_v45, %v631_v49 }
 0x148   :  { %668 = vst [vmem:[%s1283_s5 + $0x10] sm:$0xff] %v632_v50 }
 0x14d   :  { %v633_v51 = vpop.f32.mrf.mxu3 }
 0x14e   :  { %v634_v52 = vadd.f32 %v945_v45, %v633_v51 }
 0x150   :  { %669 = vst [vmem:[%s1283_s5 + $0x18] sm:$0xff] %v634_v52 }
 0x155   :  { %v636_v53 = vpop.f32.mrf.mxu3 }
 0x156   :  { %v637_v54 = vadd.f32 %v945_v45, %v636_v53 }
 0x158   :  { %670 = vst [vmem:[%s1283_s5 + $0x20] sm:$0xff] %v637_v54 }
 0x15d   :  { %v638_v55 = vpop.f32.mrf.mxu3 }
 0x15e   :  { %v639_v56 = vadd.f32 %v945_v45, %v638_v55 }
 0x160   :  { %671 = vst [vmem:[%s1283_s5 + $0x28] sm:$0xff] %v639_v56 }
 0x165   :  { %v641_v57 = vpop.f32.mrf.mxu3 }
 0x166   :  { %v642_v58 = vadd.f32 %v945_v45, %v641_v57 }
 0x168   :  { %672 = vst [vmem:[%s1283_s5 + $0x30] sm:$0xff] %v642_v58 }
 0x16d   :  { %v643_v59 = vpop.f32.mrf.mxu3 }
 0x16e   :  { %v644_v60 = vadd.f32 %v945_v45, %v643_v59 }
 0x170   :  { %673 = vst [vmem:[%s1283_s5 + $0x38] sm:$0xff] %v644_v60 }
 0x175   :  { %v646_v61 = vpop.f32.mrf.mxu3 }
 0x176   :  { %v647_v62 = vadd.f32 %v945_v45, %v646_v61 }
 0x178   :  { %674 = vst [vmem:[%s1283_s5 + $0x40] sm:$0xff] %v647_v62 }
 0x17d   :  { %v648_v63 = vpop.f32.mrf.mxu3 }
 0x17e   :  { %v649_v0 = vadd.f32 %v945_v45, %v648_v63 }
 0x180   :  { %675 = vst [vmem:[%s1283_s5 + $0x48] sm:$0xff] %v649_v0 }
 0x185   :  { %v651_v1 = vpop.f32.mrf.mxu3 }
 0x186   :  { %v652_v2 = vadd.f32 %v945_v45, %v651_v1 }
 0x188   :  { %676 = vst [vmem:[%s1283_s5 + $0x50] sm:$0xff] %v652_v2 }
 0x18d   :  { %v653_v3 = vpop.f32.mrf.mxu3 }
 0x18e   :  { %v654_v4 = vadd.f32 %v945_v45, %v653_v3 }
 0x190   :  { %677 = vst [vmem:[%s1283_s5 + $0x58] sm:$0xff] %v654_v4 }
 0x195   :  { %v656_v5 = vpop.f32.mrf.mxu3 }
 0x196   :  { %v657_v6 = vadd.f32 %v945_v45, %v656_v5 }
 0x198   :  { %678 = vst [vmem:[%s1283_s5 + $0x60] sm:$0xff] %v657_v6 }
 0x19d   :  { %v658_v7 = vpop.f32.mrf.mxu3 }
 0x19e   :  { %v659_v8 = vadd.f32 %v945_v45, %v658_v7 }
 0x1a0   :  { %679 = vst [vmem:[%s1283_s5 + $0x68] sm:$0xff] %v659_v8 }
 0x1a5   :  { %v661_v9 = vpop.f32.mrf.mxu3 }
 0x1a6   :  { %v662_v10 = vadd.f32 %v945_v45, %v661_v9 }
 0x1a8   :  { %680 = vst [vmem:[%s1283_s5 + $0x70] sm:$0xff] %v662_v10 }
 0x1ad   :  { %v663_v11 = vpop.f32.mrf.mxu3 }
 0x1ae   :  { %v664_v12 = vadd.f32 %v945_v45, %v663_v11 }
 0x1b0   :  { %681 = vst [vmem:[%s1283_s5 + $0x78] sm:$0xff] %v664_v12 }

// kernel: fpse_forward.21
= control target key start
LH: loop header
LB: loop body
LE: loop exit
PB: predicated region body
PF: predicated region fallthrough
CT: control target
= control target key end

     0   :  { %vm777_vm0 = vcmask 261120   ;;  %s3615_s1 = inlined_call_operand.vmem [shape: bf16[288,128], index: 1, kind: input, shape index: {}]   ;;  %s3616_s0 = inlined_call_operand.vmem [shape: bf16[512,288], index: 0, kind: input, shape index: {}]   ;;  %s3617_s2 = inlined_call_operand.vmem [shape: f32[1,128], index: 2, kind: input, shape index: {}]   ;;  %s3618_s3 = inlined_call_operand.vmem [shape: bf16[128,128], index: 3, kind: input, shape index: {}]   ;;  %s3619_s4 = inlined_call_operand.vmem [shape: f32[1,128], index: 4, kind: input, shape index: {}]   ;;  %s3620_s5 = inlined_call_operand.vmem [shape: f32[512,128], index: 5, kind: output, shape index: {}]  }
   0x1   :  { %v2533_v0 = vld [vmem:[%s3615_s1 + $0x38] sm:$0xff]  ;;  %v2532_v2 = vld [vmem:[%s3615_s1 + $0x30] sm:$0xff]  ;;  %v2543_v4 = vld [vmem:[%s3615_s1 + $0x88] sm:$0xff] }
   0x2   :  { %v2541_v1 = vld [vmem:[%s3615_s1 + $0x78] sm:$0xff]  ;;  %874 = vmatpush.bf16.msra.mxu0 %v2533_v0  ;;  %v2540_v3 = vld [vmem:[%s3615_s1 + $0x70] sm:$0xff]  ;;  %1218 = vmatpush.bf16.msra.mxu2 %v2543_v4  ;;  %v2542_v5 = vld [vmem:[%s3615_s1 + $0x80] sm:$0xff] }
   0x3   :  { %1043 = vmatpush.bf16.msra.mxu1 %v2541_v1  ;;  %v1920_v6 = vld [vmem:[%s3616_s0 + $0x8] sm:$0xf]  ;;  %v2432_v7 = vld [vmem:[%s3616_s0 + $0x10] sm:$0xf0]  ;;  %v2530_v11 = vld [vmem:[%s3615_s1 + $0x20] sm:$0xff] }
   0x4   :  { %v2531_v8 = vld [vmem:[%s3615_s1 + $0x28] sm:$0xff]  ;;  %v1921_v10 = vor.u32 %v2432_v7, %v1920_v6  ;;  %v2538_v12 = vld [vmem:[%s3615_s1 + $0x60] sm:$0xff]  ;;  %v2529_v13 = vld [vmem:[%s3615_s1 + $0x18] sm:$0xff] }
   0x5   :  { %v2539_v9 = vld [vmem:[%s3615_s1 + $0x68] sm:$0xff]  ;;  %v2537_v14 = vld [vmem:[%s3615_s1 + $0x58] sm:$0xff]  ;;  %v2528_v15 = vld [vmem:[%s3615_s1 + $0x10] sm:$0xff] }
   0x6   :  { %875 = vmatpush.bf16.msra.mxu0 %v2532_v2  ;;  %1219 = vmatpush.bf16.msra.mxu2 %v2542_v5  ;;  %v2536_v16 = vld [vmem:[%s3615_s1 + $0x50] sm:$0xff]  ;;  %v1932_v17 = vld [vmem:[%s3616_s0 + $0x20] sm:$0xf]  ;;  %v2435_v18 = vld [vmem:[%s3616_s0 + $0x28] sm:$0xf0] }
   0x7   :  { %1044 = vmatpush.bf16.msra.mxu1 %v2540_v3  ;;  %v2527_v19 = vld [vmem:[%s3615_s1 + $0x8] sm:$0xff]  ;;  %v1933_v21 = vor.u32 %v2435_v18, %v1932_v17  ;;  %v2526_v22 = vld [vmem:[%s3615_s1] sm:$0xff]  ;;  %v1914_v27 = vld [vmem:[%s3616_s0 + $0xc] sm:$0xf0] }
   0x8   :  { %v2535_v20 = vld [vmem:[%s3615_s1 + $0x48] sm:$0xff]  ;;  %v2534_v23 = vld [vmem:[%s3615_s1 + $0x40] sm:$0xff]  ;;  %v1944_v30 = vld [vmem:[%s3616_s0 + $0x38] sm:$0xf] }
   0x9   :  { %2366 = vmatmul.msk.bf16.vlgmr.msra.gmra.mxu2 %vm777_vm0, %v1921_v10  ;;  %v1912_v24 = vld [vmem:[%s3616_s0] sm:$0xf]  ;;  %v2431_v25 = vld [vmem:[%s3616_s0 + $0x8] sm:$0xf0]  ;;  %v2430_v26 = vld [vmem:[%s3616_s0 + $0x4] sm:$0xf] }
   0xa   :  { %876 = vmatpush.bf16.msra.mxu0 %v2531_v8  ;;  %v1913_v28 = vor.u32 %v2431_v25, %v1912_v24  ;;  %v1917_v29 = vor.u32 %v2430_v26, %v1914_v27  ;;  %v2438_v31 = vld [vmem:[%s3616_s0 + $0x40] sm:$0xf0]  ;;  %v1924_v33 = vld [vmem:[%s3616_s0 + $0x18] sm:$0xf]  ;;  %v2433_v35 = vld [vmem:[%s3616_s0 + $0x1c] sm:$0xf] }
   0xb   :  { %1045 = vmatpush.bf16.msra.mxu1 %v2539_v9  ;;  %v1945_v32 = vor.u32 %v2438_v31, %v1944_v30  ;;  %v2434_v34 = vld [vmem:[%s3616_s0 + $0x20] sm:$0xf0]  ;;  %v1926_v36 = vld [vmem:[%s3616_s0 + $0x24] sm:$0xf0]  ;;  %v1956_v39 = vld [vmem:[%s3616_s0 + $0x50] sm:$0xf] }
   0xc   :  { %v1925_v37 = vor.u32 %v2434_v34, %v1924_v33  ;;  %v1929_v38 = vor.u32 %v2433_v35, %v1926_v36  ;;  %v2441_v40 = vld [vmem:[%s3616_s0 + $0x58] sm:$0xf0]  ;;  %v1936_v42 = vld [vmem:[%s3616_s0 + $0x30] sm:$0xf]  ;;  %v2436_v44 = vld [vmem:[%s3616_s0 + $0x34] sm:$0xf] }
   0xd   :  { %v1957_v41 = vor.u32 %v2441_v40, %v1956_v39  ;;  %v2437_v43 = vld [vmem:[%s3616_s0 + $0x38] sm:$0xf0]  ;;  %v1938_v45 = vld [vmem:[%s3616_s0 + $0x3c] sm:$0xf0]  ;;  %v1968_v48 = vld [vmem:[%s3616_s0 + $0x68] sm:$0xf] }
   0xe   :  { %877 = vmatpush.bf16.msra.mxu0 %v2530_v11  ;;  %v1937_v46 = vor.u32 %v2437_v43, %v1936_v42  ;;  %v1941_v47 = vor.u32 %v2436_v44, %v1938_v45  ;;  %v2444_v49 = vld [vmem:[%s3616_s0 + $0x70] sm:$0xf0]  ;;  %v1948_v51 = vld [vmem:[%s3616_s0 + $0x48] sm:$0xf]  ;;  %v2439_v53 = vld [vmem:[%s3616_s0 + $0x4c] sm:$0xf] }
   0xf   :  { %1046 = vmatpush.bf16.msra.mxu1 %v2538_v12  ;;  %v1969_v50 = vor.u32 %v2444_v49, %v1968_v48  ;;  %v2440_v52 = vld [vmem:[%s3616_s0 + $0x50] sm:$0xf0]  ;;  %v1950_v54 = vld [vmem:[%s3616_s0 + $0x54] sm:$0xf0]  ;;  %v1980_v57 = vld [vmem:[%s3616_s0 + $0x80] sm:$0xf] }
  0x10   :  { %v1949_v55 = vor.u32 %v2440_v52, %v1948_v51  ;;  %v1953_v56 = vor.u32 %v2439_v53, %v1950_v54  ;;  %v2447_v58 = vld [vmem:[%s3616_s0 + $0x88] sm:$0xf0]  ;;  %v1960_v60 = vld [vmem:[%s3616_s0 + $0x60] sm:$0xf]  ;;  %v2442_v62 = vld [vmem:[%s3616_s0 + $0x64] sm:$0xf] }
  0x11   :  { %v1981_v59 = vor.u32 %v2447_v58, %v1980_v57  ;;  %v2443_v61 = vld [vmem:[%s3616_s0 + $0x68] sm:$0xf0]  ;;  %v1962_v63 = vld [vmem:[%s3616_s0 + $0x6c] sm:$0xf0]  ;;  %v1992_v2 = vld [vmem:[%s3616_s0 + $0x98] sm:$0xf] }
  0x12   :  { %878 = vmatpush.bf16.msra.mxu0 %v2529_v13  ;;  %v1961_v0 = vor.u32 %v2443_v61, %v1960_v60  ;;  %v1965_v1 = vor.u32 %v2442_v62, %v1962_v63  ;;  %v2450_v3 = vld [vmem:[%s3616_s0 + $0xa0] sm:$0xf0]  ;;  %v1972_v5 = vld [vmem:[%s3616_s0 + $0x78] sm:$0xf]  ;;  %v2445_v7 = vld [vmem:[%s3616_s0 + $0x7c] sm:$0xf] }
  0x13   :  { %1047 = vmatpush.bf16.msra.mxu1 %v2537_v14  ;;  %v1993_v4 = vor.u32 %v2450_v3, %v1992_v2  ;;  %v2446_v6 = vld [vmem:[%s3616_s0 + $0x80] sm:$0xf0]  ;;  %v1974_v8 = vld [vmem:[%s3616_s0 + $0x84] sm:$0xf0]  ;;  %v2551_v11 = vld [vmem:[%s3618_s3 + $0x38] sm:$0xff] }
  0x14   :  { %v1973_v9 = vor.u32 %v2446_v6, %v1972_v5  ;;  %v1977_v10 = vor.u32 %v2445_v7, %v1974_v8  ;;  %1673 = vmatpush.bf16.msra.mxu3 %v2551_v11  ;;  %v2550_v12 = vld [vmem:[%s3618_s3 + $0x30] sm:$0xff]  ;;  %v2453_v14 = vld [vmem:[%s3616_s0 + $0xb8] sm:$0xf0]  ;;  %v2016_v25 = vld [vmem:[%s3616_s0 + $0xc8] sm:$0xf] }
  0x15   :  { %v2004_v13 = vld [vmem:[%s3616_s0 + $0xb0] sm:$0xf]  ;;  %v2449_v18 = vld [vmem:[%s3616_s0 + $0x98] sm:$0xf0]  ;;  %v2456_v26 = vld [vmem:[%s3616_s0 + $0xd0] sm:$0xf0] }
  0x16   :  { %879 = vmatpush.bf16.msra.mxu0 %v2528_v15  ;;  %v2005_v15 = vor.u32 %v2453_v14, %v2004_v13  ;;  %v1984_v17 = vld [vmem:[%s3616_s0 + $0x90] sm:$0xf]  ;;  %v2547_v24 = vld [vmem:[%s3618_s3 + $0x18] sm:$0xff]  ;;  %v2545_v30 = vld [vmem:[%s3618_s3 + $0x8] sm:$0xff] }
  0x17   :  { %1048 = vmatpush.bf16.msra.mxu1 %v2536_v16  ;;  %v2549_v16 = vld [vmem:[%s3618_s3 + $0x28] sm:$0xff]  ;;  %v2546_v27 = vld [vmem:[%s3618_s3 + $0x10] sm:$0xff]  ;;  %v1998_v33 = vld [vmem:[%s3616_s0 + $0xb4] sm:$0xf0] }
  0x18   :  { %1674 = vmatpush.bf16.msra.mxu3 %v2550_v12  ;;  %v2452_v31 = vld [vmem:[%s3616_s0 + $0xb0] sm:$0xf0]  ;;  %v2544_v36 = vld [vmem:[%s3618_s3] sm:$0xff]  ;;  %v2459_v39 = vld [vmem:[%s3616_s0 + $0xe8] sm:$0xf0] }
  0x19   :  { %2367 = vmatmul.msk.bf16.gmra.mxu2 %vm777_vm0, %v1933_v21  ;;  %v1985_v21 = vor.u32 %v2449_v18, %v1984_v17  ;;  %v2008_v42 = vld [vmem:[%s3616_s0 + $0xc0] sm:$0xf]  ;;  %v2455_v43 = vld [vmem:[%s3616_s0 + $0xc8] sm:$0xf0]  ;;  %v2454_v44 = vld [vmem:[%s3616_s0 + $0xc4] sm:$0xf] }
  0x1a   :  { %880 = vmatpush.bf16.msra.mxu0 %v2527_v19  ;;  %v2448_v19 = vld [vmem:[%s3616_s0 + $0x94] sm:$0xf]  ;;  %v2010_v45 = vld [vmem:[%s3616_s0 + $0xcc] sm:$0xf0]  ;;  %v2040_v54 = vld [vmem:[%s3616_s0 + $0xf8] sm:$0xf] }
  0x1b   :  { %1049 = vmatpush.bf16.msra.mxu1 %v2535_v20  ;;  %v1986_v20 = vld [vmem:[%s3616_s0 + $0x9c] sm:$0xf0]  ;;  %v2013_v48 = vor.u32 %v2454_v44, %v2010_v45  ;;  %v2020_v63 = vld [vmem:[%s3616_s0 + $0xd8] sm:$0xf]  ;;  %v2022_v2 = vld [vmem:[%s3616_s0 + $0xe4] sm:$0xf0] }
  0x1c   :  { %1675 = vmatpush.bf16.msra.mxu3 %v2549_v16  ;;  %v2052_v16 = vld [vmem:[%s3616_s0 + $0x110] sm:$0xf]  ;;  %v2465_v17 = vld [vmem:[%s3616_s0 + $0x118] sm:$0xf0] }
  0x1e   :  { %881 = vmatpush.bf16.msra.mxu0 %v2526_v22  ;;  %v1989_v22 = vor.u32 %v2448_v19, %v1986_v20 }
  0x1f   :  { %1050 = vmatpush.bf16.msra.mxu1 %v2534_v23  ;;  %v2548_v23 = vld [vmem:[%s3618_s3 + $0x20] sm:$0xff] }
  0x20   :  { %1676 = vmatpush.bf16.msra.mxu3 %v2548_v23  ;;  %v2053_v23 = vor.u32 %v2465_v17, %v2052_v16  ;;  %v2466_v16 = vld [vmem:[%s3616_s0 + $0x124] sm:$0xf]  ;;  %v2058_v17 = vld [vmem:[%s3616_s0 + $0x12c] sm:$0xf0] }
  0x21   :  { %882 = vmatmul.bf16.vlgmr.msra.gmra.mxu0 %v1913_v28  ;;  %v2017_v28 = vor.u32 %v2456_v26, %v2016_v25  ;;  %v2032_v25 = vld [vmem:[%s3616_s0 + $0xf0] sm:$0xf]  ;;  %v2461_v26 = vld [vmem:[%s3616_s0 + $0xf8] sm:$0xf0] }
  0x22   :  { %1051 = vmatmul.bf16.vlgmr.msra.gmra.mxu1 %v1917_v29  ;;  %v1996_v29 = vld [vmem:[%s3616_s0 + $0xa8] sm:$0xf] }
  0x23   :  { %v1997_v34 = vor.u32 %v2452_v31, %v1996_v29  ;;  %v2033_v31 = vor.u32 %v2461_v26, %v2032_v25 }
  0x24   :  { %1677 = vmatpush.bf16.msra.mxu3 %v2547_v24 }
  0x28   :  { %1678 = vmatpush.bf16.msra.mxu3 %v2546_v27  ;;  %v2460_v27 = vld [vmem:[%s3616_s0 + $0xf4] sm:$0xf] }
  0x29   :  { %2368 = vmatmul.msk.bf16.gmra.mxu2 %vm777_vm0, %v1945_v32  ;;  %v2451_v32 = vld [vmem:[%s3616_s0 + $0xac] sm:$0xf] }
  0x2a   :  { %v2001_v35 = vor.u32 %v2451_v32, %v1998_v33 }
  0x2c   :  { %1679 = vmatpush.bf16.msra.mxu3 %v2545_v30 }
  0x30   :  { %1680 = vmatpush.bf16.msra.mxu3 %v2544_v36 }
  0x31   :  { %887 = vmatmul.bf16.gmra.mxu0 %v1925_v37 }
  0x32   :  { %1056 = vmatmul.bf16.gmra.mxu1 %v1929_v38  ;;  %v2028_v38 = vld [vmem:[%s3616_s0 + $0xe0] sm:$0xf] }
  0x39   :  { %2369 = vmatmul.msk.bf16.gmra.mxu2 %vm777_vm0, %v1957_v41  ;;  %v2029_v41 = vor.u32 %v2459_v39, %v2028_v38 }
  0x41   :  { %892 = vmatmul.bf16.gmra.mxu0 %v1937_v46  ;;  %v2845_v46 = vld [vmem:[%s3617_s2] ss:$0 sm:$0xff] }
  0x42   :  { %1061 = vmatmul.bf16.gmra.mxu1 %v1941_v47  ;;  %v2009_v47 = vor.u32 %v2455_v43, %v2008_v42  ;;  %v2064_v42 = vld [vmem:[%s3616_s0 + $0x128] sm:$0xf]  ;;  %v2468_v43 = vld [vmem:[%s3616_s0 + $0x130] sm:$0xf0] }
  0x49   :  { %2370 = vmatmul.msk.bf16.gmra.mxu2 %vm777_vm0, %v1969_v50 }
  0x51   :  { %897 = vmatmul.bf16.gmra.mxu0 %v1949_v55  ;;  %v2462_v55 = vld [vmem:[%s3616_s0 + $0x100] sm:$0xf0] }
  0x52   :  { %1066 = vmatmul.bf16.gmra.mxu1 %v1953_v56  ;;  %v2041_v61 = vor.u32 %v2462_v55, %v2040_v54  ;;  %v2463_v54 = vld [vmem:[%s3616_s0 + $0x10c] sm:$0xf]  ;;  %v2046_v55 = vld [vmem:[%s3616_s0 + $0x114] sm:$0xf0] }
  0x59   :  { %2371 = vmatmul.msk.bf16.gmra.mxu2 %vm777_vm0, %v1981_v59 }
  0x61   :  { %902 = vmatmul.bf16.gmra.mxu0 %v1961_v0  ;;  %v2458_v0 = vld [vmem:[%s3616_s0 + $0xe0] sm:$0xf0] }
  0x62   :  { %1071 = vmatmul.bf16.gmra.mxu1 %v1965_v1  ;;  %v2457_v1 = vld [vmem:[%s3616_s0 + $0xdc] sm:$0xf]  ;;  %v2021_v5 = vor.u32 %v2458_v0, %v2020_v63 }
  0x63   :  { %v2025_v6 = vor.u32 %v2457_v1, %v2022_v2 }
  0x69   :  { %2372 = vmatmul.msk.bf16.gmra.mxu2 %vm777_vm0, %v1993_v4 }
  0x71   :  { %907 = vmatmul.bf16.gmra.mxu0 %v1973_v9 }
  0x72   :  { %1076 = vmatmul.bf16.gmra.mxu1 %v1977_v10 }
  0x79   :  { %2373 = vmatmul.msk.bf16.gmra.mxu2 %vm777_vm0, %v2005_v15 }
  0x81   :  { %912 = vmatmul.bf16.gmra.mxu0 %v1985_v21 }
  0x82   :  { %1081 = vmatmul.bf16.gmra.mxu1 %v1989_v22 }
  0x89   :  { %2374 = vmatmul.msk.bf16.gmra.mxu2 %vm777_vm0, %v2017_v28  ;;  %v2034_v28 = vld [vmem:[%s3616_s0 + $0xfc] sm:$0xf0] }
  0x8a   :  { %v2037_v32 = vor.u32 %v2460_v27, %v2034_v28 }
  0x8c   :  { %v1221_v37 = vpop.f32.mrf.mxu2 }
  0x91   :  { %917 = vmatmul.bf16.gmra.mxu0 %v1997_v34 }
  0x92   :  { %1086 = vmatmul.bf16.gmra.mxu1 %v2001_v35 }
  0x94   :  { %v1223_v40 = vpop.f32.mrf.mxu2 }
  0x99   :  { %2375 = vmatmul.msk.bf16.gmra.mxu2 %vm777_vm0, %v2029_v41 }
  0x9c   :  { %v1226_v52 = vpop.f32.mrf.mxu2 }
  0x9e   :  { %v883_v49 = vpop.f32.mrf.mxu0 }
  0x9f   :  { %v1052_v50 = vpop.f32.mrf.mxu1  ;;  %v884_v51 = vadd.f32 %v2845_v46, %v883_v49 }
  0xa1   :  { %922 = vmatmul.bf16.gmra.mxu0 %v2009_v47  ;;  %v1053_v53 = vadd.f32 %v1052_v50, %v884_v51  ;;  %v2065_v50 = vor.u32 %v2468_v43, %v2064_v42  ;;  %v2469_v42 = vld [vmem:[%s3616_s0 + $0x13c] sm:$0xf]  ;;  %v2070_v43 = vld [vmem:[%s3616_s0 + $0x144] sm:$0xf0] }
  0xa2   :  { %1091 = vmatmul.bf16.gmra.mxu1 %v2013_v48 }
  0xa3   :  { %v1222_v58 = vadd.f32 %v1221_v37, %v1053_v53  ;;  %v2464_v53 = vld [vmem:[%s3616_s0 + $0x110] sm:$0xf0] }
  0xa4   :  { %v1228_v60 = vpop.f32.mrf.mxu2 }
  0xa5   :  { %v1445_v4 = vmul.f32 0.2, %v1222_v58  ;;  %vm1381_vm1 = vcmp.ge.f32.partialorder %v1222_v58, 0.0 }
  0xa6   :  { %v885_v56 = vpop.f32.mrf.mxu0 }
  0xa7   :  { %v1054_v57 = vpop.f32.mrf.mxu1  ;;  %v886_v59 = vadd.f32 %v2845_v46, %v885_v56  ;;  %v1509_v11 = vsel %vm1381_vm1, %v1222_v58, %v1445_v4 }
  0xa9   :  { %v1055_v62 = vadd.f32 %v1054_v57, %v886_v59  ;;  %2376 = vmatmul.msk.bf16.gmra.mxu2 %vm777_vm0, %v2041_v61  ;;  %v2049_v59 = vor.u32 %v2463_v54, %v2046_v55 }
  0xab   :  { %v1224_v3 = vadd.f32 %v1223_v40, %v1055_v62 }
  0xac   :  { %v1231_v13 = vpop.f32.mrf.mxu2 }
  0xad   :  { %vm1382_vm2 = vcmp.ge.f32.partialorder %v1224_v3, 0.0  ;;  %v1446_v7 = vmul.f32 0.2, %v1224_v3 }
  0xae   :  { %v888_v8 = vpop.f32.mrf.mxu0 }
  0xaf   :  { %v1057_v9 = vpop.f32.mrf.mxu1  ;;  %v889_v10 = vadd.f32 %v2845_v46, %v888_v8  ;;  %v1510_v12 = vsel %vm1382_vm2, %v1224_v3, %v1446_v7 }
  0xb0   :  { %v1573_v14 = vpack.c.bf16 %v1510_v12, %v1509_v11 }
  0xb1   :  { %927 = vmatmul.bf16.gmra.mxu0 %v2021_v5  ;;  %v1058_v15 = vadd.f32 %v1057_v9, %v889_v10  ;;  %v2076_v5 = vld [vmem:[%s3616_s0 + $0x140] sm:$0xf] }
  0xb2   :  { %1096 = vmatmul.bf16.gmra.mxu1 %v2025_v6  ;;  %1681 = vmatmul.bf16.vlgmr.msra.gmra.mxu3 %v1573_v14  ;;  %v2471_v6 = vld [vmem:[%s3616_s0 + $0x148] sm:$0xf0]  ;;  %v2056_v14 = vld [vmem:[%s3616_s0 + $0x120] sm:$0xf] }
  0xb3   :  { %v1227_v20 = vadd.f32 %v1226_v52, %v1058_v15  ;;  %v2044_v52 = vld [vmem:[%s3616_s0 + $0x108] sm:$0xf]  ;;  %v2077_v12 = vor.u32 %v2471_v6, %v2076_v5  ;;  %v2467_v15 = vld [vmem:[%s3616_s0 + $0x128] sm:$0xf0]  ;;  %v2472_v5 = vld [vmem:[%s3616_s0 + $0x154] sm:$0xf] }
  0xb4   :  { %v1233_v22 = vpop.f32.mrf.mxu2  ;;  %v2045_v58 = vor.u32 %v2464_v53, %v2044_v52  ;;  %v2082_v6 = vld [vmem:[%s3616_s0 + $0x15c] sm:$0xf0] }
  0xb5   :  { %v1447_v30 = vmul.f32 0.2, %v1227_v20  ;;  %vm1383_vm3 = vcmp.ge.f32.partialorder %v1227_v20, 0.0 }
  0xb6   :  { %v890_v18 = vpop.f32.mrf.mxu0 }
  0xb7   :  { %v1059_v19 = vpop.f32.mrf.mxu1  ;;  %v891_v21 = vadd.f32 %v2845_v46, %v890_v18  ;;  %v1511_v37 = vsel %vm1383_vm3, %v1227_v20, %v1447_v30  ;;  %v2057_v20 = vor.u32 %v2467_v15, %v2056_v14 }
  0xb9   :  { %v1060_v24 = vadd.f32 %v1059_v19, %v891_v21  ;;  %2377 = vmatmul.msk.bf16.gmra.mxu2 %vm777_vm0, %v2053_v23  ;;  %v2061_v21 = vor.u32 %v2466_v16, %v2058_v17 }
  0xbb   :  { %v1229_v29 = vadd.f32 %v1228_v60, %v1060_v24 }
  0xbc   :  { %v1236_v39 = vpop.f32.mrf.mxu2 }
  0xbd   :  { %vm1384_vm4 = vcmp.ge.f32.partialorder %v1229_v29, 0.0  ;;  %v1448_v33 = vmul.f32 0.2, %v1229_v29 }
  0xbe   :  { %v893_v34 = vpop.f32.mrf.mxu0 }
  0xbf   :  { %v1062_v35 = vpop.f32.mrf.mxu1  ;;  %v894_v36 = vadd.f32 %v2845_v46, %v893_v34  ;;  %v1512_v38 = vsel %vm1384_vm4, %v1229_v29, %v1448_v33 }
  0xc0   :  { %v1574_v40 = vpack.c.bf16 %v1512_v38, %v1511_v37 }
  0xc1   :  { %932 = vmatmul.bf16.gmra.mxu0 %v2033_v31  ;;  %v1063_v41 = vadd.f32 %v1062_v35, %v894_v36  ;;  %v2088_v31 = vld [vmem:[%s3616_s0 + $0x158] sm:$0xf] }
  0xc2   :  { %1101 = vmatmul.bf16.gmra.mxu1 %v2037_v32  ;;  %1686 = vmatmul.bf16.gmra.mxu3 %v1574_v40  ;;  %v2474_v32 = vld [vmem:[%s3616_s0 + $0x160] sm:$0xf0]  ;;  %v2068_v40 = vld [vmem:[%s3616_s0 + $0x138] sm:$0xf] }
  0xc3   :  { %v1232_v47 = vadd.f32 %v1231_v13, %v1063_v41  ;;  %v2089_v38 = vor.u32 %v2474_v32, %v2088_v31  ;;  %v2470_v41 = vld [vmem:[%s3616_s0 + $0x140] sm:$0xf0]  ;;  %v2475_v31 = vld [vmem:[%s3616_s0 + $0x16c] sm:$0xf]  ;;  %v2094_v32 = vld [vmem:[%s3616_s0 + $0x174] sm:$0xf0] }
  0xc4   :  { %v1238_v49 = vpop.f32.mrf.mxu2 }
  0xc5   :  { %v1449_v57 = vmul.f32 0.2, %v1232_v47  ;;  %vm1385_vm5 = vcmp.ge.f32.partialorder %v1232_v47, 0.0 }
  0xc6   :  { %v895_v44 = vpop.f32.mrf.mxu0 }
  0xc7   :  { %v1064_v45 = vpop.f32.mrf.mxu1  ;;  %v896_v48 = vadd.f32 %v2845_v46, %v895_v44  ;;  %v1513_v0 = vsel %vm1385_vm5, %v1232_v47, %v1449_v57  ;;  %v2069_v47 = vor.u32 %v2470_v41, %v2068_v40 }
  0xc9   :  { %v1065_v51 = vadd.f32 %v1064_v45, %v896_v48  ;;  %2378 = vmatmul.msk.bf16.gmra.mxu2 %vm777_vm0, %v2065_v50  ;;  %v2073_v48 = vor.u32 %v2469_v42, %v2070_v43 }
  0xcb   :  { %v1234_v56 = vadd.f32 %v1233_v22, %v1065_v51 }
  0xcc   :  { %v1241_v2 = vpop.f32.mrf.mxu2 }
  0xcd   :  { %vm1386_vm6 = vcmp.ge.f32.partialorder %v1234_v56, 0.0  ;;  %v1450_v60 = vmul.f32 0.2, %v1234_v56 }
  0xce   :  { %v898_v61 = vpop.f32.mrf.mxu0 }
  0xcf   :  { %v1067_v62 = vpop.f32.mrf.mxu1  ;;  %v899_v63 = vadd.f32 %v2845_v46, %v898_v61  ;;  %v1514_v1 = vsel %vm1386_vm6, %v1234_v56, %v1450_v60 }
  0xd0   :  { %v1575_v3 = vpack.c.bf16 %v1514_v1, %v1513_v0 }
  0xd1   :  { %937 = vmatmul.bf16.gmra.mxu0 %v2045_v58  ;;  %v1068_v4 = vadd.f32 %v1067_v62, %v899_v63  ;;  %v2100_v58 = vld [vmem:[%s3616_s0 + $0x170] sm:$0xf] }
  0xd2   :  { %1106 = vmatmul.bf16.gmra.mxu1 %v2049_v59  ;;  %1691 = vmatmul.bf16.gmra.mxu3 %v1575_v3  ;;  %v2477_v59 = vld [vmem:[%s3616_s0 + $0x178] sm:$0xf0]  ;;  %v2080_v3 = vld [vmem:[%s3616_s0 + $0x150] sm:$0xf] }
  0xd3   :  { %v1237_v9 = vadd.f32 %v1236_v39, %v1068_v4  ;;  %v2101_v1 = vor.u32 %v2477_v59, %v2100_v58  ;;  %v2473_v4 = vld [vmem:[%s3616_s0 + $0x158] sm:$0xf0]  ;;  %v2478_v58 = vld [vmem:[%s3616_s0 + $0x184] sm:$0xf]  ;;  %v2106_v59 = vld [vmem:[%s3616_s0 + $0x18c] sm:$0xf0] }
  0xd4   :  { %v1243_v11 = vpop.f32.mrf.mxu2 }
  0xd5   :  { %v1451_v19 = vmul.f32 0.2, %v1237_v9  ;;  %vm1387_vm7 = vcmp.ge.f32.partialorder %v1237_v9, 0.0 }
  0xd6   :  { %v900_v7 = vpop.f32.mrf.mxu0 }
  0xd7   :  { %v1069_v8 = vpop.f32.mrf.mxu1  ;;  %v901_v10 = vadd.f32 %v2845_v46, %v900_v7  ;;  %v1515_v26 = vsel %vm1387_vm7, %v1237_v9, %v1451_v19  ;;  %v2081_v9 = vor.u32 %v2473_v4, %v2080_v3 }
  0xd9   :  { %v1070_v13 = vadd.f32 %v1069_v8, %v901_v10  ;;  %2379 = vmatmul.msk.bf16.gmra.mxu2 %vm777_vm0, %v2077_v12  ;;  %v2085_v10 = vor.u32 %v2472_v5, %v2082_v6 }
  0xdb   :  { %v1239_v18 = vadd.f32 %v1238_v49, %v1070_v13 }
  0xdc   :  { %v1246_v28 = vpop.f32.mrf.mxu2 }
  0xdd   :  { %vm1388_vm8 = vcmp.ge.f32.partialorder %v1239_v18, 0.0  ;;  %v1452_v22 = vmul.f32 0.2, %v1239_v18 }
  0xde   :  { %v903_v23 = vpop.f32.mrf.mxu0 }
  0xdf   :  { %v1072_v24 = vpop.f32.mrf.mxu1  ;;  %v904_v25 = vadd.f32 %v2845_v46, %v903_v23  ;;  %v1516_v27 = vsel %vm1388_vm8, %v1239_v18, %v1452_v22 }
  0xe0   :  { %v1576_v29 = vpack.c.bf16 %v1516_v27, %v1515_v26 }
  0xe1   :  { %942 = vmatmul.bf16.gmra.mxu0 %v2057_v20  ;;  %v1073_v30 = vadd.f32 %v1072_v24, %v904_v25  ;;  %v2112_v20 = vld [vmem:[%s3616_s0 + $0x188] sm:$0xf] }
  0xe2   :  { %1111 = vmatmul.bf16.gmra.mxu1 %v2061_v21  ;;  %1696 = vmatmul.bf16.gmra.mxu3 %v1576_v29  ;;  %v2480_v21 = vld [vmem:[%s3616_s0 + $0x190] sm:$0xf0]  ;;  %v2092_v29 = vld [vmem:[%s3616_s0 + $0x168] sm:$0xf] }
  0xe3   :  { %v1242_v35 = vadd.f32 %v1241_v2, %v1073_v30  ;;  %v2113_v27 = vor.u32 %v2480_v21, %v2112_v20  ;;  %v2476_v30 = vld [vmem:[%s3616_s0 + $0x170] sm:$0xf0]  ;;  %v2481_v20 = vld [vmem:[%s3616_s0 + $0x19c] sm:$0xf]  ;;  %v2118_v21 = vld [vmem:[%s3616_s0 + $0x1a4] sm:$0xf0] }
  0xe4   :  { %v1248_v37 = vpop.f32.mrf.mxu2 }
  0xe5   :  { %v1453_v45 = vmul.f32 0.2, %v1242_v35  ;;  %vm1389_vm9 = vcmp.ge.f32.partialorder %v1242_v35, 0.0 }
  0xe6   :  { %v905_v33 = vpop.f32.mrf.mxu0 }
  0xe7   :  { %v1074_v34 = vpop.f32.mrf.mxu1  ;;  %v906_v36 = vadd.f32 %v2845_v46, %v905_v33  ;;  %v1517_v53 = vsel %vm1389_vm9, %v1242_v35, %v1453_v45  ;;  %v2093_v35 = vor.u32 %v2476_v30, %v2092_v29 }
  0xe9   :  { %v1075_v39 = vadd.f32 %v1074_v34, %v906_v36  ;;  %2380 = vmatmul.msk.bf16.gmra.mxu2 %vm777_vm0, %v2089_v38  ;;  %v2097_v36 = vor.u32 %v2475_v31, %v2094_v32 }
  0xeb   :  { %v1244_v44 = vadd.f32 %v1243_v11, %v1075_v39 }
  0xec   :  { %v1251_v55 = vpop.f32.mrf.mxu2 }
  0xed   :  { %vm1390_vm10 = vcmp.ge.f32.partialorder %v1244_v44, 0.0  ;;  %v1454_v49 = vmul.f32 0.2, %v1244_v44 }
  0xee   :  { %v908_v50 = vpop.f32.mrf.mxu0 }
  0xef   :  { %v1077_v51 = vpop.f32.mrf.mxu1  ;;  %v909_v52 = vadd.f32 %v2845_v46, %v908_v50  ;;  %v1518_v54 = vsel %vm1390_vm10, %v1244_v44, %v1454_v49 }
  0xf0   :  { %v1577_v56 = vpack.c.bf16 %v1518_v54, %v1517_v53 }
  0xf1   :  { %947 = vmatmul.bf16.gmra.mxu0 %v2069_v47  ;;  %v1078_v57 = vadd.f32 %v1077_v51, %v909_v52  ;;  %v2124_v47 = vld [vmem:[%s3616_s0 + $0x1a0] sm:$0xf] }
  0xf2   :  { %1116 = vmatmul.bf16.gmra.mxu1 %v2073_v48  ;;  %1701 = vmatmul.bf16.gmra.mxu3 %v1577_v56  ;;  %v2483_v48 = vld [vmem:[%s3616_s0 + $0x1a8] sm:$0xf0]  ;;  %v2104_v56 = vld [vmem:[%s3616_s0 + $0x180] sm:$0xf] }
  0xf3   :  { %v1247_v62 = vadd.f32 %v1246_v28, %v1078_v57  ;;  %v2125_v54 = vor.u32 %v2483_v48, %v2124_v47  ;;  %v2479_v57 = vld [vmem:[%s3616_s0 + $0x188] sm:$0xf0]  ;;  %v2128_v48 = vld [vmem:[%s3616_s0 + $0x1b0] sm:$0xf] }
  0xf4   :  { %v1253_v0 = vpop.f32.mrf.mxu2 }
  0xf5   :  { %v1455_v8 = vmul.f32 0.2, %v1247_v62  ;;  %vm1391_vm11 = vcmp.ge.f32.partialorder %v1247_v62, 0.0 }
  0xf6   :  { %v910_v60 = vpop.f32.mrf.mxu0 }
  0xf7   :  { %v1079_v61 = vpop.f32.mrf.mxu1  ;;  %v911_v63 = vadd.f32 %v2845_v46, %v910_v60  ;;  %v1519_v15 = vsel %vm1391_vm11, %v1247_v62, %v1455_v8  ;;  %v2105_v62 = vor.u32 %v2479_v57, %v2104_v56 }
  0xf9   :  { %v1080_v2 = vadd.f32 %v1079_v61, %v911_v63  ;;  %2381 = vmatmul.msk.bf16.gmra.mxu2 %vm777_vm0, %v2101_v1  ;;  %v2109_v63 = vor.u32 %v2478_v58, %v2106_v59 }
  0xfb   :  { %v1249_v7 = vadd.f32 %v1248_v37, %v1080_v2 }
  0xfc   :  { %v1256_v17 = vpop.f32.mrf.mxu2 }
  0xfd   :  { %vm1392_vm12 = vcmp.ge.f32.partialorder %v1249_v7, 0.0  ;;  %v1456_v11 = vmul.f32 0.2, %v1249_v7 }
  0xfe   :  { %v913_v12 = vpop.f32.mrf.mxu0 }
  0xff   :  { %v1082_v13 = vpop.f32.mrf.mxu1  ;;  %v914_v14 = vadd.f32 %v2845_v46, %v913_v12  ;;  %v1520_v16 = vsel %vm1392_vm12, %v1249_v7, %v1456_v11 }
 0x100   :  { %v1578_v18 = vpack.c.bf16 %v1520_v16, %v1519_v15 }
 0x101   :  { %952 = vmatmul.bf16.gmra.mxu0 %v2081_v9  ;;  %v1083_v19 = vadd.f32 %v1082_v13, %v914_v14  ;;  %v2136_v9 = vld [vmem:[%s3616_s0 + $0x1b8] sm:$0xf] }
 0x102   :  { %1121 = vmatmul.bf16.gmra.mxu1 %v2085_v10  ;;  %1706 = vmatmul.bf16.gmra.mxu3 %v1578_v18  ;;  %v2486_v10 = vld [vmem:[%s3616_s0 + $0x1c0] sm:$0xf0]  ;;  %v2116_v18 = vld [vmem:[%s3616_s0 + $0x198] sm:$0xf] }
 0x103   :  { %v1252_v24 = vadd.f32 %v1251_v55, %v1083_v19  ;;  %v2137_v16 = vor.u32 %v2486_v10, %v2136_v9  ;;  %v2482_v19 = vld [vmem:[%s3616_s0 + $0x1a0] sm:$0xf0] }
 0x104   :  { %v1258_v26 = vpop.f32.mrf.mxu2 }
 0x105   :  { %v1457_v34 = vmul.f32 0.2, %v1252_v24  ;;  %vm1393_vm13 = vcmp.ge.f32.partialorder %v1252_v24, 0.0 }
 0x106   :  { %v915_v22 = vpop.f32.mrf.mxu0 }
 0x107   :  { %v1084_v23 = vpop.f32.mrf.mxu1  ;;  %v916_v25 = vadd.f32 %v2845_v46, %v915_v22  ;;  %v1521_v41 = vsel %vm1393_vm13, %v1252_v24, %v1457_v34  ;;  %v2117_v24 = vor.u32 %v2482_v19, %v2116_v18  ;;  %v3041_v34 = vld [vmem:[%s3619_s4] ss:$0 sm:$0xff] }
 0x109   :  { %v1085_v28 = vadd.f32 %v1084_v23, %v916_v25  ;;  %2382 = vmatmul.msk.bf16.gmra.mxu2 %vm777_vm0, %v2113_v27  ;;  %v2121_v25 = vor.u32 %v2481_v20, %v2118_v21 }
 0x10b   :  { %v1254_v33 = vadd.f32 %v1253_v0, %v1085_v28 }
 0x10c   :  { %v1261_v43 = vpop.f32.mrf.mxu2 }
 0x10d   :  { %vm1394_vm14 = vcmp.ge.f32.partialorder %v1254_v33, 0.0  ;;  %v1458_v37 = vmul.f32 0.2, %v1254_v33 }
 0x10e   :  { %v918_v38 = vpop.f32.mrf.mxu0 }
 0x10f   :  { %v1087_v39 = vpop.f32.mrf.mxu1  ;;  %v919_v40 = vadd.f32 %v2845_v46, %v918_v38  ;;  %v1522_v42 = vsel %vm1394_vm14, %v1254_v33, %v1458_v37  ;;  %v2489_v37 = vld [vmem:[%s3616_s0 + $0x1d8] sm:$0xf0] }
 0x110   :  { %v1579_v44 = vpack.c.bf16 %v1522_v42, %v1521_v41 }
 0x111   :  { %957 = vmatmul.bf16.gmra.mxu0 %v2093_v35  ;;  %v1088_v45 = vadd.f32 %v1087_v39, %v919_v40 }
 0x112   :  { %1126 = vmatmul.bf16.gmra.mxu1 %v2097_v36  ;;  %1711 = vmatmul.bf16.gmra.mxu3 %v1579_v44  ;;  %v2148_v36 = vld [vmem:[%s3616_s0 + $0x1d0] sm:$0xf] }
 0x113   :  { %v1257_v51 = vadd.f32 %v1256_v17, %v1088_v45  ;;  %v2149_v45 = vor.u32 %v2489_v37, %v2148_v36 }
 0x114   :  { %v1263_v53 = vpop.f32.mrf.mxu2 }
 0x115   :  { %v1459_v61 = vmul.f32 0.2, %v1257_v51  ;;  %vm1395_vm15 = vcmp.ge.f32.partialorder %v1257_v51, 0.0 }
 0x116   :  { %v920_v49 = vpop.f32.mrf.mxu0 }
 0x117   :  { %v1089_v50 = vpop.f32.mrf.mxu1  ;;  %v921_v52 = vadd.f32 %v2845_v46, %v920_v49  ;;  %v1523_v4 = vsel %vm1395_vm15, %v1257_v51, %v1459_v61  ;;  %v2485_v49 = vld [vmem:[%s3616_s0 + $0x1b8] sm:$0xf0]  ;;  %v2130_v51 = vld [vmem:[%s3616_s0 + $0x1bc] sm:$0xf0] }
 0x119   :  { %v1090_v55 = vadd.f32 %v1089_v50, %v921_v52  ;;  %2383 = vmatmul.msk.bf16.gmra.mxu2 %vm777_vm0, %v2125_v54  ;;  %v2484_v50 = vld [vmem:[%s3616_s0 + $0x1b4] sm:$0xf] }
 0x11a   :  { %v2133_v56 = vor.u32 %v2484_v50, %v2130_v51 }
 0x11b   :  { %v1259_v60 = vadd.f32 %v1258_v26, %v1090_v55  ;;  %v2129_v55 = vor.u32 %v2485_v49, %v2128_v48  ;;  %v2490_v48 = vld [vmem:[%s3616_s0 + $0x1e4] sm:$0xf]  ;;  %v2154_v49 = vld [vmem:[%s3616_s0 + $0x1ec] sm:$0xf0] }
 0x11c   :  { %v1266_v6 = vpop.f32.mrf.mxu2 }
 0x11d   :  { %vm1396_vm1 = vcmp.ge.f32.partialorder %v1259_v60, 0.0  ;;  %v1460_v0 = vmul.f32 0.2, %v1259_v60 }
 0x11e   :  { %v923_v1 = vpop.f32.mrf.mxu0 }
 0x11f   :  { %v1092_v2 = vpop.f32.mrf.mxu1  ;;  %v924_v3 = vadd.f32 %v2845_v46, %v923_v1  ;;  %v1524_v5 = vsel %vm1396_vm1, %v1259_v60, %v1460_v0 }
 0x120   :  { %v1580_v7 = vpack.c.bf16 %v1524_v5, %v1523_v4  ;;  %v2492_v4 = vld [vmem:[%s3616_s0 + $0x1f0] sm:$0xf0] }
 0x121   :  { %962 = vmatmul.bf16.gmra.mxu0 %v2105_v62  ;;  %v1093_v8 = vadd.f32 %v1092_v2, %v924_v3  ;;  %v2160_v3 = vld [vmem:[%s3616_s0 + $0x1e8] sm:$0xf] }
 0x122   :  { %1131 = vmatmul.bf16.gmra.mxu1 %v2109_v63  ;;  %1716 = vmatmul.bf16.gmra.mxu3 %v1580_v7 }
 0x123   :  { %v1262_v13 = vadd.f32 %v1261_v43, %v1093_v8 }
 0x124   :  { %v1268_v15 = vpop.f32.mrf.mxu2 }
 0x125   :  { %v1461_v23 = vmul.f32 0.2, %v1262_v13  ;;  %vm1397_vm2 = vcmp.ge.f32.partialorder %v1262_v13, 0.0 }
 0x126   :  { %v925_v11 = vpop.f32.mrf.mxu0 }
 0x127   :  { %v1094_v12 = vpop.f32.mrf.mxu1  ;;  %v926_v14 = vadd.f32 %v2845_v46, %v925_v11  ;;  %v1525_v30 = vsel %vm1397_vm2, %v1262_v13, %v1461_v23 }
 0x129   :  { %v1095_v17 = vadd.f32 %v1094_v12, %v926_v14  ;;  %2384 = vmatmul.msk.bf16.gmra.mxu2 %vm777_vm0, %v2137_v16  ;;  %v2161_v12 = vor.u32 %v2492_v4, %v2160_v3  ;;  %v2140_v14 = vld [vmem:[%s3616_s0 + $0x1c8] sm:$0xf]  ;;  %v2487_v16 = vld [vmem:[%s3616_s0 + $0x1cc] sm:$0xf] }
 0x12b   :  { %v1264_v22 = vadd.f32 %v1263_v53, %v1095_v17  ;;  %v2142_v17 = vld [vmem:[%s3616_s0 + $0x1d4] sm:$0xf0] }
 0x12c   :  { %v1271_v32 = vpop.f32.mrf.mxu2 }
 0x12d   :  { %vm1398_vm3 = vcmp.ge.f32.partialorder %v1264_v22, 0.0  ;;  %v1462_v26 = vmul.f32 0.2, %v1264_v22 }
 0x12e   :  { %v928_v27 = vpop.f32.mrf.mxu0 }
 0x12f   :  { %v1097_v28 = vpop.f32.mrf.mxu1  ;;  %v929_v29 = vadd.f32 %v2845_v46, %v928_v27  ;;  %v1526_v31 = vsel %vm1398_vm3, %v1264_v22, %v1462_v26  ;;  %v2145_v22 = vor.u32 %v2487_v16, %v2142_v17 }
 0x130   :  { %v1581_v33 = vpack.c.bf16 %v1526_v31, %v1525_v30 }
 0x131   :  { %967 = vmatmul.bf16.gmra.mxu0 %v2117_v24  ;;  %v1098_v35 = vadd.f32 %v1097_v28, %v929_v29 }
 0x132   :  { %1136 = vmatmul.bf16.gmra.mxu1 %v2121_v25  ;;  %1721 = vmatmul.bf16.gmra.mxu3 %v1581_v33  ;;  %v2172_v33 = vld [vmem:[%s3616_s0 + $0x200] sm:$0xf] }
 0x133   :  { %v1267_v42 = vadd.f32 %v1266_v6, %v1098_v35  ;;  %v2495_v35 = vld [vmem:[%s3616_s0 + $0x208] sm:$0xf0] }
 0x134   :  { %v1273_v44 = vpop.f32.mrf.mxu2 }
 0x135   :  { %v1682_v38 = vpop.f32.mrf.mxu3  ;;  %v1463_v53 = vmul.f32 0.2, %v1267_v42  ;;  %vm1399_vm4 = vcmp.ge.f32.partialorder %v1267_v42, 0.0 }
 0x136   :  { %v1683_v39 = vadd.f32 %v3041_v34, %v1682_v38  ;;  %v930_v40 = vpop.f32.mrf.mxu0 }
 0x137   :  { %v1099_v41 = vpop.f32.mrf.mxu1  ;;  %v931_v43 = vadd.f32 %v2845_v46, %v930_v40  ;;  %v1527_v62 = vsel %vm1399_vm4, %v1267_v42, %v1463_v53 }
 0x138   :  { %1842 = vst [vmem:[%s3620_s5] sm:$0xff] %v1683_v39 }
 0x139   :  { %v1100_v47 = vadd.f32 %v1099_v41, %v931_v43  ;;  %2385 = vmatmul.msk.bf16.gmra.mxu2 %vm777_vm0, %v2149_v45  ;;  %v2173_v43 = vor.u32 %v2495_v35, %v2172_v33  ;;  %v2152_v45 = vld [vmem:[%s3616_s0 + $0x1e0] sm:$0xf] }
 0x13b   :  { %v1269_v52 = vadd.f32 %v1268_v15, %v1100_v47  ;;  %v2488_v15 = vld [vmem:[%s3616_s0 + $0x1d0] sm:$0xf0]  ;;  %v2491_v47 = vld [vmem:[%s3616_s0 + $0x1e8] sm:$0xf0] }
 0x13c   :  { %v1276_v0 = vpop.f32.mrf.mxu2  ;;  %v2141_v21 = vor.u32 %v2488_v15, %v2140_v14  ;;  %v2153_v53 = vor.u32 %v2491_v47, %v2152_v45  ;;  %v2493_v14 = vld [vmem:[%s3616_s0 + $0x1fc] sm:$0xf]  ;;  %v2166_v15 = vld [vmem:[%s3616_s0 + $0x204] sm:$0xf0]  ;;  %v2496_v45 = vld [vmem:[%s3616_s0 + $0x214] sm:$0xf] }
 0x13d   :  { %v1684_v54 = vpop.f32.mrf.mxu3  ;;  %vm1400_vm5 = vcmp.ge.f32.partialorder %v1269_v52, 0.0  ;;  %v1464_v57 = vmul.f32 0.2, %v1269_v52  ;;  %v2178_v47 = vld [vmem:[%s3616_s0 + $0x21c] sm:$0xf0] }
 0x13e   :  { %v1685_v58 = vadd.f32 %v3041_v34, %v1684_v54  ;;  %v933_v59 = vpop.f32.mrf.mxu0  ;;  %v2157_v54 = vor.u32 %v2490_v48, %v2154_v49 }
 0x13f   :  { %v1102_v60 = vpop.f32.mrf.mxu1  ;;  %v934_v61 = vadd.f32 %v2845_v46, %v933_v59  ;;  %v1528_v63 = vsel %vm1400_vm5, %v1269_v52, %v1464_v57 }
 0x140   :  { %1843 = vst [vmem:[%s3620_s5 + $0x8] sm:$0xff] %v1685_v58  ;;  %v1582_v1 = vpack.c.bf16 %v1528_v63, %v1527_v62 }
 0x141   :  { %972 = vmatmul.bf16.gmra.mxu0 %v2129_v55  ;;  %v1103_v2 = vadd.f32 %v1102_v60, %v934_v61 }
 0x142   :  { %1141 = vmatmul.bf16.gmra.mxu1 %v2133_v56  ;;  %1726 = vmatmul.bf16.gmra.mxu3 %v1582_v1  ;;  %v2184_v1 = vld [vmem:[%s3616_s0 + $0x218] sm:$0xf] }
 0x143   :  { %v1272_v9 = vadd.f32 %v1271_v32, %v1103_v2  ;;  %v2498_v2 = vld [vmem:[%s3616_s0 + $0x220] sm:$0xf0] }
 0x144   :  { %v1278_v11 = vpop.f32.mrf.mxu2 }
 0x145   :  { %v1687_v5 = vpop.f32.mrf.mxu3  ;;  %v1465_v19 = vmul.f32 0.2, %v1272_v9  ;;  %vm1401_vm6 = vcmp.ge.f32.partialorder %v1272_v9, 0.0 }
 0x146   :  { %v1688_v6 = vadd.f32 %v3041_v34, %v1687_v5  ;;  %v935_v7 = vpop.f32.mrf.mxu0 }
 0x147   :  { %v1104_v8 = vpop.f32.mrf.mxu1  ;;  %v936_v10 = vadd.f32 %v2845_v46, %v935_v7  ;;  %v1529_v28 = vsel %vm1401_vm6, %v1272_v9, %v1465_v19 }
 0x148   :  { %1844 = vst [vmem:[%s3620_s5 + $0x10] sm:$0xff] %v1688_v6 }
 0x149   :  { %v1105_v13 = vadd.f32 %v1104_v8, %v936_v10  ;;  %2386 = vmatmul.msk.bf16.gmra.mxu2 %vm777_vm0, %v2161_v12  ;;  %v2185_v10 = vor.u32 %v2498_v2, %v2184_v1  ;;  %v2164_v12 = vld [vmem:[%s3616_s0 + $0x1f8] sm:$0xf] }
 0x14b   :  { %v1274_v18 = vadd.f32 %v1273_v44, %v1105_v13  ;;  %v2494_v13 = vld [vmem:[%s3616_s0 + $0x200] sm:$0xf0] }
 0x14c   :  { %v1281_v30 = vpop.f32.mrf.mxu2 }
 0x14d   :  { %v1689_v20 = vpop.f32.mrf.mxu3  ;;  %vm1402_vm7 = vcmp.ge.f32.partialorder %v1274_v18, 0.0  ;;  %v1466_v23 = vmul.f32 0.2, %v1274_v18 }
 0x14e   :  { %v1690_v24 = vadd.f32 %v3041_v34, %v1689_v20  ;;  %v938_v25 = vpop.f32.mrf.mxu0  ;;  %v2165_v20 = vor.u32 %v2494_v13, %v2164_v12  ;;  %v2499_v12 = vld [vmem:[%s3616_s0 + $0x22c] sm:$0xf] }
 0x14f   :  { %v1107_v26 = vpop.f32.mrf.mxu1  ;;  %v939_v27 = vadd.f32 %v2845_v46, %v938_v25  ;;  %v1530_v29 = vsel %vm1402_vm7, %v1274_v18, %v1466_v23 }
 0x150   :  { %1845 = vst [vmem:[%s3620_s5 + $0x18] sm:$0xff] %v1690_v24  ;;  %v1583_v31 = vpack.c.bf16 %v1530_v29, %v1529_v28 }
 0x151   :  { %977 = vmatmul.bf16.gmra.mxu0 %v2141_v21  ;;  %v1108_v32 = vadd.f32 %v1107_v26, %v939_v27  ;;  %v2169_v21 = vor.u32 %v2493_v14, %v2166_v15 }
 0x152   :  { %1146 = vmatmul.bf16.gmra.mxu1 %v2145_v22  ;;  %1731 = vmatmul.bf16.gmra.mxu3 %v1583_v31  ;;  %v2196_v31 = vld [vmem:[%s3616_s0 + $0x230] sm:$0xf] }
 0x153   :  { %v1277_v40 = vadd.f32 %v1276_v0, %v1108_v32  ;;  %v2501_v32 = vld [vmem:[%s3616_s0 + $0x238] sm:$0xf0] }
 0x154   :  { %v1283_v42 = vpop.f32.mrf.mxu2 }
 0x155   :  { %v1692_v36 = vpop.f32.mrf.mxu3  ;;  %v1467_v51 = vmul.f32 0.2, %v1277_v40  ;;  %vm1403_vm8 = vcmp.ge.f32.partialorder %v1277_v40, 0.0 }
 0x156   :  { %v1693_v37 = vadd.f32 %v3041_v34, %v1692_v36  ;;  %v940_v38 = vpop.f32.mrf.mxu0 }
 0x157   :  { %v1109_v39 = vpop.f32.mrf.mxu1  ;;  %v941_v41 = vadd.f32 %v2845_v46, %v940_v38  ;;  %v1531_v60 = vsel %vm1403_vm8, %v1277_v40, %v1467_v51 }
 0x158   :  { %1846 = vst [vmem:[%s3620_s5 + $0x20] sm:$0xff] %v1693_v37 }
 0x159   :  { %v1110_v44 = vadd.f32 %v1109_v39, %v941_v41  ;;  %2387 = vmatmul.msk.bf16.gmra.mxu2 %vm777_vm0, %v2173_v43  ;;  %v2197_v41 = vor.u32 %v2501_v32, %v2196_v31  ;;  %v2176_v43 = vld [vmem:[%s3616_s0 + $0x210] sm:$0xf] }
 0x15b   :  { %v1279_v50 = vadd.f32 %v1278_v11, %v1110_v44  ;;  %v2497_v44 = vld [vmem:[%s3616_s0 + $0x218] sm:$0xf0] }
 0x15c   :  { %v1286_v62 = vpop.f32.mrf.mxu2 }
 0x15d   :  { %v1694_v52 = vpop.f32.mrf.mxu3  ;;  %vm1404_vm9 = vcmp.ge.f32.partialorder %v1279_v50, 0.0  ;;  %v1468_v55 = vmul.f32 0.2, %v1279_v50 }
 0x15e   :  { %v1695_v56 = vadd.f32 %v3041_v34, %v1694_v52  ;;  %v943_v57 = vpop.f32.mrf.mxu0  ;;  %v2177_v52 = vor.u32 %v2497_v44, %v2176_v43  ;;  %v2502_v43 = vld [vmem:[%s3616_s0 + $0x244] sm:$0xf]  ;;  %v2202_v44 = vld [vmem:[%s3616_s0 + $0x24c] sm:$0xf0] }
 0x15f   :  { %v1112_v58 = vpop.f32.mrf.mxu1  ;;  %v944_v59 = vadd.f32 %v2845_v46, %v943_v57  ;;  %v1532_v61 = vsel %vm1404_vm9, %v1279_v50, %v1468_v55 }
 0x160   :  { %1847 = vst [vmem:[%s3620_s5 + $0x28] sm:$0xff] %v1695_v56  ;;  %v1584_v63 = vpack.c.bf16 %v1532_v61, %v1531_v60 }
 0x161   :  { %982 = vmatmul.bf16.gmra.mxu0 %v2153_v53  ;;  %v1113_v0 = vadd.f32 %v1112_v58, %v944_v59  ;;  %v2181_v53 = vor.u32 %v2496_v45, %v2178_v47 }
 0x162   :  { %1151 = vmatmul.bf16.gmra.mxu1 %v2157_v54  ;;  %1736 = vmatmul.bf16.gmra.mxu3 %v1584_v63  ;;  %v2208_v63 = vld [vmem:[%s3616_s0 + $0x248] sm:$0xf] }
 0x163   :  { %v1282_v7 = vadd.f32 %v1281_v30, %v1113_v0  ;;  %v2504_v0 = vld [vmem:[%s3616_s0 + $0x250] sm:$0xf0] }
 0x164   :  { %v1288_v9 = vpop.f32.mrf.mxu2 }
 0x165   :  { %v1697_v3 = vpop.f32.mrf.mxu3  ;;  %v1469_v16 = vmul.f32 0.2, %v1282_v7  ;;  %vm1405_vm10 = vcmp.ge.f32.partialorder %v1282_v7, 0.0 }
 0x166   :  { %v1698_v4 = vadd.f32 %v3041_v34, %v1697_v3  ;;  %v945_v5 = vpop.f32.mrf.mxu0 }
 0x167   :  { %v1114_v6 = vpop.f32.mrf.mxu1  ;;  %v946_v8 = vadd.f32 %v2845_v46, %v945_v5  ;;  %v1533_v26 = vsel %vm1405_vm10, %v1282_v7, %v1469_v16 }
 0x168   :  { %1848 = vst [vmem:[%s3620_s5 + $0x30] sm:$0xff] %v1698_v4 }
 0x169   :  { %v1115_v11 = vadd.f32 %v1114_v6, %v946_v8  ;;  %2388 = vmatmul.msk.bf16.gmra.mxu2 %vm777_vm0, %v2185_v10  ;;  %v2209_v8 = vor.u32 %v2504_v0, %v2208_v63  ;;  %v2188_v10 = vld [vmem:[%s3616_s0 + $0x228] sm:$0xf] }
 0x16b   :  { %v1284_v17 = vadd.f32 %v1283_v42, %v1115_v11  ;;  %v2500_v11 = vld [vmem:[%s3616_s0 + $0x230] sm:$0xf0] }
 0x16c   :  { %v1291_v28 = vpop.f32.mrf.mxu2 }
 0x16d   :  { %v1470_v18 = vmul.f32 0.2, %v1284_v17  ;;  %v1699_v19 = vpop.f32.mrf.mxu3  ;;  %vm1406_vm11 = vcmp.ge.f32.partialorder %v1284_v17, 0.0 }
 0x16e   :  { %v1700_v22 = vadd.f32 %v3041_v34, %v1699_v19  ;;  %v948_v23 = vpop.f32.mrf.mxu0 }
 0x16f   :  { %v1117_v24 = vpop.f32.mrf.mxu1  ;;  %v949_v25 = vadd.f32 %v2845_v46, %v948_v23  ;;  %v1534_v27 = vsel %vm1406_vm11, %v1284_v17, %v1470_v18  ;;  %v2189_v17 = vor.u32 %v2500_v11, %v2188_v10  ;;  %v2505_v10 = vld [vmem:[%s3616_s0 + $0x25c] sm:$0xf]  ;;  %v2214_v11 = vld [vmem:[%s3616_s0 + $0x264] sm:$0xf0] }
 0x170   :  { %1849 = vst [vmem:[%s3620_s5 + $0x38] sm:$0xff] %v1700_v22  ;;  %v1585_v29 = vpack.c.bf16 %v1534_v27, %v1533_v26  ;;  %v3216_v22 = vld [vmem:[%s3617_s2] ss:$0 sm:$0xff] }
 0x171   :  { %987 = vmatmul.bf16.gmra.mxu0 %v2165_v20  ;;  %v1118_v30 = vadd.f32 %v1117_v24, %v949_v25 }
 0x172   :  { %1156 = vmatmul.bf16.gmra.mxu1 %v2169_v21  ;;  %1741 = vmatmul.bf16.gmra.mxu3 %v1585_v29  ;;  %v2220_v29 = vld [vmem:[%s3616_s0 + $0x260] sm:$0xf] }
 0x173   :  { %v1287_v38 = vadd.f32 %v1286_v62, %v1118_v30  ;;  %v2507_v30 = vld [vmem:[%s3616_s0 + $0x268] sm:$0xf0] }
 0x174   :  { %v1293_v40 = vpop.f32.mrf.mxu2 }
 0x175   :  { %v1702_v33 = vpop.f32.mrf.mxu3  ;;  %v1471_v48 = vmul.f32 0.2, %v1287_v38  ;;  %vm1407_vm12 = vcmp.ge.f32.partialorder %v1287_v38, 0.0 }
 0x176   :  { %v1703_v35 = vadd.f32 %v3041_v34, %v1702_v33  ;;  %v950_v36 = vpop.f32.mrf.mxu0 }
 0x177   :  { %v1119_v37 = vpop.f32.mrf.mxu1  ;;  %v951_v39 = vadd.f32 %v2845_v46, %v950_v36  ;;  %v1535_v58 = vsel %vm1407_vm12, %v1287_v38, %v1471_v48 }
 0x178   :  { %1850 = vst [vmem:[%s3620_s5 + $0x40] sm:$0xff] %v1703_v35 }
 0x179   :  { %v1120_v42 = vadd.f32 %v1119_v37, %v951_v39  ;;  %2389 = vmatmul.msk.bf16.gmra.mxu2 %vm777_vm0, %v2197_v41  ;;  %v2221_v39 = vor.u32 %v2507_v30, %v2220_v29  ;;  %v2200_v41 = vld [vmem:[%s3616_s0 + $0x240] sm:$0xf] }
 0x17b   :  { %v1289_v49 = vadd.f32 %v1288_v9, %v1120_v42  ;;  %v2503_v42 = vld [vmem:[%s3616_s0 + $0x248] sm:$0xf0] }
 0x17c   :  { %v1296_v60 = vpop.f32.mrf.mxu2 }
 0x17d   :  { %v1472_v50 = vmul.f32 0.2, %v1289_v49  ;;  %v1704_v51 = vpop.f32.mrf.mxu3  ;;  %vm1408_vm13 = vcmp.ge.f32.partialorder %v1289_v49, 0.0 }
 0x17e   :  { %v1705_v54 = vadd.f32 %v3041_v34, %v1704_v51  ;;  %v953_v55 = vpop.f32.mrf.mxu0  ;;  %v2205_v51 = vor.u32 %v2502_v43, %v2202_v44 }
 0x17f   :  { %v1122_v56 = vpop.f32.mrf.mxu1  ;;  %v954_v57 = vadd.f32 %v2845_v46, %v953_v55  ;;  %v1536_v59 = vsel %vm1408_vm13, %v1289_v49, %v1472_v50  ;;  %v2201_v50 = vor.u32 %v2503_v42, %v2200_v41  ;;  %v2508_v41 = vld [vmem:[%s3616_s0 + $0x274] sm:$0xf]  ;;  %v2226_v42 = vld [vmem:[%s3616_s0 + $0x27c] sm:$0xf0] }
 0x180   :  { %1851 = vst [vmem:[%s3620_s5 + $0x48] sm:$0xff] %v1705_v54  ;;  %v1586_v61 = vpack.c.bf16 %v1536_v59, %v1535_v58 }
 0x181   :  { %992 = vmatmul.bf16.gmra.mxu0 %v2177_v52  ;;  %v1123_v62 = vadd.f32 %v1122_v56, %v954_v57 }
 0x182   :  { %1161 = vmatmul.bf16.gmra.mxu1 %v2181_v53  ;;  %1746 = vmatmul.bf16.gmra.mxu3 %v1586_v61  ;;  %v2232_v61 = vld [vmem:[%s3616_s0 + $0x278] sm:$0xf] }
 0x183   :  { %v1292_v5 = vadd.f32 %v1291_v28, %v1123_v62  ;;  %v2510_v62 = vld [vmem:[%s3616_s0 + $0x280] sm:$0xf0] }
 0x184   :  { %v1298_v7 = vpop.f32.mrf.mxu2 }
 0x185   :  { %v1707_v1 = vpop.f32.mrf.mxu3  ;;  %v1473_v13 = vmul.f32 0.2, %v1292_v5  ;;  %vm1409_vm14 = vcmp.ge.f32.partialorder %v1292_v5, 0.0 }
 0x186   :  { %v1708_v2 = vadd.f32 %v3041_v34, %v1707_v1  ;;  %v955_v3 = vpop.f32.mrf.mxu0 }
 0x187   :  { %v1124_v4 = vpop.f32.mrf.mxu1  ;;  %v956_v6 = vadd.f32 %v2845_v46, %v955_v3  ;;  %v2190_v46 = vld [vmem:[%s3616_s0 + $0x234] sm:$0xf0]  ;;  %v1537_v24 = vsel %vm1409_vm14, %v1292_v5, %v1473_v13 }
 0x188   :  { %1852 = vst [vmem:[%s3620_s5 + $0x50] sm:$0xff] %v1708_v2  ;;  %v2193_v18 = vor.u32 %v2499_v12, %v2190_v46 }
 0x189   :  { %v1125_v9 = vadd.f32 %v1124_v4, %v956_v6  ;;  %2390 = vmatmul.msk.bf16.gmra.mxu2 %vm777_vm0, %v2209_v8  ;;  %v2233_v6 = vor.u32 %v2510_v62, %v2232_v61  ;;  %v2212_v8 = vld [vmem:[%s3616_s0 + $0x258] sm:$0xf] }
 0x18b   :  { %v1294_v14 = vadd.f32 %v1293_v40, %v1125_v9  ;;  %v2506_v9 = vld [vmem:[%s3616_s0 + $0x260] sm:$0xf0] }
 0x18c   :  { %v1301_v26 = vpop.f32.mrf.mxu2 }
 0x18d   :  { %v1474_v15 = vmul.f32 0.2, %v1294_v14  ;;  %v1709_v16 = vpop.f32.mrf.mxu3  ;;  %vm1410_vm15 = vcmp.ge.f32.partialorder %v1294_v14, 0.0 }
 0x18e   :  { %v1710_v19 = vadd.f32 %v3041_v34, %v1709_v16  ;;  %v958_v20 = vpop.f32.mrf.mxu0  ;;  %v2217_v16 = vor.u32 %v2505_v10, %v2214_v11 }
 0x18f   :  { %v1127_v21 = vpop.f32.mrf.mxu1  ;;  %v959_v23 = vadd.f32 %v3216_v22, %v958_v20  ;;  %v1538_v25 = vsel %vm1410_vm15, %v1294_v14, %v1474_v15  ;;  %v2213_v15 = vor.u32 %v2506_v9, %v2212_v8  ;;  %v2511_v8 = vld [vmem:[%s3616_s0 + $0x28c] sm:$0xf]  ;;  %v2238_v9 = vld [vmem:[%s3616_s0 + $0x294] sm:$0xf0] }
 0x190   :  { %1853 = vst [vmem:[%s3620_s5 + $0x58] sm:$0xff] %v1710_v19  ;;  %v1587_v27 = vpack.c.bf16 %v1538_v25, %v1537_v24 }
 0x191   :  { %997 = vmatmul.bf16.gmra.mxu0 %v2189_v17  ;;  %v1128_v28 = vadd.f32 %v1127_v21, %v959_v23 }
 0x192   :  { %1166 = vmatmul.bf16.gmra.mxu1 %v2193_v18  ;;  %1751 = vmatmul.bf16.gmra.mxu3 %v1587_v27  ;;  %v2244_v27 = vld [vmem:[%s3616_s0 + $0x290] sm:$0xf] }
 0x193   :  { %v1297_v36 = vadd.f32 %v1296_v60, %v1128_v28  ;;  %v2513_v28 = vld [vmem:[%s3616_s0 + $0x298] sm:$0xf0] }
 0x194   :  { %v1303_v38 = vpop.f32.mrf.mxu2 }
 0x195   :  { %v1712_v31 = vpop.f32.mrf.mxu3  ;;  %v1475_v45 = vmul.f32 0.2, %v1297_v36  ;;  %vm1411_vm1 = vcmp.ge.f32.partialorder %v1297_v36, 0.0 }
 0x196   :  { %v1713_v32 = vadd.f32 %v3041_v34, %v1712_v31  ;;  %v960_v33 = vpop.f32.mrf.mxu0 }
 0x197   :  { %v1129_v35 = vpop.f32.mrf.mxu1  ;;  %v961_v37 = vadd.f32 %v3216_v22, %v960_v33  ;;  %v1539_v56 = vsel %vm1411_vm1, %v1297_v36, %v1475_v45 }
 0x198   :  { %1854 = vst [vmem:[%s3620_s5 + $0x60] sm:$0xff] %v1713_v32 }
 0x199   :  { %v1130_v40 = vadd.f32 %v1129_v35, %v961_v37  ;;  %2391 = vmatmul.msk.bf16.gmra.mxu2 %vm777_vm0, %v2221_v39  ;;  %v2245_v37 = vor.u32 %v2513_v28, %v2244_v27  ;;  %v2224_v39 = vld [vmem:[%s3616_s0 + $0x270] sm:$0xf] }
 0x19b   :  { %v1299_v47 = vadd.f32 %v1298_v7, %v1130_v40  ;;  %v2509_v40 = vld [vmem:[%s3616_s0 + $0x278] sm:$0xf0] }
 0x19c   :  { %v1306_v58 = vpop.f32.mrf.mxu2 }
 0x19d   :  { %v1476_v48 = vmul.f32 0.2, %v1299_v47  ;;  %v1714_v49 = vpop.f32.mrf.mxu3  ;;  %vm1412_vm2 = vcmp.ge.f32.partialorder %v1299_v47, 0.0 }
 0x19e   :  { %v1715_v52 = vadd.f32 %v3041_v34, %v1714_v49  ;;  %v963_v53 = vpop.f32.mrf.mxu0  ;;  %v2229_v49 = vor.u32 %v2508_v41, %v2226_v42 }
 0x19f   :  { %v1132_v54 = vpop.f32.mrf.mxu1  ;;  %v964_v55 = vadd.f32 %v3216_v22, %v963_v53  ;;  %v1540_v57 = vsel %vm1412_vm2, %v1299_v47, %v1476_v48  ;;  %v2225_v48 = vor.u32 %v2509_v40, %v2224_v39  ;;  %v2514_v39 = vld [vmem:[%s3616_s0 + $0x2a4] sm:$0xf]  ;;  %v2250_v40 = vld [vmem:[%s3616_s0 + $0x2ac] sm:$0xf0] }
 0x1a0   :  { %1855 = vst [vmem:[%s3620_s5 + $0x68] sm:$0xff] %v1715_v52  ;;  %v1588_v59 = vpack.c.bf16 %v1540_v57, %v1539_v56 }
 0x1a1   :  { %1002 = vmatmul.bf16.gmra.mxu0 %v2201_v50  ;;  %v1133_v60 = vadd.f32 %v1132_v54, %v964_v55 }
 0x1a2   :  { %1171 = vmatmul.bf16.gmra.mxu1 %v2205_v51  ;;  %1756 = vmatmul.bf16.gmra.mxu3 %v1588_v59  ;;  %v2256_v59 = vld [vmem:[%s3616_s0 + $0x2a8] sm:$0xf] }
 0x1a3   :  { %v1302_v3 = vadd.f32 %v1301_v26, %v1133_v60  ;;  %v2516_v60 = vld [vmem:[%s3616_s0 + $0x2b0] sm:$0xf0] }
 0x1a4   :  { %v1308_v5 = vpop.f32.mrf.mxu2 }
 0x1a5   :  { %v1717_v63 = vpop.f32.mrf.mxu3  ;;  %v1477_v12 = vmul.f32 0.2, %v1302_v3  ;;  %vm1413_vm3 = vcmp.ge.f32.partialorder %v1302_v3, 0.0 }
 0x1a6   :  { %v1718_v0 = vadd.f32 %v3041_v34, %v1717_v63  ;;  %v965_v1 = vpop.f32.mrf.mxu0 }
 0x1a7   :  { %v1134_v2 = vpop.f32.mrf.mxu1  ;;  %v966_v4 = vadd.f32 %v3216_v22, %v965_v1  ;;  %v1541_v21 = vsel %vm1413_vm3, %v1302_v3, %v1477_v12 }
 0x1a8   :  { %1856 = vst [vmem:[%s3620_s5 + $0x70] sm:$0xff] %v1718_v0 }
 0x1a9   :  { %v1135_v7 = vadd.f32 %v1134_v2, %v966_v4  ;;  %2392 = vmatmul.msk.bf16.gmra.mxu2 %vm777_vm0, %v2233_v6  ;;  %v2257_v4 = vor.u32 %v2516_v60, %v2256_v59  ;;  %v2236_v6 = vld [vmem:[%s3616_s0 + $0x288] sm:$0xf] }
 0x1ab   :  { %v1304_v46 = vadd.f32 %v1303_v38, %v1135_v7  ;;  %v2512_v7 = vld [vmem:[%s3616_s0 + $0x290] sm:$0xf0] }
 0x1ac   :  { %v1311_v24 = vpop.f32.mrf.mxu2 }
 0x1ad   :  { %v1478_v13 = vmul.f32 0.2, %v1304_v46  ;;  %v1719_v14 = vpop.f32.mrf.mxu3  ;;  %vm1414_vm4 = vcmp.ge.f32.partialorder %v1304_v46, 0.0 }
 0x1ae   :  { %v1720_v17 = vadd.f32 %v3041_v34, %v1719_v14  ;;  %v968_v18 = vpop.f32.mrf.mxu0  ;;  %v2241_v14 = vor.u32 %v2511_v8, %v2238_v9 }
 0x1af   :  { %v1137_v19 = vpop.f32.mrf.mxu1  ;;  %v969_v20 = vadd.f32 %v3216_v22, %v968_v18  ;;  %v1542_v23 = vsel %vm1414_vm4, %v1304_v46, %v1478_v13  ;;  %v2237_v13 = vor.u32 %v2512_v7, %v2236_v6  ;;  %v2517_v6 = vld [vmem:[%s3616_s0 + $0x2bc] sm:$0xf]  ;;  %v2262_v7 = vld [vmem:[%s3616_s0 + $0x2c4] sm:$0xf0] }
 0x1b0   :  { %1857 = vst [vmem:[%s3620_s5 + $0x78] sm:$0xff] %v1720_v17  ;;  %v1589_v25 = vpack.c.bf16 %v1542_v23, %v1541_v21 }
 0x1b1   :  { %1007 = vmatmul.bf16.gmra.mxu0 %v2213_v15  ;;  %v1138_v26 = vadd.f32 %v1137_v19, %v969_v20 }
 0x1b2   :  { %1176 = vmatmul.bf16.gmra.mxu1 %v2217_v16  ;;  %1761 = vmatmul.bf16.gmra.mxu3 %v1589_v25  ;;  %v2268_v25 = vld [vmem:[%s3616_s0 + $0x2c0] sm:$0xf] }
 0x1b3   :  { %v1307_v33 = vadd.f32 %v1306_v58, %v1138_v26  ;;  %v2519_v26 = vld [vmem:[%s3616_s0 + $0x2c8] sm:$0xf0] }
 0x1b4   :  { %v1313_v36 = vpop.f32.mrf.mxu2 }
 0x1b5   :  { %v1722_v29 = vpop.f32.mrf.mxu3  ;;  %v1479_v43 = vmul.f32 0.2, %v1307_v33  ;;  %vm1415_vm5 = vcmp.ge.f32.partialorder %v1307_v33, 0.0 }
 0x1b6   :  { %v1723_v30 = vadd.f32 %v3041_v34, %v1722_v29  ;;  %v970_v31 = vpop.f32.mrf.mxu0 }
 0x1b7   :  { %v1139_v32 = vpop.f32.mrf.mxu1  ;;  %v971_v35 = vadd.f32 %v3216_v22, %v970_v31  ;;  %v1543_v54 = vsel %vm1415_vm5, %v1307_v33, %v1479_v43 }
 0x1b8   :  { %1858 = vst [vmem:[%s3620_s5 + $0x80] sm:$0xff] %v1723_v30 }
 0x1b9   :  { %v1140_v38 = vadd.f32 %v1139_v32, %v971_v35  ;;  %2393 = vmatmul.msk.bf16.gmra.mxu2 %vm777_vm0, %v2245_v37  ;;  %v2269_v35 = vor.u32 %v2519_v26, %v2268_v25  ;;  %v2248_v37 = vld [vmem:[%s3616_s0 + $0x2a0] sm:$0xf] }
 0x1bb   :  { %v1309_v44 = vadd.f32 %v1308_v5, %v1140_v38  ;;  %v2515_v38 = vld [vmem:[%s3616_s0 + $0x2a8] sm:$0xf0] }
 0x1bc   :  { %v1316_v56 = vpop.f32.mrf.mxu2 }
 0x1bd   :  { %v1480_v45 = vmul.f32 0.2, %v1309_v44  ;;  %v1724_v47 = vpop.f32.mrf.mxu3  ;;  %vm1416_vm6 = vcmp.ge.f32.partialorder %v1309_v44, 0.0 }
 0x1be   :  { %v1725_v50 = vadd.f32 %v3041_v34, %v1724_v47  ;;  %v973_v51 = vpop.f32.mrf.mxu0  ;;  %v2253_v47 = vor.u32 %v2514_v39, %v2250_v40 }
 0x1bf   :  { %v1142_v52 = vpop.f32.mrf.mxu1  ;;  %v974_v53 = vadd.f32 %v3216_v22, %v973_v51  ;;  %v1544_v55 = vsel %vm1416_vm6, %v1309_v44, %v1480_v45  ;;  %v2249_v45 = vor.u32 %v2515_v38, %v2248_v37  ;;  %v2520_v37 = vld [vmem:[%s3616_s0 + $0x2d4] sm:$0xf]  ;;  %v2274_v38 = vld [vmem:[%s3616_s0 + $0x2dc] sm:$0xf0] }
 0x1c0   :  { %1859 = vst [vmem:[%s3620_s5 + $0x88] sm:$0xff] %v1725_v50  ;;  %v1590_v57 = vpack.c.bf16 %v1544_v55, %v1543_v54 }
 0x1c1   :  { %1012 = vmatmul.bf16.gmra.mxu0 %v2225_v48  ;;  %v1143_v58 = vadd.f32 %v1142_v52, %v974_v53 }
 0x1c2   :  { %1181 = vmatmul.bf16.gmra.mxu1 %v2229_v49  ;;  %1766 = vmatmul.bf16.gmra.mxu3 %v1590_v57  ;;  %v2280_v57 = vld [vmem:[%s3616_s0 + $0x2d8] sm:$0xf] }
 0x1c3   :  { %v1312_v1 = vadd.f32 %v1311_v24, %v1143_v58  ;;  %v2522_v58 = vld [vmem:[%s3616_s0 + $0x2e0] sm:$0xf0] }
 0x1c4   :  { %v1318_v3 = vpop.f32.mrf.mxu2 }
 0x1c5   :  { %v1727_v61 = vpop.f32.mrf.mxu3  ;;  %v1481_v10 = vmul.f32 0.2, %v1312_v1  ;;  %vm1417_vm7 = vcmp.ge.f32.partialorder %v1312_v1, 0.0 }
 0x1c6   :  { %v1728_v62 = vadd.f32 %v3041_v34, %v1727_v61  ;;  %v975_v63 = vpop.f32.mrf.mxu0 }
 0x1c7   :  { %v1144_v0 = vpop.f32.mrf.mxu1  ;;  %v976_v2 = vadd.f32 %v3216_v22, %v975_v63  ;;  %v1545_v19 = vsel %vm1417_vm7, %v1312_v1, %v1481_v10 }
 0x1c8   :  { %1860 = vst [vmem:[%s3620_s5 + $0x90] sm:$0xff] %v1728_v62 }
 0x1c9   :  { %v1145_v5 = vadd.f32 %v1144_v0, %v976_v2  ;;  %2394 = vmatmul.msk.bf16.gmra.mxu2 %vm777_vm0, %v2257_v4  ;;  %v2281_v2 = vor.u32 %v2522_v58, %v2280_v57  ;;  %v2260_v4 = vld [vmem:[%s3616_s0 + $0x2b8] sm:$0xf] }
 0x1cb   :  { %v1314_v11 = vadd.f32 %v1313_v36, %v1145_v5  ;;  %v2518_v5 = vld [vmem:[%s3616_s0 + $0x2c0] sm:$0xf0] }
 0x1cc   :  { %v1321_v21 = vpop.f32.mrf.mxu2 }
 0x1cd   :  { %v1482_v12 = vmul.f32 0.2, %v1314_v11  ;;  %v1729_v46 = vpop.f32.mrf.mxu3  ;;  %vm1418_vm8 = vcmp.ge.f32.partialorder %v1314_v11, 0.0 }
 0x1ce   :  { %v1730_v15 = vadd.f32 %v3041_v34, %v1729_v46  ;;  %v978_v16 = vpop.f32.mrf.mxu0  ;;  %v2265_v46 = vor.u32 %v2517_v6, %v2262_v7 }
 0x1cf   :  { %v1147_v17 = vpop.f32.mrf.mxu1  ;;  %v979_v18 = vadd.f32 %v3216_v22, %v978_v16  ;;  %v1546_v20 = vsel %vm1418_vm8, %v1314_v11, %v1482_v12  ;;  %v2261_v12 = vor.u32 %v2518_v5, %v2260_v4 }
 0x1d0   :  { %1861 = vst [vmem:[%s3620_s5 + $0x98] sm:$0xff] %v1730_v15  ;;  %v1591_v23 = vpack.c.bf16 %v1546_v20, %v1545_v19 }
 0x1d1   :  { %1017 = vmatmul.bf16.gmra.mxu0 %v2237_v13  ;;  %v1148_v24 = vadd.f32 %v1147_v17, %v979_v18 }
 0x1d2   :  { %1186 = vmatmul.bf16.gmra.mxu1 %v2241_v14  ;;  %1771 = vmatmul.bf16.gmra.mxu3 %v1591_v23  ;;  %v2292_v23 = vld [vmem:[%s3616_s0 + $0x2f0] sm:$0xf] }
 0x1d3   :  { %v1317_v31 = vadd.f32 %v1316_v56, %v1148_v24  ;;  %v2525_v24 = vld [vmem:[%s3616_s0 + $0x2f8] sm:$0xf0] }
 0x1d4   :  { %v1323_v33 = vpop.f32.mrf.mxu2 }
 0x1d5   :  { %v1732_v27 = vpop.f32.mrf.mxu3  ;;  %v1483_v41 = vmul.f32 0.2, %v1317_v31  ;;  %vm1419_vm9 = vcmp.ge.f32.partialorder %v1317_v31, 0.0 }
 0x1d6   :  { %v1733_v28 = vadd.f32 %v3041_v34, %v1732_v27  ;;  %v980_v29 = vpop.f32.mrf.mxu0 }
 0x1d7   :  { %v1149_v30 = vpop.f32.mrf.mxu1  ;;  %v981_v32 = vadd.f32 %v3216_v22, %v980_v29  ;;  %v1547_v52 = vsel %vm1419_vm9, %v1317_v31, %v1483_v41 }
 0x1d8   :  { %1862 = vst [vmem:[%s3620_s5 + $0xa0] sm:$0xff] %v1733_v28 }
 0x1d9   :  { %v1150_v36 = vadd.f32 %v1149_v30, %v981_v32  ;;  %2395 = vmatmul.msk.bf16.gmra.mxu2 %vm777_vm0, %v2269_v35  ;;  %v2293_v32 = vor.u32 %v2525_v24, %v2292_v23  ;;  %v2272_v35 = vld [vmem:[%s3616_s0 + $0x2d0] sm:$0xf] }
 0x1db   :  { %v1319_v42 = vadd.f32 %v1318_v3, %v1150_v36  ;;  %v2521_v36 = vld [vmem:[%s3616_s0 + $0x2d8] sm:$0xf0] }
 0x1dc   :  { %v1326_v54 = vpop.f32.mrf.mxu2 }
 0x1dd   :  { %v1484_v43 = vmul.f32 0.2, %v1319_v42  ;;  %v1734_v44 = vpop.f32.mrf.mxu3  ;;  %vm1420_vm10 = vcmp.ge.f32.partialorder %v1319_v42, 0.0 }
 0x1de   :  { %v1735_v48 = vadd.f32 %v3041_v34, %v1734_v44  ;;  %v983_v49 = vpop.f32.mrf.mxu0  ;;  %v2277_v44 = vor.u32 %v2520_v37, %v2274_v38 }
 0x1df   :  { %v1152_v50 = vpop.f32.mrf.mxu1  ;;  %v984_v51 = vadd.f32 %v3216_v22, %v983_v49  ;;  %v1548_v53 = vsel %vm1420_vm10, %v1319_v42, %v1484_v43  ;;  %v2273_v43 = vor.u32 %v2521_v36, %v2272_v35 }
 0x1e0   :  { %1863 = vst [vmem:[%s3620_s5 + $0xa8] sm:$0xff] %v1735_v48  ;;  %v1592_v55 = vpack.c.bf16 %v1548_v53, %v1547_v52 }
 0x1e1   :  { %1022 = vmatmul.bf16.gmra.mxu0 %v2249_v45  ;;  %v1153_v56 = vadd.f32 %v1152_v50, %v984_v51 }
 0x1e2   :  { %1191 = vmatmul.bf16.gmra.mxu1 %v2253_v47  ;;  %1776 = vmatmul.bf16.gmra.mxu3 %v1592_v55 }
 0x1e3   :  { %v1322_v63 = vadd.f32 %v1321_v21, %v1153_v56 }
 0x1e4   :  { %v1328_v1 = vpop.f32.mrf.mxu2 }
 0x1e5   :  { %v1737_v59 = vpop.f32.mrf.mxu3  ;;  %v1485_v8 = vmul.f32 0.2, %v1322_v63  ;;  %vm1421_vm11 = vcmp.ge.f32.partialorder %v1322_v63, 0.0 }
 0x1e6   :  { %v1738_v60 = vadd.f32 %v3041_v34, %v1737_v59  ;;  %v985_v61 = vpop.f32.mrf.mxu0 }
 0x1e7   :  { %v1154_v62 = vpop.f32.mrf.mxu1  ;;  %v986_v0 = vadd.f32 %v3216_v22, %v985_v61  ;;  %v1549_v17 = vsel %vm1421_vm11, %v1322_v63, %v1485_v8  ;;  %v2284_v63 = vld [vmem:[%s3616_s0 + $0x2e8] sm:$0xf]  ;;  %v3445_v8 = vld [vmem:[%s3619_s4] ss:$0 sm:$0xff] }
 0x1e8   :  { %1864 = vst [vmem:[%s3620_s5 + $0xb0] sm:$0xff] %v1738_v60 }
 0x1e9   :  { %v1155_v3 = vadd.f32 %v1154_v62, %v986_v0  ;;  %2396 = vmatmul.msk.bf16.gmra.mxu2 %vm777_vm0, %v2281_v2  ;;  %v2524_v0 = vld [vmem:[%s3616_s0 + $0x2f0] sm:$0xf0] }
 0x1ea   :  { %v2285_v6 = vor.u32 %v2524_v0, %v2284_v63 }
 0x1eb   :  { %v1324_v9 = vadd.f32 %v1323_v33, %v1155_v3 }
 0x1ec   :  { %v1331_v19 = vpop.f32.mrf.mxu2 }
 0x1ed   :  { %vm1422_vm12 = vcmp.ge.f32.partialorder %v1324_v9, 0.0  ;;  %v1486_v10 = vmul.f32 0.2, %v1324_v9  ;;  %v1739_v11 = vpop.f32.mrf.mxu3 }
 0x1ee   :  { %v1740_v13 = vadd.f32 %v3041_v34, %v1739_v11  ;;  %v988_v14 = vpop.f32.mrf.mxu0 }
 0x1ef   :  { %v1157_v15 = vpop.f32.mrf.mxu1  ;;  %v989_v16 = vadd.f32 %v3216_v22, %v988_v14  ;;  %v1550_v18 = vsel %vm1422_vm12, %v1324_v9, %v1486_v10 }
 0x1f0   :  { %1865 = vst [vmem:[%s3620_s5 + $0xb8] sm:$0xff] %v1740_v13  ;;  %v1593_v20 = vpack.c.bf16 %v1550_v18, %v1549_v17 }
 0x1f1   :  { %1027 = vmatmul.bf16.gmra.mxu0 %v2261_v12  ;;  %v1158_v21 = vadd.f32 %v1157_v15, %v989_v16 }
 0x1f2   :  { %1196 = vmatmul.bf16.gmra.mxu1 %v2265_v46  ;;  %1781 = vmatmul.bf16.gmra.mxu3 %v1593_v20 }
 0x1f3   :  { %v1327_v29 = vadd.f32 %v1326_v54, %v1158_v21 }
 0x1f4   :  { %v1333_v31 = vpop.f32.mrf.mxu2 }
 0x1f5   :  { %v1742_v25 = vpop.f32.mrf.mxu3  ;;  %v1487_v39 = vmul.f32 0.2, %v1327_v29  ;;  %vm1423_vm13 = vcmp.ge.f32.partialorder %v1327_v29, 0.0 }
 0x1f6   :  { %v1743_v26 = vadd.f32 %v3041_v34, %v1742_v25  ;;  %v990_v27 = vpop.f32.mrf.mxu0 }
 0x1f7   :  { %v1159_v28 = vpop.f32.mrf.mxu1  ;;  %v991_v30 = vadd.f32 %v3216_v22, %v990_v27  ;;  %v1551_v50 = vsel %vm1423_vm13, %v1327_v29, %v1487_v39 }
 0x1f8   :  { %1866 = vst [vmem:[%s3620_s5 + $0xc0] sm:$0xff] %v1743_v26 }
 0x1f9   :  { %v1160_v33 = vadd.f32 %v1159_v28, %v991_v30  ;;  %2397 = vmatmul.msk.bf16.gmra.mxu2 %vm777_vm0, %v2293_v32 }
 0x1fb   :  { %v1329_v40 = vadd.f32 %v1328_v1, %v1160_v33  ;;  %v2286_v1 = vld [vmem:[%s3616_s0 + $0x2f4] sm:$0xf0] }
 0x1fc   :  { %v1336_v52 = vpop.f32.mrf.mxu2 }
 0x1fd   :  { %vm1424_vm14 = vcmp.ge.f32.partialorder %v1329_v40, 0.0  ;;  %v1488_v41 = vmul.f32 0.2, %v1329_v40  ;;  %v1744_v42 = vpop.f32.mrf.mxu3 }
 0x1fe   :  { %v1745_v45 = vadd.f32 %v3041_v34, %v1744_v42  ;;  %v993_v47 = vpop.f32.mrf.mxu0 }
 0x1ff   :  { %v1162_v48 = vpop.f32.mrf.mxu1  ;;  %v994_v49 = vadd.f32 %v3216_v22, %v993_v47  ;;  %v1552_v51 = vsel %vm1424_vm14, %v1329_v40, %v1488_v41 }
 0x200   :  { %1867 = vst [vmem:[%s3620_s5 + $0xc8] sm:$0xff] %v1745_v45  ;;  %v1594_v53 = vpack.c.bf16 %v1552_v51, %v1551_v50 }
 0x201   :  { %1032 = vmatmul.bf16.gmra.mxu0 %v2273_v43  ;;  %v1163_v54 = vadd.f32 %v1162_v48, %v994_v49 }
 0x202   :  { %1201 = vmatmul.bf16.gmra.mxu1 %v2277_v44  ;;  %1786 = vmatmul.bf16.gmra.mxu3 %v1594_v53 }
 0x203   :  { %v1332_v59 = vadd.f32 %v1331_v19, %v1163_v54 }
 0x204   :  { %v1338_v61 = vpop.f32.mrf.mxu2 }
 0x205   :  { %v1747_v55 = vpop.f32.mrf.mxu3  ;;  %v1489_v2 = vmul.f32 0.2, %v1332_v59  ;;  %vm1425_vm0 = vcmp.ge.f32.partialorder %v1332_v59, 0.0 }
 0x206   :  { %v1748_v56 = vadd.f32 %v3041_v34, %v1747_v55  ;;  %v995_v57 = vpop.f32.mrf.mxu0  ;;  %v2523_v34 = vld [vmem:[%s3616_s0 + $0x2ec] sm:$0xf] }
 0x207   :  { %v1164_v58 = vpop.f32.mrf.mxu1  ;;  %v996_v60 = vadd.f32 %v3216_v22, %v995_v57  ;;  %v2289_v7 = vor.u32 %v2523_v34, %v2286_v1  ;;  %v1553_v46 = vsel %vm1425_vm0, %v1332_v59, %v1489_v2 }
 0x208   :  { %1868 = vst [vmem:[%s3620_s5 + $0xd0] sm:$0xff] %v1748_v56 }
 0x209   :  { %v1165_v62 = vadd.f32 %v1164_v58, %v996_v60 }
 0x20b   :  { %v1334_v3 = vadd.f32 %v1333_v31, %v1165_v62 }
 0x20c   :  { %v1341_v14 = vpop.f32.mrf.mxu2 }
 0x20d   :  { %vm1426_vm15 = vcmp.ge.f32.partialorder %v1334_v3, 0.0  ;;  %v1490_v4 = vmul.f32 0.2, %v1334_v3  ;;  %v1749_v5 = vpop.f32.mrf.mxu3 }
 0x20e   :  { %v1750_v9 = vadd.f32 %v3445_v8, %v1749_v5  ;;  %v998_v10 = vpop.f32.mrf.mxu0 }
 0x20f   :  { %v1167_v11 = vpop.f32.mrf.mxu1  ;;  %v999_v12 = vadd.f32 %v3216_v22, %v998_v10  ;;  %v1554_v13 = vsel %vm1426_vm15, %v1334_v3, %v1490_v4 }
 0x210   :  { %1869 = vst [vmem:[%s3620_s5 + $0xd8] sm:$0xff] %v1750_v9  ;;  %v1595_v15 = vpack.c.bf16 %v1554_v13, %v1553_v46 }
 0x211   :  { %1037 = vmatmul.bf16.gmra.mxu0 %v2285_v6  ;;  %v1168_v16 = vadd.f32 %v1167_v11, %v999_v12 }
 0x212   :  { %1206 = vmatmul.bf16.gmra.mxu1 %v2289_v7  ;;  %1791 = vmatmul.bf16.gmra.mxu3 %v1595_v15 }
 0x213   :  { %v1337_v21 = vadd.f32 %v1336_v52, %v1168_v16 }
 0x214   :  { %v1343_v24 = vpop.f32.mrf.mxu2 }
 0x215   :  { %v1752_v17 = vpop.f32.mrf.mxu3  ;;  %v1491_v26 = vmul.f32 0.2, %v1337_v21  ;;  %vm1427_vm1 = vcmp.ge.f32.partialorder %v1337_v21, 0.0 }
 0x216   :  { %v1753_v18 = vadd.f32 %v3445_v8, %v1752_v17  ;;  %v1000_v19 = vpop.f32.mrf.mxu0 }
 0x217   :  { %v1169_v20 = vpop.f32.mrf.mxu1  ;;  %v1001_v23 = vadd.f32 %v3216_v22, %v1000_v19  ;;  %v1555_v35 = vsel %vm1427_vm1, %v1337_v21, %v1491_v26 }
 0x218   :  { %1870 = vst [vmem:[%s3620_s5 + $0xe0] sm:$0xff] %v1753_v18 }
 0x219   :  { %v1170_v25 = vadd.f32 %v1169_v20, %v1001_v23 }
 0x21b   :  { %v1339_v27 = vadd.f32 %v1338_v61, %v1170_v25 }
 0x21c   :  { %v1346_v37 = vpop.f32.mrf.mxu2 }
 0x21d   :  { %vm1428_vm2 = vcmp.ge.f32.partialorder %v1339_v27, 0.0  ;;  %v1492_v28 = vmul.f32 0.2, %v1339_v27  ;;  %v1754_v29 = vpop.f32.mrf.mxu3 }
 0x21e   :  { %v1755_v30 = vadd.f32 %v3445_v8, %v1754_v29  ;;  %v1003_v31 = vpop.f32.mrf.mxu0 }
 0x21f   :  { %v1172_v32 = vpop.f32.mrf.mxu1  ;;  %v1004_v33 = vadd.f32 %v3216_v22, %v1003_v31  ;;  %v1556_v36 = vsel %vm1428_vm2, %v1339_v27, %v1492_v28 }
 0x220   :  { %1871 = vst [vmem:[%s3620_s5 + $0xe8] sm:$0xff] %v1755_v30  ;;  %v1596_v38 = vpack.c.bf16 %v1556_v36, %v1555_v35 }
 0x221   :  { %v1173_v39 = vadd.f32 %v1172_v32, %v1004_v33 }
 0x222   :  { %1796 = vmatmul.bf16.gmra.mxu3 %v1596_v38 }
 0x223   :  { %v1342_v44 = vadd.f32 %v1341_v14, %v1173_v39 }
 0x224   :  { %v1348_v47 = vpop.f32.mrf.mxu2 }
 0x225   :  { %v1757_v40 = vpop.f32.mrf.mxu3  ;;  %v1493_v49 = vmul.f32 0.2, %v1342_v44  ;;  %vm1429_vm3 = vcmp.ge.f32.partialorder %v1342_v44, 0.0 }
 0x226   :  { %v1758_v41 = vadd.f32 %v3445_v8, %v1757_v40  ;;  %v1005_v42 = vpop.f32.mrf.mxu0 }
 0x227   :  { %v1174_v43 = vpop.f32.mrf.mxu1  ;;  %v1006_v45 = vadd.f32 %v3216_v22, %v1005_v42  ;;  %v1557_v57 = vsel %vm1429_vm3, %v1342_v44, %v1493_v49 }
 0x228   :  { %1872 = vst [vmem:[%s3620_s5 + $0xf0] sm:$0xff] %v1758_v41 }
 0x229   :  { %v1175_v48 = vadd.f32 %v1174_v43, %v1006_v45 }
 0x22b   :  { %v1344_v50 = vadd.f32 %v1343_v24, %v1175_v48 }
 0x22c   :  { %v1351_v59 = vpop.f32.mrf.mxu2 }
 0x22d   :  { %vm1430_vm4 = vcmp.ge.f32.partialorder %v1344_v50, 0.0  ;;  %v1494_v51 = vmul.f32 0.2, %v1344_v50  ;;  %v1759_v52 = vpop.f32.mrf.mxu3 }
 0x22e   :  { %v1760_v53 = vadd.f32 %v3445_v8, %v1759_v52  ;;  %v1008_v54 = vpop.f32.mrf.mxu0 }
 0x22f   :  { %v1177_v55 = vpop.f32.mrf.mxu1  ;;  %v1009_v56 = vadd.f32 %v3216_v22, %v1008_v54  ;;  %v1558_v58 = vsel %vm1430_vm4, %v1344_v50, %v1494_v51 }
 0x230   :  { %1873 = vst [vmem:[%s3620_s5 + $0xf8] sm:$0xff] %v1760_v53  ;;  %v1597_v60 = vpack.c.bf16 %v1558_v58, %v1557_v57 }
 0x231   :  { %v1178_v61 = vadd.f32 %v1177_v55, %v1009_v56 }
 0x232   :  { %1801 = vmatmul.bf16.gmra.mxu3 %v1597_v60 }
 0x233   :  { %v1347_v1 = vadd.f32 %v1346_v37, %v1178_v61 }
 0x234   :  { %v1353_v3 = vpop.f32.mrf.mxu2 }
 0x235   :  { %v1762_v62 = vpop.f32.mrf.mxu3  ;;  %v1495_v5 = vmul.f32 0.2, %v1347_v1  ;;  %vm1431_vm5 = vcmp.ge.f32.partialorder %v1347_v1, 0.0 }
 0x236   :  { %v1763_v63 = vadd.f32 %v3445_v8, %v1762_v62  ;;  %v1010_v0 = vpop.f32.mrf.mxu0 }
 0x237   :  { %v1179_v34 = vpop.f32.mrf.mxu1  ;;  %v1011_v2 = vadd.f32 %v3216_v22, %v1010_v0  ;;  %v1559_v13 = vsel %vm1431_vm5, %v1347_v1, %v1495_v5 }
 0x238   :  { %1874 = vst [vmem:[%s3620_s5 + $0x100] sm:$0xff] %v1763_v63 }
 0x239   :  { %v1180_v4 = vadd.f32 %v1179_v34, %v1011_v2 }
 0x23b   :  { %v1349_v6 = vadd.f32 %v1348_v47, %v1180_v4 }
 0x23c   :  { %v1356_v15 = vpop.f32.mrf.mxu2 }
 0x23d   :  { %vm1432_vm6 = vcmp.ge.f32.partialorder %v1349_v6, 0.0  ;;  %v1496_v7 = vmul.f32 0.2, %v1349_v6  ;;  %v1764_v9 = vpop.f32.mrf.mxu3 }
 0x23e   :  { %v1765_v10 = vadd.f32 %v3445_v8, %v1764_v9  ;;  %v1013_v11 = vpop.f32.mrf.mxu0 }
 0x23f   :  { %v1182_v12 = vpop.f32.mrf.mxu1  ;;  %v1014_v46 = vadd.f32 %v3216_v22, %v1013_v11  ;;  %v1560_v14 = vsel %vm1432_vm6, %v1349_v6, %v1496_v7 }
 0x240   :  { %1875 = vst [vmem:[%s3620_s5 + $0x108] sm:$0xff] %v1765_v10  ;;  %v1598_v16 = vpack.c.bf16 %v1560_v14, %v1559_v13 }
 0x241   :  { %v1183_v17 = vadd.f32 %v1182_v12, %v1014_v46 }
 0x242   :  { %1806 = vmatmul.bf16.gmra.mxu3 %v1598_v16 }
 0x243   :  { %v1352_v23 = vadd.f32 %v1351_v59, %v1183_v17 }
 0x244   :  { %v1358_v26 = vpop.f32.mrf.mxu2 }
 0x245   :  { %v1767_v18 = vpop.f32.mrf.mxu3  ;;  %v1497_v27 = vmul.f32 0.2, %v1352_v23  ;;  %vm1433_vm7 = vcmp.ge.f32.partialorder %v1352_v23, 0.0 }
 0x246   :  { %v1768_v19 = vadd.f32 %v3445_v8, %v1767_v18  ;;  %v1015_v20 = vpop.f32.mrf.mxu0 }
 0x247   :  { %v1184_v21 = vpop.f32.mrf.mxu1  ;;  %v1016_v24 = vadd.f32 %v3216_v22, %v1015_v20  ;;  %v1561_v36 = vsel %vm1433_vm7, %v1352_v23, %v1497_v27 }
 0x248   :  { %1876 = vst [vmem:[%s3620_s5 + $0x110] sm:$0xff] %v1768_v19 }
 0x249   :  { %v1185_v25 = vadd.f32 %v1184_v21, %v1016_v24 }
 0x24b   :  { %v1354_v28 = vadd.f32 %v1353_v3, %v1185_v25 }
 0x24c   :  { %v1361_v40 = vpop.f32.mrf.mxu2 }
 0x24d   :  { %vm1434_vm8 = vcmp.ge.f32.partialorder %v1354_v28, 0.0  ;;  %v1498_v29 = vmul.f32 0.2, %v1354_v28  ;;  %v1769_v30 = vpop.f32.mrf.mxu3 }
 0x24e   :  { %v1770_v31 = vadd.f32 %v3445_v8, %v1769_v30  ;;  %v1018_v32 = vpop.f32.mrf.mxu0 }
 0x24f   :  { %v1187_v33 = vpop.f32.mrf.mxu1  ;;  %v1019_v35 = vadd.f32 %v3216_v22, %v1018_v32  ;;  %v1562_v37 = vsel %vm1434_vm8, %v1354_v28, %v1498_v29 }
 0x250   :  { %1877 = vst [vmem:[%s3620_s5 + $0x118] sm:$0xff] %v1770_v31  ;;  %v1599_v38 = vpack.c.bf16 %v1562_v37, %v1561_v36 }
 0x251   :  { %v1188_v39 = vadd.f32 %v1187_v33, %v1019_v35 }
 0x252   :  { %1811 = vmatmul.bf16.gmra.mxu3 %v1599_v38 }
 0x253   :  { %v1357_v45 = vadd.f32 %v1356_v15, %v1188_v39 }
 0x254   :  { %v1363_v53 = vpop.f32.mrf.mxu2 }
 0x255   :  { %v1772_v41 = vpop.f32.mrf.mxu3  ;;  %v1499_v49 = vmul.f32 0.2, %v1357_v45  ;;  %vm1435_vm9 = vcmp.ge.f32.partialorder %v1357_v45, 0.0 }
 0x256   :  { %v1773_v42 = vadd.f32 %v3445_v8, %v1772_v41  ;;  %v1020_v43 = vpop.f32.mrf.mxu0 }
 0x257   :  { %v1189_v44 = vpop.f32.mrf.mxu1  ;;  %v1021_v47 = vadd.f32 %v3216_v22, %v1020_v43  ;;  %v1563_v58 = vsel %vm1435_vm9, %v1357_v45, %v1499_v49 }
 0x258   :  { %1878 = vst [vmem:[%s3620_s5 + $0x120] sm:$0xff] %v1773_v42 }
 0x259   :  { %v1190_v48 = vadd.f32 %v1189_v44, %v1021_v47 }
 0x25b   :  { %v1359_v50 = vadd.f32 %v1358_v26, %v1190_v48 }
 0x25c   :  { %v1366_v3 = vpop.f32.mrf.mxu2 }
 0x25d   :  { %vm1436_vm10 = vcmp.ge.f32.partialorder %v1359_v50, 0.0  ;;  %v1500_v51 = vmul.f32 0.2, %v1359_v50  ;;  %v1774_v52 = vpop.f32.mrf.mxu3 }
 0x25e   :  { %v1775_v54 = vadd.f32 %v3445_v8, %v1774_v52  ;;  %v1023_v55 = vpop.f32.mrf.mxu0 }
 0x25f   :  { %v1192_v56 = vpop.f32.mrf.mxu1  ;;  %v1024_v57 = vadd.f32 %v3216_v22, %v1023_v55  ;;  %v1564_v59 = vsel %vm1436_vm10, %v1359_v50, %v1500_v51 }
 0x260   :  { %1879 = vst [vmem:[%s3620_s5 + $0x128] sm:$0xff] %v1775_v54  ;;  %v1600_v60 = vpack.c.bf16 %v1564_v59, %v1563_v58 }
 0x261   :  { %v1193_v61 = vadd.f32 %v1192_v56, %v1024_v57 }
 0x262   :  { %1816 = vmatmul.bf16.gmra.mxu3 %v1600_v60 }
 0x263   :  { %v1362_v1 = vadd.f32 %v1361_v40, %v1193_v61 }
 0x264   :  { %v1368_v16 = vpop.f32.mrf.mxu2 }
 0x265   :  { %v1777_v62 = vpop.f32.mrf.mxu3  ;;  %v1501_v5 = vmul.f32 0.2, %v1362_v1  ;;  %vm1437_vm11 = vcmp.ge.f32.partialorder %v1362_v1, 0.0 }
 0x266   :  { %v1778_v63 = vadd.f32 %v3445_v8, %v1777_v62  ;;  %v1025_v0 = vpop.f32.mrf.mxu0 }
 0x267   :  { %v1194_v34 = vpop.f32.mrf.mxu1  ;;  %v1026_v2 = vadd.f32 %v3216_v22, %v1025_v0  ;;  %v1565_v13 = vsel %vm1437_vm11, %v1362_v1, %v1501_v5  ;;  %v2556_v1 = vld [vmem:[%s3617_s2] ss:$0 sm:$0xff] }
 0x268   :  { %1880 = vst [vmem:[%s3620_s5 + $0x130] sm:$0xff] %v1778_v63 }
 0x269   :  { %v1195_v4 = vadd.f32 %v1194_v34, %v1026_v2 }
 0x26b   :  { %v1364_v6 = vadd.f32 %v1363_v53, %v1195_v4 }
 0x26c   :  { %v1371_v28 = vpop.f32.mrf.mxu2 }
 0x26d   :  { %vm1438_vm12 = vcmp.ge.f32.partialorder %v1364_v6, 0.0  ;;  %v1502_v7 = vmul.f32 0.2, %v1364_v6  ;;  %v1779_v9 = vpop.f32.mrf.mxu3 }
 0x26e   :  { %v1780_v10 = vadd.f32 %v3445_v8, %v1779_v9  ;;  %v1028_v11 = vpop.f32.mrf.mxu0 }
 0x26f   :  { %v1197_v12 = vpop.f32.mrf.mxu1  ;;  %v1029_v46 = vadd.f32 %v3216_v22, %v1028_v11  ;;  %v1566_v14 = vsel %vm1438_vm12, %v1364_v6, %v1502_v7 }
 0x270   :  { %1881 = vst [vmem:[%s3620_s5 + $0x138] sm:$0xff] %v1780_v10  ;;  %v1601_v15 = vpack.c.bf16 %v1566_v14, %v1565_v13 }
 0x271   :  { %v1198_v17 = vadd.f32 %v1197_v12, %v1029_v46 }
 0x272   :  { %1821 = vmatmul.bf16.gmra.mxu3 %v1601_v15 }
 0x273   :  { %v1367_v23 = vadd.f32 %v1366_v3, %v1198_v17 }
 0x274   :  { %v1373_v40 = vpop.f32.mrf.mxu2 }
 0x275   :  { %v1782_v18 = vpop.f32.mrf.mxu3  ;;  %v1503_v26 = vmul.f32 0.2, %v1367_v23  ;;  %vm1439_vm13 = vcmp.ge.f32.partialorder %v1367_v23, 0.0 }
 0x276   :  { %v1783_v19 = vadd.f32 %v3445_v8, %v1782_v18  ;;  %v1030_v20 = vpop.f32.mrf.mxu0 }
 0x277   :  { %v1199_v21 = vpop.f32.mrf.mxu1  ;;  %v1031_v24 = vadd.f32 %v3216_v22, %v1030_v20  ;;  %v1567_v36 = vsel %vm1439_vm13, %v1367_v23, %v1503_v26 }
 0x278   :  { %1882 = vst [vmem:[%s3620_s5 + $0x140] sm:$0xff] %v1783_v19 }
 0x279   :  { %v1200_v25 = vadd.f32 %v1199_v21, %v1031_v24 }
 0x27b   :  { %v1369_v27 = vadd.f32 %v1368_v16, %v1200_v25 }
 0x27c   :  { %v1376_v59 = vpop.f32.mrf.mxu2 }
 0x27d   :  { %vm1440_vm14 = vcmp.ge.f32.partialorder %v1369_v27, 0.0  ;;  %v1504_v29 = vmul.f32 0.2, %v1369_v27  ;;  %v1784_v30 = vpop.f32.mrf.mxu3 }
 0x27e   :  { %v1785_v31 = vadd.f32 %v3445_v8, %v1784_v30  ;;  %v1033_v32 = vpop.f32.mrf.mxu0 }
 0x27f   :  { %v1202_v33 = vpop.f32.mrf.mxu1  ;;  %v1034_v35 = vadd.f32 %v3216_v22, %v1033_v32  ;;  %v1568_v37 = vsel %vm1440_vm14, %v1369_v27, %v1504_v29 }
 0x280   :  { %1883 = vst [vmem:[%s3620_s5 + $0x148] sm:$0xff] %v1785_v31  ;;  %v1602_v38 = vpack.c.bf16 %v1568_v37, %v1567_v36 }
 0x281   :  { %v1203_v39 = vadd.f32 %v1202_v33, %v1034_v35 }
 0x282   :  { %1826 = vmatmul.bf16.gmra.mxu3 %v1602_v38 }
 0x283   :  { %v1372_v45 = vadd.f32 %v1371_v28, %v1203_v39 }
 0x284   :  { %v1378_v4 = vpop.f32.mrf.mxu2 }
 0x285   :  { %v1787_v41 = vpop.f32.mrf.mxu3  ;;  %v1505_v49 = vmul.f32 0.2, %v1372_v45  ;;  %vm1441_vm0 = vcmp.ge.f32.partialorder %v1372_v45, 0.0 }
 0x286   :  { %v1788_v42 = vadd.f32 %v3445_v8, %v1787_v41  ;;  %v1035_v43 = vpop.f32.mrf.mxu0 }
 0x287   :  { %v1204_v44 = vpop.f32.mrf.mxu1  ;;  %v1036_v47 = vadd.f32 %v3216_v22, %v1035_v43  ;;  %v1569_v57 = vsel %vm1441_vm0, %v1372_v45, %v1505_v49 }
 0x288   :  { %1884 = vst [vmem:[%s3620_s5 + $0x150] sm:$0xff] %v1788_v42 }
 0x289   :  { %v1205_v48 = vadd.f32 %v1204_v44, %v1036_v47 }
 0x28b   :  { %v1374_v50 = vadd.f32 %v1373_v40, %v1205_v48 }
 0x28d   :  { %vm1442_vm15 = vcmp.ge.f32.partialorder %v1374_v50, 0.0  ;;  %v1506_v51 = vmul.f32 0.2, %v1374_v50  ;;  %v1789_v52 = vpop.f32.mrf.mxu3 }
 0x28e   :  { %v1790_v53 = vadd.f32 %v3445_v8, %v1789_v52  ;;  %v1038_v54 = vpop.f32.mrf.mxu0 }
 0x28f   :  { %v1207_v55 = vpop.f32.mrf.mxu1  ;;  %v1039_v56 = vadd.f32 %v3216_v22, %v1038_v54  ;;  %v1570_v58 = vsel %vm1442_vm15, %v1374_v50, %v1506_v51 }
 0x290   :  { %1885 = vst [vmem:[%s3620_s5 + $0x158] sm:$0xff] %v1790_v53  ;;  %v1603_v60 = vpack.c.bf16 %v1570_v58, %v1569_v57 }
 0x291   :  { %v1208_v61 = vadd.f32 %v1207_v55, %v1039_v56 }
 0x292   :  { %1831 = vmatmul.bf16.gmra.mxu3 %v1603_v60 }
 0x293   :  { %v1377_v34 = vadd.f32 %v1376_v59, %v1208_v61 }
 0x295   :  { %v1792_v62 = vpop.f32.mrf.mxu3  ;;  %v1507_v5 = vmul.f32 0.2, %v1377_v34  ;;  %vm1443_vm1 = vcmp.ge.f32.partialorder %v1377_v34, 0.0 }
 0x296   :  { %v1793_v63 = vadd.f32 %v3445_v8, %v1792_v62  ;;  %v1040_v0 = vpop.f32.mrf.mxu0 }
 0x297   :  { %v1041_v22 = vadd.f32 %v2556_v1, %v1040_v0  ;;  %v1209_v2 = vpop.f32.mrf.mxu1  ;;  %v1571_v11 = vsel %vm1443_vm1, %v1377_v34, %v1507_v5 }
 0x298   :  { %1886 = vst [vmem:[%s3620_s5 + $0x160] sm:$0xff] %v1793_v63 }
 0x299   :  { %v1210_v3 = vadd.f32 %v1209_v2, %v1041_v22 }
 0x29b   :  { %v1379_v6 = vadd.f32 %v1378_v4, %v1210_v3 }
 0x29d   :  { %vm1444_vm2 = vcmp.ge.f32.partialorder %v1379_v6, 0.0  ;;  %v1508_v7 = vmul.f32 0.2, %v1379_v6  ;;  %v1794_v9 = vpop.f32.mrf.mxu3 }
 0x29e   :  { %v1795_v10 = vadd.f32 %v3445_v8, %v1794_v9 }
 0x29f   :  { %v1572_v12 = vsel %vm1444_vm2, %v1379_v6, %v1508_v7 }
 0x2a0   :  { %1887 = vst [vmem:[%s3620_s5 + $0x168] sm:$0xff] %v1795_v10  ;;  %v1604_v46 = vpack.c.bf16 %v1572_v12, %v1571_v11 }
 0x2a2   :  { %1836 = vmatmul.bf16.gmra.mxu3 %v1604_v46 }
 0x2a5   :  { %v1797_v13 = vpop.f32.mrf.mxu3 }
 0x2a6   :  { %v1798_v14 = vadd.f32 %v3445_v8, %v1797_v13 }
 0x2a8   :  { %1888 = vst [vmem:[%s3620_s5 + $0x170] sm:$0xff] %v1798_v14 }
 0x2ad   :  { %v1799_v15 = vpop.f32.mrf.mxu3 }
 0x2ae   :  { %v1800_v16 = vadd.f32 %v3445_v8, %v1799_v15 }
 0x2b0   :  { %1889 = vst [vmem:[%s3620_s5 + $0x178] sm:$0xff] %v1800_v16 }
 0x2b5   :  { %v1802_v17 = vpop.f32.mrf.mxu3 }
 0x2b6   :  { %v1803_v18 = vadd.f32 %v3445_v8, %v1802_v17 }
 0x2b8   :  { %1890 = vst [vmem:[%s3620_s5 + $0x180] sm:$0xff] %v1803_v18 }
 0x2bd   :  { %v1804_v19 = vpop.f32.mrf.mxu3 }
 0x2be   :  { %v1805_v20 = vadd.f32 %v3445_v8, %v1804_v19 }
 0x2c0   :  { %1891 = vst [vmem:[%s3620_s5 + $0x188] sm:$0xff] %v1805_v20 }
 0x2c5   :  { %v1807_v21 = vpop.f32.mrf.mxu3 }
 0x2c6   :  { %v1808_v23 = vadd.f32 %v3445_v8, %v1807_v21 }
 0x2c8   :  { %1892 = vst [vmem:[%s3620_s5 + $0x190] sm:$0xff] %v1808_v23 }
 0x2cd   :  { %v1809_v24 = vpop.f32.mrf.mxu3 }
 0x2ce   :  { %v1810_v25 = vadd.f32 %v3445_v8, %v1809_v24 }
 0x2d0   :  { %1893 = vst [vmem:[%s3620_s5 + $0x198] sm:$0xff] %v1810_v25 }
 0x2d5   :  { %v1812_v26 = vpop.f32.mrf.mxu3 }
 0x2d6   :  { %v1813_v27 = vadd.f32 %v3445_v8, %v1812_v26 }
 0x2d8   :  { %1894 = vst [vmem:[%s3620_s5 + $0x1a0] sm:$0xff] %v1813_v27 }
 0x2dd   :  { %v1814_v28 = vpop.f32.mrf.mxu3 }
 0x2de   :  { %v1815_v29 = vadd.f32 %v3445_v8, %v1814_v28 }
 0x2e0   :  { %1895 = vst [vmem:[%s3620_s5 + $0x1a8] sm:$0xff] %v1815_v29 }
 0x2e5   :  { %v1817_v30 = vpop.f32.mrf.mxu3 }
 0x2e6   :  { %v1818_v31 = vadd.f32 %v3445_v8, %v1817_v30 }
 0x2e8   :  { %1896 = vst [vmem:[%s3620_s5 + $0x1b0] sm:$0xff] %v1818_v31 }
 0x2ed   :  { %v1819_v32 = vpop.f32.mrf.mxu3 }
 0x2ee   :  { %v1820_v33 = vadd.f32 %v3445_v8, %v1819_v32 }
 0x2f0   :  { %1897 = vst [vmem:[%s3620_s5 + $0x1b8] sm:$0xff] %v1820_v33 }
 0x2f5   :  { %v1822_v35 = vpop.f32.mrf.mxu3 }
 0x2f6   :  { %v1823_v36 = vadd.f32 %v3445_v8, %v1822_v35 }
 0x2f8   :  { %1898 = vst [vmem:[%s3620_s5 + $0x1c0] sm:$0xff] %v1823_v36 }
 0x2fd   :  { %v1824_v37 = vpop.f32.mrf.mxu3 }
 0x2fe   :  { %v1825_v38 = vadd.f32 %v3445_v8, %v1824_v37 }
 0x300   :  { %1899 = vst [vmem:[%s3620_s5 + $0x1c8] sm:$0xff] %v1825_v38 }
 0x305   :  { %v1827_v39 = vpop.f32.mrf.mxu3 }
 0x306   :  { %v1828_v40 = vadd.f32 %v3445_v8, %v1827_v39 }
 0x308   :  { %1900 = vst [vmem:[%s3620_s5 + $0x1d0] sm:$0xff] %v1828_v40 }
 0x30d   :  { %v1829_v41 = vpop.f32.mrf.mxu3 }
 0x30e   :  { %v1830_v42 = vadd.f32 %v3445_v8, %v1829_v41 }
 0x310   :  { %1901 = vst [vmem:[%s3620_s5 + $0x1d8] sm:$0xff] %v1830_v42 }
 0x315   :  { %v1832_v43 = vpop.f32.mrf.mxu3 }
 0x316   :  { %v1833_v44 = vadd.f32 %v3445_v8, %v1832_v43 }
 0x318   :  { %1902 = vst [vmem:[%s3620_s5 + $0x1e0] sm:$0xff] %v1833_v44 }
 0x31d   :  { %v1834_v45 = vpop.f32.mrf.mxu3 }
 0x31e   :  { %v1835_v47 = vadd.f32 %v3445_v8, %v1834_v45 }
 0x320   :  { %1903 = vst [vmem:[%s3620_s5 + $0x1e8] sm:$0xff] %v1835_v47 }
 0x325   :  { %v1837_v48 = vpop.f32.mrf.mxu3 }
 0x326   :  { %v1838_v49 = vadd.f32 %v3445_v8, %v1837_v48 }
 0x328   :  { %1904 = vst [vmem:[%s3620_s5 + $0x1f0] sm:$0xff] %v1838_v49 }
 0x32d   :  { %v1839_v50 = vpop.f32.mrf.mxu3 }
 0x32e   :  { %v1840_v51 = vadd.f32 %v3445_v8, %v1839_v50 }
 0x330   :  { %1905 = vst [vmem:[%s3620_s5 + $0x1f8] sm:$0xff] %v1840_v51 }

</bundles_post_ra>
